<compile_context>
chip_gen: v5e
topology: v5e:2x2
jax: 0.10.0
libtpu: 0.0.40
codegen_flags: <defaults>
</compile_context>

<pallas_src>
import functools
from math import sqrt

import jax
import jax.numpy as jnp
from jax import lax
from jax.experimental import pallas as pl
from jax.experimental.pallas import tpu as pltpu


def _transformer_block_kernel(x_ref, wqkv_ref, wo_ref, w1_ref, w2_ref, g1_ref, g2_ref,
                              o_ref, k_cache, v_cache,
                              *, num_heads, d_k, q_tile, ff_chunk, n_ff_chunks,
                              eps, compute_dtype, approx_recip, ffn_unroll_limit):
    TQ = q_tile
    H = num_heads
    D = H * d_k
    cdt = compute_dtype
    qi = pl.program_id(1)

    x = x_ref[0]                       # (TQ, D) float32
    g1 = g1_ref[0]                     # (D,) float32
    g2 = g2_ref[0]

    # ---------------- RMSNorm 1 (f32, rsqrt on EUP) ----------------
    ms = jnp.mean(x * x, axis=-1, keepdims=True)
    xn_c = ((x * lax.rsqrt(ms + eps)) * g1).astype(cdt)

    # ---------------- Fused QKV projection: one (TQ, D) @ (D, 3D) matmul ----------------
    qkv = jnp.dot(xn_c, wqkv_ref[...], preferred_element_type=jnp.float32)   # (TQ, 3D) f32
    qkv_c = qkv.astype(cdt)

    # Scatter K/V head-major into the persistent caches (this grid step's rows) and build
    # the head-major, pre-scaled Q directly (no scratch round-trip).
    scale = 1.0 / sqrt(d_k)
    row0 = pl.multiple_of(qi * TQ, TQ)
    q_heads = []
    for h in range(H):
        lo = h * d_k
        q_heads.append((qkv[:, lo:lo + d_k] * scale).astype(cdt))
        k_cache[h, pl.ds(row0, TQ), :] = qkv_c[:, D + lo:D + lo + d_k]
        v_cache[h, pl.ds(row0, TQ), :] = qkv_c[:, 2 * D + lo:2 * D + lo + d_k]
    q3 = jnp.stack(q_heads, axis=0)                 # (H, TQ, d_k), compute dtype

    # ---------------- Causal flash attention over cached KV tiles ----------------
    neg = jnp.float32(-1e30)                        # finite mask value

    def kv_tile(j, carry, *, masked):
        m_p, l_p, a_p = carry
        c0 = pl.multiple_of(j * TQ, TQ)
        kt = k_cache[:, pl.ds(c0, TQ), :]           # (H, TQ, d_k)
        vt = v_cache[:, pl.ds(c0, TQ), :]
        s = jnp.einsum('hqd,hkd->hqk', q3, kt,
                       preferred_element_type=jnp.float32)       # Q is pre-scaled
        if masked:
            # Diagonal tile only: causal mask with relative (in-tile) positions.
            q_pos = lax.broadcasted_iota(jnp.int32, (TQ, TQ), 0)
            k_pos = lax.broadcasted_iota(jnp.int32, (TQ, TQ), 1)
            s = jnp.where((k_pos <= q_pos)[None, :, :], s, neg)
        m_c = jnp.maximum(m_p, jnp.max(s, axis=-1, keepdims=True))
        alpha = jnp.exp(m_p - m_c)
        p = jnp.exp(s - m_c)
        l_c = alpha * l_p + jnp.sum(p, axis=-1, keepdims=True)
        a_c = alpha * a_p + jnp.einsum('hqk,hkd->hqd', p.astype(cdt), vt,
                                       preferred_element_type=jnp.float32)
        return m_c, l_c, a_c

    m0 = jnp.full((H, TQ, 1), neg, jnp.float32)
    l0 = jnp.zeros((H, TQ, 1), jnp.float32)
    a0 = jnp.zeros((H, TQ, d_k), jnp.float32)
    # Off-diagonal tiles (fully visible under the causal mask): no masking work at all.
    carry = lax.fori_loop(0, qi, functools.partial(kv_tile, masked=False), (m0, l0, a0))
    # Diagonal tile: the only one that pays for the mask.
    _, l_f, a_f = kv_tile(qi, carry, masked=True)

    attn = a_f * pl.reciprocal(l_f, approx=approx_recip)         # (H, TQ, d_k) f32

    # ---------------- Output projection: one relayout + one full-width matmul ----------------
    attn_cat = jnp.concatenate([attn[h] for h in range(H)], axis=-1).astype(cdt)  # (TQ, D)
    attn_out = jnp.dot(attn_cat, wo_ref[...], preferred_element_type=jnp.float32)
    x1 = x + attn_out                  # residual 1 (dropout disabled / p=0)

    # ---------------- RMSNorm 2 ----------------
    ms2 = jnp.mean(x1 * x1, axis=-1, keepdims=True)
    xn2_c = ((x1 * lax.rsqrt(ms2 + eps)) * g2).astype(cdt)

    # ---------------- FFN: linear1 -> gelu(erf) -> linear2, hidden dim chunked ----------------
    inv_sqrt2 = 1.0 / sqrt(2.0)

    def ff_piece(lo_val):
        h1 = jnp.dot(xn2_c, w1_ref[:, pl.ds(lo_val, ff_chunk)],
                     preferred_element_type=jnp.float32)          # (TQ, ff_chunk) f32
        gch = h1 * 0.5 * (1.0 + lax.erf(h1 * inv_sqrt2))
        return jnp.dot(gch.astype(cdt), w2_ref[pl.ds(lo_val, ff_chunk), :],
                       preferred_element_type=jnp.float32)        # (TQ, D) f32

    if n_ff_chunks <= ffn_unroll_limit:
        ffn_out = jnp.zeros((TQ, D), jnp.float32)
        for c in range(n_ff_chunks):
            ffn_out = ffn_out + ff_piece(c * ff_chunk)
    else:
        def ff_body(c, acc):
            lo = pl.multiple_of(c * ff_chunk, ff_chunk)
            return acc + ff_piece(lo)
        ffn_out = lax.fori_loop(0, n_ff_chunks, ff_body, jnp.zeros((TQ, D), jnp.float32))

    o_ref[0] = (x1 + ffn_out).astype(o_ref.dtype)  # residual 2


def transformer_block(x, params, *, num_heads, eps=1e-5, q_tile=None, ff_chunk=None,
                      matmul_dtype=jnp.bfloat16, ffn_unroll_limit=8,
                      single_buffer_weights=False):
    B, S, D = x.shape
    assert D % num_heads == 0
    d_k = D // num_heads
    wq, wk, wv, wo, w1, w2, g1, g2 = params
    d_ff = w1.shape[0]

    if q_tile is not None:
        TQ = q_tile
    else:
        # v6e/v7x MXU is 256 rows deep; prefer 256-row query tiles when they divide S.
        TQ = 256 if S % 256 == 0 else (128 if S % 128 == 0 else S)
    assert S % TQ == 0 and TQ % 8 == 0, "q_tile must divide S and be a multiple of 8"
    n_q = S // TQ

    C = ff_chunk if ff_chunk is not None else min(d_ff, 512)
    assert d_ff % C == 0 and (C % 128 == 0 or C == d_ff)
    n_ff = d_ff // C

    cdt = matmul_dtype
    exact = jnp.dtype(cdt) == jnp.dtype(jnp.float32)

    # Host-side relayout: fused pre-transposed weights so the kernel is pure x @ W.
    wqkv = jnp.concatenate([wq.T, wk.T, wv.T], axis=1).astype(cdt)   # (D, 3D)
    wo_t = wo.T.astype(cdt)                                          # (D, D)
    w1_t = w1.T.astype(cdt)                                          # (D, d_ff)
    w2_t = w2.T.astype(cdt)                                          # (d_ff, D)
    g1r = g1.reshape(1, D).astype(jnp.float32)
    g2r = g2.reshape(1, D).astype(jnp.float32)

    # ----- VMEM budget (weights + KV cache + double-buffered I/O tiles) -----
    bpe = jnp.dtype(cdt).itemsize
    dk_lanes = ((d_k + 127) // 128) * 128          # lane padding of the head-minor caches
    weight_bytes = (D * 3 * D + D * D + D * d_ff + d_ff * D) * bpe
    weight_bytes *= 1 if single_buffer_weights else 2
    cache_bytes = 2 * num_heads * S * dk_lanes * bpe
    io_bytes = 2 * 2 * TQ * D * jnp.dtype(x.dtype).itemsize
    vmem_limit = int(1.25 * (weight_bytes + cache_bytes + io_bytes)) + (8 << 20)
    vmem_limit = max(32 << 20, min(vmem_limit, 128 << 20))

    kernel = functools.partial(
        _transformer_block_kernel, num_heads=num_heads, d_k=d_k, q_tile=TQ,
        ff_chunk=C, n_ff_chunks=n_ff, eps=eps, compute_dtype=cdt,
        approx_recip=not exact, ffn_unroll_limit=ffn_unroll_limit)

    def _wspec(shape):
        nd = len(shape)
        idx = lambda b, q, _n=nd: (0,) * _n
        if single_buffer_weights:
            # Constant-index weights: one VMEM copy instead of a double buffer (v7x headroom).
            return pl.BlockSpec(shape, idx, pipeline_mode=pl.Buffered(1))
        return pl.BlockSpec(shape, idx)

    grid_spec = pltpu.PrefetchScalarGridSpec(
        num_scalar_prefetch=0,
        grid=(B, n_q),
        in_specs=[
            pl.BlockSpec((1, TQ, D), lambda b, q: (b, q, 0)),   # x (query tile)
            _wspec((D, 3 * D)),                                 # fused Wqkv (pre-T)
            _wspec((D, D)),                                     # Wo (pre-T)
            _wspec((D, d_ff)),                                  # W1 (pre-T)
            _wspec((d_ff, D)),                                  # W2 (pre-T)
            _wspec((1, D)),                                     # ln1 weight
            _wspec((1, D)),                                     # ln2 weight
        ],
        out_specs=pl.BlockSpec((1, TQ, D), lambda b, q: (b, q, 0)),
        scratch_shapes=[
            pltpu.VMEM((num_heads, S, d_k), cdt),    # K cache (persists across q tiles)
            pltpu.VMEM((num_heads, S, d_k), cdt),    # V cache
        ],
    )

    return pl.pallas_call(
        kernel,
        out_shape=jax.ShapeDtypeStruct((B, S, D), x.dtype),
        grid_spec=grid_spec,
        compiler_params=pltpu.CompilerParams(
            # batch is independent (megacore-parallel); the query-tile axis carries the
            # incremental KV cache and MUST run in order -> "arbitrary".
            dimension_semantics=("parallel", "arbitrary"),
            vmem_limit_bytes=vmem_limit),
    )(x, wqkv, wo_t, w1_t, w2_t, g1r, g2r)


# ------------------------ pure-JAX reference for checking ------------------------
def _ref_block(x, params, *, num_heads, eps=1e-5):
    wq, wk, wv, wo, w1, w2, g1, g2 = params
    B, S, D = x.shape
    d_k = D // num_heads

    def mm(eq, a, b):
        return jnp.einsum(eq, a, b, preferred_element_type=jnp.float32)

    def rms(v, w):
        return v * lax.rsqrt(jnp.mean(v * v, axis=-1, keepdims=True) + eps) * w

    xn = rms(x, g1)
    q = mm('bsd,od->bso', xn, wq).reshape(B, S, num_heads, d_k).transpose(0, 2, 1, 3)
    k = mm('bsd,od->bso', xn, wk).reshape(B, S, num_heads, d_k).transpose(0, 2, 1, 3)
    v = mm('bsd,od->bso', xn, wv).reshape(B, S, num_heads, d_k).transpose(0, 2, 1, 3)
    s = mm('bhqd,bhkd->bhqk', q, k) / sqrt(d_k)
    mask = jnp.triu(jnp.ones((S, S), dtype=bool), k=1)
    s = jnp.where(mask, -jnp.inf, s)
    p = jax.nn.softmax(s, axis=-1)
    o = mm('bhqk,bhkd->bhqd', p, v).transpose(0, 2, 1, 3).reshape(B, S, D)
    x1 = x + mm('bsk,dk->bsd', o, wo)
    xn2 = rms(x1, g2)
    h1 = mm('bsd,fd->bsf', xn2, w1)
    g = h1 * 0.5 * (1.0 + lax.erf(h1 / sqrt(2.0)))
    return x1 + mm('bsf,df->bsd', g, w2)


if __name__ == "__main__":
    # Small config (exercises 2 query tiles, 2 KV tiles, 2 FFN chunks).
    B, S, D, H, d_ff = 2, 128, 128, 4, 512
    TQ, FFC = 64, 256

    key = jax.random.PRNGKey(0)
    ks = jax.random.split(key, 9)

    def uinit(k, shape, fan_in):
        bound = 1.0 / sqrt(fan_in)   # kaiming_uniform(a=sqrt(5))-style bound
        return jax.random.uniform(k, shape, jnp.float32, -bound, bound)

    wq = uinit(ks[0], (D, D), D)        # stacked per-head (H*d_k, D)
    wk = uinit(ks[1], (D, D), D)
    wv = uinit(ks[2], (D, D), D)
    wo = uinit(ks[3], (D, D), D)        # W_o: (d_model, H*d_v)
    w1 = uinit(ks[4], (d_ff, D), D)     # linear1: (d_ff, d_model)
    w2 = uinit(ks[5], (D, d_ff), d_ff)  # linear2: (d_model, d_ff)
    g1 = 1.0 + 0.1 * jax.random.normal(ks[6], (D,), jnp.float32)   # RMSNorm gains
    g2 = 1.0 + 0.1 * jax.random.normal(ks[7], (D,), jnp.float32)
    params = (wq, wk, wv, wo, w1, w2, g1, g2)

    x = jax.random.normal(ks[8], (B, S, D), jnp.float32)

    ref = _ref_block(x, params, num_heads=H)

    # Exact-precision path (f32 MXU operands, exact reciprocal, fori-loop FFN) -> tight check.
    out_f32 = transformer_block(x, params, num_heads=H, q_tile=TQ, ff_chunk=FFC,
                                matmul_dtype=jnp.float32, ffn_unroll_limit=0)
    out_f32 = jax.block_until_ready(out_f32)
    assert out_f32.shape == (B, S, D)
    err32 = float(jnp.max(jnp.abs(out_f32 - ref)))
    assert err32 < 5e-3, f"f32-path mismatch vs reference: max abs err {err32}"

    # Default bf16 MXU path (f32 accumulation), explicit tiling (multi-tile flash + unrolled FFN).
    out_bf16 = transformer_block(x, params, num_heads=H, q_tile=TQ, ff_chunk=FFC)
    out_bf16 = jax.block_until_ready(out_bf16)
    errbf = float(jnp.max(jnp.abs(out_bf16 - ref)))
    assert errbf < 4e-2, f"bf16-path mismatch vs reference: max abs err {errbf}"

    # bf16 path with automatic tile / chunk selection (single q tile, single FFN chunk).
    out_auto = transformer_block(x, params, num_heads=H)
    out_auto = jax.block_until_ready(out_auto)
    erra = float(jnp.max(jnp.abs(out_auto - ref)))
    assert erra < 4e-2, f"auto-tiling bf16 path mismatch vs reference: max abs err {erra}"

    print("KERNEL_OK")
</pallas_src>

<mosaic_0001>
module attributes {stable_mosaic.version = 11 : i64} {
  func.func @_transformer_block_kernel(%arg0: i32, %arg1: i32, %arg2: memref<1x64x128xf32, #tpu.memory_space<vmem>>, %arg3: memref<128x384xf32, #tpu.memory_space<vmem>>, %arg4: memref<128x128xf32, #tpu.memory_space<vmem>>, %arg5: memref<128x512xf32, #tpu.memory_space<vmem>>, %arg6: memref<512x128xf32, #tpu.memory_space<vmem>>, %arg7: memref<1x128xf32, #tpu.memory_space<vmem>>, %arg8: memref<1x128xf32, #tpu.memory_space<vmem>>, %arg9: memref<1x64x128xf32, #tpu.memory_space<vmem>>, %arg10: memref<4x128x32xf32, #tpu.memory_space<vmem>>, %arg11: memref<4x128x32xf32, #tpu.memory_space<vmem>>) attributes {dimension_semantics = [#tpu.dimension_semantics<parallel>, #tpu.dimension_semantics<arbitrary>], iteration_bounds = array<i64: 2, 2>, scalar_prefetch = 0 : i64, scratch_operands = 2 : i64, tpu.core_type = #tpu.core_type<tc>, window_params = [{transform_indices = @transform_0, window_bounds = array<i64: 1, 64, 128>}, {pipeline_mode = #tpu.pipeline_mode<synchronous>, transform_indices = @transform_1, window_bounds = array<i64: 128, 384>}, {pipeline_mode = #tpu.pipeline_mode<synchronous>, transform_indices = @transform_2, window_bounds = array<i64: 128, 128>}, {pipeline_mode = #tpu.pipeline_mode<synchronous>, transform_indices = @transform_3, window_bounds = array<i64: 128, 512>}, {pipeline_mode = #tpu.pipeline_mode<synchronous>, transform_indices = @transform_4, window_bounds = array<i64: 512, 128>}, {pipeline_mode = #tpu.pipeline_mode<synchronous>, transform_indices = @transform_5, window_bounds = array<i64: 1, 128>}, {pipeline_mode = #tpu.pipeline_mode<synchronous>, transform_indices = @transform_6, window_bounds = array<i64: 1, 128>}, {transform_indices = @transform_7, window_bounds = array<i64: 1, 64, 128>}]} {
    %c0 = arith.constant 0 : index
    %c0_0 = arith.constant 0 : index
    %c0_1 = arith.constant 0 : index
    %0 = vector.load %arg2[%c0, %c0_0, %c0_1] : memref<1x64x128xf32, #tpu.memory_space<vmem>>, vector<1x64x128xf32>
    %1 = vector.shape_cast %0 : vector<1x64x128xf32> to vector<64x128xf32>
    %c0_2 = arith.constant 0 : index
    %c0_3 = arith.constant 0 : index
    %2 = vector.load %arg7[%c0_2, %c0_3] : memref<1x128xf32, #tpu.memory_space<vmem>>, vector<1x128xf32>
    %3 = vector.shape_cast %2 : vector<1x128xf32> to vector<128xf32>
    %c0_4 = arith.constant 0 : index
    %c0_5 = arith.constant 0 : index
    %4 = vector.load %arg8[%c0_4, %c0_5] : memref<1x128xf32, #tpu.memory_space<vmem>>, vector<1x128xf32>
    %5 = vector.shape_cast %4 : vector<1x128xf32> to vector<128xf32>
    %6 = arith.mulf %1, %1 : vector<64x128xf32>
    %cst = arith.constant dense<0.000000e+00> : vector<64xf32>
    %7 = vector.multi_reduction <add>, %6, %cst [1] : vector<64x128xf32> to vector<64xf32>
    %8 = vector.shape_cast %7 : vector<64xf32> to vector<64x1xf32>
    %cst_6 = arith.constant 1.280000e+02 : f32
    %9 = vector.broadcast %cst_6 : f32 to vector<64x1xf32>
    %10 = arith.divf %8, %9 : vector<64x1xf32>
    %cst_7 = arith.constant 9.99999974E-6 : f32
    %11 = vector.broadcast %cst_7 : f32 to vector<64x1xf32>
    %12 = arith.addf %10, %11 : vector<64x1xf32>
    %13 = math.rsqrt %12 : vector<64x1xf32>
    %14 = vector.broadcast %13 : vector<64x1xf32> to vector<64x128xf32>
    %15 = arith.mulf %1, %14 : vector<64x128xf32>
    %16 = vector.shape_cast %3 : vector<128xf32> to vector<1x128xf32>
    %17 = vector.broadcast %16 : vector<1x128xf32> to vector<64x128xf32>
    %18 = arith.mulf %15, %17 : vector<64x128xf32>
    %c0_8 = arith.constant 0 : index
    %c0_9 = arith.constant 0 : index
    %19 = vector.load %arg3[%c0_8, %c0_9] : memref<128x384xf32, #tpu.memory_space<vmem>>, vector<128x384xf32>
    %cst_10 = arith.constant dense<0.000000e+00> : vector<64x384xf32>
    %20 = tpu.matmul %18, %19, %cst_10 {dimension_numbers = #tpu.dot_dimension_numbers<[1], [0], [0], [1], [0, 0, 1, 1], [], []>} : vector<64x128xf32>, vector<128x384xf32>, vector<64x384xf32> -> vector<64x384xf32>
    %c64_i32 = arith.constant 64 : i32
    %21 = arith.muli %arg1, %c64_i32 : i32
    %22 = tpu.assume_multiple %21, 64 : i32
    %23 = vector.extract_strided_slice %20 {offsets = [0, 0], sizes = [64, 32], strides = [1, 1]} : vector<64x384xf32> to vector<64x32xf32>
    %cst_11 = arith.constant 0.176776692 : f32
    %24 = vector.broadcast %cst_11 : f32 to vector<64x32xf32>
    %25 = arith.mulf %23, %24 : vector<64x32xf32>
    %26 = vector.extract_strided_slice %20 {offsets = [0, 128], sizes = [64, 32], strides = [1, 1]} : vector<64x384xf32> to vector<64x32xf32>
    %c0_12 = arith.constant 0 : index
    %27 = arith.index_cast %22 : i32 to index
    %c0_13 = arith.constant 0 : index
    %28 = vector.load %arg10[%c0_12, %27, %c0_13] : memref<4x128x32xf32, #tpu.memory_space<vmem>>, vector<1x64x32xf32>
    %29 = vector.shape_cast %28 : vector<1x64x32xf32> to vector<64x32xf32>
    %30 = vector.shape_cast %26 : vector<64x32xf32> to vector<1x64x32xf32>
    tpu.vector_store %arg10[%c0_12, %27, %c0_13], %30 {strides = array<i32>} : memref<4x128x32xf32, #tpu.memory_space<vmem>>, vector<1x64x32xf32>,
    %31 = vector.extract_strided_slice %20 {offsets = [0, 256], sizes = [64, 32], strides = [1, 1]} : vector<64x384xf32> to vector<64x32xf32>
    %c0_14 = arith.constant 0 : index
    %32 = arith.index_cast %22 : i32 to index
    %c0_15 = arith.constant 0 : index
    %33 = vector.load %arg11[%c0_14, %32, %c0_15] : memref<4x128x32xf32, #tpu.memory_space<vmem>>, vector<1x64x32xf32>
    %34 = vector.shape_cast %33 : vector<1x64x32xf32> to vector<64x32xf32>
    %35 = vector.shape_cast %31 : vector<64x32xf32> to vector<1x64x32xf32>
    tpu.vector_store %arg11[%c0_14, %32, %c0_15], %35 {strides = array<i32>} : memref<4x128x32xf32, #tpu.memory_space<vmem>>, vector<1x64x32xf32>,
    %36 = vector.extract_strided_slice %20 {offsets = [0, 32], sizes = [64, 32], strides = [1, 1]} : vector<64x384xf32> to vector<64x32xf32>
    %cst_16 = arith.constant 0.176776692 : f32
    %37 = vector.broadcast %cst_16 : f32 to vector<64x32xf32>
    %38 = arith.mulf %36, %37 : vector<64x32xf32>
    %39 = vector.extract_strided_slice %20 {offsets = [0, 160], sizes = [64, 32], strides = [1, 1]} : vector<64x384xf32> to vector<64x32xf32>
    %c1 = arith.constant 1 : index
    %40 = arith.index_cast %22 : i32 to index
    %c0_17 = arith.constant 0 : index
    %41 = vector.load %arg10[%c1, %40, %c0_17] : memref<4x128x32xf32, #tpu.memory_space<vmem>>, vector<1x64x32xf32>
    %42 = vector.shape_cast %41 : vector<1x64x32xf32> to vector<64x32xf32>
    %43 = vector.shape_cast %39 : vector<64x32xf32> to vector<1x64x32xf32>
    tpu.vector_store %arg10[%c1, %40, %c0_17], %43 {strides = array<i32>} : memref<4x128x32xf32, #tpu.memory_space<vmem>>, vector<1x64x32xf32>,
    %44 = vector.extract_strided_slice %20 {offsets = [0, 288], sizes = [64, 32], strides = [1, 1]} : vector<64x384xf32> to vector<64x32xf32>
    %c1_18 = arith.constant 1 : index
    %45 = arith.index_cast %22 : i32 to index
    %c0_19 = arith.constant 0 : index
    %46 = vector.load %arg11[%c1_18, %45, %c0_19] : memref<4x128x32xf32, #tpu.memory_space<vmem>>, vector<1x64x32xf32>
    %47 = vector.shape_cast %46 : vector<1x64x32xf32> to vector<64x32xf32>
    %48 = vector.shape_cast %44 : vector<64x32xf32> to vector<1x64x32xf32>
    tpu.vector_store %arg11[%c1_18, %45, %c0_19], %48 {strides = array<i32>} : memref<4x128x32xf32, #tpu.memory_space<vmem>>, vector<1x64x32xf32>,
    %49 = vector.extract_strided_slice %20 {offsets = [0, 64], sizes = [64, 32], strides = [1, 1]} : vector<64x384xf32> to vector<64x32xf32>
    %cst_20 = arith.constant 0.176776692 : f32
    %50 = vector.broadcast %cst_20 : f32 to vector<64x32xf32>
    %51 = arith.mulf %49, %50 : vector<64x32xf32>
    %52 = vector.extract_strided_slice %20 {offsets = [0, 192], sizes = [64, 32], strides = [1, 1]} : vector<64x384xf32> to vector<64x32xf32>
    %c2 = arith.constant 2 : index
    %53 = arith.index_cast %22 : i32 to index
    %c0_21 = arith.constant 0 : index
    %54 = vector.load %arg10[%c2, %53, %c0_21] : memref<4x128x32xf32, #tpu.memory_space<vmem>>, vector<1x64x32xf32>
    %55 = vector.shape_cast %54 : vector<1x64x32xf32> to vector<64x32xf32>
    %56 = vector.shape_cast %52 : vector<64x32xf32> to vector<1x64x32xf32>
    tpu.vector_store %arg10[%c2, %53, %c0_21], %56 {strides = array<i32>} : memref<4x128x32xf32, #tpu.memory_space<vmem>>, vector<1x64x32xf32>,
    %57 = vector.extract_strided_slice %20 {offsets = [0, 320], sizes = [64, 32], strides = [1, 1]} : vector<64x384xf32> to vector<64x32xf32>
    %c2_22 = arith.constant 2 : index
    %58 = arith.index_cast %22 : i32 to index
    %c0_23 = arith.constant 0 : index
    %59 = vector.load %arg11[%c2_22, %58, %c0_23] : memref<4x128x32xf32, #tpu.memory_space<vmem>>, vector<1x64x32xf32>
    %60 = vector.shape_cast %59 : vector<1x64x32xf32> to vector<64x32xf32>
    %61 = vector.shape_cast %57 : vector<64x32xf32> to vector<1x64x32xf32>
    tpu.vector_store %arg11[%c2_22, %58, %c0_23], %61 {strides = array<i32>} : memref<4x128x32xf32, #tpu.memory_space<vmem>>, vector<1x64x32xf32>,
    %62 = vector.extract_strided_slice %20 {offsets = [0, 96], sizes = [64, 32], strides = [1, 1]} : vector<64x384xf32> to vector<64x32xf32>
    %cst_24 = arith.constant 0.176776692 : f32
    %63 = vector.broadcast %cst_24 : f32 to vector<64x32xf32>
    %64 = arith.mulf %62, %63 : vector<64x32xf32>
    %65 = vector.extract_strided_slice %20 {offsets = [0, 224], sizes = [64, 32], strides = [1, 1]} : vector<64x384xf32> to vector<64x32xf32>
    %c3 = arith.constant 3 : index
    %66 = arith.index_cast %22 : i32 to index
    %c0_25 = arith.constant 0 : index
    %67 = vector.load %arg10[%c3, %66, %c0_25] : memref<4x128x32xf32, #tpu.memory_space<vmem>>, vector<1x64x32xf32>
    %68 = vector.shape_cast %67 : vector<1x64x32xf32> to vector<64x32xf32>
    %69 = vector.shape_cast %65 : vector<64x32xf32> to vector<1x64x32xf32>
    tpu.vector_store %arg10[%c3, %66, %c0_25], %69 {strides = array<i32>} : memref<4x128x32xf32, #tpu.memory_space<vmem>>, vector<1x64x32xf32>,
    %70 = vector.extract_strided_slice %20 {offsets = [0, 352], sizes = [64, 32], strides = [1, 1]} : vector<64x384xf32> to vector<64x32xf32>
    %c3_26 = arith.constant 3 : index
    %71 = arith.index_cast %22 : i32 to index
    %c0_27 = arith.constant 0 : index
    %72 = vector.load %arg11[%c3_26, %71, %c0_27] : memref<4x128x32xf32, #tpu.memory_space<vmem>>, vector<1x64x32xf32>
    %73 = vector.shape_cast %72 : vector<1x64x32xf32> to vector<64x32xf32>
    %74 = vector.shape_cast %70 : vector<64x32xf32> to vector<1x64x32xf32>
    tpu.vector_store %arg11[%c3_26, %71, %c0_27], %74 {strides = array<i32>} : memref<4x128x32xf32, #tpu.memory_space<vmem>>, vector<1x64x32xf32>,
    %75 = vector.shape_cast %25 : vector<64x32xf32> to vector<1x64x32xf32>
    %76 = vector.shape_cast %38 : vector<64x32xf32> to vector<1x64x32xf32>
    %77 = vector.shape_cast %51 : vector<64x32xf32> to vector<1x64x32xf32>
    %78 = vector.shape_cast %64 : vector<64x32xf32> to vector<1x64x32xf32>
    %79 = tpu.concatenate %75, %76, %77, %78 in 0 : vector<1x64x32xf32>, vector<1x64x32xf32>, vector<1x64x32xf32>, vector<1x64x32xf32> -> vector<4x64x32xf32>
    %cst_28 = arith.constant -1.000000e+30 : f32
    %80 = vector.broadcast %cst_28 : f32 to vector<4x64x1xf32>
    %cst_29 = arith.constant 0.000000e+00 : f32
    %81 = vector.broadcast %cst_29 : f32 to vector<4x64x1xf32>
    %cst_30 = arith.constant 0.000000e+00 : f32
    %82 = vector.broadcast %cst_30 : f32 to vector<4x64x32xf32>
    %c0_i32 = arith.constant 0 : i32
    %83 = arith.subi %arg1, %c0_i32 : i32
    %84 = arith.addi %c0_i32, %83 : i32
    %c1_i32 = arith.constant 1 : i32
    %85:3 = scf.for %arg12 = %c0_i32 to %84 step %c1_i32 iter_args(%arg13 = %80, %arg14 = %81, %arg15 = %82) -> (vector<4x64x1xf32>, vector<4x64x1xf32>, vector<4x64x32xf32>)  : i32 {
      %c64_i32_54 = arith.constant 64 : i32
      %152 = arith.muli %arg12, %c64_i32_54 : i32
      %153 = tpu.assume_multiple %152, 64 : i32
      %c0_55 = arith.constant 0 : index
      %154 = arith.index_cast %153 : i32 to index
      %c0_56 = arith.constant 0 : index
      %155 = vector.load %arg10[%c0_55, %154, %c0_56] : memref<4x128x32xf32, #tpu.memory_space<vmem>>, vector<4x64x32xf32>
      %c0_57 = arith.constant 0 : index
      %156 = arith.index_cast %153 : i32 to index
      %c0_58 = arith.constant 0 : index
      %157 = vector.load %arg11[%c0_57, %156, %c0_58] : memref<4x128x32xf32, #tpu.memory_space<vmem>>, vector<4x64x32xf32>
      "tpu.trace_start"() <{level = 10 : i32, message = "hqd,hkd->hqk"}> : () -> ()
      %cst_59 = arith.constant dense<0.000000e+00> : vector<4x64x64xf32>
      %158 = tpu.matmul %79, %155, %cst_59 {dimension_numbers = #tpu.dot_dimension_numbers<[2], [2], [1], [1], [0, 0, 0, 1, 1, 1], [0], [0]>} : vector<4x64x32xf32>, vector<4x64x32xf32>, vector<4x64x64xf32> -> vector<4x64x64xf32>
      "tpu.trace_stop"() : () -> ()
      %cst_60 = arith.constant dense<0xFF800000> : vector<4x64xf32>
      %159 = vector.multi_reduction <maximumf>, %158, %cst_60 [2] : vector<4x64x64xf32> to vector<4x64xf32>
      %160 = vector.shape_cast %159 : vector<4x64xf32> to vector<4x64x1xf32>
      %161 = arith.maximumf %arg13, %160 : vector<4x64x1xf32>
      %162 = arith.subf %arg13, %161 : vector<4x64x1xf32>
      %163 = math.exp %162 : vector<4x64x1xf32>
      %164 = vector.broadcast %161 : vector<4x64x1xf32> to vector<4x64x64xf32>
      %165 = arith.subf %158, %164 : vector<4x64x64xf32>
      %166 = math.exp %165 : vector<4x64x64xf32>
      %167 = arith.mulf %163, %arg14 : vector<4x64x1xf32>
      %cst_61 = arith.constant dense<0.000000e+00> : vector<4x64xf32>
      %168 = vector.multi_reduction <add>, %166, %cst_61 [2] : vector<4x64x64xf32> to vector<4x64xf32>
      %169 = vector.shape_cast %168 : vector<4x64xf32> to vector<4x64x1xf32>
      %170 = arith.addf %167, %169 : vector<4x64x1xf32>
      %171 = vector.broadcast %163 : vector<4x64x1xf32> to vector<4x64x32xf32>
      %172 = arith.mulf %171, %arg15 : vector<4x64x32xf32>
      "tpu.trace_start"() <{level = 10 : i32, message = "hqk,hkd->hqd"}> : () -> ()
      %cst_62 = arith.constant dense<0.000000e+00> : vector<4x64x32xf32>
      %173 = tpu.matmul %166, %157, %cst_62 {dimension_numbers = #tpu.dot_dimension_numbers<[2], [1], [1], [2], [0, 0, 0, 1, 1, 2], [0], [0]>} : vector<4x64x64xf32>, vector<4x64x32xf32>, vector<4x64x32xf32> -> vector<4x64x32xf32>
      "tpu.trace_stop"() : () -> ()
      %174 = arith.addf %172, %173 : vector<4x64x32xf32>
      scf.yield %161, %170, %174 : vector<4x64x1xf32>, vector<4x64x1xf32>, vector<4x64x32xf32>
    }
    %c64_i32_31 = arith.constant 64 : i32
    %86 = arith.muli %arg1, %c64_i32_31 : i32
    %87 = tpu.assume_multiple %86, 64 : i32
    %c0_32 = arith.constant 0 : index
    %88 = arith.index_cast %87 : i32 to index
    %c0_33 = arith.constant 0 : index
    %89 = vector.load %arg10[%c0_32, %88, %c0_33] : memref<4x128x32xf32, #tpu.memory_space<vmem>>, vector<4x64x32xf32>
    %c0_34 = arith.constant 0 : index
    %90 = arith.index_cast %87 : i32 to index
    %c0_35 = arith.constant 0 : index
    %91 = vector.load %arg11[%c0_34, %90, %c0_35] : memref<4x128x32xf32, #tpu.memory_space<vmem>>, vector<4x64x32xf32>
    "tpu.trace_start"() <{level = 10 : i32, message = "hqd,hkd->hqk"}> : () -> ()
    %cst_36 = arith.constant dense<0.000000e+00> : vector<4x64x64xf32>
    %92 = tpu.matmul %79, %89, %cst_36 {dimension_numbers = #tpu.dot_dimension_numbers<[2], [2], [1], [1], [0, 0, 0, 1, 1, 1], [0], [0]>} : vector<4x64x32xf32>, vector<4x64x32xf32>, vector<4x64x64xf32> -> vector<4x64x64xf32>
    "tpu.trace_stop"() : () -> ()
    %93 = tpu.iota {dimensions = array<i32: 0>} : vector<64x64xi32>
    %94 = tpu.iota {dimensions = array<i32: 1>} : vector<64x64xi32>
    %95 = arith.cmpi sle, %94, %93 : vector<64x64xi32>
    %96 = vector.shape_cast %95 : vector<64x64xi1> to vector<1x64x64xi1>
    %cst_37 = arith.constant -1.000000e+30 : f32
    %97 = vector.shape_cast %96 : vector<1x64x64xi1> to vector<1x64x64xi1>
    %98 = vector.broadcast %97 : vector<1x64x64xi1> to vector<4x64x64xi1>
    %99 = vector.broadcast %cst_37 : f32 to vector<4x64x64xf32>
    %100 = arith.select %98, %92, %99 : vector<4x64x64xi1>, vector<4x64x64xf32>
    %cst_38 = arith.constant dense<0xFF800000> : vector<4x64xf32>
    %101 = vector.multi_reduction <maximumf>, %100, %cst_38 [2] : vector<4x64x64xf32> to vector<4x64xf32>
    %102 = vector.shape_cast %101 : vector<4x64xf32> to vector<4x64x1xf32>
    %103 = arith.maximumf %85#0, %102 : vector<4x64x1xf32>
    %104 = arith.subf %85#0, %103 : vector<4x64x1xf32>
    %105 = math.exp %104 : vector<4x64x1xf32>
    %106 = vector.broadcast %103 : vector<4x64x1xf32> to vector<4x64x64xf32>
    %107 = arith.subf %100, %106 : vector<4x64x64xf32>
    %108 = math.exp %107 : vector<4x64x64xf32>
    %109 = arith.mulf %105, %85#1 : vector<4x64x1xf32>
    %cst_39 = arith.constant dense<0.000000e+00> : vector<4x64xf32>
    %110 = vector.multi_reduction <add>, %108, %cst_39 [2] : vector<4x64x64xf32> to vector<4x64xf32>
    %111 = vector.shape_cast %110 : vector<4x64xf32> to vector<4x64x1xf32>
    %112 = arith.addf %109, %111 : vector<4x64x1xf32>
    %113 = vector.broadcast %105 : vector<4x64x1xf32> to vector<4x64x32xf32>
    %114 = arith.mulf %113, %85#2 : vector<4x64x32xf32>
    "tpu.trace_start"() <{level = 10 : i32, message = "hqk,hkd->hqd"}> : () -> ()
    %cst_40 = arith.constant dense<0.000000e+00> : vector<4x64x32xf32>
    %115 = tpu.matmul %108, %91, %cst_40 {dimension_numbers = #tpu.dot_dimension_numbers<[2], [1], [1], [2], [0, 0, 0, 1, 1, 2], [0], [0]>} : vector<4x64x64xf32>, vector<4x64x32xf32>, vector<4x64x32xf32> -> vector<4x64x32xf32>
    "tpu.trace_stop"() : () -> ()
    %116 = arith.addf %114, %115 : vector<4x64x32xf32>
    %117 = tpu.reciprocal %112 : vector<4x64x1xf32> -> vector<4x64x1xf32>
    %118 = vector.broadcast %117 : vector<4x64x1xf32> to vector<4x64x32xf32>
    %119 = arith.mulf %116, %118 : vector<4x64x32xf32>
    %120 = vector.extract_strided_slice %119 {offsets = [0, 0, 0], sizes = [1, 64, 32], strides = [1, 1, 1]} : vector<4x64x32xf32> to vector<1x64x32xf32>
    %121 = vector.shape_cast %120 : vector<1x64x32xf32> to vector<64x32xf32>
    %122 = vector.extract_strided_slice %119 {offsets = [1, 0, 0], sizes = [1, 64, 32], strides = [1, 1, 1]} : vector<4x64x32xf32> to vector<1x64x32xf32>
    %123 = vector.shape_cast %122 : vector<1x64x32xf32> to vector<64x32xf32>
    %124 = vector.extract_strided_slice %119 {offsets = [2, 0, 0], sizes = [1, 64, 32], strides = [1, 1, 1]} : vector<4x64x32xf32> to vector<1x64x32xf32>
    %125 = vector.shape_cast %124 : vector<1x64x32xf32> to vector<64x32xf32>
    %126 = vector.extract_strided_slice %119 {offsets = [3, 0, 0], sizes = [1, 64, 32], strides = [1, 1, 1]} : vector<4x64x32xf32> to vector<1x64x32xf32>
    %127 = vector.shape_cast %126 : vector<1x64x32xf32> to vector<64x32xf32>
    %128 = tpu.concatenate %121, %123, %125, %127 in 1 : vector<64x32xf32>, vector<64x32xf32>, vector<64x32xf32>, vector<64x32xf32> -> vector<64x128xf32>
    %c0_41 = arith.constant 0 : index
    %c0_42 = arith.constant 0 : index
    %129 = vector.load %arg4[%c0_41, %c0_42] : memref<128x128xf32, #tpu.memory_space<vmem>>, vector<128x128xf32>
    %cst_43 = arith.constant dense<0.000000e+00> : vector<64x128xf32>
    %130 = tpu.matmul %128, %129, %cst_43 {dimension_numbers = #tpu.dot_dimension_numbers<[1], [0], [0], [1], [0, 0, 1, 1], [], []>} : vector<64x128xf32>, vector<128x128xf32>, vector<64x128xf32> -> vector<64x128xf32>
    %131 = arith.addf %1, %130 : vector<64x128xf32>
    %132 = arith.mulf %131, %131 : vector<64x128xf32>
    %cst_44 = arith.constant dense<0.000000e+00> : vector<64xf32>
    %133 = vector.multi_reduction <add>, %132, %cst_44 [1] : vector<64x128xf32> to vector<64xf32>
    %134 = vector.shape_cast %133 : vector<64xf32> to vector<64x1xf32>
    %cst_45 = arith.constant 1.280000e+02 : f32
    %135 = vector.broadcast %cst_45 : f32 to vector<64x1xf32>
    %136 = arith.divf %134, %135 : vector<64x1xf32>
    %cst_46 = arith.constant 9.99999974E-6 : f32
    %137 = vector.broadcast %cst_46 : f32 to vector<64x1xf32>
    %138 = arith.addf %136, %137 : vector<64x1xf32>
    %139 = math.rsqrt %138 : vector<64x1xf32>
    %140 = vector.broadcast %139 : vector<64x1xf32> to vector<64x128xf32>
    %141 = arith.mulf %131, %140 : vector<64x128xf32>
    %142 = vector.shape_cast %5 : vector<128xf32> to vector<1x128xf32>
    %143 = vector.broadcast %142 : vector<1x128xf32> to vector<64x128xf32>
    %144 = arith.mulf %141, %143 : vector<64x128xf32>
    %cst_47 = arith.constant 0.000000e+00 : f32
    %145 = vector.broadcast %cst_47 : f32 to vector<64x128xf32>
    %c0_i32_48 = arith.constant 0 : i32
    %c2_i32 = arith.constant 2 : i32
    %146 = arith.addi %c0_i32_48, %c2_i32 : i32
    %c1_i32_49 = arith.constant 1 : i32
    %147 = scf.for %arg12 = %c0_i32_48 to %146 step %c1_i32_49 iter_args(%arg13 = %145) -> (vector<64x128xf32>)  : i32 {
      %c256_i32 = arith.constant 256 : i32
      %152 = arith.muli %arg12, %c256_i32 : i32
      %153 = tpu.assume_multiple %152, 256 : i32
      %c0_54 = arith.constant 0 : index
      %154 = arith.index_cast %153 : i32 to index
      %155 = vector.load %arg5[%c0_54, %154] : memref<128x512xf32, #tpu.memory_space<vmem>>, vector<128x256xf32>
      %cst_55 = arith.constant dense<0.000000e+00> : vector<64x256xf32>
      %156 = tpu.matmul %144, %155, %cst_55 {dimension_numbers = #tpu.dot_dimension_numbers<[1], [0], [0], [1], [0, 0, 1, 1], [], []>} : vector<64x128xf32>, vector<128x256xf32>, vector<64x256xf32> -> vector<64x256xf32>
      %cst_56 = arith.constant 5.000000e-01 : f32
      %157 = vector.broadcast %cst_56 : f32 to vector<64x256xf32>
      %158 = arith.mulf %156, %157 : vector<64x256xf32>
      %cst_57 = arith.constant 0.707106769 : f32
      %159 = vector.broadcast %cst_57 : f32 to vector<64x256xf32>
      %160 = arith.mulf %156, %159 : vector<64x256xf32>
      %161 = math.erf %160 : vector<64x256xf32>
      %cst_58 = arith.constant 1.000000e+00 : f32
      %162 = vector.broadcast %cst_58 : f32 to vector<64x256xf32>
      %163 = arith.addf %162, %161 : vector<64x256xf32>
      %164 = arith.mulf %158, %163 : vector<64x256xf32>
      %165 = arith.index_cast %153 : i32 to index
      %c0_59 = arith.constant 0 : index
      %166 = vector.load %arg6[%165, %c0_59] : memref<512x128xf32, #tpu.memory_space<vmem>>, vector<256x128xf32>
      %cst_60 = arith.constant dense<0.000000e+00> : vector<64x128xf32>
      %167 = tpu.matmul %164, %166, %cst_60 {dimension_numbers = #tpu.dot_dimension_numbers<[1], [0], [0], [1], [0, 0, 1, 1], [], []>} : vector<64x256xf32>, vector<256x128xf32>, vector<64x128xf32> -> vector<64x128xf32>
      %168 = arith.addf %arg13, %167 : vector<64x128xf32>
      scf.yield %168 : vector<64x128xf32>
    }
    %c2_i32_50 = arith.constant 2 : i32
    %148 = arith.addf %131, %147 : vector<64x128xf32>
    %c0_51 = arith.constant 0 : index
    %c0_52 = arith.constant 0 : index
    %c0_53 = arith.constant 0 : index
    %149 = vector.load %arg9[%c0_51, %c0_52, %c0_53] : memref<1x64x128xf32, #tpu.memory_space<vmem>>, vector<1x64x128xf32>
    %150 = vector.shape_cast %149 : vector<1x64x128xf32> to vector<64x128xf32>
    %151 = vector.shape_cast %148 : vector<64x128xf32> to vector<1x64x128xf32>
    tpu.vector_store %arg9[%c0_51, %c0_52, %c0_53], %151 {strides = array<i32>} : memref<1x64x128xf32, #tpu.memory_space<vmem>>, vector<1x64x128xf32>,
    return
  }
  func.func @transform_0(%arg0: i32, %arg1: i32) -> (i32, i32, i32) {
    %c0_i32 = arith.constant 0 : i32
    %c0_i32_0 = arith.constant 0 : i32
    return %arg0, %arg1, %c0_i32 : i32, i32, i32
  }
  func.func @transform_1(%arg0: i32, %arg1: i32) -> (i32, i32) {
    %c0_i32 = arith.constant 0 : i32
    %c0_i32_0 = arith.constant 0 : i32
    %c0_i32_1 = arith.constant 0 : i32
    return %c0_i32, %c0_i32_0 : i32, i32
  }
  func.func @transform_2(%arg0: i32, %arg1: i32) -> (i32, i32) {
    %c0_i32 = arith.constant 0 : i32
    %c0_i32_0 = arith.constant 0 : i32
    %c0_i32_1 = arith.constant 0 : i32
    return %c0_i32, %c0_i32_0 : i32, i32
  }
  func.func @transform_3(%arg0: i32, %arg1: i32) -> (i32, i32) {
    %c0_i32 = arith.constant 0 : i32
    %c0_i32_0 = arith.constant 0 : i32
    %c0_i32_1 = arith.constant 0 : i32
    return %c0_i32, %c0_i32_0 : i32, i32
  }
  func.func @transform_4(%arg0: i32, %arg1: i32) -> (i32, i32) {
    %c0_i32 = arith.constant 0 : i32
    %c0_i32_0 = arith.constant 0 : i32
    %c0_i32_1 = arith.constant 0 : i32
    return %c0_i32, %c0_i32_0 : i32, i32
  }
  func.func @transform_5(%arg0: i32, %arg1: i32) -> (i32, i32) {
    %c0_i32 = arith.constant 0 : i32
    %c0_i32_0 = arith.constant 0 : i32
    %c0_i32_1 = arith.constant 0 : i32
    return %c0_i32, %c0_i32_0 : i32, i32
  }
  func.func @transform_6(%arg0: i32, %arg1: i32) -> (i32, i32) {
    %c0_i32 = arith.constant 0 : i32
    %c0_i32_0 = arith.constant 0 : i32
    %c0_i32_1 = arith.constant 0 : i32
    return %c0_i32, %c0_i32_0 : i32, i32
  }
  func.func @transform_7(%arg0: i32, %arg1: i32) -> (i32, i32, i32) {
    %c0_i32 = arith.constant 0 : i32
    %c0_i32_0 = arith.constant 0 : i32
    return %arg0, %arg1, %c0_i32 : i32, i32, i32
  }
}

</mosaic_0001>

<bundles_post_ra>
// kernel: tpu_custom_call.1
= control target key start
LH: loop header
LB: loop body
LE: loop exit
PB: predicated region body
PF: predicated region fallthrough
CT: control target
= control target key end

     0   :  { %s16286_s0 = inlined_call_operand.hbm [shape: f32[2,128,128], index: 0, kind: input, shape index: {}]   ;;  %s16287_s1 = inlined_call_operand.hbm [shape: f32[128,384], index: 1, kind: input, shape index: {}]   ;;  %s16288_s2 = inlined_call_operand.hbm [shape: f32[128,128], index: 2, kind: input, shape index: {}]   ;;  %s16289_s3 = inlined_call_operand.hbm [shape: f32[128,512], index: 3, kind: input, shape index: {}]   ;;  %s16290_s4 = inlined_call_operand.hbm [shape: f32[512,128], index: 4, kind: input, shape index: {}]   ;;  %s16291_s5 = inlined_call_operand.vmem [shape: f32[1,128], index: 5, kind: input, shape index: {}]   ;;  %s16292_s6 = inlined_call_operand.vmem [shape: f32[1,128], index: 6, kind: input, shape index: {}]   ;;  %s16293_s7 = inlined_call_operand.hbm [shape: f32[2,128,128], index: 7, kind: output, shape index: {}]  }
   0x1   :  { %16455 = sst [smem:[#allocation282_spill]] %s16287_s1 }
   0x2   :  { %16456 = sst [smem:[#allocation283_spill]] %s16288_s2 }
   0x3   :  { %16457 = sst [smem:[#allocation284_spill]] %s16289_s3 }
   0x4   :  { %16458 = sst [smem:[#allocation285_spill]] %s16290_s4 }
   0x5   :  { %16459 = sst [smem:[#allocation286_spill]] %s16293_s7 }
   0x6   :  { %12 = vsyncpa [#allocation5], 0 }
   0x7   :  { %14 = vsyncpa [#allocation5 + $0x1], 0 }
   0x8   :  { %15 = vsyncpa [#allocation8], 0 }
   0x9   :  { %16 = vsyncpa [#allocation11], 0 }
   0xa   :  { %17 = vsyncpa [#allocation6], 0 }
   0xb   :  { %19 = vsyncpa [#allocation6 + $0x1], 0  ;;  %s10320_s24 = smov 0   ;;  %s10322_s25 = smov 0  }
   0xc   :  { %s10324_s26 = smov 0   ;;  %s10326_s27 = smov 0  }
   0xd   :  { %s10328_s28 = smov 0   ;;  %s10330_s29 = smov 0  }
   0xe   :  { %s10332_s30 = smov 0   ;;  %s10334_s8 = smov 0  }
   0xf LB: > { %16460 = sst [smem:[#allocation18_spill]] %s9426_s24  ;;  %s5850_s9 = sadd.s32 4294967295, %s9454_s8   ;;  %s9454_s8 = sphi %s10334_s8, %s25_s8   ;;  %s9450_s30 = sphi %s10332_s30, %s17967_s30   ;;  %s9446_s29 = sphi %s10330_s29, %s17966_s29   ;;  %s9442_s28 = sphi %s10328_s28, %s17965_s28   ;;  %s9438_s27 = sphi %s10326_s27, %s17964_s27   ;;  %s9434_s26 = sphi %s10324_s26, %s17963_s26   ;;  %s9430_s25 = sphi %s10322_s25, %s17962_s25   ;;  %s9426_s24 = sphi %s10320_s24, %s17961_s24  }
  0x10   : > { %16461 = sst [smem:[#allocation19_spill]] %s9442_s28  ;;  %s5851_s10 = sadd.s32 4294967294, %s9454_s8  }
  0x11   : > { %p59_p0 = scmp.ne.s32.totalorder %s9430_s25, %s9426_s24  ;;  %p10364_p1 = scmp.eq.s32.totalorder %s5850_s9, 0 }
  0x12   : > { %p10368_p2 = scmp.eq.s32.totalorder %s5850_s9, 3  ;;  %p217_p3 = scmp.eq.s32.totalorder %s5851_s10, 3 }
  0x13   : > { %p10374_p4 = por %p10364_p1, %p59_p0  ;;  %p5852_p5 = scmp.ge.s32.totalorder %s9454_s8, 1 }
  0x14   : > { %p10379_p6 = por %p217_p3, %p59_p0  ;;  %p224_p7 = scmp.lt.s32.totalorder %s9454_s8, 5 }
  0x15   : > { %s16467_s1 = sld [smem:[#allocation282_spill]]  ;;  %s10264_s19 = smov [#allocation7]  }
  0x16   : > { %s16465_s14 = scalar_select %p10379_p6, 1, 0 }
  0x17   : > { %p10387_p8 = pnand %p5852_p5, %p224_p7  ;;  %s237_s20 = sshll.u32 %s10264_s19, 4  ;;  %s238_s20 = int_to_ptr.vmem [resolvable:$true] %s237_s20 }
  0x18   : > { %16466 = sst [smem:[#allocation20_spill]] %s16465_s14  ;;  %s10265_s10 = smov 384  }
  0x19   : > { %p6226_p9 = pneg %p10387_p8  ;;  %s16470_s3 = sld [smem:[#allocation284_spill]] }
  0x1a   : > { %s10266_s15 = smov 24   ;;  %s10267_s16 = smov [#allocation10]  }
  0x1b   : > { %s235_s17 = sshll.u32 %s16467_s1, 4  ;;  %p10395_p10 = pnand %p6226_p9, %p10364_p1  ;;  %s236_s17 = int_to_ptr.hbm [resolvable:$true] %s235_s17 }
  0x1c   : > { %s265_s19 = sshll.u32 %s10267_s16, 4  ;;  %s10268_s1 = smov 512   ;;  %s266_s19 = int_to_ptr.vmem [resolvable:$true] %s265_s19 }
  0x1d   : > { %6229 = dma.hbm_to_vmem [thread:$0]  (!%p10395_p10), %s236_s17, 6144, %s238_s20, [#allocation8], %s10265_s10, %s10265_s10, %s10266_s15  }
  0x1e   : > { %s10269_s14 = smov 32   ;;  %s16471_s2 = sld [smem:[#allocation283_spill]] }
  0x1f   : > { %s263_s9 = sshll.u32 %s16470_s3, 4  ;;  %s10270_s3 = smov [#allocation9]   ;;  %s264_s9 = int_to_ptr.hbm [resolvable:$true] %s263_s9 }
  0x20   : > { %6235 = dma.hbm_to_vmem [thread:$0]  (!%p10395_p10), %s264_s9, 8192, %s266_s19, [#allocation11], %s10268_s1, %s10268_s1, %s10269_s14  }
  0x21   : > { %s251_s17 = sshll.u32 %s10270_s3, 4  ;;  %s16472_s4 = sld [smem:[#allocation285_spill]]  ;;  %s252_s17 = int_to_ptr.vmem [resolvable:$true] %s251_s17 }
  0x22   : > { %s16296_s16 = smov 128   ;;  %s16297_s1 = smov 8  }
  0x23   : > { %s10273_s24 = smov [#allocation12]   ;;  %s34_s14 = sadd.s32 1, %s9446_s29 }
  0x24   : > { %s249_s23 = sshll.u32 %s16471_s2, 4  ;;  %s279_s3 = sshll.u32 %s10273_s24, 4  ;;  %s250_s23 = int_to_ptr.hbm [resolvable:$true] %s249_s23  ;;  %s280_s3 = int_to_ptr.vmem [resolvable:$true] %s279_s3 }
  0x25   : > { %6232 = dma.hbm_to_vmem [thread:$0]  (!%p10395_p10), %s250_s23, 2048, %s252_s17, [#allocation8], %s16296_s16, %s16296_s16, %s16297_s1  }
  0x26   : > { %s37_s9 = sadd.s32 1, %s9450_s30  ;;  %p35_p11 = scmp.ge.s32.totalorder %s34_s14, 2 }
  0x27   : > { %s277_s15 = sshll.u32 %s16472_s4, 4  ;;  %s46_s19 = sadd.s32 1, %s9434_s26  ;;  %s278_s15 = int_to_ptr.hbm [resolvable:$true] %s277_s15 }
  0x28   : > { %6238 = dma.hbm_to_vmem [thread:$0]  (!%p10395_p10), %s278_s15, 8192, %s280_s3, [#allocation11], %s16296_s16, %s16296_s16, %s16297_s1  }
  0x29   : > { %p53_p12 = scmp.ne.s32.totalorder %s9434_s26, %s9430_s25  ;;  %p54_p13 = scmp.eq.s32.totalorder %s9454_s8, 0 }
  0x2a   : > { %s17969_s14 = smov (%p35_p11, %s34_s14), 0  ;;  %s17971_s9 = smov (!%p35_p11, %s37_s9), %s9450_s30 }
  0x2b   : > { %16473 = sst [smem:[#allocation21_spill]] %s17969_s14  ;;  %s42_s22 = ssub.s32 %s9446_s29, %s17969_s14 }
  0x2c   : > { %p10433_p0 = por %p54_p13, %p53_p12  ;;  %p39_p3 = scmp.ge.s32.totalorder %s17971_s9, 2 }
  0x2d   : > { %p10439_p5 = por %p10368_p2, %p53_p12  ;;  %p6251_p7 = scmp.lt.s32.totalorder %s9454_s8, 4 }
  0x2e   : > { %s299_s17 = sand.u32 1, %s9434_s26   ;;  %s17973_s9 = smov (%p39_p3, %s17971_s9), 0 }
  0x2f   : > { %s16475_s23 = scalar_select %p10439_p5, 1, 0 }
  0x30   : > { %s5858_s20 = sshll.u32 %s299_s17, 6  ;;  %s41_s10 = ssub.s32 %s9450_s30, %s17973_s9 }
  0x31   : > { %16476 = sst [smem:[#allocation22_spill]] %s16475_s23  ;;  %s43_s15 = sor.u32 %s42_s22, %s41_s10 }
  0x32   : > { %s5859_s24 = sshll.u32 %s9446_s29, 3  ;;  %p44_p9 = scmp.eq.s32.totalorder %s43_s15, 0 }
  0x33   : > { %s5860_s3 = sshll.u32 %s9450_s30, 4  ;;  %s303_s1 = scalar_lea.vmem [#allocation4], %s5858_s20 }
  0x34   : > { %s308_s16 = sadd.s32 %s5860_s3, %s5859_s24  ;;  %s313_s12 = sshll.u32 %s303_s1, 4  ;;  %s314_s12 = int_to_ptr.vmem [resolvable:$true] %s313_s12 }
  0x35   : > { %s10452_s2 = scalar_select %p44_p9, %s9434_s26, %s46_s19  }
  0x36   : > { %s5861_s4 = sshll.u32 %s308_s16, 3  ;;  %p6240_p2 = pnand %p6251_p7, %p10433_p0 }
  0x37   : > { %s310_s7 = scalar_lea.hbm %s16286_s0, %s5861_s4  ;;  %s300_s22 = scalar_lea.sflag [#allocation5], %s299_s17 }
  0x38   : > { %s311_s28 = sshll.u32 %s310_s7, 4  ;;  %s16477_s10 = smov 8   ;;  %s312_s28 = int_to_ptr.hbm [resolvable:$true] %s311_s28 }
  0x39   : > { %s16478_s15 = smov 128   ;;  %325 = sbr.rel (%p10387_p8) target bundleno = 2903 (0xb57), region = 48 }
  0x3a   : > { %6242 = dma.hbm_to_vmem [thread:$0]  (!%p6240_p2), %s312_s28, 1024, %s314_s12, %s300_s22, %s16478_s15, %s16478_s15, %s16477_s10  }
  0x3e   : > { %s10467_s16 = sand.u32 1, %s9430_s25  }
  0x3f   : > { %s5863_s4 = sshll.u32 %s10467_s16, 6  ;;  %s328_s1 = scalar_lea.sflag [#allocation5], %s10467_s16 }
  0x40   : > { %s10473_s7 = scalar_lea.vmem [#allocation4], %s5863_s4 }
  0x41   : > { %9409 = dma.done.wait (%p10374_p4), %s328_s1, 1024  }
  0x42   : > { %9411 = vsyncadd (%p10374_p4), %s328_s1, 4294966272 }
  0x43   : > { %9413 = dma.done.wait (%p10364_p1), [#allocation8], 8192  }
  0x44   : > { %9415 = vsyncadd (%p10364_p1), [#allocation8], 4294959104 }
  0x45   : > { %9417 = dma.done.wait (%p10364_p1), [#allocation11], 16384  }
  0x46   : > { %9419 = vsyncadd (%p10364_p1), [#allocation11], 4294950912  ;;  %v10490_v0 = vld [vmem:[%s16292_s6] sm:$0x1]  ;;  %v10498_v3 = vld [vmem:[%s10473_s7 + $0x10] sm:$0xff]  ;;  %v10274_v32 = vmov 128.0  }
  0x47   : > { %16479 = vst [vmem:[#allocation23_spill] sm:$0xff] %v10490_v0  ;;  %v10493_v1 = vld [vmem:[%s10473_s7] sm:$0xff]  ;;  %v397_v4 = vmul.f32 %v10498_v3, %v10498_v3  ;;  %v586_v7 = vld [vmem:[#allocation7 + $0x168] sm:$0xff]  ;;  %v10507_v8 = vld [vmem:[#allocation7 + $0x170] sm:$0xff]  ;;  %7954 = vrcp.f32 %v10274_v32  ;;  %s5869_s14 = sshll.u32 %s9438_s27, 6  ;;  %s10275_s21 = smov 64  }
  0x48   : > { %16480 = vst [vmem:[#allocation24_spill] sm:$0xff] %v10493_v1  ;;  %v395_v2 = vmul.f32 %v10493_v1, %v10493_v1  ;;  %v10503_v5 = vld [vmem:[%s10473_s7 + $0x20] sm:$0xff]  ;;  %v588_v9 = vld [vmem:[#allocation7 + $0x178] sm:$0xff]  ;;  %v10510_v10 = vld [vmem:[%s10473_s7 + $0x8] sm:$0xff]  ;;  %589 = vmatpush.msra.mxu0 %v586_v7  ;;  %630 = vmatpush.msra.mxu1 %v10507_v8  ;;  %s10707_s19 = scalar_lea.vmem [#allocation2], %s5869_s14  ;;  %s10276_s23 = smov 96  }
  0x49   : > { %16481 = vst [vmem:[#allocation25_spill] sm:$0xff] %v10498_v3  ;;  %v399_v6 = vmul.f32 %v10503_v5, %v10503_v5  ;;  %407 = vadd.xlane.f32.xlu1 %v397_v4  ;;  %v583_v11 = vld [vmem:[#allocation7 + $0x150] sm:$0xff]  ;;  %v10512_v12 = vld [vmem:[#allocation7 + $0x158] sm:$0xff]  ;;  %v10518_v14 = vld [vmem:[%s10473_s7 + $0x28] sm:$0xff]  ;;  %671 = vmatpush.msra.mxu2 %v588_v9  ;;  %v396_v18 = vmul.f32 %v10510_v10, %v10510_v10  ;;  %s10715_s17 = scalar_lea.vmem [#allocation3], %s5869_s14  ;;  %s10277_s20 = smov 32  }
  0x4a   : > { %16482 = vst [vmem:[#allocation26_spill] sm:$0xff] %v10503_v5  ;;  %403 = vadd.xlane.f32.xlu0 %v395_v2  ;;  %v10515_v13 = vld [vmem:[%s10473_s7 + $0x18] sm:$0xff]  ;;  %v585_v15 = vld [vmem:[#allocation7 + $0x160] sm:$0xff]  ;;  %6142 = vmatpush.msra.mxu3 %v586_v7  ;;  %v582_v19 = vld [vmem:[#allocation7 + $0x148] sm:$0xff]  ;;  %v400_v21 = vmul.f32 %v10518_v14, %v10518_v14  ;;  %s11041_s24 = scalar_lea.vmem [#allocation13], %s5863_s4  ;;  %p5924_p1 = scmp.le.s32.totalorder %s9438_s27, 0 }
  0x4b   : > { %16483 = vst [vmem:[#allocation27_spill] sm:$0xff] %v10510_v10  ;;  %411 = vadd.xlane.f32.xlu2 %v399_v6  ;;  %v580_v16 = vld [vmem:[#allocation7 + $0x138] sm:$0xff]  ;;  %v10521_v17 = vld [vmem:[#allocation7 + $0x140] sm:$0xff]  ;;  %590 = vmatpush.msra.mxu0 %v583_v11  ;;  %v398_v20 = vmul.f32 %v10515_v13, %v10515_v13  ;;  %v10532_v22 = vld [vmem:[%s10473_s7 + $0x30] sm:$0xff]  ;;  %v11088_v0 = vmov 0.0  }
  0x4c   : > { %16484 = vst [vmem:[#allocation28_spill] sm:$0xff] %v10515_v13  ;;  %631 = vmatpush.msra.mxu1 %v10512_v12  ;;  %672 = vmatpush.msra.mxu2 %v585_v15  ;;  %v10535_v23 = vld [vmem:[%s10473_s7 + $0x38] sm:$0xff]  ;;  %v401_v24 = vmul.f32 %v10532_v22, %v10532_v22  ;;  %v577_v26 = vld [vmem:[#allocation7 + $0x120] sm:$0xff]  ;;  %v10541_v27 = vld [vmem:[#allocation7 + $0x128] sm:$0xff] }
  0x4d   : > { %16485 = vst [vmem:[#allocation29_spill] sm:$0xff] %v10518_v14  ;;  %6143 = vmatpush.msra.mxu3 %v583_v11  ;;  %591 = vmatpush.msra.mxu0 %v580_v16  ;;  %v402_v25 = vmul.f32 %v10535_v23, %v10535_v23  ;;  %v579_v28 = vld [vmem:[#allocation7 + $0x130] sm:$0xff]  ;;  %v574_v29 = vld [vmem:[#allocation7 + $0x108] sm:$0xff]  ;;  %v576_v31 = vld [vmem:[#allocation7 + $0x118] sm:$0xff]  ;;  %v10556_v42 = vpop.eup %7954 }
  0x4e   : > { %632 = vmatpush.msra.mxu1 %v10521_v17  ;;  %673 = vmatpush.msra.mxu2 %v582_v19  ;;  %16486 = vst [vmem:[#allocation30_spill] sm:$0xff] %v10532_v22  ;;  %v10544_v30 = vld [vmem:[#allocation7 + $0x110] sm:$0xff]  ;;  %v10547_v34 = vld [vmem:[#allocation7 + $0xf8] sm:$0xff]  ;;  %v573_v35 = vld [vmem:[#allocation7 + $0x100] sm:$0xff]  ;;  %v420_v49 = vmul.f32 128.0, %v10556_v42  ;;  %vm424_vm0 = vweird.f32 %v10556_v42 }
  0x4f   : > { %6144 = vmatpush.msra.mxu3 %v580_v16  ;;  %16487 = vst [vmem:[#allocation31_spill] sm:$0xff] %v10535_v23  ;;  %592 = vmatpush.msra.mxu0 %v577_v26  ;;  %v571_v33 = vld [vmem:[#allocation7 + $0xf0] sm:$0xff]  ;;  %v568_v36 = vld [vmem:[#allocation7 + $0xd8] sm:$0xff]  ;;  %v10550_v37 = vld [vmem:[#allocation7 + $0xe0] sm:$0xff] }
  0x50   : > { %633 = vmatpush.msra.mxu1 %v10541_v27  ;;  %674 = vmatpush.msra.mxu2 %v579_v28  ;;  %v570_v38 = vld [vmem:[#allocation7 + $0xe8] sm:$0xff]  ;;  %v565_v39 = vld [vmem:[#allocation7 + $0xc0] sm:$0xff]  ;;  %v567_v41 = vld [vmem:[#allocation7 + $0xd0] sm:$0xff]  ;;  %v421_v56 = vsub.f32 1.0, %v420_v49  ;;  %16532 = vst [vmem:[#allocation72_spill] sm:$0xff] %v11088_v0 }
  0x51   : > { %409 = vadd.xlane.f32.xlu1 %v398_v20  ;;  %6145 = vmatpush.msra.mxu3 %v577_v26  ;;  %v10553_v40 = vld [vmem:[#allocation7 + $0xc8] sm:$0xff]  ;;  %v10558_v44 = vld [vmem:[#allocation7 + $0xb0] sm:$0xff]  ;;  %v564_v45 = vld [vmem:[#allocation7 + $0xb8] sm:$0xff] }
  0x52   : > { %405 = vadd.xlane.f32.xlu0 %v396_v18  ;;  %593 = vmatpush.msra.mxu0 %v574_v29  ;;  %v562_v43 = vld [vmem:[#allocation7 + $0xa8] sm:$0xff]  ;;  %v559_v46 = vld [vmem:[#allocation7 + $0x90] sm:$0xff]  ;;  %v10561_v47 = vld [vmem:[#allocation7 + $0x98] sm:$0xff]  ;;  %v422_v63 = vmul.f32 %v10556_v42, %v421_v56 }
  0x53   : > { %413 = vadd.xlane.f32.xlu2 %v400_v21  ;;  %634 = vmatpush.msra.mxu1 %v10544_v30  ;;  %v561_v48 = vld [vmem:[#allocation7 + $0xa0] sm:$0xff]  ;;  %v556_v50 = vld [vmem:[#allocation7 + $0x78] sm:$0xff]  ;;  %v558_v52 = vld [vmem:[#allocation7 + $0x88] sm:$0xff] }
  0x54   : > { %675 = vmatpush.msra.mxu2 %v576_v31  ;;  %6146 = vmatpush.msra.mxu3 %v574_v29  ;;  %v10565_v51 = vld [vmem:[#allocation7 + $0x80] sm:$0xff]  ;;  %v10568_v54 = vld [vmem:[#allocation7 + $0x68] sm:$0xff]  ;;  %v555_v55 = vld [vmem:[#allocation7 + $0x70] sm:$0xff]  ;;  %v423_v15 = vadd.f32 %v10556_v42, %v422_v63 }
  0x55   : > { %594 = vmatpush.msra.mxu0 %v571_v33  ;;  %635 = vmatpush.msra.mxu1 %v10547_v34  ;;  %v553_v53 = vld [vmem:[#allocation7 + $0x60] sm:$0xff]  ;;  %v550_v57 = vld [vmem:[#allocation7 + $0x48] sm:$0xff]  ;;  %v10571_v58 = vld [vmem:[#allocation7 + $0x50] sm:$0xff] }
  0x56   : > { %676 = vmatpush.msra.mxu2 %v573_v35  ;;  %6147 = vmatpush.msra.mxu3 %v571_v33  ;;  %v552_v59 = vld [vmem:[#allocation7 + $0x58] sm:$0xff]  ;;  %v547_v60 = vld [vmem:[#allocation7 + $0x30] sm:$0xff]  ;;  %v549_v62 = vld [vmem:[#allocation7 + $0x40] sm:$0xff]  ;;  %v10588_v16 = vsel %vm424_vm0, %v10556_v42, %v423_v15 }
  0x57   : > { %595 = vmatpush.msra.mxu0 %v568_v36  ;;  %636 = vmatpush.msra.mxu1 %v10550_v37  ;;  %v10574_v61 = vld [vmem:[#allocation7 + $0x38] sm:$0xff]  ;;  %v10578_v4 = vld [vmem:[#allocation7 + $0x20] sm:$0xff]  ;;  %v546_v6 = vld [vmem:[#allocation7 + $0x28] sm:$0xff]  ;;  %16488 = vst [vmem:[#allocation32_spill] sm:$0xff] %v10588_v16 }
  0x58   : > { %677 = vmatpush.msra.mxu2 %v570_v38  ;;  %6148 = vmatpush.msra.mxu3 %v568_v36  ;;  %v544_v2 = vld [vmem:[#allocation7 + $0x18] sm:$0xff]  ;;  %v541_v7 = vld [vmem:[#allocation7] sm:$0xff]  ;;  %v10581_v9 = vld [vmem:[#allocation7 + $0x8] sm:$0xff] }
  0x59   : > { %417 = vadd.xlane.f32.xlu1 %v402_v25  ;;  %596 = vmatpush.msra.mxu0 %v565_v39  ;;  %v543_v11 = vld [vmem:[#allocation7 + $0x10] sm:$0xff] }
  0x5a   : > { %415 = vadd.xlane.f32.xlu0 %v401_v24  ;;  %637 = vmatpush.msra.mxu1 %v10553_v40 }
  0x5b   : > { %678 = vmatpush.msra.mxu2 %v567_v41  ;;  %6149 = vmatpush.msra.mxu3 %v565_v39 }
  0x5c   : > { %597 = vmatpush.msra.mxu0 %v562_v43  ;;  %638 = vmatpush.msra.mxu1 %v10558_v44 }
  0x5d   : > { %679 = vmatpush.msra.mxu2 %v564_v45  ;;  %6150 = vmatpush.msra.mxu3 %v562_v43 }
  0x5e   : > { %598 = vmatpush.msra.mxu0 %v559_v46  ;;  %639 = vmatpush.msra.mxu1 %v10561_v47 }
  0x5f   : > { %680 = vmatpush.msra.mxu2 %v561_v48  ;;  %6151 = vmatpush.msra.mxu3 %v559_v46 }
  0x60   : > { %599 = vmatpush.msra.mxu0 %v556_v50  ;;  %640 = vmatpush.msra.mxu1 %v10565_v51 }
  0x61   : > { %681 = vmatpush.msra.mxu2 %v558_v52  ;;  %6152 = vmatpush.msra.mxu3 %v556_v50 }
  0x62   : > { %600 = vmatpush.msra.mxu0 %v553_v53  ;;  %641 = vmatpush.msra.mxu1 %v10568_v54 }
  0x63   : > { %682 = vmatpush.msra.mxu2 %v555_v55  ;;  %6153 = vmatpush.msra.mxu3 %v553_v53  ;;  %v10641_v55 = vld [vmem:[%s16291_s5] ss:$0 sm:$0xff] }
  0x64   : > { %601 = vmatpush.msra.mxu0 %v550_v57  ;;  %642 = vmatpush.msra.mxu1 %v10571_v58 }
  0x65   : > { %683 = vmatpush.msra.mxu2 %v552_v59  ;;  %6154 = vmatpush.msra.mxu3 %v550_v57 }
  0x66   : > { %602 = vmatpush.msra.mxu0 %v547_v60  ;;  %643 = vmatpush.msra.mxu1 %v10574_v61 }
  0x67   : > { %684 = vmatpush.msra.mxu2 %v549_v62  ;;  %6155 = vmatpush.msra.mxu3 %v547_v60 }
  0x68   : > { %603 = vmatpush.msra.mxu0 %v544_v2  ;;  %644 = vmatpush.msra.mxu1 %v10578_v4 }
  0x69   : > { %685 = vmatpush.msra.mxu2 %v546_v6  ;;  %6156 = vmatpush.msra.mxu3 %v544_v2 }
  0x6a   : > { %604 = vmatpush.msra.mxu0 %v541_v7  ;;  %645 = vmatpush.msra.mxu1 %v10581_v9 }
  0x6b   : > { %686 = vmatpush.msra.mxu2 %v543_v11  ;;  %6157 = vmatpush.msra.mxu3 %v541_v7 }
  0x6d   : > { %6158 = vmatpush.msrb.mxu3 %v10507_v8 }
  0x6f   : > { %6159 = vmatpush.msrb.mxu3 %v10512_v12 }
  0x71   : > { %6160 = vmatpush.msrb.mxu3 %v10521_v17 }
  0x73   : > { %6161 = vmatpush.msrb.mxu3 %v10541_v27 }
  0x75   : > { %6162 = vmatpush.msrb.mxu3 %v10544_v30 }
  0x77   : > { %6163 = vmatpush.msrb.mxu3 %v10547_v34 }
  0x79   : > { %6164 = vmatpush.msrb.mxu3 %v10550_v37 }
  0x7b   : > { %6165 = vmatpush.msrb.mxu3 %v10553_v40 }
  0x7d   : > { %6166 = vmatpush.msrb.mxu3 %v10558_v44 }
  0x7f   : > { %6167 = vmatpush.msrb.mxu3 %v10561_v47 }
  0x81   : > { %6168 = vmatpush.msrb.mxu3 %v10565_v51 }
  0x83   : > { %6169 = vmatpush.msrb.mxu3 %v10568_v54 }
  0x85   : > { %6170 = vmatpush.msrb.mxu3 %v10571_v58 }
  0x87   : > { %6171 = vmatpush.msrb.mxu3 %v10574_v61 }
  0x89   : > { %6172 = vmatpush.msrb.mxu3 %v10578_v4 }
  0x8b   : > { %6173 = vmatpush.msrb.mxu3 %v10581_v9 }
  0xbc   : > { %v408_v20 = vpop.xlane.xlu1 %407 }
  0xbd   : > { %v404_v18 = vpop.xlane.xlu0 %403  ;;  %v428_v21 = vmul.f32 %v10588_v16, %v408_v20 }
  0xbe   : > { %v426_v19 = vmul.f32 %v10588_v16, %v404_v18  ;;  %v412_v8 = vpop.xlane.xlu2 %411 }
  0xbf   : > { %v10595_v25 = vadd.f32 1e-05, %v428_v21  ;;  %v430_v27 = vmul.f32 %v10588_v16, %v412_v8 }
  0xc0   : > { %v434_v24 = vadd.f32 1e-05, %v426_v19 }
  0xc1   : > { %v10616_v36 = vadd.f32 1e-05, %v430_v27  ;;  %vm468_vm4 = vweird.f32 %v10595_v25 }
  0xc2   : > { %7956 = vrsqrt.f32 %v434_v24  ;;  %vm448_vm2 = vweird.f32 %v434_v24 }
  0xc3   : > { %7958 = vrsqrt.f32 %v10595_v25 }
  0xc4   : > { %v410_v26 = vpop.xlane.xlu1 %409 }
  0xc5   : > { %v406_v12 = vpop.xlane.xlu0 %405  ;;  %v429_v28 = vmul.f32 %v10588_v16, %v410_v26 }
  0xc6   : > { %v427_v17 = vmul.f32 %v10588_v16, %v406_v12  ;;  %v414_v40 = vpop.xlane.xlu2 %413 }
  0xc7   : > { %v10609_v33 = vadd.f32 1e-05, %v429_v28  ;;  %v431_v47 = vmul.f32 %v10588_v16, %v414_v40 }
  0xc8   : > { %v7957_v29 = vpop.eup %7956  ;;  %v10605_v30 = vadd.f32 1e-05, %v427_v17 }
  0xc9   : > { %v10607_v31 = vpop.eup %7958  ;;  %v443_v32 = vmul.f32 %v7957_v29, %v434_v24  ;;  %vm449_vm1 = vweird.f32 %v7957_v29  ;;  %v10647_v62 = vadd.f32 1e-05, %v431_v47  ;;  %vm478_vm14 = vweird.f32 %v10609_v33 }
  0xca   : > { %7960 = vrsqrt.f32 %v10605_v30  ;;  %v463_v34 = vmul.f32 %v10607_v31, %v10595_v25  ;;  %vm450_vm3 = vmor %vm448_vm2, %vm449_vm1  ;;  %vm469_vm5 = vweird.f32 %v10607_v31  ;;  %vm458_vm6 = vweird.f32 %v10605_v30 }
  0xcb   : > { %v444_v35 = vmul.f32 %v7957_v29, %v443_v32  ;;  %7962 = vrsqrt.f32 %v10609_v33  ;;  %vm10659_vm8 = vmor %vm468_vm4, %vm469_vm5 }
  0xcc   : > { %v464_v38 = vmul.f32 %v10607_v31, %v463_v34  ;;  %v418_v42 = vpop.xlane.xlu1 %417  ;;  %7964 = vrsqrt.f32 %v10616_v36 }
  0xcd   : > { %v445_v37 = vmul.f32 0.5, %v444_v35  ;;  %v416_v39 = vpop.xlane.xlu0 %415  ;;  %v433_v44 = vmul.f32 %v10588_v16, %v418_v42 }
  0xce   : > { %v432_v41 = vmul.f32 %v10588_v16, %v416_v39  ;;  %v465_v51 = vmul.f32 0.5, %v464_v38  ;;  %v11090_v16 = vmov 0.0  }
  0xcf   : > { %v446_v43 = vsub.f32 1.5, %v445_v37  ;;  %v10631_v52 = vadd.f32 1e-05, %v433_v44 }
  0xd0   : > { %v7961_v45 = vpop.eup %7960  ;;  %v10625_v46 = vadd.f32 1e-05, %v432_v41  ;;  %v466_v59 = vsub.f32 1.5, %v465_v51 }
  0xd1   : > { %v10628_v48 = vpop.eup %7962  ;;  %v447_v49 = vmul.f32 %v7957_v29, %v446_v43  ;;  %v453_v50 = vmul.f32 %v7961_v45, %v10605_v30  ;;  %vm459_vm7 = vweird.f32 %v7961_v45  ;;  %vm518_vm12 = vweird.f32 %v10631_v52 }
  0xd2   : > { %7966 = vrsqrt.f32 %v10625_v46  ;;  %v473_v53 = vmul.f32 %v10628_v48, %v10609_v33  ;;  %v10644_v57 = vpop.eup %7964  ;;  %v467_v15 = vmul.f32 %v10607_v31, %v466_v59  ;;  %vm460_vm9 = vmor %vm458_vm6, %vm459_vm7  ;;  %vm508_vm10 = vweird.f32 %v10625_v46 }
  0xd3   : > { %v454_v54 = vmul.f32 %v7961_v45, %v453_v50  ;;  %7968 = vrsqrt.f32 %v10631_v52  ;;  %v451_v56 = vsel %vm450_vm3, %v7957_v29, %v447_v49  ;;  %v483_v7 = vmul.f32 %v10644_v57, %v10616_v36 }
  0xd4   : > { %v522_v60 = vmul.f32 %v451_v56, %v10493_v1  ;;  %v474_v63 = vmul.f32 %v10628_v48, %v473_v53  ;;  %7970 = vrsqrt.f32 %v10647_v62  ;;  %v471_v26 = vsel %vm10659_vm8, %v10607_v31, %v467_v15 }
  0xd5   : > { %v455_v58 = vmul.f32 0.5, %v454_v54  ;;  %v484_v17 = vmul.f32 %v10644_v57, %v483_v7  ;;  %vm479_vm15 = vweird.f32 %v10628_v48  ;;  %v524_v31 = vmul.f32 %v471_v26, %v10498_v3 }
  0xd6   : > { %v533_v61 = vmul.f32 %v10641_v55, %v522_v60  ;;  %v475_v9 = vmul.f32 0.5, %v474_v63  ;;  %vm480_vm2 = vmor %vm478_vm14, %vm479_vm15  ;;  %vm488_vm3 = vweird.f32 %v10616_v36  ;;  %vm489_vm4 = vweird.f32 %v10644_v57 }
  0xd7   : > { %v456_v2 = vsub.f32 1.5, %v455_v58  ;;  %v485_v40 = vmul.f32 0.5, %v484_v17  ;;  %v535_v43 = vmul.f32 %v10641_v55, %v524_v31  ;;  %vm490_vm5 = vmor %vm488_vm3, %vm489_vm4  ;;  %vm498_vm6 = vweird.f32 %v10647_v62 }
  0xd8   : > { %v7967_v6 = vpop.eup %7966  ;;  %605 = vmatmul.f32.vlgmr.msra.gmra.mxu0 %v533_v61  ;;  %646 = vmatmul.f32.vlgmr.msra.gmra.mxu1 %v533_v61  ;;  %v476_v28 = vsub.f32 1.5, %v475_v9  ;;  %v11102_v3 = vmov 0.0   ;;  %v11106_v1 = vmov 0.0  }
  0xd9   : > { %v7969_v11 = vpop.eup %7968  ;;  %v457_v4 = vmul.f32 %v7961_v45, %v456_v2  ;;  %v503_v19 = vmul.f32 %v7967_v6, %v10625_v46  ;;  %687 = vmatmul.f32.vlgmr.msra.gmra.mxu2 %v533_v61  ;;  %vm509_vm11 = vweird.f32 %v7967_v6 }
  0xda   : > { %v513_v20 = vmul.f32 %v7969_v11, %v10631_v52  ;;  %v7971_v30 = vpop.eup %7970  ;;  %vm519_vm13 = vweird.f32 %v7969_v11  ;;  %vm510_vm0 = vmor %vm508_vm10, %vm509_vm11  ;;  %v477_v37 = vmul.f32 %v10628_v48, %v476_v28 }
  0xdb   : > { %v504_v21 = vmul.f32 %v7967_v6, %v503_v19  ;;  %v461_v24 = vsel %vm460_vm9, %v7961_v45, %v457_v4  ;;  %vm10680_vm1 = vmor %vm518_vm12, %vm519_vm13  ;;  %v493_v33 = vmul.f32 %v7971_v30, %v10647_v62  ;;  %v486_v45 = vsub.f32 1.5, %v485_v40 }
  0xdc   : > { %v514_v25 = vmul.f32 %v7969_v11, %v513_v20  ;;  %v523_v8 = vmul.f32 %v461_v24, %v10510_v10  ;;  %v481_v49 = vsel %vm480_vm2, %v10628_v48, %v477_v37  ;;  %vm499_vm7 = vweird.f32 %v7971_v30 }
  0xdd   : > { %v505_v12 = vmul.f32 0.5, %v504_v21  ;;  %v494_v46 = vmul.f32 %v7971_v30, %v493_v33  ;;  %v525_v51 = vmul.f32 %v481_v49, %v10515_v13  ;;  %v487_v52 = vmul.f32 %v10644_v57, %v486_v45  ;;  %vm500_vm8 = vmor %vm498_vm6, %vm499_vm7 }
  0xde   : > { %v515_v27 = vmul.f32 0.5, %v514_v25  ;;  %v534_v29 = vmul.f32 %v10641_v55, %v523_v8  ;;  %vm722_vm9 = vcmask 261120   ;;  %v11100_v13 = vmov 0.0  }
  0xdf   : > { %v506_v32 = vsub.f32 1.5, %v505_v12  ;;  %v495_v53 = vmul.f32 0.5, %v494_v46  ;;  %v536_v48 = vmul.f32 %v10641_v55, %v525_v51  ;;  %v491_v36 = vsel %vm490_vm5, %v10644_v57, %v487_v52 }
  0xe0   : > { %v516_v34 = vsub.f32 1.5, %v515_v27  ;;  %608 = vmatmul.f32.gmra.mxu0 %v534_v29  ;;  %649 = vmatmul.f32.gmra.mxu1 %v534_v29  ;;  %v526_v58 = vmul.f32 %v491_v36, %v10503_v5  ;;  %v11096_v5 = vmov 0.0   ;;  %v11104_v10 = vmov 0.0  }
  0xe1   : > { %v507_v35 = vmul.f32 %v7967_v6, %v506_v32  ;;  %690 = vmatmul.f32.gmra.mxu2 %v534_v29  ;;  %v496_v56 = vsub.f32 1.5, %v495_v53  ;;  %16534 = vst [vmem:[#allocation74_spill] sm:$0xff] %v11096_v5 }
  0xe2   : > { %v517_v38 = vmul.f32 %v7969_v11, %v516_v34  ;;  %v537_v60 = vmul.f32 %v10641_v55, %v526_v58 }
  0xe3   : > { %v511_v41 = vsel %vm510_vm0, %v7967_v6, %v507_v35  ;;  %v497_v59 = vmul.f32 %v7971_v30, %v496_v56 }
  0xe4   : > { %v528_v42 = vmul.f32 %v511_v41, %v10532_v22  ;;  %v521_v44 = vsel %vm10680_vm1, %v7969_v11, %v517_v38  ;;  %v11098_v22 = vmov 0.0  }
  0xe5   : > { %v529_v50 = vmul.f32 %v521_v44, %v10535_v23  ;;  %v501_v63 = vsel %vm500_vm8, %v7971_v30, %v497_v59  ;;  %v11094_v23 = vmov 0.0   ;;  %16535 = vst [vmem:[#allocation75_spill] sm:$0xff] %v11098_v22 }
  0xe6   : > { %v539_v47 = vmul.f32 %v10641_v55, %v528_v42  ;;  %v527_v2 = vmul.f32 %v501_v63, %v10518_v14  ;;  %v11092_v14 = vmov 0.0   ;;  %16533 = vst [vmem:[#allocation73_spill] sm:$0xff] %v11094_v23 }
  0xe7   : > { %v540_v54 = vmul.f32 %v10641_v55, %v529_v50 }
  0xe8   : > { %623 = vmatmul.f32.vlgmr.msra.gmra.mxu3 %v539_v47  ;;  %652 = vmatmul.f32.gmra.mxu1 %v535_v43  ;;  %v538_v57 = vmul.f32 %v10641_v55, %v527_v2 }
  0xe9   : > { %611 = vmatmul.f32.gmra.mxu0 %v535_v43  ;;  %693 = vmatmul.f32.gmra.mxu2 %v535_v43 }
  0xf0   : > { %626 = vmatmul.f32.gmra.mxu3 %v540_v54  ;;  %655 = vmatmul.f32.gmra.mxu1 %v536_v48 }
  0xf1   : > { %614 = vmatmul.f32.gmra.mxu0 %v536_v48  ;;  %696 = vmatmul.f32.gmra.mxu2 %v536_v48 }
  0xf8   : > { %667 = vmatmul.f32.vlgmr.msrb.gmra.mxu3 %v540_v54  ;;  %658 = vmatmul.f32.gmra.mxu1 %v537_v60 }
  0xf9   : > { %617 = vmatmul.f32.gmra.mxu0 %v537_v60  ;;  %699 = vmatmul.f32.gmra.mxu2 %v537_v60 }
 0x100   : > { %661 = vmatmul.f32.gmra.mxu1 %v538_v57 }
 0x101   : > { %620 = vmatmul.f32.gmra.mxu0 %v538_v57  ;;  %702 = vmatmul.f32.gmra.mxu2 %v538_v57 }
 0x108   : > { %664 = vmatmul.f32.gmra.mxu1 %v539_v47 }
 0x109   : > { %705 = vmatmul.f32.gmra.mxu2 %v539_v47 }
 0x111   : > { %708 = vmatmul.f32.gmra.mxu2 %v540_v54 }
 0x155   : > { %v606_v62 = vpop.f32.mrf.mxu0  ;;  %v647_v61 = vpop.f32.mrf.mxu1 }
 0x156   : > { %v10705_v6 = vmul.f32 0.17677669, %v606_v62  ;;  %723 = vst.msk [vmem:[%s10707_s19] sm:$0xff] %vm722_vm9, %v647_v61  ;;  %823 = vrot.lane.b32.xlu0 %v647_v61, %s10275_s21  ;;  %748 = vrot.lane.b32.xlu2 %v647_v61, %s10276_s23 }
 0x158   : > { %16493 = vst [vmem:[#allocation33_spill] sm:$0xff] %v10705_v6  ;;  %965 = vrot.lane.b32.xlu1 %v10705_v6, %s10276_s23 }
 0x15c   : > { %v688_v55 = vpop.f32.mrf.mxu2 }
 0x15d   : > { %732 = vst.msk [vmem:[%s10715_s17] sm:$0xff] %vm722_vm9, %v688_v55  ;;  %v650_v7 = vpop.f32.mrf.mxu1  ;;  %v609_v20 = vpop.f32.mrf.mxu0 }
 0x15e   : > { %724 = vst.msk [vmem:[%s10707_s19 + $0x8] sm:$0xff] %vm722_vm9, %v650_v7  ;;  %890 = vrot.lane.b32.xlu2 %v647_v61, %s10277_s20  ;;  %997 = vrot.lane.b32.xlu0 %v10705_v6, %s10277_s20  ;;  %v10743_v24 = vmul.f32 0.17677669, %v609_v20 }
 0x160   : > { %857 = vrot.lane.b32.xlu1 %v688_v55, %s10275_s21  ;;  %16495 = vst [vmem:[#allocation35_spill] sm:$0xff] %v10743_v24 }
 0x164   : > { %v691_v11 = vpop.f32.mrf.mxu2 }
 0x165   : > { %733 = vst.msk [vmem:[%s10715_s17 + $0x8] sm:$0xff] %vm722_vm9, %v691_v11  ;;  %v653_v4 = vpop.f32.mrf.mxu1 }
 0x166   : > { %725 = vst.msk [vmem:[%s10707_s19 + $0x10] sm:$0xff] %vm722_vm9, %v653_v4  ;;  %924 = vrot.lane.b32.xlu0 %v688_v55, %s10277_s20  ;;  %981 = vrot.lane.b32.xlu2 %v10705_v6, %s10275_s21  ;;  %v612_v32 = vpop.f32.mrf.mxu0  ;;  %v11170_v6 = vmov 0.0  }
 0x167   : > { %v10798_v34 = vmul.f32 0.17677669, %v612_v32  ;;  %16554 = vst [vmem:[#allocation94_spill] sm:$0xff] %v11170_v6  ;;  %v11192_v6 = vmov -1e+30  }
 0x168   : > { %892 = vrot.lane.b32.xlu1 %v650_v7, %s10277_s20  ;;  %16565 = vst [vmem:[#allocation105_spill] sm:$0xff] %v11192_v6  ;;  %v11212_v6 = vmov -1e+30  }
 0x169   : > { %16497 = vst [vmem:[#allocation37_spill] sm:$0xff] %v10798_v34 }
 0x16a   : > { %16575 = vst [vmem:[#allocation115_spill] sm:$0xff] %v11212_v6  ;;  %v11234_v6 = vmov -1e+30  }
 0x16b   : > { %v624_v15 = vpop.f32.mrf.mxu3 }
 0x16c   : > { %v694_v18 = vpop.f32.mrf.mxu2  ;;  %v10735_v9 = vmul.f32 0.17677669, %v624_v15 }
 0x16d   : > { %734 = vst.msk [vmem:[%s10715_s17 + $0x10] sm:$0xff] %vm722_vm9, %v694_v18  ;;  %v656_v19 = vpop.f32.mrf.mxu1 }
 0x16e   : > { %16494 = vst [vmem:[#allocation34_spill] sm:$0xff] %v10735_v9  ;;  %790 = vrot.lane.b32.xlu2 %v688_v55, %s10276_s23  ;;  %750 = vrot.lane.b32.xlu0 %v650_v7, %s10276_s23  ;;  %v615_v37 = vpop.f32.mrf.mxu0 }
 0x16f   : > { %726 = vst.msk [vmem:[%s10707_s19 + $0x18] sm:$0xff] %vm722_vm9, %v656_v19  ;;  %v10823_v38 = vmul.f32 0.17677669, %v615_v37 }
 0x170   : > { %977 = vrot.lane.b32.xlu1 %v10735_v9, %s10276_s23 }
 0x171   : > { %16498 = vst [vmem:[#allocation38_spill] sm:$0xff] %v10823_v38 }
 0x173   : > { %v627_v21 = vpop.f32.mrf.mxu3 }
 0x174   : > { %v697_v25 = vpop.f32.mrf.mxu2  ;;  %v10787_v29 = vmul.f32 0.17677669, %v627_v21 }
 0x175   : > { %735 = vst.msk [vmem:[%s10715_s17 + $0x18] sm:$0xff] %vm722_vm9, %v697_v25  ;;  %v10747_v8 = vpop.f32.mrf.mxu1 }
 0x176   : > { %727 = vst.msk [vmem:[%s10707_s19 + $0x20] sm:$0xff] %vm722_vm9, %v10747_v8  ;;  %825 = vrot.lane.b32.xlu2 %v650_v7, %s10275_s21  ;;  %967 = vrot.lane.b32.xlu0 %v10743_v24, %s10276_s23  ;;  %v618_v42 = vpop.f32.mrf.mxu0 }
 0x177   : > { %16496 = vst [vmem:[#allocation36_spill] sm:$0xff] %v10787_v29  ;;  %v10849_v44 = vmul.f32 0.17677669, %v618_v42 }
 0x178   : > { %983 = vrot.lane.b32.xlu1 %v10743_v24, %s10275_s21 }
 0x179   : > { %16501 = vst [vmem:[#allocation41_spill] sm:$0xff] %v10849_v44 }
 0x17b   : > { %v668_v12 = vpop.f32.mrf.mxu3 }
 0x17c   : > { %730 = vst.msk [vmem:[%s10707_s19 + $0x38] sm:$0xff] %vm722_vm9, %v668_v12  ;;  %v10759_v17 = vpop.f32.mrf.mxu2 }
 0x17d   : > { %736 = vst.msk [vmem:[%s10715_s17 + $0x20] sm:$0xff] %vm722_vm9, %v10759_v17  ;;  %v10764_v26 = vpop.f32.mrf.mxu1 }
 0x17e   : > { %728 = vst.msk [vmem:[%s10707_s19 + $0x28] sm:$0xff] %vm722_vm9, %v10764_v26  ;;  %859 = vrot.lane.b32.xlu0 %v691_v11, %s10275_s21  ;;  %993 = vrot.lane.b32.xlu2 %v10735_v9, %s10275_s21  ;;  %v621_v54 = vpop.f32.mrf.mxu0 }
 0x17f   : > { %v10887_v56 = vmul.f32 0.17677669, %v621_v54 }
 0x180   : > { %792 = vrot.lane.b32.xlu1 %v691_v11, %s10276_s23 }
 0x181   : > { %16506 = vst [vmem:[#allocation46_spill] sm:$0xff] %v10887_v56 }
 0x184   : > { %v10773_v28 = vpop.f32.mrf.mxu2 }
 0x185   : > { %737 = vst.msk [vmem:[%s10715_s17 + $0x28] sm:$0xff] %vm722_vm9, %v10773_v28  ;;  %v10778_v27 = vpop.f32.mrf.mxu1 }
 0x186   : > { %729 = vst.msk [vmem:[%s10707_s19 + $0x30] sm:$0xff] %vm722_vm9, %v10778_v27  ;;  %894 = vrot.lane.b32.xlu0 %v653_v4, %s10277_s20  ;;  %999 = vrot.lane.b32.xlu2 %v10743_v24, %s10277_s20  ;;  %v11160_v24 = vmov 0.0  }
 0x187   : > { %16549 = vst [vmem:[#allocation89_spill] sm:$0xff] %v11160_v24  ;;  %v11182_v24 = vmov -1e+30  }
 0x188   : > { %752 = vrot.lane.b32.xlu1 %v653_v4, %s10276_s23  ;;  %16560 = vst [vmem:[#allocation100_spill] sm:$0xff] %v11182_v24  ;;  %v11204_v24 = vmov -1e+30  }
 0x189   : > { %16571 = vst [vmem:[#allocation111_spill] sm:$0xff] %v11204_v24  ;;  %v11224_v24 = vmov -1e+30  }
 0x18c   : > { %v10789_v30 = vpop.f32.mrf.mxu2 }
 0x18d   : > { %738 = vst.msk [vmem:[%s10715_s17 + $0x30] sm:$0xff] %vm722_vm9, %v10789_v30 }
 0x18e   : > { %926 = vrot.lane.b32.xlu2 %v691_v11, %s10277_s20  ;;  %979 = vrot.lane.b32.xlu0 %v10787_v29, %s10276_s23 }
 0x190   : > { %827 = vrot.lane.b32.xlu1 %v653_v4, %s10275_s21 }
 0x194   : > { %v10800_v35 = vpop.f32.mrf.mxu2 }
 0x195   : > { %739 = vst.msk [vmem:[%s10715_s17 + $0x38] sm:$0xff] %vm722_vm9, %v10800_v35 }
 0x196   : > { %969 = vrot.lane.b32.xlu2 %v10798_v34, %s10276_s23  ;;  %985 = vrot.lane.b32.xlu0 %v10798_v34, %s10275_s21 }
 0x198   : > { %995 = vrot.lane.b32.xlu1 %v10787_v29, %s10275_s21 }
 0x19e   : > { %837 = vrot.lane.b32.xlu2 %v668_v12, %s10275_s21  ;;  %762 = vrot.lane.b32.xlu0 %v668_v12, %s10276_s23 }
 0x1a0   : > { %1001 = vrot.lane.b32.xlu1 %v10798_v34, %s10277_s20  ;;  %v11154_v34 = vmov 0.0  }
 0x1a1   : > { %16546 = vst [vmem:[#allocation86_spill] sm:$0xff] %v11154_v34  ;;  %v11176_v34 = vmov -1e+30  }
 0x1a2   : > { %16557 = vst [vmem:[#allocation97_spill] sm:$0xff] %v11176_v34  ;;  %v11198_v34 = vmov -1e+30  }
 0x1a3   : > { %16568 = vst [vmem:[#allocation108_spill] sm:$0xff] %v11198_v34  ;;  %v11218_v34 = vmov -1e+30  }
 0x1a6   : > { %861 = vrot.lane.b32.xlu2 %v694_v18, %s10275_s21  ;;  %794 = vrot.lane.b32.xlu0 %v694_v18, %s10276_s23 }
 0x1a8   : > { %904 = vrot.lane.b32.xlu1 %v668_v12, %s10277_s20 }
 0x1ae   : > { %754 = vrot.lane.b32.xlu2 %v656_v19, %s10276_s23  ;;  %829 = vrot.lane.b32.xlu0 %v656_v19, %s10275_s21 }
 0x1b0   : > { %v749_v31 = vpop.permute.xlu2 %748  ;;  %928 = vrot.lane.b32.xlu1 %v694_v18, %s10277_s20 }
 0x1b1   : > { %5871 = vst.msk [vmem:[%s10707_s19 + $0x80] sm:$0xff] %vm722_vm9, %v749_v31 }
 0x1b6   : > { %896 = vrot.lane.b32.xlu2 %v656_v19, %s10277_s20  ;;  %1003 = vrot.lane.b32.xlu0 %v10823_v38, %s10277_s20 }
 0x1b8   : > { %v891_v39 = vpop.permute.xlu2 %890  ;;  %971 = vrot.lane.b32.xlu1 %v10823_v38, %s10276_s23 }
 0x1b9   : > { %5907 = vst.msk [vmem:[%s10707_s19 + $0x180] sm:$0xff] %vm722_vm9, %v891_v39 }
 0x1be   : > { %987 = vrot.lane.b32.xlu2 %v10823_v38, %s10275_s21  ;;  %930 = vrot.lane.b32.xlu0 %v697_v25, %s10277_s20  ;;  %v11144_v38 = vmov 0.0  }
 0x1c0   : > { %v10835_v40 = vpop.permute.xlu2 %981  ;;  %863 = vrot.lane.b32.xlu1 %v697_v25, %s10275_s21 }
 0x1c1   : > { %16499 = vst [vmem:[#allocation39_spill] sm:$0xff] %v10835_v40  ;;  %v11168_v40 = vmov 0.0  }
 0x1c2   : > { %16553 = vst [vmem:[#allocation93_spill] sm:$0xff] %v11168_v40  ;;  %v11190_v40 = vmov -1e+30  }
 0x1c3   : > { %16564 = vst [vmem:[#allocation104_spill] sm:$0xff] %v11190_v40  ;;  %v11210_v40 = vmov -1e+30  }
 0x1c4   : > { %16574 = vst [vmem:[#allocation114_spill] sm:$0xff] %v11210_v40  ;;  %v11232_v40 = vmov -1e+30  }
 0x1c6   : > { %796 = vrot.lane.b32.xlu2 %v697_v25, %s10276_s23  ;;  %756 = vrot.lane.b32.xlu0 %v10747_v8, %s10276_s23 }
 0x1c8   : > { %v791_v33 = vpop.permute.xlu2 %790  ;;  %898 = vrot.lane.b32.xlu1 %v10747_v8, %s10277_s20  ;;  %v824_v41 = vpop.permute.xlu0 %823 }
 0x1c9   : > { %5880 = vst.msk [vmem:[%s10715_s17 + $0x80] sm:$0xff] %vm722_vm9, %v791_v33 }
 0x1ca   : > { %5889 = vst.msk [vmem:[%s10707_s19 + $0x100] sm:$0xff] %vm722_vm9, %v824_v41  ;;  %v10847_v43 = vpop.permute.xlu1 %965 }
 0x1cb   : > { %16500 = vst [vmem:[#allocation40_spill] sm:$0xff] %v10847_v43  ;;  %v11164_v43 = vmov 0.0  }
 0x1cc   : > { %16551 = vst [vmem:[#allocation91_spill] sm:$0xff] %v11164_v43  ;;  %v11186_v43 = vmov -1e+30  }
 0x1cd   : > { %16562 = vst [vmem:[#allocation102_spill] sm:$0xff] %v11186_v43  ;;  %v11206_v43 = vmov -1e+30  }
 0x1ce   : > { %831 = vrot.lane.b32.xlu2 %v10747_v8, %s10275_s21  ;;  %973 = vrot.lane.b32.xlu0 %v10849_v44, %s10276_s23  ;;  %16572 = vst [vmem:[#allocation112_spill] sm:$0xff] %v11206_v43  ;;  %v11228_v43 = vmov -1e+30  }
 0x1d0   : > { %v826_v45 = vpop.permute.xlu2 %825  ;;  %989 = vrot.lane.b32.xlu1 %v10849_v44, %s10275_s21  ;;  %v10857_v46 = vpop.permute.xlu0 %997 }
 0x1d1   : > { %16502 = vst [vmem:[#allocation42_spill] sm:$0xff] %v10857_v46  ;;  %v11166_v46 = vmov 0.0  }
 0x1d2   : > { %5890 = vst.msk [vmem:[%s10707_s19 + $0x108] sm:$0xff] %vm722_vm9, %v826_v45  ;;  %v858_v47 = vpop.permute.xlu1 %857 }
 0x1d3   : > { %5898 = vst.msk [vmem:[%s10715_s17 + $0x100] sm:$0xff] %vm722_vm9, %v858_v47 }
 0x1d4   : > { %16552 = vst [vmem:[#allocation92_spill] sm:$0xff] %v11166_v46  ;;  %v11188_v46 = vmov -1e+30  }
 0x1d5   : > { %16563 = vst [vmem:[#allocation103_spill] sm:$0xff] %v11188_v46  ;;  %v11208_v46 = vmov -1e+30  }
 0x1d6   : > { %1005 = vrot.lane.b32.xlu2 %v10849_v44, %s10277_s20  ;;  %865 = vrot.lane.b32.xlu0 %v10759_v17, %s10275_s21  ;;  %v11136_v44 = vmov 0.0   ;;  %16573 = vst [vmem:[#allocation113_spill] sm:$0xff] %v11208_v46  ;;  %v11230_v46 = vmov -1e+30  }
 0x1d7   : > { %16541 = vst [vmem:[#allocation81_spill] sm:$0xff] %v11136_v44 }
 0x1d8   : > { %v10867_v49 = vpop.permute.xlu2 %993  ;;  %798 = vrot.lane.b32.xlu1 %v10759_v17, %s10276_s23  ;;  %v925_v50 = vpop.permute.xlu0 %924 }
 0x1d9   : > { %16503 = vst [vmem:[#allocation43_spill] sm:$0xff] %v10867_v49  ;;  %v11122_v49 = vmov 0.0  }
 0x1da   : > { %5916 = vst.msk [vmem:[%s10715_s17 + $0x180] sm:$0xff] %vm722_vm9, %v925_v50  ;;  %v893_v51 = vpop.permute.xlu1 %892 }
 0x1db   : > { %5908 = vst.msk [vmem:[%s10707_s19 + $0x188] sm:$0xff] %vm722_vm9, %v893_v51 }
 0x1dc   : > { %16539 = vst [vmem:[#allocation79_spill] sm:$0xff] %v11122_v49 }
 0x1de   : > { %932 = vrot.lane.b32.xlu2 %v10759_v17, %s10277_s20  ;;  %900 = vrot.lane.b32.xlu0 %v10764_v26, %s10277_s20 }
 0x1e0   : > { %v10879_v52 = vpop.permute.xlu2 %999  ;;  %833 = vrot.lane.b32.xlu1 %v10764_v26, %s10275_s21  ;;  %v751_v53 = vpop.permute.xlu0 %750 }
 0x1e1   : > { %16504 = vst [vmem:[#allocation44_spill] sm:$0xff] %v10879_v52  ;;  %v11158_v52 = vmov 0.0  }
 0x1e2   : > { %5872 = vst.msk [vmem:[%s10707_s19 + $0x88] sm:$0xff] %vm722_vm9, %v751_v53  ;;  %v10885_v48 = vpop.permute.xlu1 %977 }
 0x1e3   : > { %16505 = vst [vmem:[#allocation45_spill] sm:$0xff] %v10885_v48  ;;  %v11116_v48 = vmov 0.0  }
 0x1e4   : > { %16548 = vst [vmem:[#allocation88_spill] sm:$0xff] %v11158_v52  ;;  %v11180_v52 = vmov -1e+30  }
 0x1e5   : > { %16559 = vst [vmem:[#allocation99_spill] sm:$0xff] %v11180_v52  ;;  %v11202_v52 = vmov -1e+30  }
 0x1e6   : > { %758 = vrot.lane.b32.xlu2 %v10764_v26, %s10276_s23  ;;  %991 = vrot.lane.b32.xlu0 %v10887_v56, %s10275_s21  ;;  %16570 = vst [vmem:[#allocation110_spill] sm:$0xff] %v11202_v52  ;;  %v11222_v52 = vmov -1e+30  }
 0x1e8   : > { %v927_v36 = vpop.permute.xlu2 %926  ;;  %934 = vrot.lane.b32.xlu1 %v10773_v28, %s10277_s20  ;;  %v10895_v58 = vpop.permute.xlu0 %967 }
 0x1e9   : > { %16507 = vst [vmem:[#allocation47_spill] sm:$0xff] %v10895_v58  ;;  %v11156_v58 = vmov 0.0  }
 0x1ea   : > { %5917 = vst.msk [vmem:[%s10715_s17 + $0x188] sm:$0xff] %vm722_vm9, %v927_v36  ;;  %v10899_v59 = vpop.permute.xlu1 %983 }
 0x1eb   : > { %16508 = vst [vmem:[#allocation48_spill] sm:$0xff] %v10899_v59  ;;  %v11162_v59 = vmov 0.0  }
 0x1ec   : > { %16547 = vst [vmem:[#allocation87_spill] sm:$0xff] %v11156_v58  ;;  %v11178_v58 = vmov -1e+30  }
 0x1ed   : > { %16550 = vst [vmem:[#allocation90_spill] sm:$0xff] %v11162_v59  ;;  %v11184_v59 = vmov -1e+30  }
 0x1ee   : > { %975 = vrot.lane.b32.xlu2 %v10887_v56, %s10276_s23  ;;  %800 = vrot.lane.b32.xlu0 %v10773_v28, %s10276_s23  ;;  %16558 = vst [vmem:[#allocation98_spill] sm:$0xff] %v11178_v58  ;;  %v11200_v58 = vmov -1e+30  }
 0x1ef   : > { %16561 = vst [vmem:[#allocation101_spill] sm:$0xff] %v11184_v59  ;;  %v11226_v59 = vmov -1e+30  }
 0x1f0   : > { %v10905_v60 = vpop.permute.xlu2 %969  ;;  %760 = vrot.lane.b32.xlu1 %v10778_v27, %s10276_s23  ;;  %v860_v63 = vpop.permute.xlu0 %859  ;;  %16569 = vst [vmem:[#allocation109_spill] sm:$0xff] %v11200_v58  ;;  %v11220_v58 = vmov -1e+30  }
 0x1f1   : > { %16509 = vst [vmem:[#allocation49_spill] sm:$0xff] %v10905_v60  ;;  %v11148_v60 = vmov 0.0  }
 0x1f2   : > { %5899 = vst.msk [vmem:[%s10715_s17 + $0x108] sm:$0xff] %vm722_vm9, %v860_v63  ;;  %v793_v2 = vpop.permute.xlu1 %792 }
 0x1f3   : > { %5881 = vst.msk [vmem:[%s10715_s17 + $0x88] sm:$0xff] %vm722_vm9, %v793_v2 }
 0x1f6   : > { %867 = vrot.lane.b32.xlu2 %v10773_v28, %s10275_s21  ;;  %835 = vrot.lane.b32.xlu0 %v10778_v27, %s10275_s21 }
 0x1f8   : > { %869 = vrot.lane.b32.xlu1 %v10789_v30, %s10275_s21  ;;  %v838_v57 = vpop.permute.xlu2 %837  ;;  %v895_v62 = vpop.permute.xlu0 %894 }
 0x1f9   : > { %5896 = vst.msk [vmem:[%s10707_s19 + $0x138] sm:$0xff] %vm722_vm9, %v838_v57 }
 0x1fa   : > { %5909 = vst.msk [vmem:[%s10707_s19 + $0x190] sm:$0xff] %vm722_vm9, %v895_v62  ;;  %v753_v61 = vpop.permute.xlu1 %752 }
 0x1fb   : > { %5873 = vst.msk [vmem:[%s10707_s19 + $0x90] sm:$0xff] %vm722_vm9, %v753_v61 }
 0x1fe   : > { %902 = vrot.lane.b32.xlu2 %v10778_v27, %s10277_s20  ;;  %936 = vrot.lane.b32.xlu0 %v10789_v30, %s10277_s20 }
 0x200   : > { %804 = vrot.lane.b32.xlu1 %v10800_v35, %s10276_s23  ;;  %v862_v55 = vpop.permute.xlu2 %861  ;;  %v10931_v7 = vpop.permute.xlu0 %979 }
 0x201   : > { %16510 = vst [vmem:[#allocation50_spill] sm:$0xff] %v10931_v7  ;;  %v11108_v7 = vmov 0.0  }
 0x202   : > { %5900 = vst.msk [vmem:[%s10715_s17 + $0x110] sm:$0xff] %vm722_vm9, %v862_v55  ;;  %v828_v11 = vpop.permute.xlu1 %827 }
 0x203   : > { %5891 = vst.msk [vmem:[%s10707_s19 + $0x110] sm:$0xff] %vm722_vm9, %v828_v11 }
 0x206   : > { %802 = vrot.lane.b32.xlu2 %v10789_v30, %s10276_s23  ;;  %871 = vrot.lane.b32.xlu0 %v10800_v35, %s10275_s21 }
 0x208   : > { %1007 = vrot.lane.b32.xlu1 %v10887_v56, %s10277_s20  ;;  %v755_v4 = vpop.permute.xlu2 %754  ;;  %v10943_v15 = vpop.permute.xlu0 %985  ;;  %v11128_v56 = vmov 0.0  }
 0x209   : > { %16511 = vst [vmem:[#allocation51_spill] sm:$0xff] %v10943_v15  ;;  %v11152_v15 = vmov 0.0  }
 0x20a   : > { %5874 = vst.msk [vmem:[%s10707_s19 + $0x98] sm:$0xff] %vm722_vm9, %v755_v4  ;;  %v10947_v18 = vpop.permute.xlu1 %995 }
 0x20b   : > { %16512 = vst [vmem:[#allocation52_spill] sm:$0xff] %v10947_v18  ;;  %v11114_v18 = vmov 0.0  }
 0x20c   : > { %16545 = vst [vmem:[#allocation85_spill] sm:$0xff] %v11152_v15  ;;  %v11174_v15 = vmov -1e+30  }
 0x20d   : > { %16556 = vst [vmem:[#allocation96_spill] sm:$0xff] %v11174_v15  ;;  %v11196_v15 = vmov -1e+30  }
 0x20e   : > { %938 = vrot.lane.b32.xlu2 %v10800_v35, %s10277_s20  ;;  %1009 = vrot.lane.b32.xlu0 %v10735_v9, %s10277_s20  ;;  %v11120_v9 = vmov 0.0   ;;  %16567 = vst [vmem:[#allocation107_spill] sm:$0xff] %v11196_v15  ;;  %v11216_v15 = vmov -1e+30  }
 0x20f   : > { %16538 = vst [vmem:[#allocation78_spill] sm:$0xff] %v11120_v9 }
 0x210   : > { %v897_v19 = vpop.permute.xlu2 %896  ;;  %v763_v20 = vpop.permute.xlu0 %762 }
 0x211   : > { %5910 = vst.msk [vmem:[%s10707_s19 + $0x198] sm:$0xff] %vm722_vm9, %v897_v19 }
 0x212   : > { %5878 = vst.msk [vmem:[%s10707_s19 + $0xb8] sm:$0xff] %vm722_vm9, %v763_v20  ;;  %v10957_v21 = vpop.permute.xlu1 %1001 }
 0x213   : > { %16513 = vst [vmem:[#allocation53_spill] sm:$0xff] %v10957_v21  ;;  %v11150_v21 = vmov 0.0  }
 0x214   : > { %16544 = vst [vmem:[#allocation84_spill] sm:$0xff] %v11150_v21  ;;  %v11172_v21 = vmov -1e+30  }
 0x215   : > { %16555 = vst [vmem:[#allocation95_spill] sm:$0xff] %v11172_v21  ;;  %v11194_v21 = vmov -1e+30  }
 0x216   : > { %1011 = vrot.lane.b32.xlu2 %v10787_v29, %s10277_s20  ;;  %v11112_v29 = vmov 0.0   ;;  %16566 = vst [vmem:[#allocation106_spill] sm:$0xff] %v11194_v21  ;;  %v11214_v21 = vmov -1e+30  }
 0x217   : > { %16536 = vst [vmem:[#allocation76_spill] sm:$0xff] %v11112_v29 }
 0x218   : > { %v10961_v25 = vpop.permute.xlu2 %987  ;;  %v795_v8 = vpop.permute.xlu0 %794 }
 0x219   : > { %16514 = vst [vmem:[#allocation54_spill] sm:$0xff] %v10961_v25  ;;  %v11146_v25 = vmov 0.0  }
 0x21a   : > { %5882 = vst.msk [vmem:[%s10715_s17 + $0x90] sm:$0xff] %vm722_vm9, %v795_v8  ;;  %v905_v12 = vpop.permute.xlu1 %904 }
 0x21b   : > { %5914 = vst.msk [vmem:[%s10707_s19 + $0x1b8] sm:$0xff] %vm722_vm9, %v905_v12 }
 0x21c   : > { %16543 = vst [vmem:[#allocation83_spill] sm:$0xff] %v11146_v25 }
 0x220   : > { %v797_v17 = vpop.permute.xlu2 %796  ;;  %v830_v26 = vpop.permute.xlu0 %829 }
 0x221   : > { %5883 = vst.msk [vmem:[%s10715_s17 + $0x98] sm:$0xff] %vm722_vm9, %v797_v17 }
 0x222   : > { %5892 = vst.msk [vmem:[%s10707_s19 + $0x118] sm:$0xff] %vm722_vm9, %v830_v26  ;;  %v929_v28 = vpop.permute.xlu1 %928 }
 0x223   : > { %5918 = vst.msk [vmem:[%s10715_s17 + $0x190] sm:$0xff] %vm722_vm9, %v929_v28 }
 0x228   : > { %v832_v27 = vpop.permute.xlu2 %831  ;;  %v10973_v30 = vpop.permute.xlu0 %1003 }
 0x229   : > { %16515 = vst [vmem:[#allocation55_spill] sm:$0xff] %v10973_v30  ;;  %v11142_v30 = vmov 0.0  }
 0x22a   : > { %5893 = vst.msk [vmem:[%s10707_s19 + $0x120] sm:$0xff] %vm722_vm9, %v832_v27  ;;  %v10977_v32 = vpop.permute.xlu1 %971 }
 0x22b   : > { %16516 = vst [vmem:[#allocation56_spill] sm:$0xff] %v10977_v32  ;;  %v11140_v32 = vmov 0.0  }
 0x230   : > { %v10979_v35 = vpop.permute.xlu2 %1005  ;;  %v931_v31 = vpop.permute.xlu0 %930 }
 0x231   : > { %16517 = vst [vmem:[#allocation57_spill] sm:$0xff] %v10979_v35  ;;  %v11134_v35 = vmov 0.0  }
 0x232   : > { %5919 = vst.msk [vmem:[%s10715_s17 + $0x198] sm:$0xff] %vm722_vm9, %v931_v31  ;;  %v864_v37 = vpop.permute.xlu1 %863  ;;  %v11044_v31 = vmov 0.0  }
 0x233   : > { %5901 = vst.msk [vmem:[%s10715_s17 + $0x118] sm:$0xff] %vm722_vm9, %v864_v37  ;;  %v11046_v37 = vmov 0.0  }
 0x234   : > { %16525 = vst [vmem:[#allocation65_spill] sm:$0xff] %v11046_v37 }
 0x238   : > { %v933_v39 = vpop.permute.xlu2 %932  ;;  %v757_v33 = vpop.permute.xlu0 %756 }
 0x239   : > { %5920 = vst.msk [vmem:[%s10715_s17 + $0x1a0] sm:$0xff] %vm722_vm9, %v933_v39  ;;  %v11048_v39 = vmov 0.0  }
 0x23a   : > { %5875 = vst.msk [vmem:[%s10707_s19 + $0xa0] sm:$0xff] %vm722_vm9, %v757_v33  ;;  %v899_v41 = vpop.permute.xlu1 %898  ;;  %v11050_v33 = vmov 0.0  }
 0x23b   : > { %5911 = vst.msk [vmem:[%s10707_s19 + $0x1a0] sm:$0xff] %vm722_vm9, %v899_v41  ;;  %v11052_v41 = vmov 0.0  }
 0x240   : > { %v759_v42 = vpop.permute.xlu2 %758  ;;  %v10991_v45 = vpop.permute.xlu0 %973 }
 0x241   : > { %16518 = vst [vmem:[#allocation58_spill] sm:$0xff] %v10991_v45  ;;  %v11132_v45 = vmov 0.0  }
 0x242   : > { %5876 = vst.msk [vmem:[%s10707_s19 + $0xa8] sm:$0xff] %vm722_vm9, %v759_v42  ;;  %v10995_v47 = vpop.permute.xlu1 %989  ;;  %v11054_v42 = vmov 0.0  }
 0x243   : > { %16519 = vst [vmem:[#allocation59_spill] sm:$0xff] %v10995_v47  ;;  %v11138_v47 = vmov 0.0  }
 0x244   : > { %16540 = vst [vmem:[#allocation80_spill] sm:$0xff] %v11132_v45 }
 0x245   : > { %16542 = vst [vmem:[#allocation82_spill] sm:$0xff] %v11138_v47 }
 0x248   : > { %v10997_v50 = vpop.permute.xlu2 %975  ;;  %v866_v51 = vpop.permute.xlu0 %865 }
 0x249   : > { %16520 = vst [vmem:[#allocation60_spill] sm:$0xff] %v10997_v50  ;;  %v11124_v50 = vmov 0.0  }
 0x24a   : > { %5902 = vst.msk [vmem:[%s10715_s17 + $0x120] sm:$0xff] %vm722_vm9, %v866_v51  ;;  %v799_v53 = vpop.permute.xlu1 %798  ;;  %v11056_v51 = vmov 0.0  }
 0x24b   : > { %5884 = vst.msk [vmem:[%s10715_s17 + $0xa0] sm:$0xff] %vm722_vm9, %v799_v53  ;;  %v11058_v53 = vmov 0.0  }
 0x24c   : > { %16526 = vst [vmem:[#allocation66_spill] sm:$0xff] %v11058_v53 }
 0x250   : > { %v868_v54 = vpop.permute.xlu2 %867  ;;  %v901_v36 = vpop.permute.xlu0 %900 }
 0x251   : > { %5903 = vst.msk [vmem:[%s10715_s17 + $0x128] sm:$0xff] %vm722_vm9, %v868_v54  ;;  %v11060_v54 = vmov 0.0  }
 0x252   : > { %5912 = vst.msk [vmem:[%s10707_s19 + $0x1a8] sm:$0xff] %vm722_vm9, %v901_v36  ;;  %v834_v63 = vpop.permute.xlu1 %833  ;;  %v11062_v36 = vmov 0.0  }
 0x253   : > { %5894 = vst.msk [vmem:[%s10707_s19 + $0x128] sm:$0xff] %vm722_vm9, %v834_v63  ;;  %v11064_v63 = vmov 0.0  }
 0x258   : > { %v903_v2 = vpop.permute.xlu2 %902  ;;  %v11009_v57 = vpop.permute.xlu0 %991 }
 0x259   : > { %16521 = vst [vmem:[#allocation61_spill] sm:$0xff] %v11009_v57  ;;  %v11130_v57 = vmov 0.0  }
 0x25a   : > { %5913 = vst.msk [vmem:[%s10707_s19 + $0x1b0] sm:$0xff] %vm722_vm9, %v903_v2  ;;  %v935_v62 = vpop.permute.xlu1 %934  ;;  %v11066_v2 = vmov 0.0  }
 0x25b   : > { %5921 = vst.msk [vmem:[%s10715_s17 + $0x1a8] sm:$0xff] %vm722_vm9, %v935_v62  ;;  %v11068_v62 = vmov 0.0  }
 0x260   : > { %v803_v61 = vpop.permute.xlu2 %802  ;;  %v801_v55 = vpop.permute.xlu0 %800 }
 0x261   : > { %5886 = vst.msk [vmem:[%s10715_s17 + $0xb0] sm:$0xff] %vm722_vm9, %v803_v61  ;;  %v11070_v61 = vmov 0.0  }
 0x262   : > { %5885 = vst.msk [vmem:[%s10715_s17 + $0xa8] sm:$0xff] %vm722_vm9, %v801_v55  ;;  %v761_v11 = vpop.permute.xlu1 %760  ;;  %v11072_v55 = vmov 0.0  }
 0x263   : > { %5877 = vst.msk [vmem:[%s10707_s19 + $0xb0] sm:$0xff] %vm722_vm9, %v761_v11  ;;  %v11074_v11 = vmov 0.0  }
 0x264   : > { %16527 = vst [vmem:[#allocation67_spill] sm:$0xff] %v11070_v61 }
 0x265   : > { %16528 = vst [vmem:[#allocation68_spill] sm:$0xff] %v11074_v11 }
 0x268   : > { %v939_v4 = vpop.permute.xlu2 %938  ;;  %v836_v19 = vpop.permute.xlu0 %835 }
 0x269   : > { %5923 = vst.msk [vmem:[%s10715_s17 + $0x1b8] sm:$0xff] %vm722_vm9, %v939_v4  ;;  %v11076_v4 = vmov 0.0  }
 0x26a   : > { %5895 = vst.msk [vmem:[%s10707_s19 + $0x130] sm:$0xff] %vm722_vm9, %v836_v19  ;;  %v870_v20 = vpop.permute.xlu1 %869  ;;  %v11078_v19 = vmov 0.0  }
 0x26b   : > { %5904 = vst.msk [vmem:[%s10715_s17 + $0x130] sm:$0xff] %vm722_vm9, %v870_v20  ;;  %v11080_v20 = vmov 0.0  }
 0x26c   : > { %16529 = vst [vmem:[#allocation69_spill] sm:$0xff] %v11076_v4 }
 0x26d   : > { %16530 = vst [vmem:[#allocation70_spill] sm:$0xff] %v11080_v20 }
 0x270   : > { %v11027_v8 = vpop.permute.xlu2 %1011  ;;  %v937_v12 = vpop.permute.xlu0 %936 }
 0x271   : > { %16522 = vst [vmem:[#allocation62_spill] sm:$0xff] %v11027_v8  ;;  %v11110_v8 = vmov 0.0  }
 0x272   : > { %5922 = vst.msk [vmem:[%s10715_s17 + $0x1b0] sm:$0xff] %vm722_vm9, %v937_v12  ;;  %v805_v17 = vpop.permute.xlu1 %804  ;;  %v11082_v12 = vmov 0.0  }
 0x273   : > { %5887 = vst.msk [vmem:[%s10715_s17 + $0xb8] sm:$0xff] %vm722_vm9, %v805_v17  ;;  %v11084_v17 = vmov 0.0  }
 0x274   : > { %16531 = vst [vmem:[#allocation71_spill] sm:$0xff] %v11082_v12 }
 0x278   : > { %v872_v26 = vpop.permute.xlu0 %871 }
 0x279   : > { %5905 = vst.msk [vmem:[%s10715_s17 + $0x138] sm:$0xff] %vm722_vm9, %v872_v26  ;;  %v11086_v26 = vmov 0.0  }
 0x27a   : > { %v11035_v28 = vpop.permute.xlu1 %1007 }
 0x27b   : > { %16523 = vst [vmem:[#allocation63_spill] sm:$0xff] %v11035_v28  ;;  %v11126_v28 = vmov 0.0  }
 0x27e   : > { %5555 = sbr.rel (%p5924_p1) target bundleno = 1347 (0x543), region = 129 }
 0x280   : > { %v11037_v27 = vpop.permute.xlu0 %1009 }
 0x281   : > { %16524 = vst [vmem:[#allocation64_spill] sm:$0xff] %v11037_v27  ;;  %v11118_v27 = vmov 0.0  }
 0x282   : > { %16537 = vst [vmem:[#allocation77_spill] sm:$0xff] %v11118_v27 }
 0x283   : > { %v11238_v0 = vmov 0.0   ;;  %v11240_v1 = vmov 0.0   ;;  %v11242_v2 = vmov 0.0   ;;  %v11244_v3 = vmov 0.0   ;;  %s11430_s3 = smov 0  }
 0x284   : > { %16576 = vst [vmem:[#allocation65_spill] sm:$0xff] %v11238_v0  ;;  %v11246_v4 = vmov 0.0   ;;  %v11248_v5 = vmov 0.0   ;;  %v11250_v6 = vmov 0.0   ;;  %v11252_v7 = vmov 0.0  }
 0x285   : > { %16577 = vst [vmem:[#allocation66_spill] sm:$0xff] %v11246_v4  ;;  %v11254_v8 = vmov 0.0   ;;  %v11256_v9 = vmov 0.0   ;;  %v11258_v10 = vmov 0.0   ;;  %v11260_v13 = vmov 0.0  }
 0x286   : > { %16578 = vst [vmem:[#allocation67_spill] sm:$0xff] %v11248_v5  ;;  %v11262_v14 = vmov 0.0   ;;  %v11264_v22 = vmov 0.0   ;;  %v11266_v23 = vmov 0.0   ;;  %v11268_v16 = vmov 0.0  }
 0x287   : > { %16579 = vst [vmem:[#allocation68_spill] sm:$0xff] %v11250_v6  ;;  %v11270_v24 = vmov 0.0   ;;  %v11272_v29 = vmov 0.0   ;;  %v11274_v34 = vmov 0.0   ;;  %v11276_v38 = vmov 0.0  }
 0x288   : > { %16580 = vst [vmem:[#allocation69_spill] sm:$0xff] %v11256_v9  ;;  %v11278_v40 = vmov 0.0   ;;  %v11280_v43 = vmov 0.0   ;;  %v11282_v44 = vmov 0.0   ;;  %v11284_v46 = vmov 0.0  }
 0x289   : > { %16581 = vst [vmem:[#allocation70_spill] sm:$0xff] %v11262_v14  ;;  %v11286_v49 = vmov 0.0   ;;  %v11288_v52 = vmov 0.0   ;;  %v11290_v48 = vmov 0.0   ;;  %v11292_v56 = vmov 0.0  }
 0x28a   : > { %16582 = vst [vmem:[#allocation71_spill] sm:$0xff] %v11264_v22  ;;  %v11294_v58 = vmov 0.0   ;;  %v11296_v59 = vmov 0.0   ;;  %v11298_v60 = vmov 0.0   ;;  %v11300_v15 = vmov 0.0  }
 0x28b   : > { %16583 = vst [vmem:[#allocation72_spill] sm:$0xff] %v11266_v23  ;;  %v11302_v18 = vmov 0.0   ;;  %v11304_v21 = vmov 0.0   ;;  %v11306_v25 = vmov 0.0   ;;  %v11308_v30 = vmov 0.0  }
 0x28c   : > { %16584 = vst [vmem:[#allocation73_spill] sm:$0xff] %v11272_v29  ;;  %v11310_v32 = vmov 0.0   ;;  %v11312_v35 = vmov 0.0   ;;  %v11314_v45 = vmov 0.0   ;;  %v11316_v47 = vmov 0.0  }
 0x28d   : > { %16585 = vst [vmem:[#allocation74_spill] sm:$0xff] %v11278_v40  ;;  %v11318_v50 = vmov 0.0   ;;  %v11320_v57 = vmov 0.0   ;;  %v11322_v28 = vmov 0.0   ;;  %v11324_v27 = vmov 0.0  }
 0x28e   : > { %16586 = vst [vmem:[#allocation75_spill] sm:$0xff] %v11280_v43  ;;  %v11326_v31 = vmov 0.0   ;;  %v11328_v37 = vmov 0.0   ;;  %v11330_v39 = vmov 0.0   ;;  %v11332_v33 = vmov 0.0  }
 0x28f   : > { %16587 = vst [vmem:[#allocation76_spill] sm:$0xff] %v11282_v44  ;;  %v11334_v41 = vmov 0.0   ;;  %v11336_v42 = vmov 0.0   ;;  %v11338_v51 = vmov 0.0   ;;  %v11340_v53 = vmov 0.0  }
 0x290   : > { %16588 = vst [vmem:[#allocation77_spill] sm:$0xff] %v11286_v49  ;;  %v11342_v54 = vmov 0.0   ;;  %v11344_v36 = vmov 0.0   ;;  %v11346_v63 = vmov 0.0   ;;  %v11348_v62 = vmov 0.0  }
 0x291   : > { %16589 = vst [vmem:[#allocation78_spill] sm:$0xff] %v11296_v59  ;;  %v11350_v61 = vmov 0.0   ;;  %v11352_v55 = vmov 0.0   ;;  %v11354_v11 = vmov 0.0   ;;  %v11356_v19 = vmov 0.0  }
 0x292   : > { %16590 = vst [vmem:[#allocation79_spill] sm:$0xff] %v11300_v15  ;;  %v11358_v20 = vmov 0.0   ;;  %v11360_v12 = vmov 0.0   ;;  %v11362_v17 = vmov 0.0   ;;  %v11364_v26 = vmov 0.0  }
 0x293   : > { %16591 = vst [vmem:[#allocation80_spill] sm:$0xff] %v11306_v25 }
 0x294   : > { %16592 = vst [vmem:[#allocation81_spill] sm:$0xff] %v11314_v45 }
 0x295   : > { %16593 = vst [vmem:[#allocation82_spill] sm:$0xff] %v11316_v47 }
 0x296   : > { %16594 = vst [vmem:[#allocation83_spill] sm:$0xff] %v11324_v27 }
 0x297   : > { %16595 = vst [vmem:[#allocation84_spill] sm:$0xff] %v11328_v37 }
 0x298   : > { %16596 = vst [vmem:[#allocation85_spill] sm:$0xff] %v11340_v53 }
 0x299   : > { %16597 = vst [vmem:[#allocation86_spill] sm:$0xff] %v11344_v36  ;;  %v11366_v36 = vmov -1e+30  }
 0x29a   : > { %16598 = vst [vmem:[#allocation87_spill] sm:$0xff] %v11346_v63  ;;  %v11368_v63 = vmov -1e+30  }
 0x29b   : > { %16599 = vst [vmem:[#allocation88_spill] sm:$0xff] %v11348_v62  ;;  %v11370_v62 = vmov -1e+30  }
 0x29c   : > { %16600 = vst [vmem:[#allocation89_spill] sm:$0xff] %v11350_v61  ;;  %v11372_v61 = vmov -1e+30  }
 0x29d   : > { %16601 = vst [vmem:[#allocation90_spill] sm:$0xff] %v11352_v55  ;;  %v11374_v55 = vmov -1e+30  }
 0x29e   : > { %16602 = vst [vmem:[#allocation91_spill] sm:$0xff] %v11354_v11  ;;  %v11376_v11 = vmov -1e+30  }
 0x29f   : > { %16603 = vst [vmem:[#allocation92_spill] sm:$0xff] %v11356_v19  ;;  %v11378_v19 = vmov -1e+30  }
 0x2a0   : > { %16604 = vst [vmem:[#allocation93_spill] sm:$0xff] %v11358_v20  ;;  %v11380_v20 = vmov -1e+30  }
 0x2a1   : > { %16605 = vst [vmem:[#allocation94_spill] sm:$0xff] %v11360_v12  ;;  %v11382_v12 = vmov -1e+30  }
 0x2a2   : > { %16606 = vst [vmem:[#allocation95_spill] sm:$0xff] %v11362_v17  ;;  %v11384_v17 = vmov -1e+30  }
 0x2a3   : > { %16607 = vst [vmem:[#allocation96_spill] sm:$0xff] %v11364_v26  ;;  %v11386_v26 = vmov -1e+30  }
 0x2a4   : > { %16608 = vst [vmem:[#allocation97_spill] sm:$0xff] %v11366_v36  ;;  %v11388_v36 = vmov -1e+30  }
 0x2a5   : > { %16609 = vst [vmem:[#allocation98_spill] sm:$0xff] %v11368_v63  ;;  %v11390_v63 = vmov -1e+30  }
 0x2a6   : > { %16610 = vst [vmem:[#allocation99_spill] sm:$0xff] %v11370_v62  ;;  %v11392_v62 = vmov -1e+30  }
 0x2a7   : > { %16611 = vst [vmem:[#allocation100_spill] sm:$0xff] %v11372_v61  ;;  %v11394_v61 = vmov -1e+30  }
 0x2a8   : > { %16612 = vst [vmem:[#allocation101_spill] sm:$0xff] %v11374_v55  ;;  %v11396_v55 = vmov -1e+30  }
 0x2a9   : > { %16613 = vst [vmem:[#allocation102_spill] sm:$0xff] %v11376_v11  ;;  %v11398_v11 = vmov -1e+30  }
 0x2aa   : > { %16614 = vst [vmem:[#allocation103_spill] sm:$0xff] %v11378_v19  ;;  %v11400_v19 = vmov -1e+30  }
 0x2ab   : > { %16615 = vst [vmem:[#allocation104_spill] sm:$0xff] %v11380_v20  ;;  %v11402_v20 = vmov -1e+30  }
 0x2ac   : > { %16616 = vst [vmem:[#allocation105_spill] sm:$0xff] %v11382_v12  ;;  %v11404_v12 = vmov -1e+30  }
 0x2ad   : > { %16617 = vst [vmem:[#allocation106_spill] sm:$0xff] %v11384_v17  ;;  %v11406_v17 = vmov -1e+30  }
 0x2ae   : > { %16618 = vst [vmem:[#allocation107_spill] sm:$0xff] %v11386_v26  ;;  %v11408_v26 = vmov -1e+30  }
 0x2af   : > { %16619 = vst [vmem:[#allocation108_spill] sm:$0xff] %v11388_v36  ;;  %v11410_v36 = vmov -1e+30  }
 0x2b0   : > { %16620 = vst [vmem:[#allocation109_spill] sm:$0xff] %v11390_v63  ;;  %v11412_v63 = vmov -1e+30  }
 0x2b1   : > { %16621 = vst [vmem:[#allocation110_spill] sm:$0xff] %v11392_v62  ;;  %v11414_v62 = vmov -1e+30  }
 0x2b2   : > { %16622 = vst [vmem:[#allocation111_spill] sm:$0xff] %v11394_v61  ;;  %v11416_v61 = vmov -1e+30  }
 0x2b3   : > { %16623 = vst [vmem:[#allocation112_spill] sm:$0xff] %v11396_v55  ;;  %v11418_v55 = vmov -1e+30  }
 0x2b4   : > { %16624 = vst [vmem:[#allocation113_spill] sm:$0xff] %v11398_v11  ;;  %v11420_v11 = vmov -1e+30  }
 0x2b5   : > { %16625 = vst [vmem:[#allocation114_spill] sm:$0xff] %v11400_v19  ;;  %v11422_v19 = vmov -1e+30  }
 0x2b6   : > { %16626 = vst [vmem:[#allocation115_spill] sm:$0xff] %v11402_v20  ;;  %v11424_v20 = vmov -1e+30  }
 0x2b7   : > { %16627 = vst [vmem:[#allocation116_spill] sm:$0xff] %v11404_v12  ;;  %v11426_v12 = vmov -1e+30  }
 0x2b8   : > { %16628 = vst [vmem:[#allocation117_spill] sm:$0xff] %v11406_v17  ;;  %v11428_v17 = vmov -1e+30  }
 0x2b9   : > { %16629 = vst [vmem:[#allocation118_spill] sm:$0xff] %v11416_v61 }
 0x2ba   : > { %16630 = vst [vmem:[#allocation119_spill] sm:$0xff] %v11420_v11 }
 0x2bb   : > { %16631 = vst [vmem:[#allocation120_spill] sm:$0xff] %v11424_v20 }
 0x2bc   : > { %16632 = vst [vmem:[#allocation121_spill] sm:$0xff] %v11426_v12 }
 0x2bd LB: >> { %v16690_v0 = vld [vmem:[#allocation65_spill] sm:$0xff]  ;;  %16692 = vst [vmem:[#allocation122_spill] sm:$0xff] %v9462_v1  ;;  %v16695_v4 = vld [vmem:[#allocation66_spill] sm:$0xff]  ;;  %v16697_v5 = vld [vmem:[#allocation67_spill] sm:$0xff]  ;;  %s5925_s12 = sshll.u32 %s9842_s3, 6  ;;  %vm1506_vm10 = vcmask 523264   ;;  %s9842_s3 = sphi %s11430_s3, %s17269_s3   ;;  %v9838_v17 = vphi %v11428_v17, %v17268_v17   ;;  %v9826_v19 = vphi %v11422_v19, %v17263_v19   ;;  %v9818_v55 = vphi %v11418_v55, %v17260_v55   ;;  %v9810_v62 = vphi %v11414_v62, %v17258_v62   ;;  %v9806_v63 = vphi %v11412_v63, %v17257_v63   ;;  %v9802_v36 = vphi %v11410_v36, %v17256_v36   ;;  %v9798_v26 = vphi %v11408_v26, %v17255_v26   ;;  %v9666_v54 = vphi %v11342_v54, %v17196_v54   ;;  %v9658_v51 = vphi %v11338_v51, %v17193_v51   ;;  %v9654_v42 = vphi %v11336_v42, %v17192_v42   ;;  %v9650_v41 = vphi %v11334_v41, %v17191_v41   ;;  %v9646_v33 = vphi %v11332_v33, %v17190_v33   ;;  %v9642_v39 = vphi %v11330_v39, %v17189_v39   ;;  %v9634_v31 = vphi %v11326_v31, %v17186_v31   ;;  %v9626_v28 = vphi %v11322_v28, %v17183_v28   ;;  %v9622_v57 = vphi %v11320_v57, %v17182_v57   ;;  %v9618_v50 = vphi %v11318_v50, %v17181_v50   ;;  %v9606_v35 = vphi %v11312_v35, %v17176_v35   ;;  %v9602_v32 = vphi %v11310_v32, %v17175_v32   ;;  %v9598_v30 = vphi %v11308_v30, %v17174_v30   ;;  %v9590_v21 = vphi %v11304_v21, %v17171_v21   ;;  %v9586_v18 = vphi %v11302_v18, %v17169_v18   ;;  %v9578_v60 = vphi %v11298_v60, %v17165_v60   ;;  %v9570_v58 = vphi %v11294_v58, %v17162_v58   ;;  %v9566_v56 = vphi %v11292_v56, %v17161_v56   ;;  %v9562_v48 = vphi %v11290_v48, %v17160_v48   ;;  %v9558_v52 = vphi %v11288_v52, %v17159_v52   ;;  %v9550_v46 = vphi %v11284_v46, %v17157_v46   ;;  %v9534_v38 = vphi %v11276_v38, %v17152_v38   ;;  %v9530_v34 = vphi %v11274_v34, %v17151_v34   ;;  %v9522_v24 = vphi %v11270_v24, %v17149_v24   ;;  %v9518_v16 = vphi %v11268_v16, %v17148_v16   ;;  %v9502_v13 = vphi %v11260_v13, %v17144_v13   ;;  %v9498_v10 = vphi %v11258_v10, %v17143_v10   ;;  %v9490_v8 = vphi %v11254_v8, %v17141_v8   ;;  %v9486_v7 = vphi %v11252_v7, %v17140_v7   ;;  %v9470_v3 = vphi %v11244_v3, %v17136_v3   ;;  %v9466_v2 = vphi %v11242_v2, %v17135_v2   ;;  %v9462_v1 = vphi %v11240_v1, %v17134_v1  }
 0x2be   : >> { %16691 = vst [vmem:[#allocation65_spill] sm:$0xff] %v16690_v0  ;;  %v16699_v6 = vld [vmem:[#allocation68_spill] sm:$0xff]  ;;  %v16703_v9 = vld [vmem:[#allocation69_spill] sm:$0xff]  ;;  %v16707_v14 = vld [vmem:[#allocation70_spill] sm:$0xff]  ;;  %s11726_s22 = scalar_lea.vmem [#allocation2], %s5925_s12  ;;  %s11946_s10 = scalar_lea.vmem [#allocation3], %s5925_s12 }
 0x2bf   : >> { %16693 = vst [vmem:[#allocation123_spill] sm:$0xff] %v9466_v2  ;;  %v16709_v22 = vld [vmem:[#allocation71_spill] sm:$0xff]  ;;  %v16711_v23 = vld [vmem:[#allocation72_spill] sm:$0xff]  ;;  %v16715_v29 = vld [vmem:[#allocation73_spill] sm:$0xff]  ;;  %s1016_s15 = sadd.s32 1, %s9842_s3  }
 0x2c0   : >> { %16694 = vst [vmem:[#allocation124_spill] sm:$0xff] %v9470_v3  ;;  %v16719_v40 = vld [vmem:[#allocation74_spill] sm:$0xff]  ;;  %v16721_v43 = vld [vmem:[#allocation75_spill] sm:$0xff]  ;;  %v16723_v44 = vld [vmem:[#allocation76_spill] sm:$0xff]  ;;  %p12620_p4 = scmp.ge.s32.totalorder %s1016_s15, %s9438_s27  ;;  %s17269_s3 = smov %s1016_s15 }
 0x2c1   : >> { %16696 = vst [vmem:[#allocation66_spill] sm:$0xff] %v16695_v4  ;;  %v16726_v49 = vld [vmem:[#allocation77_spill] sm:$0xff]  ;;  %v16732_v59 = vld [vmem:[#allocation78_spill] sm:$0xff]  ;;  %v16735_v15 = vld [vmem:[#allocation79_spill] sm:$0xff] }
 0x2c2   : >> { %16698 = vst [vmem:[#allocation67_spill] sm:$0xff] %v16697_v5  ;;  %v16739_v25 = vld [vmem:[#allocation80_spill] sm:$0xff]  ;;  %v16744_v45 = vld [vmem:[#allocation81_spill] sm:$0xff]  ;;  %v16746_v47 = vld [vmem:[#allocation82_spill] sm:$0xff] }
 0x2c3   : >> { %16700 = vst [vmem:[#allocation68_spill] sm:$0xff] %v16699_v6  ;;  %v16751_v27 = vld [vmem:[#allocation83_spill] sm:$0xff]  ;;  %v16754_v37 = vld [vmem:[#allocation84_spill] sm:$0xff]  ;;  %v16761_v53 = vld [vmem:[#allocation85_spill] sm:$0xff] }
 0x2c4   : >> { %16701 = vst [vmem:[#allocation125_spill] sm:$0xff] %v9486_v7  ;;  %v16764_v0 = vld [vmem:[#allocation86_spill] sm:$0xff]  ;;  %v16795_v2 = vld [vmem:[#allocation103_spill] sm:$0xff]  ;;  %v16803_v3 = vld [vmem:[#allocation109_spill] sm:$0xff] }
 0x2c5   : >> { %16702 = vst [vmem:[#allocation126_spill] sm:$0xff] %v9490_v8  ;;  %v16766_v8 = vld [vmem:[#allocation87_spill] sm:$0xff]  ;;  %v16788_v1 = vld [vmem:[#allocation98_spill] sm:$0xff]  ;;  %v16815_v61 = vld [vmem:[#allocation118_spill] sm:$0xff] }
 0x2c6   : >> { %16704 = vst [vmem:[#allocation69_spill] sm:$0xff] %v16703_v9  ;;  %v16778_v9 = vld [vmem:[#allocation93_spill] sm:$0xff]  ;;  %v16819_v20 = vld [vmem:[#allocation120_spill] sm:$0xff]  ;;  %v16821_v12 = vld [vmem:[#allocation121_spill] sm:$0xff] }
 0x2c7   : >> { %16705 = vst [vmem:[#allocation127_spill] sm:$0xff] %v9498_v10  ;;  %v16791_v10 = vld [vmem:[#allocation100_spill] sm:$0xff]  ;;  %v16817_v11 = vld [vmem:[#allocation119_spill] sm:$0xff]  ;;  %v1148_v4 = vld [vmem:[%s11726_s22 + $0x1b8] sm:$0xff] }
 0x2c8   : >> { %16706 = vst [vmem:[#allocation128_spill] sm:$0xff] %v9502_v13  ;;  %v16804_v13 = vld [vmem:[#allocation110_spill] sm:$0xff]  ;;  %5974 = vmatpush.xpose.msk.msra.mxu3 %vm722_vm9, %v1148_v4  ;;  %v1138_v4 = vld [vmem:[%s11726_s22 + $0x128] sm:$0xff] }
 0x2c9   : >> { %16708 = vst [vmem:[#allocation70_spill] sm:$0xff] %v16707_v14  ;;  %v16809_v14 = vld [vmem:[#allocation114_spill] sm:$0xff]  ;;  %v1130_v5 = vld [vmem:[%s11726_s22 + $0xa8] sm:$0xff] }
 0x2ca   : >> { %16710 = vst [vmem:[#allocation71_spill] sm:$0xff] %v16709_v22  ;;  %v1123_v22 = vld [vmem:[%s11726_s22 + $0x30] sm:$0xff] }
 0x2cb   : >> { %16712 = vst [vmem:[#allocation72_spill] sm:$0xff] %v16711_v23 }
 0x2cc   : >> { %16713 = vst [vmem:[#allocation129_spill] sm:$0xff] %v9518_v16 }
 0x2cd   : >> { %16714 = vst [vmem:[#allocation130_spill] sm:$0xff] %v9522_v24  ;;  %v16774_v24 = vld [vmem:[#allocation91_spill] sm:$0xff] }
 0x2ce   : >> { %16716 = vst [vmem:[#allocation73_spill] sm:$0xff] %v16715_v29  ;;  %v16782_v29 = vld [vmem:[#allocation95_spill] sm:$0xff] }
 0x2cf   : >> { %16717 = vst [vmem:[#allocation131_spill] sm:$0xff] %v9530_v34  ;;  %v16802_v34 = vld [vmem:[#allocation108_spill] sm:$0xff] }
 0x2d0   : >> { %16718 = vst [vmem:[#allocation132_spill] sm:$0xff] %v9534_v38  ;;  %v16812_v38 = vld [vmem:[#allocation116_spill] sm:$0xff] }
 0x2d1   : >> { %16720 = vst [vmem:[#allocation74_spill] sm:$0xff] %v16719_v40  ;;  %v1132_v40 = vld [vmem:[%s11726_s22 + $0xb8] sm:$0xff] }
 0x2d2   : >> { %16722 = vst [vmem:[#allocation75_spill] sm:$0xff] %v16721_v43  ;;  %5942 = vmatpush.xpose.msk.msra.mxu1 %vm722_vm9, %v1132_v40  ;;  %v1137_v40 = vld [vmem:[%s11726_s22 + $0x120] sm:$0xff] }
 0x2d3   : >> { %16724 = vst [vmem:[#allocation76_spill] sm:$0xff] %v16723_v44 }
 0x2d4   : >> { %16725 = vst [vmem:[#allocation133_spill] sm:$0xff] %v9550_v46 }
 0x2d5   : >> { %16727 = vst [vmem:[#allocation77_spill] sm:$0xff] %v16726_v49  ;;  %v16768_v49 = vld [vmem:[#allocation88_spill] sm:$0xff] }
 0x2d6   : >> { %16728 = vst [vmem:[#allocation134_spill] sm:$0xff] %v9558_v52  ;;  %v16784_v52 = vld [vmem:[#allocation96_spill] sm:$0xff] }
 0x2d7   : >> { %16729 = vst [vmem:[#allocation135_spill] sm:$0xff] %v9562_v48  ;;  %v16797_v48 = vld [vmem:[#allocation105_spill] sm:$0xff] }
 0x2d8   : >> { %16730 = vst [vmem:[#allocation136_spill] sm:$0xff] %v9566_v56  ;;  %v16805_v56 = vld [vmem:[#allocation111_spill] sm:$0xff] }
 0x2d9   : >> { %16731 = vst [vmem:[#allocation137_spill] sm:$0xff] %v9570_v58  ;;  %v16813_v58 = vld [vmem:[#allocation117_spill] sm:$0xff] }
 0x2da   : >> { %16733 = vst [vmem:[#allocation78_spill] sm:$0xff] %v16732_v59  ;;  %v1141_v59 = vld [vmem:[%s11726_s22 + $0x180] sm:$0xff] }
 0x2db   : >> { %16734 = vst [vmem:[#allocation138_spill] sm:$0xff] %v9578_v60 }
 0x2dc   : >> { %16736 = vst [vmem:[#allocation79_spill] sm:$0xff] %v16735_v15 }
 0x2dd   : >> { %16737 = vst [vmem:[#allocation139_spill] sm:$0xff] %v9586_v18  ;;  %v16770_v18 = vld [vmem:[#allocation89_spill] sm:$0xff] }
 0x2de   : >> { %16738 = vst [vmem:[#allocation140_spill] sm:$0xff] %v9590_v21  ;;  %v16772_v21 = vld [vmem:[#allocation90_spill] sm:$0xff] }
 0x2df   : >> { %16740 = vst [vmem:[#allocation80_spill] sm:$0xff] %v16739_v25  ;;  %v16776_v25 = vld [vmem:[#allocation92_spill] sm:$0xff] }
 0x2e0   : >> { %16741 = vst [vmem:[#allocation141_spill] sm:$0xff] %v9598_v30  ;;  %v16806_v30 = vld [vmem:[#allocation112_spill] sm:$0xff] }
 0x2e1   : >> { %16742 = vst [vmem:[#allocation142_spill] sm:$0xff] %v9602_v32  ;;  %v1124_v32 = vld [vmem:[%s11726_s22 + $0x38] sm:$0xff] }
 0x2e2   : >> { %16743 = vst [vmem:[#allocation143_spill] sm:$0xff] %v9606_v35  ;;  %5926 = vmatpush.xpose.msk.msra.mxu0 %vm722_vm9, %v1124_v32  ;;  %v1146_v32 = vld [vmem:[%s11726_s22 + $0x1a8] sm:$0xff] }
 0x2e3   : >> { %16745 = vst [vmem:[#allocation81_spill] sm:$0xff] %v16744_v45 }
 0x2e4   : >> { %16747 = vst [vmem:[#allocation82_spill] sm:$0xff] %v16746_v47 }
 0x2e5   : >> { %16748 = vst [vmem:[#allocation144_spill] sm:$0xff] %v9618_v50  ;;  %v16790_v50 = vld [vmem:[#allocation99_spill] sm:$0xff] }
 0x2e6   : >> { %16749 = vst [vmem:[#allocation145_spill] sm:$0xff] %v9622_v57  ;;  %v16792_v57 = vld [vmem:[#allocation101_spill] sm:$0xff]  ;;  %5927 = vmatpush.xpose.msk.msra.mxu0 %vm722_vm9, %v1123_v22  ;;  %v1121_v22 = vld [vmem:[%s11726_s22 + $0x20] sm:$0xff] }
 0x2e7   : >> { %16750 = vst [vmem:[#allocation146_spill] sm:$0xff] %v9626_v28  ;;  %v16801_v28 = vld [vmem:[#allocation107_spill] sm:$0xff] }
 0x2e8   : >> { %16752 = vst [vmem:[#allocation83_spill] sm:$0xff] %v16751_v27  ;;  %v1139_v27 = vld [vmem:[%s11726_s22 + $0x130] sm:$0xff] }
 0x2e9   : >> { %16753 = vst [vmem:[#allocation147_spill] sm:$0xff] %v9634_v31  ;;  %v1147_v31 = vld [vmem:[%s11726_s22 + $0x1b0] sm:$0xff] }
 0x2ea   : >> { %16755 = vst [vmem:[#allocation84_spill] sm:$0xff] %v16754_v37  ;;  %5975 = vmatpush.xpose.msk.msra.mxu3 %vm722_vm9, %v1147_v31  ;;  %v1129_v31 = vld [vmem:[%s11726_s22 + $0xa0] sm:$0xff] }
 0x2eb   : >> { %16756 = vst [vmem:[#allocation148_spill] sm:$0xff] %v9642_v39 }
 0x2ec   : >> { %16757 = vst [vmem:[#allocation149_spill] sm:$0xff] %v9646_v33 }
 0x2ed   : >> { %16758 = vst [vmem:[#allocation150_spill] sm:$0xff] %v9650_v41  ;;  %v16780_v41 = vld [vmem:[#allocation94_spill] sm:$0xff] }
 0x2ee   : >> { %16759 = vst [vmem:[#allocation151_spill] sm:$0xff] %v9654_v42  ;;  %v16796_v42 = vld [vmem:[#allocation104_spill] sm:$0xff]  ;;  %5976 = vmatpush.xpose.msk.msra.mxu3 %vm722_vm9, %v1146_v32  ;;  %v1128_v32 = vld [vmem:[%s11726_s22 + $0x98] sm:$0xff] }
 0x2ef   : >> { %16760 = vst [vmem:[#allocation152_spill] sm:$0xff] %v9658_v51  ;;  %v16799_v51 = vld [vmem:[#allocation106_spill] sm:$0xff] }
 0x2f0   : >> { %16762 = vst [vmem:[#allocation85_spill] sm:$0xff] %v16761_v53  ;;  %v16807_v53 = vld [vmem:[#allocation113_spill] sm:$0xff] }
 0x2f1   : >> { %16763 = vst [vmem:[#allocation153_spill] sm:$0xff] %v9666_v54  ;;  %v1133_v54 = vld [vmem:[%s11726_s22 + $0x100] sm:$0xff] }
 0x2f2   : >> { %16765 = vst [vmem:[#allocation86_spill] sm:$0xff] %v16764_v0 }
 0x2f3   : >> { %16767 = vst [vmem:[#allocation87_spill] sm:$0xff] %v16766_v8 }
 0x2f4   : >> { %16769 = vst [vmem:[#allocation88_spill] sm:$0xff] %v16768_v49  ;;  %v1180_v49 = vld [vmem:[%s11946_s10 + $0x1b0] sm:$0xff] }
 0x2f5   : >> { %16771 = vst [vmem:[#allocation89_spill] sm:$0xff] %v16770_v18  ;;  %v16786_v18 = vld [vmem:[#allocation97_spill] sm:$0xff] }
 0x2f6   : >> { %16773 = vst [vmem:[#allocation90_spill] sm:$0xff] %v16772_v21  ;;  %v16794_v21 = vld [vmem:[#allocation102_spill] sm:$0xff] }
 0x2f7   : >> { %16775 = vst [vmem:[#allocation91_spill] sm:$0xff] %v16774_v24  ;;  %v16811_v24 = vld [vmem:[#allocation115_spill] sm:$0xff] }
 0x2f8   : >> { %16777 = vst [vmem:[#allocation92_spill] sm:$0xff] %v16776_v25  ;;  %v1140_v25 = vld [vmem:[%s11726_s22 + $0x138] sm:$0xff] }
 0x2f9   : >> { %16779 = vst [vmem:[#allocation93_spill] sm:$0xff] %v16778_v9  ;;  %5958 = vmatpush.xpose.msk.msra.mxu2 %vm722_vm9, %v1140_v25  ;;  %v1131_v9 = vld [vmem:[%s11726_s22 + $0xb0] sm:$0xff]  ;;  %v1122_v25 = vld [vmem:[%s11726_s22 + $0x28] sm:$0xff] }
 0x2fa   : >> { %16781 = vst [vmem:[#allocation94_spill] sm:$0xff] %v16780_v41  ;;  %5943 = vmatpush.xpose.msk.msra.mxu1 %vm722_vm9, %v1131_v9  ;;  %5928 = vmatpush.xpose.msk.msra.mxu0 %vm722_vm9, %v1122_v25  ;;  %v1120_v9 = vld [vmem:[%s11726_s22 + $0x18] sm:$0xff] }
 0x2fb   : >> { %16783 = vst [vmem:[#allocation95_spill] sm:$0xff] %v16782_v29  ;;  %v1136_v25 = vld [vmem:[%s11726_s22 + $0x118] sm:$0xff] }
 0x2fc   : >> { %16785 = vst [vmem:[#allocation96_spill] sm:$0xff] %v16784_v52 }
 0x2fd   : >> { %16787 = vst [vmem:[#allocation97_spill] sm:$0xff] %v16786_v18  ;;  %5959 = vmatpush.xpose.msk.msra.mxu2 %vm722_vm9, %v1139_v27  ;;  %v1145_v27 = vld [vmem:[%s11726_s22 + $0x1a0] sm:$0xff]  ;;  %v1164_v18 = vld [vmem:[%s11946_s10 + $0xb0] sm:$0xff] }
 0x2fe   : >> { %16789 = vst [vmem:[#allocation98_spill] sm:$0xff] %v16788_v1  ;;  %5944 = vmatpush.xpose.msk.msra.mxu1 %vm722_vm9, %v1130_v5  ;;  %5929 = vmatpush.xpose.msk.msra.mxu0 %vm722_vm9, %v1121_v22  ;;  %v1119_v5 = vld [vmem:[%s11726_s22 + $0x10] sm:$0xff] }
 0x2ff   : >> { %16793 = vst [vmem:[#allocation99_spill] sm:$0xff] %v16792_v57  ;;  %5977 = vmatpush.xpose.msk.msra.mxu3 %vm722_vm9, %v1145_v27  ;;  %v1135_v22 = vld [vmem:[%s11726_s22 + $0x110] sm:$0xff] }
 0x300   : >> { %16798 = vst [vmem:[#allocation102_spill] sm:$0xff] %v16797_v48  ;;  %v1127_v27 = vld [vmem:[%s11726_s22 + $0x90] sm:$0xff] }
 0x301   : >> { %16800 = vst [vmem:[#allocation106_spill] sm:$0xff] %v16799_v51  ;;  %5960 = vmatpush.xpose.msk.msra.mxu2 %vm722_vm9, %v1138_v4  ;;  %v1144_v4 = vld [vmem:[%s11726_s22 + $0x198] sm:$0xff] }
 0x302   : >> { %16808 = vst [vmem:[#allocation107_spill] sm:$0xff] %v16807_v53  ;;  %5945 = vmatpush.xpose.msk.msra.mxu1 %vm722_vm9, %v1129_v31  ;;  %5930 = vmatpush.xpose.msk.msra.mxu0 %vm722_vm9, %v1120_v9  ;;  %v1118_v31 = vld [vmem:[%s11726_s22 + $0x8] sm:$0xff] }
 0x303   : >> { %16810 = vst [vmem:[#allocation108_spill] sm:$0xff] %v16809_v14  ;;  %5978 = vmatpush.xpose.msk.msra.mxu3 %vm722_vm9, %v1144_v4  ;;  %v1134_v9 = vld [vmem:[%s11726_s22 + $0x108] sm:$0xff] }
 0x304   : >> { %16814 = vst [vmem:[#allocation109_spill] sm:$0xff] %v9810_v62  ;;  %v1126_v4 = vld [vmem:[%s11726_s22 + $0x88] sm:$0xff]  ;;  %v1156_v62 = vld [vmem:[%s11946_s10 + $0x30] sm:$0xff] }
 0x305   : >> { %16816 = vst [vmem:[#allocation110_spill] sm:$0xff] %v16815_v61  ;;  %5961 = vmatpush.xpose.msk.msra.mxu2 %vm722_vm9, %v1137_v40  ;;  %v1143_v40 = vld [vmem:[%s11726_s22 + $0x190] sm:$0xff]  ;;  %v1171_v53 = vld [vmem:[%s11946_s10 + $0x128] sm:$0xff] }
 0x306   : >> { %16818 = vst [vmem:[#allocation111_spill] sm:$0xff] %v16817_v11  ;;  %5946 = vmatpush.xpose.msk.msra.mxu1 %vm722_vm9, %v1128_v32  ;;  %5931 = vmatpush.xpose.msk.msra.mxu0 %vm722_vm9, %v1119_v5  ;;  %v1117_v32 = vld [vmem:[%s11726_s22] sm:$0xff]  ;;  %v1179_v61 = vld [vmem:[%s11946_s10 + $0x1a8] sm:$0xff] }
 0x307   : >> { %16820 = vst [vmem:[#allocation112_spill] sm:$0xff] %v16819_v20  ;;  %5979 = vmatpush.xpose.msk.msra.mxu3 %vm722_vm9, %v1143_v40  ;;  %v1125_v5 = vld [vmem:[%s11726_s22 + $0x80] sm:$0xff] }
 0x308   : >> { %16822 = vst [vmem:[#allocation113_spill] sm:$0xff] %v16821_v12  ;;  %v16824_v40 = vld [vmem:[#allocation39_spill] sm:$0xff] }
 0x309   : >> { %5962 = vmatpush.xpose.msk.msra.mxu2 %vm722_vm9, %v1136_v25  ;;  %v1142_v25 = vld [vmem:[%s11726_s22 + $0x188] sm:$0xff] }
 0x30a   : >> { %5947 = vmatpush.xpose.msk.msra.mxu1 %vm722_vm9, %v1127_v27  ;;  %5932 = vmatpush.xpose.msk.msra.mxu0 %vm722_vm9, %v1118_v31  ;;  %v16825_v27 = vld [vmem:[#allocation42_spill] sm:$0xff]  ;;  %v16826_v31 = vld [vmem:[#allocation40_spill] sm:$0xff] }
 0x30b   : >> { %5980 = vmatpush.xpose.msk.msra.mxu3 %vm722_vm9, %v1142_v25  ;;  %v16830_v25 = vld [vmem:[#allocation47_spill] sm:$0xff] }
 0x30d   : >> { %5963 = vmatpush.xpose.msk.msra.mxu2 %vm722_vm9, %v1135_v22  ;;  %v16823_v22 = vld [vmem:[#allocation33_spill] sm:$0xff] }
 0x30e   : >> { %5948 = vmatpush.xpose.msk.msra.mxu1 %vm722_vm9, %v1126_v4  ;;  %5933 = vmatpush.xpose.msk.msra.mxu0 %vm722_vm9, %v1117_v32  ;;  %v16831_v4 = vld [vmem:[#allocation37_spill] sm:$0xff]  ;;  %v16832_v32 = vld [vmem:[#allocation51_spill] sm:$0xff] }
 0x30f   : >> { %5981 = vmatpush.xpose.msk.msra.mxu3 %vm722_vm9, %v1141_v59  ;;  %v16829_v59 = vld [vmem:[#allocation44_spill] sm:$0xff] }
 0x311   : >> { %5964 = vmatpush.xpose.msk.msra.mxu2 %vm722_vm9, %v1134_v9  ;;  %5934 = vmatmul.msk.f32.vlgmr.msra.gmra.mxu0 %vm722_vm9, %v16823_v22  ;;  %v16827_v9 = vld [vmem:[#allocation48_spill] sm:$0xff]  ;;  %v16834_v22 = vld [vmem:[#allocation49_spill] sm:$0xff] }
 0x312   : >> { %5949 = vmatpush.xpose.msk.msra.mxu1 %vm722_vm9, %v1125_v5  ;;  %5982 = vmatmul.msk.f32.vlgmr.msra.gmra.mxu3 %vm722_vm9, %v16825_v27  ;;  %v16833_v5 = vld [vmem:[#allocation53_spill] sm:$0xff]  ;;  %v16836_v27 = vld [vmem:[#allocation38_spill] sm:$0xff] }
 0x315   : >> { %5965 = vmatpush.xpose.msk.msra.mxu2 %vm722_vm9, %v1133_v54  ;;  %5950 = vmatmul.msk.f32.vlgmr.msra.gmra.mxu1 %vm722_vm9, %v16826_v31  ;;  %v16828_v54 = vld [vmem:[#allocation35_spill] sm:$0xff] }
 0x316   : >> { %v16837_v31 = vld [vmem:[#allocation55_spill] sm:$0xff] }
 0x318   : >> { %5966 = vmatmul.msk.f32.vlgmr.msra.gmra.mxu2 %vm722_vm9, %v16824_v40  ;;  %v16835_v40 = vld [vmem:[#allocation54_spill] sm:$0xff] }
 0x319   : >> { %5935 = vmatmul.msk.f32.gmra.mxu0 %vm722_vm9, %v16828_v54  ;;  %v16839_v54 = vld [vmem:[#allocation59_spill] sm:$0xff] }
 0x31a   : >> { %5983 = vmatmul.msk.f32.gmra.mxu3 %vm722_vm9, %v16829_v59  ;;  %v16840_v59 = vld [vmem:[#allocation41_spill] sm:$0xff] }
 0x31d   : >> { %5951 = vmatmul.msk.f32.gmra.mxu1 %vm722_vm9, %v16830_v25  ;;  %v16841_v25 = vld [vmem:[#allocation57_spill] sm:$0xff] }
 0x320   : >> { %5967 = vmatmul.msk.f32.gmra.mxu2 %vm722_vm9, %v16827_v9  ;;  %v16838_v9 = vld [vmem:[#allocation56_spill] sm:$0xff] }
 0x321   : >> { %5936 = vmatmul.msk.f32.gmra.mxu0 %vm722_vm9, %v16831_v4  ;;  %v16842_v4 = vld [vmem:[#allocation58_spill] sm:$0xff] }
 0x322   : >> { %5984 = vmatmul.msk.f32.gmra.mxu3 %vm722_vm9, %v16833_v5  ;;  %v16844_v5 = vld [vmem:[#allocation46_spill] sm:$0xff] }
 0x325   : >> { %5952 = vmatmul.msk.f32.gmra.mxu1 %vm722_vm9, %v16834_v22  ;;  %v16845_v22 = vld [vmem:[#allocation63_spill] sm:$0xff] }
 0x328   : >> { %5968 = vmatmul.msk.f32.gmra.mxu2 %vm722_vm9, %v16832_v32  ;;  %v16843_v32 = vld [vmem:[#allocation61_spill] sm:$0xff] }
 0x329   : >> { %5937 = vmatmul.msk.f32.gmra.mxu0 %vm722_vm9, %v16836_v27  ;;  %v16847_v27 = vld [vmem:[#allocation43_spill] sm:$0xff] }
 0x32a   : >> { %5985 = vmatmul.msk.f32.gmra.mxu3 %vm722_vm9, %v16837_v31  ;;  %v16848_v31 = vld [vmem:[#allocation34_spill] sm:$0xff] }
 0x32d   : >> { %5953 = vmatmul.msk.f32.gmra.mxu1 %vm722_vm9, %v16838_v9  ;;  %v16849_v9 = vld [vmem:[#allocation64_spill] sm:$0xff] }
 0x330   : >> { %5969 = vmatmul.msk.f32.gmra.mxu2 %vm722_vm9, %v16835_v40  ;;  %v16846_v40 = vld [vmem:[#allocation60_spill] sm:$0xff] }
 0x331   : >> { %5938 = vmatmul.msk.f32.gmra.mxu0 %vm722_vm9, %v16840_v59  ;;  %v16851_v59 = vld [vmem:[#allocation52_spill] sm:$0xff] }
 0x332   : >> { %5986 = vmatmul.msk.f32.gmra.mxu3 %vm722_vm9, %v16841_v25  ;;  %v16852_v25 = vld [vmem:[#allocation36_spill] sm:$0xff] }
 0x335   : >> { %5954 = vmatmul.msk.f32.gmra.mxu1 %vm722_vm9, %v16842_v4  ;;  %v16853_v4 = vld [vmem:[#allocation62_spill] sm:$0xff] }
 0x338   : >> { %5970 = vmatmul.msk.f32.gmra.mxu2 %vm722_vm9, %v16839_v54  ;;  %v16850_v54 = vld [vmem:[#allocation45_spill] sm:$0xff] }
 0x339   : >> { %5939 = vmatmul.msk.f32.gmra.mxu0 %vm722_vm9, %v16844_v5 }
 0x33a   : >> { %5987 = vmatmul.msk.f32.gmra.mxu3 %vm722_vm9, %v16845_v22 }
 0x33d   : >> { %5955 = vmatmul.msk.f32.gmra.mxu1 %vm722_vm9, %v16846_v40 }
 0x340   : >> { %5971 = vmatmul.msk.f32.gmra.mxu2 %vm722_vm9, %v16843_v32  ;;  %v16854_v32 = vld [vmem:[#allocation50_spill] sm:$0xff] }
 0x341   : >> { %5940 = vmatmul.msk.f32.gmra.mxu0 %vm722_vm9, %v16848_v31 }
 0x342   : >> { %5988 = vmatmul.msk.f32.gmra.mxu3 %vm722_vm9, %v16849_v9 }
 0x345   : >> { %5956 = vmatmul.msk.f32.gmra.mxu1 %vm722_vm9, %v16850_v54 }
 0x348   : >> { %5972 = vmatmul.msk.f32.gmra.mxu2 %vm722_vm9, %v16847_v27 }
 0x349   : >> { %5941 = vmatmul.msk.f32.gmra.mxu0 %vm722_vm9, %v16852_v25 }
 0x34a   : >> { %5989 = vmatmul.msk.f32.gmra.mxu3 %vm722_vm9, %v16853_v4 }
 0x34d   : >> { %5957 = vmatmul.msk.f32.gmra.mxu1 %vm722_vm9, %v16854_v32 }
 0x350   : >> { %5973 = vmatmul.msk.f32.gmra.mxu2 %vm722_vm9, %v16851_v59 }
 0x38e   : >> { %v11856_v5 = vpop.f32.mrf.mxu0 }
 0x38f   : >> { %v1507_v22 = vsel %vm1506_vm10, %v11856_v5, -inf }
 0x390   : >> { %1508 = vmax.xlane.f32.xlu1 %v1507_v22 }
 0x392   : >> { %v11860_v40 = vpop.f32.mrf.mxu1 }
 0x393   : >> { %v1531_v54 = vsel %vm1506_vm10, %v11860_v40, -inf }
 0x395   : >> { %v11864_v31 = vpop.f32.mrf.mxu3 }
 0x396   : >> { %v11870_v59 = vpop.f32.mrf.mxu0  ;;  %v1579_v4 = vsel %vm1506_vm10, %v11864_v31, -inf }
 0x397   : >> { %v1510_v6 = vsel %vm1506_vm10, %v11870_v59, -inf }
 0x398   : >> { %1532 = vmax.xlane.f32.xlu1 %v1531_v54 }
 0x39a   : >> { %v11872_v25 = vpop.f32.mrf.mxu1 }
 0x39b   : >> { %v11862_v27 = vpop.f32.mrf.mxu2  ;;  %v1534_v43 = vsel %vm1506_vm10, %v11872_v25, -inf }
 0x39c   : >> { %v1555_v9 = vsel %vm1506_vm10, %v11862_v27, -inf }
 0x39d   : >> { %1556 = vmax.xlane.f32.xlu0 %v1555_v9  ;;  %v11878_v22 = vpop.f32.mrf.mxu3 }
 0x39e   : >> { %v11886_v54 = vpop.f32.mrf.mxu0  ;;  %v1582_v37 = vsel %vm1506_vm10, %v11878_v22, -inf }
 0x39f   : >> { %v1513_v45 = vsel %vm1506_vm10, %v11886_v54, -inf }
 0x3a0   : >> { %1535 = vmax.xlane.f32.xlu1 %v1534_v43 }
 0x3a2   : >> { %v11884_v9 = vpop.f32.mrf.mxu1 }
 0x3a3   : >> { %v11876_v32 = vpop.f32.mrf.mxu2  ;;  %v1537_v43 = vsel %vm1506_vm10, %v11884_v9, -inf }
 0x3a4   : >> { %v1558_v0 = vsel %vm1506_vm10, %v11876_v32, -inf }
 0x3a5   : >> { %1580 = vmax.xlane.f32.xlu0 %v1579_v4  ;;  %1559 = vmax.xlane.f32.xlu2 %v1558_v0  ;;  %v11894_v60 = vpop.f32.mrf.mxu3 }
 0x3a6   : >> { %v1585_v4 = vsel %vm1506_vm10, %v11894_v60, -inf }
 0x3a8   : >> { %1514 = vmax.xlane.f32.xlu1 %v1513_v45 }
 0x3aa   : >> { %v11898_v0 = vpop.f32.mrf.mxu1 }
 0x3ab   : >> { %v11892_v35 = vpop.f32.mrf.mxu2  ;;  %v1540_v41 = vsel %vm1506_vm10, %v11898_v0, -inf }
 0x3ac   : >> { %v1561_v45 = vsel %vm1506_vm10, %v11892_v35, -inf }
 0x3ad   : >> { %1583 = vmax.xlane.f32.xlu2 %v1582_v37  ;;  %1511 = vmax.xlane.f32.xlu0 %v1510_v6  ;;  %v11906_v7 = vpop.f32.mrf.mxu3  ;;  %v11910_v37 = vpop.f32.mrf.mxu0 }
 0x3ae   : >> { %v1588_v44 = vsel %vm1506_vm10, %v11906_v7, -inf  ;;  %v1516_v16 = vsel %vm1506_vm10, %v11910_v37, -inf }
 0x3b0   : >> { %1589 = vmax.xlane.f32.xlu1 %v1588_v44 }
 0x3b2   : >> { %v11912_v6 = vpop.f32.mrf.mxu1 }
 0x3b3   : >> { %v11904_v23 = vpop.f32.mrf.mxu2 }
 0x3b4   : >> { %v1564_v8 = vsel %vm1506_vm10, %v11904_v23, -inf }
 0x3b5   : >> { %1538 = vmax.xlane.f32.xlu2 %v1537_v43  ;;  %1586 = vmax.xlane.f32.xlu0 %v1585_v4  ;;  %v1543_v43 = vsel %vm1506_vm10, %v11912_v6, -inf  ;;  %v11922_v4 = vpop.f32.mrf.mxu3  ;;  %v11924_v44 = vpop.f32.mrf.mxu0 }
 0x3b6   : >> { %v1519_v47 = vsel %vm1506_vm10, %v11924_v44, -inf }
 0x3b8   : >> { %1544 = vmax.xlane.f32.xlu1 %v1543_v43  ;;  %v1591_v43 = vsel %vm1506_vm10, %v11922_v4, -inf }
 0x3ba   : >> { %v11954_v33 = vpop.f32.mrf.mxu1 }
 0x3bb   : >> { %v11918_v29 = vpop.f32.mrf.mxu2 }
 0x3bc   : >> { %v1567_v46 = vsel %vm1506_vm10, %v11918_v29, -inf }
 0x3bd   : >> { %1562 = vmax.xlane.f32.xlu2 %v1561_v45  ;;  %1541 = vmax.xlane.f32.xlu0 %v1540_v41  ;;  %v11934_v41 = vpop.f32.mrf.mxu3  ;;  %v11936_v45 = vpop.f32.mrf.mxu0 }
 0x3be   : >> { %v1522_v15 = vsel %vm1506_vm10, %v11936_v45, -inf }
 0x3c0   : >> { %1568 = vmax.xlane.f32.xlu1 %v1567_v46  ;;  %v1157_v46 = vld [vmem:[%s11946_s10 + $0x38] sm:$0xff] }
 0x3c1   : >> { %2051 = vmatpush.msrb.mxu0 %v1157_v46 }
 0x3c2   : >> { %v11970_v46 = vpop.f32.mrf.mxu1 }
 0x3c3   : >> { %v11932_v39 = vpop.f32.mrf.mxu2  ;;  %2052 = vmatpush.msrb.mxu0 %v1156_v62  ;;  %16855 = vst [vmem:[#allocation114_spill] sm:$0xff] %v11970_v46 }
 0x3c4   : >> { %v1570_v62 = vsel %vm1506_vm10, %v11932_v39, -inf }
 0x3c5   : >> { %1565 = vmax.xlane.f32.xlu0 %v1564_v8  ;;  %1517 = vmax.xlane.f32.xlu2 %v1516_v16  ;;  %v1173_v8 = vld [vmem:[%s11946_s10 + $0x138] sm:$0xff]  ;;  %v11962_v14 = vpop.f32.mrf.mxu3 }
 0x3c6   : >> { %v1181_v16 = vld [vmem:[%s11946_s10 + $0x1b8] sm:$0xff]  ;;  %2181 = vmatpush.msrb.mxu2 %v1173_v8  ;;  %v1546_v8 = vsel %vm1506_vm10, %v11954_v33, -inf }
 0x3c7   : >> { %2246 = vmatpush.msrb.mxu3 %v1181_v16  ;;  %v1597_v16 = vsel %vm1506_vm10, %v11962_v14, -inf }
 0x3c8   : >> { %1523 = vmax.xlane.f32.xlu1 %v1522_v15  ;;  %v1594_v15 = vsel %vm1506_vm10, %v11934_v41, -inf }
 0x3c9   : >> { %2247 = vmatpush.msrb.mxu3 %v1180_v49 }
 0x3cb   : >> { %v11956_v52 = vpop.f32.mrf.mxu2  ;;  %2248 = vmatpush.msrb.mxu3 %v1179_v61  ;;  %v11982_v61 = vpop.f32.mrf.mxu1 }
 0x3cc   : >> { %v1573_v49 = vsel %vm1506_vm10, %v11956_v52, -inf  ;;  %16858 = vst [vmem:[#allocation117_spill] sm:$0xff] %v11982_v61 }
 0x3cd   : >> { %1592 = vmax.xlane.f32.xlu2 %v1591_v43  ;;  %1520 = vmax.xlane.f32.xlu0 %v1519_v47  ;;  %v1165_v43 = vld [vmem:[%s11946_s10 + $0xb8] sm:$0xff]  ;;  %v1172_v47 = vld [vmem:[%s11946_s10 + $0x130] sm:$0xff] }
 0x3ce   : >> { %2116 = vmatpush.msrb.mxu1 %v1165_v43  ;;  %2182 = vmatpush.msrb.mxu2 %v1172_v47  ;;  %v1549_v47 = vsel %vm1506_vm10, %v11970_v46, -inf }
 0x3d0   : >> { %2117 = vmatpush.msrb.mxu1 %v1164_v18  ;;  %2183 = vmatpush.msrb.mxu2 %v1171_v53  ;;  %v11980_v53 = vpop.f32.mrf.mxu0 }
 0x3d1   : >> { %1598 = vmax.xlane.f32.xlu1 %v1597_v16  ;;  %16857 = vst [vmem:[#allocation116_spill] sm:$0xff] %v11980_v53 }
 0x3d3   : >> { %v11972_v43 = vpop.f32.mrf.mxu2 }
 0x3d4   : >> { %16856 = vst [vmem:[#allocation115_spill] sm:$0xff] %v11972_v43  ;;  %v1576_v18 = vsel %vm1506_vm10, %v11972_v43, -inf  ;;  %v1170_v43 = vld [vmem:[%s11946_s10 + $0x120] sm:$0xff] }
 0x3d5   : >> { %1547 = vmax.xlane.f32.xlu2 %v1546_v8  ;;  %1595 = vmax.xlane.f32.xlu0 %v1594_v15  ;;  %v1525_v8 = vsel %vm1506_vm10, %v11980_v53, -inf  ;;  %v1552_v15 = vsel %vm1506_vm10, %v11982_v61, -inf  ;;  %v1155_v61 = vld [vmem:[%s11946_s10 + $0x28] sm:$0xff]  ;;  %v1178_v53 = vld [vmem:[%s11946_s10 + $0x1a0] sm:$0xff] }
 0x3d6   : >> { %2053 = vmatpush.msrb.mxu0 %v1155_v61  ;;  %2184 = vmatpush.msrb.mxu2 %v1170_v43  ;;  %v1151_v61 = vld [vmem:[%s11946_s10 + $0x8] sm:$0xff]  ;;  %v1161_v43 = vld [vmem:[%s11946_s10 + $0x98] sm:$0xff] }
 0x3d7   : >> { %2249 = vmatpush.msrb.mxu3 %v1178_v53  ;;  %v1168_v53 = vld [vmem:[%s11946_s10 + $0x110] sm:$0xff] }
 0x3d8   : >> { %v11990_v16 = vpop.f32.mrf.mxu0 }
 0x3d9   : >> { %1577 = vmax.xlane.f32.xlu1 %v1576_v18  ;;  %16859 = vst [vmem:[#allocation118_spill] sm:$0xff] %v11990_v16  ;;  %v1528_v18 = vsel %vm1506_vm10, %v11990_v16, -inf  ;;  %v1150_v16 = vld [vmem:[%s11946_s10] sm:$0xff] }
 0x3dd   : >> { %1571 = vmax.xlane.f32.xlu2 %v1570_v62  ;;  %1574 = vmax.xlane.f32.xlu0 %v1573_v49  ;;  %v11992_v49 = vpop.f32.mrf.mxu3 }
 0x3de   : >> { %16860 = vst [vmem:[#allocation119_spill] sm:$0xff] %v11992_v49  ;;  %v1600_v62 = vsel %vm1506_vm10, %v11992_v49, -inf  ;;  %v1166_v49 = vld [vmem:[%s11946_s10 + $0x100] sm:$0xff] }
 0x3e1   : >> { %1553 = vmax.xlane.f32.xlu1 %v1552_v15  ;;  %v1163_v15 = vld [vmem:[%s11946_s10 + $0xa8] sm:$0xff] }
 0x3e2   : >> { %2118 = vmatpush.msrb.mxu1 %v1163_v15  ;;  %v1160_v15 = vld [vmem:[%s11946_s10 + $0x90] sm:$0xff] }
 0x3e5   : >> { %1550 = vmax.xlane.f32.xlu0 %v1549_v47  ;;  %1526 = vmax.xlane.f32.xlu2 %v1525_v8  ;;  %v1154_v47 = vld [vmem:[%s11946_s10 + $0x20] sm:$0xff]  ;;  %v1153_v8 = vld [vmem:[%s11946_s10 + $0x18] sm:$0xff] }
 0x3e6   : >> { %2054 = vmatpush.msrb.mxu0 %v1154_v47  ;;  %v1169_v47 = vld [vmem:[%s11946_s10 + $0x118] sm:$0xff] }
 0x3e7   : >> { %2185 = vmatpush.msrb.mxu2 %v1169_v47  ;;  %v1175_v47 = vld [vmem:[%s11946_s10 + $0x188] sm:$0xff] }
 0x3e8   : >> { %2055 = vmatpush.msrb.mxu0 %v1153_v8  ;;  %v1177_v8 = vld [vmem:[%s11946_s10 + $0x198] sm:$0xff] }
 0x3e9   : >> { %2250 = vmatpush.msrb.mxu3 %v1177_v8  ;;  %2186 = vmatpush.msrb.mxu2 %v1168_v53  ;;  %v1174_v8 = vld [vmem:[%s11946_s10 + $0x180] sm:$0xff] }
 0x3ed   : >> { %1601 = vmax.xlane.f32.xlu2 %v1600_v62  ;;  %1529 = vmax.xlane.f32.xlu0 %v1528_v18  ;;  %v1152_v62 = vld [vmem:[%s11946_s10 + $0x10] sm:$0xff]  ;;  %v1162_v18 = vld [vmem:[%s11946_s10 + $0xa0] sm:$0xff] }
 0x3ee   : >> { %2056 = vmatpush.msrb.mxu0 %v1152_v62  ;;  %2119 = vmatpush.msrb.mxu1 %v1162_v18  ;;  %v1167_v62 = vld [vmem:[%s11946_s10 + $0x108] sm:$0xff]  ;;  %v1158_v18 = vld [vmem:[%s11946_s10 + $0x80] sm:$0xff] }
 0x3ef   : >> { %2187 = vmatpush.msrb.mxu2 %v1167_v62 }
 0x3f0   : >> { %2057 = vmatpush.msrb.mxu0 %v1151_v61  ;;  %2120 = vmatpush.msrb.mxu1 %v1161_v43  ;;  %v1159_v61 = vld [vmem:[%s11946_s10 + $0x88] sm:$0xff] }
 0x3f1   : >> { %2188 = vmatpush.msrb.mxu2 %v1166_v49 }
 0x3f2   : >> { %2058 = vmatpush.msrb.mxu0 %v1150_v16  ;;  %2121 = vmatpush.msrb.mxu1 %v1160_v15  ;;  %v1176_v16 = vld [vmem:[%s11946_s10 + $0x190] sm:$0xff] }
 0x3f3   : >> { %2251 = vmatpush.msrb.mxu3 %v1176_v16 }
 0x3f4   : >> { %2122 = vmatpush.msrb.mxu1 %v1159_v61 }
 0x3f5   : >> { %2252 = vmatpush.msrb.mxu3 %v1175_v47 }
 0x3f6   : >> { %2123 = vmatpush.msrb.mxu1 %v1158_v18 }
 0x3f7   : >> { %2253 = vmatpush.msrb.mxu3 %v1174_v8 }
 0x403   : >> { %v1509_v46 = vpop.xlane.xlu1 %1508 }
 0x404   : >> { %v12021_v43 = vmax.f32 %v9838_v17, %v1509_v46  }
 0x406   : >> { %16861 = vst [vmem:[#allocation154_spill] sm:$0xff] %v12021_v43  ;;  %v16862_v12 = vmov %v12021_v43 }
 0x407   : >> { %v1731_v15 = vsub.f32 %v11856_v5, %v16862_v12 }
 0x409   : >> { %v1763_v62 = vmul.f32 1.442695, %v1731_v15 }
 0x40b   : >> { %7972 = vpow2.f32 %v1763_v62  ;;  %v1533_v18 = vpop.xlane.xlu1 %1532 }
 0x40c   : >> { %v12035_v47 = vmax.f32 %v9806_v63, %v1533_v18  }
 0x40e   : >> { %16865 = vst [vmem:[#allocation156_spill] sm:$0xff] %v12035_v47  ;;  %v16866_v11 = vmov %v12035_v47 }
 0x40f   : >> { %v1739_v43 = vsub.f32 %v11860_v40, %v16866_v11 }
 0x410   : >> { %v1557_v49 = vpop.xlane.xlu0 %1556 }
 0x411   : >> { %v12028_v61 = vmax.f32 %v16806_v30, %v1557_v49   ;;  %v1779_v15 = vmul.f32 1.442695, %v1739_v43  ;;  %v7973_v49 = vpop.eup %7972 }
 0x412   : >> { %5990 = vmatmul.msk.f32.vlgmr.msrb.gmra.mxu0 %vm1506_vm10, %v7973_v49  ;;  %v1859_v18 = vsel %vm1506_vm10, %v7973_v49, 0.0 }
 0x413   : >> { %16863 = vst [vmem:[#allocation155_spill] sm:$0xff] %v12028_v61  ;;  %v16864_v20 = vmov %v12028_v61  ;;  %1860 = vadd.xlane.f32.xlu2 %v1859_v18 }
 0x414   : >> { %v1747_v46 = vsub.f32 %v11862_v27, %v16864_v20 }
 0x416   : >> { %v1795_v8 = vmul.f32 1.442695, %v1747_v46  ;;  %v1536_v46 = vpop.xlane.xlu1 %1535 }
 0x417   : >> { %v12058_v43 = vmax.f32 %v9802_v36, %v1536_v46  }
 0x418   : >> { %7974 = vpow2.f32 %v1795_v8  ;;  %v1581_v62 = vpop.xlane.xlu0 %1580  ;;  %v1560_v61 = vpop.xlane.xlu2 %1559 }
 0x419   : >> { %v12042_v16 = vmax.f32 %v16796_v42, %v1581_v62   ;;  %v12045_v27 = vmax.f32 %v16805_v56, %v1560_v61   ;;  %7976 = vpow2.f32 %v1779_v15  ;;  %16871 = vst [vmem:[#allocation159_spill] sm:$0xff] %v12058_v43  ;;  %v16872_v5 = vmov %v12058_v43 }
 0x41b   : >> { %16867 = vst [vmem:[#allocation157_spill] sm:$0xff] %v12042_v16  ;;  %v16868_v53 = vmov %v12042_v16  ;;  %v16870_v20 = vmov %v12045_v27 }
 0x41c   : >> { %16869 = vst [vmem:[#allocation158_spill] sm:$0xff] %v12045_v27  ;;  %v1755_v47 = vsub.f32 %v11864_v31, %v16868_v53  ;;  %v1748_v16 = vsub.f32 %v11876_v32, %v16870_v20  ;;  %v1740_v27 = vsub.f32 %v11872_v25, %v16872_v5 }
 0x41e   : >> { %v1811_v62 = vmul.f32 1.442695, %v1755_v47  ;;  %v7975_v49 = vpop.eup %7974  ;;  %v1797_v15 = vmul.f32 1.442695, %v1748_v16  ;;  %v1781_v8 = vmul.f32 1.442695, %v1740_v27  ;;  %v1515_v61 = vpop.xlane.xlu1 %1514 }
 0x41f   : >> { %6006 = vmatmul.msk.f32.vlgmr.msrb.gmra.mxu2 %vm1506_vm10, %v7975_v49  ;;  %v1907_v31 = vsel %vm1506_vm10, %v7975_v49, 0.0  ;;  %v7977_v18 = vpop.eup %7976  ;;  %v16875_v16 = vld [vmem:[#allocation113_spill] sm:$0xff] }
 0x420   : >> { %7978 = vpow2.f32 %v1811_v62  ;;  %1908 = vadd.xlane.f32.xlu0 %v1907_v31  ;;  %v1584_v32 = vpop.xlane.xlu2 %1583  ;;  %v1512_v46 = vpop.xlane.xlu0 %1511  ;;  %5998 = vmatmul.msk.f32.vlgmr.msrb.gmra.mxu1 %vm1506_vm10, %v7977_v18  ;;  %v1883_v25 = vsel %vm1506_vm10, %v7977_v18, 0.0 }
 0x421   : >> { %v12067_v47 = vmax.f32 %v16795_v2, %v1584_v32   ;;  %v12070_v43 = vmax.f32 %v16875_v16, %v1512_v46   ;;  %7980 = vpow2.f32 %v1797_v15  ;;  %1884 = vadd.xlane.f32.xlu1 %v1883_v25  ;;  %v16878_v32 = vld [vmem:[#allocation112_spill] sm:$0xff] }
 0x422   : >> { %7982 = vpow2.f32 %v1781_v8  ;;  %v12083_v46 = vmax.f32 %v16878_v32, %v1515_v61  }
 0x423   : >> { %16873 = vst [vmem:[#allocation160_spill] sm:$0xff] %v12067_v47  ;;  %v16874_v40 = vmov %v12067_v47  ;;  %v16877_v20 = vmov %v12070_v43 }
 0x424   : >> { %16876 = vst [vmem:[#allocation161_spill] sm:$0xff] %v12070_v43  ;;  %v1756_v49 = vsub.f32 %v11878_v22, %v16874_v40  ;;  %v1732_v31 = vsub.f32 %v11870_v59, %v16877_v20  ;;  %v16880_v5 = vmov %v12083_v46 }
 0x425   : >> { %16879 = vst [vmem:[#allocation162_spill] sm:$0xff] %v12083_v46  ;;  %v1733_v25 = vsub.f32 %v11886_v54, %v16880_v5 }
 0x426   : >> { %v1813_v18 = vmul.f32 1.442695, %v1756_v49  ;;  %v7979_v15 = vpop.eup %7978  ;;  %v1765_v47 = vmul.f32 1.442695, %v1732_v31 }
 0x427   : >> { %6014 = vmatmul.msk.f32.vlgmr.msrb.gmra.mxu3 %vm1506_vm10, %v7979_v15  ;;  %v1931_v22 = vsel %vm1506_vm10, %v7979_v15, 0.0  ;;  %v7981_v8 = vpop.eup %7980  ;;  %v1767_v62 = vmul.f32 1.442695, %v1733_v25  ;;  %v1590_v15 = vpop.xlane.xlu1 %1589 }
 0x428   : >> { %7984 = vpow2.f32 %v1813_v18  ;;  %1932 = vadd.xlane.f32.xlu2 %v1931_v22  ;;  %v1539_v59 = vpop.xlane.xlu2 %1538  ;;  %v1587_v61 = vpop.xlane.xlu0 %1586  ;;  %6007 = vmatmul.msk.f32.gmra.mxu2 %vm1506_vm10, %v7981_v8  ;;  %v1910_v54 = vsel %vm1506_vm10, %v7981_v8, 0.0  ;;  %v12109_v8 = vmax.f32 %v16792_v57, %v1590_v15  }
 0x429   : >> { %v12093_v46 = vmax.f32 %v9798_v26, %v1539_v59   ;;  %v12096_v49 = vmax.f32 %v16794_v21, %v1587_v61   ;;  %v7983_v31 = vpop.eup %7982  ;;  %7986 = vpow2.f32 %v1765_v47  ;;  %1911 = vadd.xlane.f32.xlu1 %v1910_v54 }
 0x42a   : >> { %5999 = vmatmul.msk.f32.gmra.mxu1 %vm1506_vm10, %v7983_v31  ;;  %7988 = vpow2.f32 %v1767_v62  ;;  %16885 = vst [vmem:[#allocation165_spill] sm:$0xff] %v12109_v8  ;;  %v16886_v40 = vmov %v12109_v8 }
 0x42b   : >> { %16881 = vst [vmem:[#allocation163_spill] sm:$0xff] %v12093_v46  ;;  %v16882_v27 = vmov %v12093_v46  ;;  %v16884_v43 = vmov %v12096_v49 }
 0x42c   : >> { %16883 = vst [vmem:[#allocation164_spill] sm:$0xff] %v12096_v49  ;;  %v1741_v25 = vsub.f32 %v11884_v9, %v16882_v27  ;;  %v1757_v59 = vsub.f32 %v11894_v60, %v16884_v43  ;;  %v1886_v9 = vsel %vm1506_vm10, %v7983_v31, 0.0  ;;  %v1758_v60 = vsub.f32 %v11906_v7, %v16886_v40 }
 0x42e   : >> { %v1783_v47 = vmul.f32 1.442695, %v1741_v25  ;;  %v7985_v61 = vpop.eup %7984  ;;  %v1815_v46 = vmul.f32 1.442695, %v1757_v59 }
 0x42f   : >> { %6015 = vmatmul.msk.f32.gmra.mxu3 %vm1506_vm10, %v7985_v61  ;;  %v7987_v54 = vpop.eup %7986  ;;  %v1545_v31 = vpop.xlane.xlu1 %1544 }
 0x430   : >> { %7990 = vpow2.f32 %v1783_v47  ;;  %1887 = vadd.xlane.f32.xlu2 %v1886_v9  ;;  %v1563_v62 = vpop.xlane.xlu2 %1562  ;;  %v1542_v18 = vpop.xlane.xlu0 %1541  ;;  %5991 = vmatmul.msk.f32.gmra.mxu0 %vm1506_vm10, %v7987_v54  ;;  %v1862_v15 = vsel %vm1506_vm10, %v7987_v54, 0.0  ;;  %v1934_v9 = vsel %vm1506_vm10, %v7985_v61, 0.0 }
 0x431   : >> { %v12120_v25 = vmax.f32 %v16804_v13, %v1563_v62   ;;  %v12123_v59 = vmax.f32 %v16813_v58, %v1542_v18   ;;  %v7989_v8 = vpop.eup %7988  ;;  %7992 = vpow2.f32 %v1815_v46  ;;  %1863 = vadd.xlane.f32.xlu0 %v1862_v15  ;;  %v12135_v18 = vmax.f32 %v16812_v38, %v1545_v31  }
 0x432   : >> { %v1865_v62 = vsel %vm1506_vm10, %v7989_v8, 0.0  ;;  %v1817_v46 = vmul.f32 1.442695, %v1758_v60 }
 0x433   : >> { %16887 = vst [vmem:[#allocation166_spill] sm:$0xff] %v12120_v25  ;;  %v16888_v22 = vmov %v12120_v25  ;;  %v16890_v49 = vmov %v12123_v59  ;;  %v16892_v40 = vmov %v12135_v18  ;;  %1866 = vadd.xlane.f32.xlu1 %v1865_v62 }
 0x434   : >> { %16889 = vst [vmem:[#allocation167_spill] sm:$0xff] %v12123_v59  ;;  %v1749_v7 = vsub.f32 %v11892_v35, %v16888_v22  ;;  %v1742_v54 = vsub.f32 %v11898_v0, %v16890_v49  ;;  %v1743_v31 = vsub.f32 %v11912_v6, %v16892_v40 }
 0x435   : >> { %16891 = vst [vmem:[#allocation168_spill] sm:$0xff] %v12135_v18 }
 0x436   : >> { %v1799_v15 = vmul.f32 1.442695, %v1749_v7  ;;  %v7991_v25 = vpop.eup %7990  ;;  %v1785_v59 = vmul.f32 1.442695, %v1742_v54 }
 0x437   : >> { %6000 = vmatmul.msk.f32.gmra.mxu1 %vm1506_vm10, %v7991_v25  ;;  %v7993_v35 = vpop.eup %7992  ;;  %v1569_v54 = vpop.xlane.xlu1 %1568 }
 0x438   : >> { %7994 = vpow2.f32 %v1799_v15  ;;  %v1566_v0 = vpop.xlane.xlu0 %1565  ;;  %v1518_v57 = vpop.xlane.xlu2 %1517  ;;  %5992 = vmatmul.msk.f32.gmra.mxu0 %vm1506_vm10, %v7989_v8  ;;  %6016 = vmatmul.msk.f32.gmra.mxu3 %vm1506_vm10, %v7993_v35  ;;  %v1937_v18 = vsel %vm1506_vm10, %v7993_v35, 0.0 }
 0x439   : >> { %7996 = vpow2.f32 %v1817_v46  ;;  %v12146_v60 = vmax.f32 %v16803_v3, %v1566_v0   ;;  %v12149_v7 = vmax.f32 %v9826_v19, %v1518_v57   ;;  %1935 = vadd.xlane.f32.xlu0 %v1934_v9  ;;  %v12161_v57 = vmax.f32 %v16802_v34, %v1569_v54  }
 0x43a   : >> { %7998 = vpow2.f32 %v1785_v59  ;;  %v1787_v46 = vmul.f32 1.442695, %v1743_v31 }
 0x43b   : >> { %16893 = vst [vmem:[#allocation169_spill] sm:$0xff] %v12146_v60  ;;  %v16894_v49 = vmov %v12146_v60  ;;  %v16896_v47 = vmov %v12149_v7  ;;  %v16898_v40 = vmov %v12161_v57  ;;  %1938 = vadd.xlane.f32.xlu1 %v1937_v18 }
 0x43c   : >> { %16895 = vst [vmem:[#allocation170_spill] sm:$0xff] %v12149_v7  ;;  %v1750_v62 = vsub.f32 %v11904_v23, %v16894_v49  ;;  %v1734_v8 = vsub.f32 %v11910_v37, %v16896_v47  ;;  %v1751_v23 = vsub.f32 %v11918_v29, %v16898_v40  ;;  %v1889_v29 = vsel %vm1506_vm10, %v7991_v25, 0.0 }
 0x43d   : >> { %16897 = vst [vmem:[#allocation171_spill] sm:$0xff] %v12161_v57 }
 0x43e   : >> { %v1801_v9 = vmul.f32 1.442695, %v1750_v62  ;;  %v7995_v15 = vpop.eup %7994  ;;  %v1769_v59 = vmul.f32 1.442695, %v1734_v8  ;;  %v1803_v7 = vmul.f32 1.442695, %v1751_v23 }
 0x43f   : >> { %v12167_v60 = vpop.eup %7996  ;;  %6008 = vmatmul.msk.f32.gmra.mxu2 %vm1506_vm10, %v7995_v15  ;;  %v1913_v37 = vsel %vm1506_vm10, %v7995_v15, 0.0  ;;  %v16901_v8 = vld [vmem:[#allocation111_spill] sm:$0xff]  ;;  %v1524_v57 = vpop.xlane.xlu1 %1523 }
 0x440   : >> { %v7999_v35 = vpop.eup %7998  ;;  %8000 = vpow2.f32 %v1801_v9  ;;  %1914 = vadd.xlane.f32.xlu2 %v1913_v37  ;;  %v1593_v31 = vpop.xlane.xlu2 %1592  ;;  %6017 = vmatmul.msk.f32.gmra.mxu3 %vm1506_vm10, %v12167_v60  ;;  %v12191_v37 = vmax.f32 %v9818_v55, %v1524_v57  }
 0x441   : >> { %v1521_v54 = vpop.xlane.xlu0 %1520  ;;  %8002 = vpow2.f32 %v1787_v46  ;;  %6001 = vmatmul.msk.f32.gmra.mxu1 %vm1506_vm10, %v7999_v35  ;;  %v12176_v62 = vmax.f32 %v16791_v10, %v1593_v31   ;;  %1890 = vadd.xlane.f32.xlu0 %v1889_v29  ;;  %v1892_v23 = vsel %vm1506_vm10, %v7999_v35, 0.0 }
 0x442   : >> { %v12179_v18 = vmax.f32 %v16901_v8, %v1521_v54   ;;  %8004 = vpow2.f32 %v1769_v59  ;;  %16904 = vst [vmem:[#allocation174_spill] sm:$0xff] %v12191_v37  ;;  %v16905_v0 = vmov %v12191_v37 }
 0x443   : >> { %16899 = vst [vmem:[#allocation172_spill] sm:$0xff] %v12176_v62  ;;  %v16900_v61 = vmov %v12176_v62  ;;  %8006 = vpow2.f32 %v1803_v7  ;;  %1893 = vadd.xlane.f32.xlu1 %v1892_v23 }
 0x444   : >> { %16902 = vst [vmem:[#allocation173_spill] sm:$0xff] %v12179_v18  ;;  %v16903_v6 = vmov %v12179_v18  ;;  %v1759_v46 = vsub.f32 %v11922_v4, %v16900_v61  ;;  %v1736_v4 = vsub.f32 %v11936_v45, %v16905_v0 }
 0x445   : >> { %v1735_v25 = vsub.f32 %v11924_v44, %v16903_v6 }
 0x446   : >> { %v1819_v59 = vmul.f32 1.442695, %v1759_v46  ;;  %v8001_v31 = vpop.eup %8000  ;;  %v1773_v7 = vmul.f32 1.442695, %v1736_v4 }
 0x447   : >> { %v1771_v54 = vmul.f32 1.442695, %v1735_v25  ;;  %v12197_v62 = vpop.eup %8002  ;;  %6009 = vmatmul.msk.f32.gmra.mxu2 %vm1506_vm10, %v8001_v31  ;;  %v1916_v44 = vsel %vm1506_vm10, %v8001_v31, 0.0  ;;  %v1599_v37 = vpop.xlane.xlu1 %1598 }
 0x448   : >> { %v8005_v35 = vpop.eup %8004  ;;  %8008 = vpow2.f32 %v1819_v59  ;;  %v1548_v18 = vpop.xlane.xlu2 %1547 }
 0x449   : >> { %v1596_v57 = vpop.xlane.xlu0 %1595  ;;  %5993 = vmatmul.msk.f32.gmra.mxu0 %vm1506_vm10, %v8005_v35  ;;  %6002 = vmatmul.msk.f32.gmra.mxu1 %vm1506_vm10, %v12197_v62  ;;  %v1868_v46 = vsel %vm1506_vm10, %v8005_v35, 0.0  ;;  %v12206_v45 = vmax.f32 %v16811_v24, %v1548_v18   ;;  %v8007_v23 = vpop.eup %8006  ;;  %8010 = vpow2.f32 %v1771_v54  ;;  %v12221_v54 = vmax.f32 %v16788_v1, %v1599_v37  }
 0x44a   : >> { %v12209_v25 = vmax.f32 %v16790_v50, %v1596_v57   ;;  %1869 = vadd.xlane.f32.xlu2 %v1868_v46  ;;  %1917 = vadd.xlane.f32.xlu0 %v1916_v44  ;;  %8012 = vpow2.f32 %v1773_v7  ;;  %v1919_v18 = vsel %vm1506_vm10, %v8007_v23, 0.0  ;;  %v1940_v37 = vsel %vm1506_vm10, %v12167_v60, 0.0 }
 0x44b   : >> { %16906 = vst [vmem:[#allocation175_spill] sm:$0xff] %v12206_v45  ;;  %v16907_v15 = vmov %v12206_v45  ;;  %v16911_v9 = vmov %v12221_v54  ;;  %1920 = vadd.xlane.f32.xlu1 %v1919_v18 }
 0x44c   : >> { %16908 = vst [vmem:[#allocation176_spill] sm:$0xff] %v12209_v25  ;;  %v16909_v29 = vmov %v12209_v25  ;;  %v1744_v31 = vsub.f32 %v11954_v33, %v16907_v15  ;;  %v1761_v18 = vsub.f32 %v11962_v14, %v16911_v9  ;;  %v16924_v9 = vld [vmem:[#allocation114_spill] sm:$0xff] }
 0x44d   : >> { %v1760_v35 = vsub.f32 %v11934_v41, %v16909_v29  ;;  %16910 = vst [vmem:[#allocation177_spill] sm:$0xff] %v12221_v54 }
 0x44e   : >> { %v1789_v44 = vmul.f32 1.442695, %v1744_v31  ;;  %v8009_v57 = vpop.eup %8008 }
 0x44f   : >> { %v1821_v46 = vmul.f32 1.442695, %v1760_v35  ;;  %6010 = vmatmul.msk.f32.gmra.mxu2 %vm1506_vm10, %v8007_v23  ;;  %6018 = vmatmul.msk.f32.gmra.mxu3 %vm1506_vm10, %v8009_v57  ;;  %v8011_v33 = vpop.eup %8010  ;;  %v1578_v54 = vpop.xlane.xlu1 %1577 }
 0x450   : >> { %8014 = vpow2.f32 %v1789_v44  ;;  %v1572_v7 = vpop.xlane.xlu2 %1571  ;;  %v1871_v25 = vsel %vm1506_vm10, %v8011_v33, 0.0  ;;  %v8013_v23 = vpop.eup %8012 }
 0x451   : >> { %v1575_v41 = vpop.xlane.xlu0 %1574  ;;  %5994 = vmatmul.msk.f32.gmra.mxu0 %vm1506_vm10, %v8011_v33  ;;  %v12232_v31 = vmax.f32 %v16801_v28, %v1572_v7   ;;  %8016 = vpow2.f32 %v1821_v46  ;;  %v1874_v7 = vsel %vm1506_vm10, %v8013_v23, 0.0 }
 0x452   : >> { %v12235_v35 = vmax.f32 %v16799_v51, %v1575_v41   ;;  %1872 = vadd.xlane.f32.xlu0 %v1871_v25  ;;  %1941 = vadd.xlane.f32.xlu2 %v1940_v37  ;;  %v12247_v41 = vmax.f32 %v16797_v48, %v1578_v54   ;;  %v1823_v25 = vmul.f32 1.442695, %v1761_v18  ;;  %v1895_v18 = vsel %vm1506_vm10, %v12197_v62, 0.0 }
 0x453   : >> { %16912 = vst [vmem:[#allocation178_spill] sm:$0xff] %v12232_v31  ;;  %v16913_v59 = vmov %v12232_v31  ;;  %1875 = vadd.xlane.f32.xlu1 %v1874_v7  ;;  %v1943_v54 = vsel %vm1506_vm10, %v8009_v57, 0.0  ;;  %v16925_v57 = vld [vmem:[#allocation116_spill] sm:$0xff] }
 0x454   : >> { %16914 = vst [vmem:[#allocation179_spill] sm:$0xff] %v12235_v35  ;;  %v16915_v45 = vmov %v12235_v35  ;;  %v1752_v60 = vsub.f32 %v11932_v39, %v16913_v59  ;;  %v16917_v4 = vmov %v12247_v41 }
 0x455   : >> { %16916 = vst [vmem:[#allocation180_spill] sm:$0xff] %v12247_v41  ;;  %v1753_v31 = vsub.f32 %v11956_v52, %v16915_v45  ;;  %v16921_v52 = vld [vmem:[#allocation110_spill] sm:$0xff] }
 0x456   : >> { %v1805_v46 = vmul.f32 1.442695, %v1752_v60  ;;  %v8015_v14 = vpop.eup %8014  ;;  %v16918_v60 = vld [vmem:[#allocation108_spill] sm:$0xff] }
 0x457   : >> { %6003 = vmatmul.msk.f32.gmra.mxu1 %vm1506_vm10, %v8015_v14  ;;  %v12254_v39 = vpop.eup %8016  ;;  %v1807_v48 = vmul.f32 1.442695, %v1753_v31 }
 0x458   : >> { %8018 = vpow2.f32 %v1805_v46  ;;  %v1527_v33 = vpop.xlane.xlu2 %1526  ;;  %6019 = vmatmul.msk.f32.gmra.mxu3 %vm1506_vm10, %v12254_v39  ;;  %v1554_v46 = vpop.xlane.xlu1 %1553 }
 0x459   : >> { %v1551_v35 = vpop.xlane.xlu0 %1550  ;;  %5995 = vmatmul.msk.f32.gmra.mxu0 %vm1506_vm10, %v8013_v23  ;;  %v12266_v41 = vmax.f32 %v16921_v52, %v1527_v33   ;;  %8020 = vpow2.f32 %v1823_v25 }
 0x45a   : >> { %v12263_v7 = vmax.f32 %v16918_v60, %v1551_v35   ;;  %1896 = vadd.xlane.f32.xlu2 %v1895_v18  ;;  %1944 = vadd.xlane.f32.xlu0 %v1943_v54  ;;  %v16929_v54 = vld [vmem:[#allocation115_spill] sm:$0xff]  ;;  %8022 = vpow2.f32 %v1807_v48 }
 0x45b   : >> { %16922 = vst [vmem:[#allocation182_spill] sm:$0xff] %v12266_v41  ;;  %v16923_v44 = vmov %v12266_v41  ;;  %v1754_v31 = vsub.f32 %v16929_v54, %v16917_v4  ;;  %v16934_v54 = vld [vmem:[#allocation109_spill] sm:$0xff] }
 0x45c   : >> { %16919 = vst [vmem:[#allocation181_spill] sm:$0xff] %v12263_v7  ;;  %v16920_v37 = vmov %v12263_v7  ;;  %v1737_v35 = vsub.f32 %v16925_v57, %v16923_v44  ;;  %v16926_v7 = vld [vmem:[#allocation107_spill] sm:$0xff] }
 0x45d   : >> { %v1745_v1 = vsub.f32 %v16924_v9, %v16920_v37  ;;  %v12277_v33 = vmax.f32 %v16926_v7, %v1554_v46   ;;  %v16930_v9 = vld [vmem:[#allocation117_spill] sm:$0xff]  ;;  %v1809_v7 = vmul.f32 1.442695, %v1754_v31 }
 0x45e   : >> { %v8019_v18 = vpop.eup %8018  ;;  %v1775_v41 = vmul.f32 1.442695, %v1737_v35  ;;  %v16931_v35 = vld [vmem:[#allocation97_spill] sm:$0xff] }
 0x45f   : >> { %16927 = vst [vmem:[#allocation183_spill] sm:$0xff] %v12277_v33  ;;  %v16928_v45 = vmov %v12277_v33  ;;  %v1791_v25 = vmul.f32 1.442695, %v1745_v1  ;;  %6011 = vmatmul.msk.f32.gmra.mxu2 %vm1506_vm10, %v8019_v18  ;;  %v1922_v57 = vsel %vm1506_vm10, %v8019_v18, 0.0  ;;  %v8021_v62 = vpop.eup %8020  ;;  %v1898_v33 = vsel %vm1506_vm10, %v8015_v14, 0.0 }
 0x460   : >> { %v1746_v51 = vsub.f32 %v16930_v9, %v16928_v45  ;;  %v1602_v46 = vpop.xlane.xlu2 %1601  ;;  %6020 = vmatmul.msk.f32.gmra.mxu3 %vm1506_vm10, %v8021_v62  ;;  %v16937_v45 = vld [vmem:[#allocation119_spill] sm:$0xff]  ;;  %v8023_v52 = vpop.eup %8022 }
 0x461   : >> { %8024 = vpow2.f32 %v1791_v25  ;;  %v1530_v1 = vpop.xlane.xlu0 %1529  ;;  %v12290_v18 = vmax.f32 %v16931_v35, %v1602_v46   ;;  %v16938_v46 = vld [vmem:[#allocation118_spill] sm:$0xff] }
 0x462   : >> { %v12293_v48 = vmax.f32 %v16934_v54, %v1530_v1   ;;  %8026 = vpow2.f32 %v1775_v41  ;;  %1923 = vadd.xlane.f32.xlu2 %v1922_v57  ;;  %1899 = vadd.xlane.f32.xlu0 %v1898_v33  ;;  %v1793_v9 = vmul.f32 1.442695, %v1746_v51  ;;  %v1925_v57 = vsel %vm1506_vm10, %v8023_v52, 0.0 }
 0x463   : >> { %16932 = vst [vmem:[#allocation184_spill] sm:$0xff] %v12290_v18  ;;  %v16933_v4 = vmov %v12290_v18  ;;  %8028 = vpow2.f32 %v1809_v7 }
 0x464   : >> { %16935 = vst [vmem:[#allocation185_spill] sm:$0xff] %v12293_v48  ;;  %v16936_v23 = vmov %v12293_v48  ;;  %v1762_v44 = vsub.f32 %v16937_v45, %v16933_v4  ;;  %8030 = vpow2.f32 %v1793_v9 }
 0x465   : >> { %v1738_v18 = vsub.f32 %v16938_v46, %v16936_v23 }
 0x466   : >> { %v1825_v1 = vmul.f32 1.442695, %v1762_v44 }
 0x467   : >> { %v8025_v48 = vpop.eup %8024  ;;  %v1777_v31 = vmul.f32 1.442695, %v1738_v18  ;;  %6012 = vmatmul.msk.f32.gmra.mxu2 %vm1506_vm10, %v8023_v52 }
 0x468   : >> { %6004 = vmatmul.msk.f32.gmra.mxu1 %vm1506_vm10, %v8025_v48  ;;  %v1901_v51 = vsel %vm1506_vm10, %v8025_v48, 0.0  ;;  %v8027_v41 = vpop.eup %8026  ;;  %8032 = vpow2.f32 %v1825_v1  ;;  %v1946_v1 = vsel %vm1506_vm10, %v12254_v39, 0.0  ;;  %v1949_v48 = vsel %vm1506_vm10, %v8021_v62, 0.0  ;;  %v16943_v62 = vld [vmem:[#allocation96_spill] sm:$0xff] }
 0x469   : >> { %1902 = vadd.xlane.f32.xlu1 %v1901_v51  ;;  %5996 = vmatmul.msk.f32.gmra.mxu0 %vm1506_vm10, %v8027_v41  ;;  %v1877_v45 = vsel %vm1506_vm10, %v8027_v41, 0.0  ;;  %8034 = vpow2.f32 %v1777_v31  ;;  %v8029_v44 = vpop.eup %8028  ;;  %v16939_v51 = vsub.f32 %v9838_v17, %v16862_v12  ;;  %v16953_v12 = vld [vmem:[#allocation79_spill] sm:$0xff] }
 0x46a   : >> { %1878 = vadd.xlane.f32.xlu2 %v1877_v45  ;;  %1926 = vadd.xlane.f32.xlu0 %v1925_v57  ;;  %v8031_v7 = vpop.eup %8030  ;;  %v1928_v9 = vsel %vm1506_vm10, %v8029_v44, 0.0  ;;  %v16940_v45 = vld [vmem:[#allocation155_spill] sm:$0xff] }
 0x46b   : >> { %v1904_v52 = vsel %vm1506_vm10, %v8031_v7, 0.0  ;;  %v1667_v41 = vmul.f32 1.442695, %v16939_v51  ;;  %v16941_v57 = vsub.f32 %v16806_v30, %v16940_v45  ;;  %v16946_v30 = vld [vmem:[#allocation158_spill] sm:$0xff] }
 0x46d   : >> { %8036 = vpow2.f32 %v1667_v41 }
 0x46e   : >> { %v8033_v33 = vpop.eup %8032 }
 0x46f   : >> { %6013 = vmatmul.msk.f32.gmra.mxu2 %vm1506_vm10, %v8029_v44  ;;  %v8035_v46 = vpop.eup %8034  ;;  %6021 = vmatmul.msk.f32.gmra.mxu3 %vm1506_vm10, %v8033_v33  ;;  %v1952_v31 = vsel %vm1506_vm10, %v8033_v33, 0.0  ;;  %v1699_v44 = vmul.f32 1.442695, %v16941_v57 }
 0x470   : >> { %6005 = vmatmul.msk.f32.gmra.mxu1 %vm1506_vm10, %v8031_v7  ;;  %v1880_v18 = vsel %vm1506_vm10, %v8035_v46, 0.0  ;;  %v16942_v7 = vsub.f32 %v9806_v63, %v16866_v11  ;;  %v16948_v63 = vld [vmem:[#allocation149_spill] sm:$0xff] }
 0x471   : >> { %1929 = vadd.xlane.f32.xlu1 %v1928_v9  ;;  %5997 = vmatmul.msk.f32.gmra.mxu0 %vm1506_vm10, %v8035_v46  ;;  %8038 = vpow2.f32 %v1699_v44  ;;  %v16944_v46 = vsub.f32 %v16796_v42, %v16868_v53  ;;  %v16951_v42 = vld [vmem:[#allocation159_spill] sm:$0xff] }
 0x472   : >> { %1905 = vadd.xlane.f32.xlu2 %v1904_v52  ;;  %1881 = vadd.xlane.f32.xlu0 %v1880_v18  ;;  %v1683_v39 = vmul.f32 1.442695, %v16942_v7  ;;  %v16950_v7 = vld [vmem:[#allocation88_spill] sm:$0xff] }
 0x473   : >> { %v8037_v9 = vpop.eup %8036  ;;  %v1715_v52 = vmul.f32 1.442695, %v16944_v46  ;;  %v16952_v46 = vsub.f32 %v9802_v36, %v16951_v42 }
 0x474   : >> { %8040 = vpow2.f32 %v1683_v39  ;;  %v1827_v33 = vmul.f32 %v16943_v62, %v8037_v9  ;;  %v1987_v11 = vmul.f32 %v16953_v12, %v8037_v9 }
 0x475   : >> { %8042 = vpow2.f32 %v1715_v52  ;;  %v16955_v52 = vsub.f32 %v16875_v16, %v16877_v20 }
 0x479   : >> { %1947 = vadd.xlane.f32.xlu1 %v1946_v1  ;;  %v8039_v1 = vpop.eup %8038 }
 0x47a   : >> { %1950 = vadd.xlane.f32.xlu2 %v1949_v48  ;;  %1953 = vadd.xlane.f32.xlu0 %v1952_v31  ;;  %v16947_v48 = vsub.f32 %v16805_v56, %v16946_v30  ;;  %v8041_v51 = vpop.eup %8040  ;;  %v1843_v41 = vmul.f32 %v16948_v63, %v8039_v1  ;;  %v16957_v63 = vsub.f32 %v16878_v32, %v16880_v5 }
 0x47b   : >> { %v1835_v39 = vmul.f32 %v16950_v7, %v8041_v51  ;;  %v8043_v30 = vpop.eup %8042  ;;  %v16960_v7 = vld [vmem:[#allocation148_spill] sm:$0xff] }
 0x47c   : >> { %v1701_v31 = vmul.f32 1.442695, %v16947_v48  ;;  %v1669_v48 = vmul.f32 1.442695, %v16955_v52  ;;  %v1671_v36 = vmul.f32 1.442695, %v16957_v63 }
 0x47e   : >> { %8044 = vpow2.f32 %v1701_v31 }
 0x486   : >> { %v1861_v17 = vpop.xlane.xlu2 %1860 }
 0x487   : >> { %v12333_v18 = vadd.f32 %v1861_v17, %v1827_v33   ;;  %v1685_v17 = vmul.f32 1.442695, %v16952_v46  ;;  %v16961_v46 = vld [vmem:[#allocation133_spill] sm:$0xff] }
 0x488   : >> { %v1995_v16 = vmul.f32 %v16961_v46, %v8041_v51  ;;  %v16968_v51 = vld [vmem:[#allocation87_spill] sm:$0xff] }
 0x489   : >> { %16945 = vst [vmem:[#allocation186_spill] sm:$0xff] %v12333_v18  ;;  %8046 = vpow2.f32 %v1685_v17 }
 0x48a   : >> { %8048 = vpow2.f32 %v1669_v48 }
 0x48b   : >> { %8050 = vpow2.f32 %v1671_v36 }
 0x48f   : >> { %v2060_v56 = vpop.f32.mrf.mxu0 }
 0x490   : >> { %v12351_v31 = vadd.f32 %v2060_v56, %v1987_v11   ;;  %v16963_v56 = vld [vmem:[#allocation160_spill] sm:$0xff] }
 0x491   : >> { %v16964_v32 = vsub.f32 %v16795_v2, %v16963_v56  ;;  %v16970_v2 = vsub.f32 %v16804_v13, %v16888_v22  ;;  %v16977_v13 = vld [vmem:[#allocation167_spill] sm:$0xff] }
 0x492   : >> { %16956 = vst [vmem:[#allocation189_spill] sm:$0xff] %v12351_v31  ;;  %v16966_v31 = vld [vmem:[#allocation129_spill] sm:$0xff] }
 0x493   : >> { %v1909_v57 = vpop.xlane.xlu0 %1908  ;;  %v1717_v52 = vmul.f32 1.442695, %v16964_v32  ;;  %v2003_v63 = vmul.f32 %v16966_v31, %v8039_v1 }
 0x494   : >> { %v12339_v33 = vadd.f32 %v1909_v57, %v1843_v41   ;;  %v1885_v18 = vpop.xlane.xlu1 %1884  ;;  %v16958_v41 = vld [vmem:[#allocation82_spill] sm:$0xff] }
 0x495   : >> { %v12346_v45 = vadd.f32 %v1885_v18, %v1835_v39   ;;  %v1851_v57 = vmul.f32 %v16958_v41, %v8043_v30  ;;  %v16967_v41 = vsub.f32 %v16794_v21, %v16884_v43  ;;  %8052 = vpow2.f32 %v1717_v52  ;;  %v16975_v52 = vld [vmem:[#allocation94_spill] sm:$0xff] }
 0x496   : >> { %16949 = vst [vmem:[#allocation187_spill] sm:$0xff] %v12339_v33  ;;  %v8045_v33 = vpop.eup %8044  ;;  %v16973_v21 = vsub.f32 %v9798_v26, %v16882_v27 }
 0x497   : >> { %16954 = vst [vmem:[#allocation188_spill] sm:$0xff] %v12346_v45  ;;  %v1844_v39 = vmul.f32 %v16960_v7, %v8045_v33  ;;  %v8047_v17 = vpop.eup %8046 }
 0x498   : >> { %v8049_v48 = vpop.eup %8048  ;;  %v1836_v36 = vmul.f32 %v16968_v51, %v8047_v17  ;;  %v1687_v32 = vmul.f32 1.442695, %v16973_v21  ;;  %v16978_v51 = vsub.f32 %v16813_v58, %v16977_v13  ;;  %v16984_v58 = vld [vmem:[#allocation81_spill] sm:$0xff] }
 0x49b   : >> { %v1933_v12 = vpop.xlane.xlu2 %1932 }
 0x49c   : >> { %v12357_v9 = vadd.f32 %v1933_v12, %v1851_v57   ;;  %v1912_v42 = vpop.xlane.xlu1 %1911  ;;  %v1719_v57 = vmul.f32 1.442695, %v16967_v41 }
 0x49d   : >> { %v12361_v39 = vadd.f32 %v1912_v42, %v1844_v39   ;;  %v2125_v18 = vpop.f32.mrf.mxu1  ;;  %v1703_v42 = vmul.f32 1.442695, %v16970_v2  ;;  %v1689_v2 = vmul.f32 1.442695, %v16978_v51 }
 0x49e   : >> { %16959 = vst [vmem:[#allocation190_spill] sm:$0xff] %v12357_v9  ;;  %v12366_v46 = vadd.f32 %v2125_v18, %v1995_v16   ;;  %8054 = vpow2.f32 %v1719_v57 }
 0x49f   : >> { %16962 = vst [vmem:[#allocation191_spill] sm:$0xff] %v12361_v39  ;;  %v8051_v39 = vpop.eup %8050  ;;  %8056 = vpow2.f32 %v1703_v42 }
 0x4a0   : >> { %16965 = vst [vmem:[#allocation192_spill] sm:$0xff] %v12366_v46  ;;  %v16971_v46 = vld [vmem:[#allocation95_spill] sm:$0xff]  ;;  %v8053_v62 = vpop.eup %8052  ;;  %8058 = vpow2.f32 %v1687_v32 }
 0x4a1   : >> { %v1828_v18 = vmul.f32 %v16971_v46, %v8049_v48  ;;  %8060 = vpow2.f32 %v1689_v2  ;;  %v1852_v21 = vmul.f32 %v16984_v58, %v8053_v62  ;;  %v16995_v58 = vld [vmem:[#allocation84_spill] sm:$0xff] }
 0x4a2   : >> { %v2190_v12 = vpop.f32.mrf.mxu2 }
 0x4a3   : >> { %v12373_v16 = vadd.f32 %v2190_v12, %v2003_v63   ;;  %v1888_v7 = vpop.xlane.xlu2 %1887  ;;  %v16976_v63 = vld [vmem:[#allocation76_spill] sm:$0xff] }
 0x4a4   : >> { %v12379_v56 = vadd.f32 %v1888_v7, %v1836_v36   ;;  %v1864_v1 = vpop.xlane.xlu0 %1863  ;;  %v1996_v41 = vmul.f32 %v16976_v63, %v8047_v17  ;;  %v16979_v7 = vld [vmem:[#allocation125_spill] sm:$0xff]  ;;  %v8055_v17 = vpop.eup %8054  ;;  %v16987_v63 = vld [vmem:[#allocation138_spill] sm:$0xff] }
 0x4a5   : >> { %v16969_v14 = vmov %v12373_v16  ;;  %v12384_v31 = vadd.f32 %v1864_v1, %v1828_v18   ;;  %v1829_v16 = vmul.f32 %v16975_v52, %v8051_v39  ;;  %v16982_v18 = vld [vmem:[#allocation72_spill] sm:$0xff]  ;;  %v8057_v32 = vpop.eup %8056 }
 0x4a6   : >> { %16972 = vst [vmem:[#allocation193_spill] sm:$0xff] %v12379_v56  ;;  %v1867_v46 = vpop.xlane.xlu1 %1866  ;;  %v2011_v56 = vmul.f32 %v16979_v7, %v8043_v30  ;;  %v2004_v1 = vmul.f32 %v16982_v18, %v8045_v33  ;;  %v16988_v33 = vsub.f32 %v9826_v19, %v16896_v47 }
 0x4a7   : >> { %16974 = vst [vmem:[#allocation194_spill] sm:$0xff] %v12384_v31  ;;  %v2128_v36 = vpop.f32.mrf.mxu1  ;;  %v12392_v22 = vadd.f32 %v1867_v46, %v1829_v16   ;;  %v16985_v31 = vsub.f32 %v16803_v3, %v16894_v49 }
 0x4a8   : >> { %v12394_v26 = vadd.f32 %v2128_v36, %v1996_v41   ;;  %v1988_v41 = vmul.f32 %v16987_v63, %v8049_v48  ;;  %v1673_v13 = vmul.f32 1.442695, %v16988_v33  ;;  %v16991_v36 = vld [vmem:[#allocation143_spill] sm:$0xff]  ;;  %v16994_v48 = vsub.f32 %v16802_v34, %v16898_v40  ;;  %v16998_v63 = vld [vmem:[#allocation99_spill] sm:$0xff]  ;;  %v17004_v34 = vld [vmem:[#allocation168_spill] sm:$0xff] }
 0x4a9   : >> { %16980 = vst [vmem:[#allocation195_spill] sm:$0xff] %v12392_v22  ;;  %v1705_v30 = vmul.f32 1.442695, %v16985_v31 }
 0x4aa   : >> { %16981 = vst [vmem:[#allocation196_spill] sm:$0xff] %v12394_v26  ;;  %v2255_v57 = vpop.f32.mrf.mxu3  ;;  %v1707_v19 = vmul.f32 1.442695, %v16994_v48 }
 0x4ab   : >> { %v12397_v7 = vadd.f32 %v2255_v57, %v2011_v56   ;;  %v2193_v42 = vpop.f32.mrf.mxu2  ;;  %v8059_v56 = vpop.eup %8058  ;;  %v16993_v57 = vld [vmem:[#allocation68_spill] sm:$0xff]  ;;  %8062 = vpow2.f32 %v1705_v30  ;;  %v17003_v30 = vld [vmem:[#allocation86_spill] sm:$0xff] }
 0x4ac   : >> { %v12403_v52 = vadd.f32 %v2193_v42, %v2004_v1   ;;  %v1936_v16 = vpop.xlane.xlu0 %1935  ;;  %v2012_v18 = vmul.f32 %v16993_v57, %v8053_v62  ;;  %v8061_v1 = vpop.eup %8060  ;;  %8064 = vpow2.f32 %v1673_v13  ;;  %v16999_v57 = vld [vmem:[#allocation165_spill] sm:$0xff]  ;;  %v17007_v13 = vld [vmem:[#allocation78_spill] sm:$0xff] }
 0x4ad   : >> { %v16983_v25 = vmov %v12397_v7  ;;  %v12409_v51 = vadd.f32 %v1936_v16, %v1852_v21   ;;  %v2063_v2 = vpop.f32.mrf.mxu0  ;;  %v1853_v7 = vmul.f32 %v16991_v36, %v8055_v17  ;;  %v1845_v21 = vmul.f32 %v16995_v58, %v8057_v32 }
 0x4ae   : >> { %v16986_v12 = vmov %v12403_v52  ;;  %v12411_v46 = vadd.f32 %v2063_v2, %v1988_v41   ;;  %v1939_v3 = vpop.xlane.xlu1 %1938  ;;  %v16997_v52 = vld [vmem:[#allocation75_spill] sm:$0xff]  ;;  %v17000_v36 = vmov %v16999_v57  ;;  %v17001_v41 = vsub.f32 %v16998_v63, %v16999_v57 }
 0x4af   : >> { %16989 = vst [vmem:[#allocation197_spill] sm:$0xff] %v12409_v51  ;;  %v12414_v26 = vadd.f32 %v1939_v3, %v1853_v7   ;;  %v1997_v16 = vmul.f32 %v16997_v52, %v8059_v56  ;;  %v1837_v2 = vmul.f32 %v17003_v30, %v8059_v56  ;;  %v17006_v7 = vsub.f32 %v16812_v38, %v17004_v34  ;;  %v17013_v56 = vld [vmem:[#allocation153_spill] sm:$0xff]  ;;  %v17017_v30 = vld [vmem:[#allocation67_spill] sm:$0xff] }
 0x4b0   : >> { %16990 = vst [vmem:[#allocation198_spill] sm:$0xff] %v12411_v46  ;;  %v1721_v33 = vmul.f32 1.442695, %v17001_v41  ;;  %8066 = vpow2.f32 %v1707_v19  ;;  %v17011_v57 = vsub.f32 %v16901_v8, %v16903_v6  ;;  %v1838_v52 = vmul.f32 %v17013_v56, %v8061_v1 }
 0x4b1   : >> { %16992 = vst [vmem:[#allocation199_spill] sm:$0xff] %v12414_v26  ;;  %v17005_v26 = vmov %v17004_v34  ;;  %v1691_v3 = vmul.f32 1.442695, %v17006_v7  ;;  %v8063_v63 = vpop.eup %8062  ;;  %v17014_v38 = vsub.f32 %v9818_v55, %v16905_v0  ;;  %v17018_v34 = vld [vmem:[#allocation93_spill] sm:$0xff]  ;;  %v17019_v55 = vld [vmem:[#allocation147_spill] sm:$0xff] }
 0x4b2   : >> { %v2258_v42 = vpop.f32.mrf.mxu3  ;;  %8068 = vpow2.f32 %v1721_v33  ;;  %v8065_v41 = vpop.eup %8064  ;;  %17147 = vst [vmem:[#allocation72_spill] sm:$0xff] %v16986_v12 }
 0x4b3   : >> { %v12421_v51 = vadd.f32 %v2258_v42, %v2012_v18   ;;  %v1915_v31 = vpop.xlane.xlu2 %1914  ;;  %v1989_v18 = vmul.f32 %v17007_v13, %v8051_v39  ;;  %v1677_v39 = vmul.f32 1.442695, %v17014_v38  ;;  %8070 = vpow2.f32 %v1691_v3  ;;  %v17021_v3 = vld [vmem:[#allocation74_spill] sm:$0xff]  ;;  %v17027_v38 = vld [vmem:[#allocation71_spill] sm:$0xff]  ;;  %17226 = vst [vmem:[#allocation101_spill] sm:$0xff] %v17000_v36 }
 0x4b4   : >> { %v12427_v62 = vadd.f32 %v1915_v31, %v1845_v21   ;;  %v2131_v46 = vpop.f32.mrf.mxu1  ;;  %v1891_v48 = vpop.xlane.xlu0 %1890  ;;  %v1675_v21 = vmul.f32 1.442695, %v17011_v57  ;;  %v1830_v7 = vmul.f32 %v17018_v34, %v8065_v41  ;;  %v17026_v57 = vld [vmem:[#allocation83_spill] sm:$0xff]  ;;  %17252 = vst [vmem:[#allocation116_spill] sm:$0xff] %v17005_v26  ;;  %v17255_v26 = vld [vmem:[#allocation163_spill] sm:$0xff] }
 0x4b5   : >> { %v16996_v47 = vmov %v12421_v51  ;;  %v12434_v51 = vadd.f32 %v2131_v46, %v1997_v16   ;;  %v12436_v42 = vadd.f32 %v1891_v48, %v1837_v2   ;;  %v2066_v58 = vpop.f32.mrf.mxu0  ;;  %v2013_v2 = vmul.f32 %v17017_v30, %v8055_v17  ;;  %v17031_v30 = vld [vmem:[#allocation66_spill] sm:$0xff]  ;;  %v17239_v36 = vld [vmem:[#allocation169_spill] sm:$0xff] }
 0x4b6   : >> { %17002 = vst [vmem:[#allocation200_spill] sm:$0xff] %v12427_v62  ;;  %v12441_v31 = vadd.f32 %v2066_v58, %v1989_v18   ;;  %v1894_v16 = vpop.xlane.xlu1 %1893  ;;  %v17016_v62 = vsub.f32 %v16791_v10, %v16900_v61  ;;  %8072 = vpow2.f32 %v1675_v21  ;;  %v12453_v46 = vpop.eup %8066  ;;  %v1846_v48 = vmul.f32 %v17019_v55, %v8063_v63 }
 0x4b7   : >> { %17008 = vst [vmem:[#allocation201_spill] sm:$0xff] %v12434_v51  ;;  %v17009_v40 = vmov %v12434_v51  ;;  %v12447_v19 = vadd.f32 %v1894_v16, %v1838_v52   ;;  %8074 = vpow2.f32 %v1677_v39  ;;  %v1998_v51 = vmul.f32 %v17021_v3, %v8061_v1 }
 0x4b8   : >> { %17010 = vst [vmem:[#allocation202_spill] sm:$0xff] %v12436_v42  ;;  %v1723_v8 = vmul.f32 1.442695, %v17016_v62  ;;  %v8069_v58 = vpop.eup %8068  ;;  %v1847_v21 = vmul.f32 %v17026_v57, %v12453_v46  ;;  %v2005_v39 = vmul.f32 %v17027_v38, %v8057_v32 }
 0x4b9   : >> { %17012 = vst [vmem:[#allocation203_spill] sm:$0xff] %v12441_v31  ;;  %v8071_v56 = vpop.eup %8070 }
 0x4ba   : >> { %17015 = vst [vmem:[#allocation204_spill] sm:$0xff] %v12447_v19  ;;  %8076 = vpow2.f32 %v1723_v8 }
 0x4bb   : >> { %v2261_v33 = vpop.f32.mrf.mxu3  ;;  %17139 = vst [vmem:[#allocation68_spill] sm:$0xff] %v16996_v47 }
 0x4bc   : >> { %v12457_v42 = vadd.f32 %v2261_v33, %v2013_v2   ;;  %v2014_v2 = vmul.f32 %v17031_v30, %v8069_v58  ;;  %v17032_v33 = vsub.f32 %v16801_v28, %v16913_v59  ;;  %17154 = vst [vmem:[#allocation75_spill] sm:$0xff] %v17009_v40  ;;  %v17201_v40 = vld [vmem:[#allocation188_spill] sm:$0xff] }
 0x4bd   : >> { %v1870_v13 = vpop.xlane.xlu2 %1869  ;;  %v1918_v18 = vpop.xlane.xlu0 %1917  ;;  %17202 = vst [vmem:[#allocation88_spill] sm:$0xff] %v17201_v40  ;;  %v17217_v40 = vld [vmem:[#allocation186_spill] sm:$0xff] }
 0x4be   : >> { %v17020_v6 = vmov %v12457_v42  ;;  %v12460_v10 = vadd.f32 %v1870_v13, %v1830_v7   ;;  %v12462_v31 = vadd.f32 %v1918_v18, %v1846_v48   ;;  %v2134_v17 = vpop.f32.mrf.mxu1  ;;  %v1921_v52 = vpop.xlane.xlu1 %1920  ;;  %v1709_v34 = vmul.f32 1.442695, %v17032_v33  ;;  %v17033_v7 = vld [vmem:[#allocation92_spill] sm:$0xff]  ;;  %v17034_v48 = vld [vmem:[#allocation142_spill] sm:$0xff]  ;;  %17218 = vst [vmem:[#allocation96_spill] sm:$0xff] %v17217_v40 }
 0x4bf   : >> { %v12464_v17 = vadd.f32 %v2134_v17, %v1998_v51   ;;  %v8073_v42 = vpop.eup %8072  ;;  %v12469_v57 = vadd.f32 %v1921_v52, %v1847_v21   ;;  %v1854_v13 = vmul.f32 %v17034_v48, %v8069_v58  ;;  %v17036_v51 = vld [vmem:[#allocation137_spill] sm:$0xff]  ;;  %v17043_v52 = vld [vmem:[#allocation91_spill] sm:$0xff]  ;;  %17138 = vst [vmem:[#allocation67_spill] sm:$0xff] %v17020_v6  ;;  %v17241_v40 = vld [vmem:[#allocation166_spill] sm:$0xff] }
 0x4c0   : >> { %17022 = vst [vmem:[#allocation205_spill] sm:$0xff] %v12460_v10  ;;  %v12471_v16 = vpop.eup %8074  ;;  %v1831_v55 = vmul.f32 %v17033_v7, %v8073_v42  ;;  %v17037_v10 = vld [vmem:[#allocation132_spill] sm:$0xff]  ;;  %v17050_v7 = vld [vmem:[#allocation182_spill] sm:$0xff]  ;;  %v17293_v26 = vld [vmem:[#allocation201_spill] sm:$0xff] (%p12620_p4) }
 0x4c1   : >> { %17023 = vst [vmem:[#allocation206_spill] sm:$0xff] %v12462_v31  ;;  %v17025_v20 = vmov %v12464_v17  ;;  %v17029_v31 = vsub.f32 %v16811_v24, %v16907_v15  ;;  %v1990_v24 = vmul.f32 %v17036_v51, %v8065_v41  ;;  %v17045_v41 = vld [vmem:[#allocation70_spill] sm:$0xff] }
 0x4c2   : >> { %17024 = vst [vmem:[#allocation207_spill] sm:$0xff] %v12464_v17  ;;  %v2196_v1 = vpop.f32.mrf.mxu2  ;;  %v1999_v17 = vmul.f32 %v17037_v10, %v8071_v56 }
 0x4c3   : >> { %17028 = vst [vmem:[#allocation208_spill] sm:$0xff] %v12469_v57  ;;  %v1693_v19 = vmul.f32 1.442695, %v17029_v31  ;;  %v12476_v62 = vadd.f32 %v2196_v1, %v2005_v39   ;;  %v2264_v32 = vpop.f32.mrf.mxu3  ;;  %v1832_v39 = vmul.f32 %v17043_v52, %v12471_v16  ;;  %v8077_v31 = vpop.eup %8076 }
 0x4c4   : >> { %v12484_v18 = vadd.f32 %v2264_v32, %v2014_v2   ;;  %v17046_v2 = vsub.f32 %v16790_v50, %v16909_v29  ;;  %17153 = vst [vmem:[#allocation74_spill] sm:$0xff] %v17025_v20 }
 0x4c5   : >> { %v17030_v0 = vmov %v12476_v62  ;;  %v1873_v8 = vpop.xlane.xlu0 %1872  ;;  %v1942_v3 = vpop.xlane.xlu2 %1941  ;;  %v2006_v62 = vmul.f32 %v17045_v41, %v8063_v63  ;;  %8078 = vpow2.f32 %v1693_v19  ;;  %v17054_v63 = vld [vmem:[#allocation141_spill] sm:$0xff]  ;;  %v17064_v41 = vld [vmem:[#allocation124_spill] sm:$0xff]  ;;  %17240 = vst [vmem:[#allocation109_spill] sm:$0xff] %v17239_v36 }
 0x4c6   : >> { %v17035_v45 = vmov %v12484_v18  ;;  %v12488_v57 = vadd.f32 %v1873_v8, %v1831_v55   ;;  %v12490_v32 = vadd.f32 %v1942_v3, %v1854_v13   ;;  %v2069_v21 = vpop.f32.mrf.mxu0  ;;  %v2137_v28 = vpop.f32.mrf.mxu1  ;;  %v1725_v33 = vmul.f32 1.442695, %v17046_v2  ;;  %v17053_v18 = vld [vmem:[#allocation85_spill] sm:$0xff]  ;;  %v17066_v2 = vld [vmem:[#allocation177_spill] sm:$0xff]  ;;  %17146 = vst [vmem:[#allocation71_spill] sm:$0xff] %v17030_v0 }
 0x4c7   : >> { %v12492_v58 = vadd.f32 %v2069_v21, %v1990_v24   ;;  %v12494_v38 = vadd.f32 %v2137_v28, %v1999_v17   ;;  %v1876_v1 = vpop.xlane.xlu1 %1875  ;;  %8080 = vpow2.f32 %v1709_v34  ;;  %v17051_v55 = vmov %v17050_v7  ;;  %17137 = vst [vmem:[#allocation66_spill] sm:$0xff] %v17035_v45  ;;  %v17256_v36 = vld [vmem:[#allocation159_spill] sm:$0xff] }
 0x4c8   : >> { %17038 = vst [vmem:[#allocation209_spill] sm:$0xff] %v12488_v57  ;;  %v12498_v24 = vadd.f32 %v1876_v1, %v1832_v39   ;;  %v1839_v8 = vmul.f32 %v17053_v18, %v8071_v56  ;;  %v1855_v19 = vmul.f32 %v17054_v63, %v8077_v31  ;;  %8082 = vpow2.f32 %v1725_v33  ;;  %v17063_v39 = vld [vmem:[#allocation128_spill] sm:$0xff] }
 0x4c9   : >> { %17039 = vst [vmem:[#allocation210_spill] sm:$0xff] %v12490_v32  ;;  %v17042_v11 = vmov %v12494_v38  ;;  %v17049_v32 = vld [vmem:[#allocation110_spill] sm:$0xff]  ;;  %v2007_v1 = vmul.f32 %v17063_v39, %v12453_v46  ;;  %v17067_v63 = vmov %v17066_v2  ;;  %v17081_v39 = vld [vmem:[#allocation107_spill] sm:$0xff] }
 0x4ca   : >> { %17040 = vst [vmem:[#allocation211_spill] sm:$0xff] %v12492_v58  ;;  %v2199_v30 = vpop.f32.mrf.mxu2  ;;  %v17048_v58 = vsub.f32 %v16918_v60, %v16920_v37  ;;  %v17052_v48 = vsub.f32 %v17049_v32, %v17050_v7  ;;  %v17058_v60 = vld [vmem:[#allocation106_spill] sm:$0xff] }
 0x4cb   : >> { %17041 = vst [vmem:[#allocation212_spill] sm:$0xff] %v12494_v38  ;;  %v12504_v62 = vadd.f32 %v2199_v30, %v2006_v62   ;;  %v8079_v28 = vpop.eup %8078  ;;  %v17072_v7 = vld [vmem:[#allocation102_spill] sm:$0xff] }
 0x4cc   : >> { %17044 = vst [vmem:[#allocation213_spill] sm:$0xff] %v12498_v24  ;;  %v1695_v38 = vmul.f32 1.442695, %v17048_v58  ;;  %v1679_v13 = vmul.f32 1.442695, %v17052_v48  ;;  %v17055_v24 = vld [vmem:[#allocation136_spill] sm:$0xff] }
 0x4cd   : >> { %v17047_v15 = vmov %v12504_v62  ;;  %v1897_v3 = vpop.xlane.xlu2 %1896  ;;  %v1945_v51 = vpop.xlane.xlu0 %1944  ;;  %v1991_v50 = vmul.f32 %v17055_v24, %v8073_v42  ;;  %v2015_v42 = vmul.f32 %v17064_v41, %v8077_v31  ;;  %v17065_v62 = vld [vmem:[#allocation98_spill] sm:$0xff]  ;;  %17242 = vst [vmem:[#allocation110_spill] sm:$0xff] %v17241_v40 }
 0x4ce   : >> { %v12515_v10 = vadd.f32 %v1897_v3, %v1839_v8   ;;  %v12517_v30 = vadd.f32 %v1945_v51, %v1855_v19   ;;  %v2072_v34 = vpop.f32.mrf.mxu0  ;;  %v17059_v51 = vld [vmem:[#allocation179_spill] sm:$0xff]  ;;  %8084 = vpow2.f32 %v1695_v38  ;;  %v8081_v52 = vpop.eup %8080  ;;  %v17068_v58 = vsub.f32 %v17065_v62, %v17066_v2  ;;  %v17073_v48 = vld [vmem:[#allocation180_spill] sm:$0xff]  ;;  %v17076_v8 = vld [vmem:[#allocation146_spill] sm:$0xff]  ;;  %17145 = vst [vmem:[#allocation70_spill] sm:$0xff] %v17047_v15 }
 0x4cf   : >> { %v17060_v17 = vmov %v17059_v51  ;;  %v17061_v57 = vsub.f32 %v17058_v60, %v17059_v51  ;;  %v12522_v56 = vadd.f32 %v2072_v34, %v1991_v50   ;;  %8086 = vpow2.f32 %v1679_v13  ;;  %v17077_v51 = vld [vmem:[#allocation152_spill] sm:$0xff]  ;;  %17221 = vst [vmem:[#allocation98_spill] sm:$0xff] %v17067_v63  ;;  %v17235_v63 = vld [vmem:[#allocation178_spill] sm:$0xff]  ;;  %v17359_v40 = vld [vmem:[#allocation184_spill] sm:$0xff] (%p12620_p4) }
 0x4d0   : >> { %17056 = vst [vmem:[#allocation214_spill] sm:$0xff] %v12515_v10  ;;  %v17074_v19 = vmov %v17073_v48  ;;  %v17075_v18 = vsub.f32 %v17072_v7, %v17073_v48  ;;  %v1848_v31 = vmul.f32 %v17076_v8, %v8081_v52  ;;  %v1840_v24 = vmul.f32 %v17077_v51, %v8079_v28  ;;  %v8083_v10 = vpop.eup %8082  ;;  %v17091_v7 = vld [vmem:[#allocation123_spill] sm:$0xff] }
 0x4d1   : >> { %17057 = vst [vmem:[#allocation215_spill] sm:$0xff] %v12517_v30  ;;  %v1711_v21 = vmul.f32 1.442695, %v17061_v57  ;;  %v1727_v30 = vmul.f32 1.442695, %v17068_v58  ;;  %v17078_v57 = vld [vmem:[#allocation135_spill] sm:$0xff]  ;;  %v17087_v2 = vsub.f32 %v16934_v54, %v16936_v23 }
 0x4d2   : >> { %17062 = vst [vmem:[#allocation216_spill] sm:$0xff] %v12522_v56  ;;  %v2202_v33 = vpop.f32.mrf.mxu2  ;;  %v2267_v32 = vpop.f32.mrf.mxu3  ;;  %v17071_v56 = vld [vmem:[#allocation131_spill] sm:$0xff]  ;;  %v1713_v46 = vmul.f32 1.442695, %v17075_v18  ;;  %v2016_v18 = vmul.f32 %v17091_v7, %v8083_v10 }
 0x4d3   : >> { %8088 = vpow2.f32 %v1711_v21  ;;  %v12530_v13 = vadd.f32 %v2202_v33, %v2007_v1   ;;  %v12532_v3 = vadd.f32 %v2267_v32, %v2015_v42   ;;  %v2000_v38 = vmul.f32 %v17071_v56, %v8079_v28  ;;  %v17082_v1 = vld [vmem:[#allocation183_spill] sm:$0xff]  ;;  %v17089_v32 = vld [vmem:[#allocation151_spill] sm:$0xff]  ;;  %17233 = vst [vmem:[#allocation105_spill] sm:$0xff] %v17074_v19 }
 0x4d4   : >> { %v2140_v50 = vpop.f32.mrf.mxu1  ;;  %v1992_v21 = vmul.f32 %v17078_v57, %v12471_v16  ;;  %v17083_v62 = vmov %v17082_v1  ;;  %v17084_v41 = vsub.f32 %v17081_v39, %v17082_v1  ;;  %v1681_v58 = vmul.f32 1.442695, %v17087_v2  ;;  %v17098_v39 = vld [vmem:[#allocation127_spill] sm:$0xff]  ;;  %17234 = vst [vmem:[#allocation106_spill] sm:$0xff] %v17060_v17  ;;  %v17248_v17 = vld [vmem:[#allocation181_spill] sm:$0xff]  ;;  %v17250_v19 = vld [vmem:[#allocation175_spill] sm:$0xff] }
 0x4d5   : >> { %v17069_v29 = vmov %v12530_v13  ;;  %v17070_v43 = vmov %v12532_v3  ;;  %v1924_v34 = vpop.xlane.xlu2 %1923  ;;  %v1900_v60 = vpop.xlane.xlu0 %1899  ;;  %v12542_v13 = vadd.f32 %v2140_v50, %v2000_v38   ;;  %8090 = vpow2.f32 %v1727_v30  ;;  %17236 = vst [vmem:[#allocation107_spill] sm:$0xff] %v17235_v63  ;;  %v17257_v63 = vld [vmem:[#allocation156_spill] sm:$0xff] }
 0x4d6   : >> { %v8085_v3 = vpop.eup %8084  ;;  %v1697_v42 = vmul.f32 1.442695, %v17084_v41  ;;  %v12547_v28 = vadd.f32 %v1924_v34, %v1848_v31   ;;  %v12549_v51 = vadd.f32 %v1900_v60, %v1840_v24   ;;  %v2075_v48 = vpop.f32.mrf.mxu0  ;;  %8092 = vpow2.f32 %v1713_v46  ;;  %v17092_v31 = vld [vmem:[#allocation90_spill] sm:$0xff]  ;;  %17247 = vst [vmem:[#allocation113_spill] sm:$0xff] %v17083_v62  ;;  %v17258_v62 = vld [vmem:[#allocation185_spill] sm:$0xff] }
 0x4d7   : >> { %17079 = vst [vmem:[#allocation217_spill] sm:$0xff] %v12542_v13  ;;  %v17080_v49 = vmov %v12542_v13  ;;  %v12554_v48 = vadd.f32 %v2075_v48, %v1992_v21   ;;  %v8087_v33 = vpop.eup %8086  ;;  %v1841_v56 = vmul.f32 %v17089_v32, %v8085_v3  ;;  %v17090_v38 = vsub.f32 %v16931_v35, %v16933_v4  ;;  %v17094_v24 = vld [vmem:[#allocation145_spill] sm:$0xff]  ;;  %v17101_v32 = vld [vmem:[#allocation122_spill] sm:$0xff] }
 0x4d8   : >> { %17085 = vst [vmem:[#allocation218_spill] sm:$0xff] %v12547_v28  ;;  %8094 = vpow2.f32 %v1697_v42  ;;  %v1833_v54 = vmul.f32 %v17092_v31, %v8087_v33  ;;  %v2008_v1 = vmul.f32 %v17098_v39, %v8081_v52  ;;  %v17282_v62 = vmov (%p12620_p4), %v17047_v15  ;;  %v17314_v15 = vld [vmem:[#allocation199_spill] sm:$0xff] (%p12620_p4) }
 0x4d9   : >> { %17086 = vst [vmem:[#allocation219_spill] sm:$0xff] %v12549_v51  ;;  %v8089_v16 = vpop.eup %8088  ;;  %v1729_v28 = vmul.f32 1.442695, %v17090_v38  ;;  %8096 = vpow2.f32 %v1681_v58  ;;  %v17102_v38 = vld [vmem:[#allocation134_spill] sm:$0xff] }
 0x4da   : >> { %17088 = vst [vmem:[#allocation220_spill] sm:$0xff] %v12554_v48  ;;  %v1849_v30 = vmul.f32 %v17094_v24, %v8089_v16  ;;  %v17099_v48 = vld [vmem:[#allocation144_spill] sm:$0xff]  ;;  %v1993_v7 = vmul.f32 %v17102_v38, %v8087_v33 }
 0x4db   : >> { %v2270_v51 = vpop.f32.mrf.mxu3  ;;  %v8091_v34 = vpop.eup %8090  ;;  %8098 = vpow2.f32 %v1729_v28  ;;  %v17118_v38 = vld [vmem:[#allocation140_spill] sm:$0xff]  ;;  %17249 = vst [vmem:[#allocation114_spill] sm:$0xff] %v17248_v17  ;;  %v17268_v17 = vld [vmem:[#allocation154_spill] sm:$0xff] }
 0x4dc   : >> { %v1903_v8 = vpop.xlane.xlu1 %1902  ;;  %v12565_v2 = vadd.f32 %v2270_v51, %v2016_v18   ;;  %v8093_v35 = vpop.eup %8092  ;;  %v17103_v18 = vld [vmem:[#allocation73_spill] sm:$0xff]  ;;  %17251 = vst [vmem:[#allocation115_spill] sm:$0xff] %v17250_v19  ;;  %v17263_v19 = vld [vmem:[#allocation170_spill] sm:$0xff] }
 0x4dd   : >> { %v12562_v42 = vadd.f32 %v1903_v8, %v1841_v56   ;;  %v1879_v46 = vpop.xlane.xlu2 %1878  ;;  %v1927_v50 = vpop.xlane.xlu0 %1926  ;;  %17259 = vst [vmem:[#allocation118_spill] sm:$0xff] %v17051_v55  ;;  %v17260_v55 = vld [vmem:[#allocation174_spill] sm:$0xff]  ;;  %v17292_v17 = vld [vmem:[#allocation207_spill] sm:$0xff] (%p12620_p4) }
 0x4de   : >> { %v17095_v9 = vmov %v12565_v2  ;;  %v12567_v21 = vadd.f32 %v1879_v46, %v1833_v54   ;;  %v12569_v57 = vadd.f32 %v1927_v50, %v1849_v30   ;;  %v8095_v60 = vpop.eup %8094  ;;  %v2017_v2 = vmul.f32 %v17101_v32, %v8091_v34  ;;  %v17106_v54 = vld [vmem:[#allocation89_spill] sm:$0xff]  ;;  %v17116_v32 = vld [vmem:[#allocation130_spill] sm:$0xff]  ;;  %17277 = vst [vmem:[#allocation66_spill] sm:$0xff] (%p12620_p4), %v16983_v25 }
 0x4df   : >> { %17093 = vst [vmem:[#allocation221_spill] sm:$0xff] %v12562_v42  ;;  %v8097_v13 = vpop.eup %8096  ;;  %v1850_v42 = vmul.f32 %v17099_v48, %v8093_v35  ;;  %v17113_v46 = vld [vmem:[#allocation69_spill] sm:$0xff]  ;;  %v17114_v48 = vld [vmem:[#allocation80_spill] sm:$0xff]  ;;  %v17284_v55 = vmov (%p12620_p4), %v16986_v12  ;;  %v17339_v12 = vld [vmem:[#allocation193_spill] sm:$0xff] (%p12620_p4) }
 0x4e0   : >> { %17096 = vst [vmem:[#allocation222_spill] sm:$0xff] %v12567_v21  ;;  %v2001_v21 = vmul.f32 %v17103_v18, %v8085_v3  ;;  %v1834_v52 = vmul.f32 %v17106_v54, %v8097_v13 }
 0x4e1   : >> { %17097 = vst [vmem:[#allocation223_spill] sm:$0xff] %v12569_v57  ;;  %v17105_v57 = vld [vmem:[#allocation150_spill] sm:$0xff]  ;;  %v8099_v3 = vpop.eup %8098 }
 0x4e2   : >> { %v2205_v41 = vpop.f32.mrf.mxu2  ;;  %v1842_v31 = vmul.f32 %v17105_v57, %v8095_v60  ;;  %17283 = vst [vmem:[#allocation67_spill] sm:$0xff] (%p12620_p4), %v17030_v0 }
 0x4e3   : >> { %v12573_v58 = vadd.f32 %v2205_v41, %v2008_v1   ;;  %v2273_v8 = vpop.f32.mrf.mxu3  ;;  %17285 = vst [vmem:[#allocation68_spill] sm:$0xff] (%p12620_p4), %v16969_v14 }
 0x4e4   : >> { %v1930_v56 = vpop.xlane.xlu1 %1929  ;;  %v12582_v1 = vadd.f32 %v2273_v8, %v2017_v2   ;;  %v2002_v2 = vmul.f32 %v17116_v32, %v8095_v60  ;;  %v17128_v60 = vld [vmem:[#allocation126_spill] sm:$0xff]  ;;  %v17175_v32 = vld [vmem:[#allocation210_spill] sm:$0xff] }
 0x4e5   : >> { %v17100_v23 = vmov %v12573_v58  ;;  %v12578_v50 = vadd.f32 %v1930_v56, %v1850_v42   ;;  %v2143_v28 = vpop.f32.mrf.mxu1  ;;  %v1906_v51 = vpop.xlane.xlu2 %1905  ;;  %v1856_v42 = vmul.f32 %v17114_v48, %v8083_v10  ;;  %v17160_v48 = vld [vmem:[#allocation220_spill] sm:$0xff] }
 0x4e6   : >> { %v17107_v4 = vmov %v12582_v1  ;;  %v1882_v24 = vpop.xlane.xlu0 %1881  ;;  %v12584_v30 = vadd.f32 %v2143_v28, %v2001_v21   ;;  %v12586_v41 = vadd.f32 %v1906_v51, %v1842_v31   ;;  %v2078_v33 = vpop.f32.mrf.mxu0  ;;  %v17119_v21 = vld [vmem:[#allocation139_spill] sm:$0xff]  ;;  %v17120_v31 = vld [vmem:[#allocation77_spill] sm:$0xff]  ;;  %v17280_v63 = vmov (%p12620_p4), %v17100_v23 }
 0x4e7   : >> { %17104 = vst [vmem:[#allocation224_spill] sm:$0xff] %v12578_v50  ;;  %v12588_v18 = vadd.f32 %v1882_v24, %v1834_v52   ;;  %v12590_v52 = vadd.f32 %v2078_v33, %v1993_v7   ;;  %v2009_v50 = vmul.f32 %v17113_v46, %v8089_v16  ;;  %v1994_v54 = vmul.f32 %v17120_v31, %v8097_v13  ;;  %v17157_v46 = vld [vmem:[#allocation192_spill] sm:$0xff]  ;;  %v17163_v33 = vld [vmem:[#allocation203_spill] sm:$0xff]  ;;  %v17313_v48 = vld [vmem:[#allocation210_spill] sm:$0xff] (%p12620_p4) }
 0x4e8   : >> { %17108 = vst [vmem:[#allocation225_spill] sm:$0xff] %v12584_v30  ;;  %v17109_v22 = vmov %v12584_v30  ;;  %v17144_v13 = vmov %v17069_v29 }
 0x4e9   : >> { %17110 = vst [vmem:[#allocation226_spill] sm:$0xff] %v12586_v41  ;;  %v1857_v41 = vmul.f32 %v17118_v38, %v8091_v34  ;;  %v17129_v34 = vld [vmem:[#allocation65_spill] sm:$0xff]  ;;  %v17152_v38 = vmov %v17042_v11  ;;  %v17205_v11 = vld [vmem:[#allocation222_spill] sm:$0xff] }
 0x4ea   : >> { %17111 = vst [vmem:[#allocation227_spill] sm:$0xff] %v12588_v18  ;;  %v2208_v39 = vpop.f32.mrf.mxu2  ;;  %v1858_v18 = vmul.f32 %v17119_v21, %v8099_v3  ;;  %v2018_v51 = vmul.f32 %v17129_v34, %v8099_v3  ;;  %v17136_v3 = vmov %v17070_v43  ;;  %v17151_v34 = vmov %v17080_v49  ;;  %v17207_v49 = vld [vmem:[#allocation213_spill] sm:$0xff]  ;;  %v17304_v13 = vld [vmem:[#allocation211_spill] sm:$0xff] (%p12620_p4) }
 0x4eb   : >> { %17112 = vst [vmem:[#allocation228_spill] sm:$0xff] %v12590_v52  ;;  %v12594_v58 = vadd.f32 %v2208_v39, %v2009_v50   ;;  %v2010_v52 = vmul.f32 %v17128_v60, %v8093_v35  ;;  %v17155_v35 = vld [vmem:[#allocation196_spill] sm:$0xff]  ;;  %v17165_v60 = vld [vmem:[#allocation198_spill] sm:$0xff]  ;;  %v17166_v50 = vld [vmem:[#allocation189_spill] sm:$0xff] }
 0x4ec   : >> { %v1948_v1 = vpop.xlane.xlu1 %1947  ;;  %17150 = vst [vmem:[#allocation73_spill] sm:$0xff] %v17109_v22  ;;  %v17211_v22 = vld [vmem:[#allocation205_spill] sm:$0xff]  ;;  %v17305_v3 = vld [vmem:[#allocation203_spill] sm:$0xff] (%p12620_p4)  ;;  %v17336_v60 = vld [vmem:[#allocation204_spill] sm:$0xff] (%p12620_p4) }
 0x4ed   : >> { %v17115_v61 = vmov %v12594_v58  ;;  %v12597_v56 = vadd.f32 %v1948_v1, %v1856_v42   ;;  %v2146_v8 = vpop.f32.mrf.mxu1  ;;  %v1951_v7 = vpop.xlane.xlu2 %1950  ;;  %v17134_v1 = vmov %v17107_v4  ;;  %17156 = vst [vmem:[#allocation76_spill] sm:$0xff] %v17155_v35  ;;  %v17162_v58 = vld [vmem:[#allocation211_spill] sm:$0xff]  ;;  %v17177_v42 = vld [vmem:[#allocation197_spill] sm:$0xff] }
 0x4ee   : >> { %v1954_v57 = vpop.xlane.xlu0 %1953  ;;  %v12602_v24 = vadd.f32 %v2146_v8, %v2002_v2   ;;  %v12604_v21 = vadd.f32 %v1951_v7, %v1857_v41   ;;  %v2081_v10 = vpop.f32.mrf.mxu0  ;;  %v17135_v2 = vmov %v17095_v9  ;;  %v17140_v7 = vmov %v16983_v25  ;;  %17142 = vst [vmem:[#allocation69_spill] sm:$0xff] %v17115_v61  ;;  %v17176_v35 = vld [vmem:[#allocation199_spill] sm:$0xff]  ;;  %v17179_v41 = vld [vmem:[#allocation190_spill] sm:$0xff]  ;;  %v17307_v1 = vld [vmem:[#allocation189_spill] sm:$0xff] (%p12620_p4) }
 0x4ef   : >> { %17117 = vst [vmem:[#allocation229_spill] sm:$0xff] %v12597_v56  ;;  %v12606_v18 = vadd.f32 %v1954_v57, %v1858_v18   ;;  %v12608_v16 = vadd.f32 %v2081_v10, %v1994_v54   ;;  %v17143_v10 = vmov %v17100_v23  ;;  %v17161_v56 = vld [vmem:[#allocation216_spill] sm:$0xff]  ;;  %v17182_v57 = vld [vmem:[#allocation223_spill] sm:$0xff]  ;;  %v17279_v36 = vmov (%p12620_p4), %v17115_v61  ;;  %v17287_v19 = vld [vmem:[#allocation225_spill] sm:$0xff] (%p12620_p4) }
 0x4f0   : >> { %v17121_v59 = vmov %v12602_v24  ;;  %17122 = vst [vmem:[#allocation230_spill] sm:$0xff] %v12604_v21  ;;  %v17170_v44 = vmov %v12604_v21  ;;  %v17187_v54 = vld [vmem:[#allocation200_spill] sm:$0xff]  ;;  %v17281_v2 = vmov (%p12620_p4), %v17069_v29  ;;  %v17306_v10 = vld [vmem:[#allocation198_spill] sm:$0xff] (%p12620_p4)  ;;  %v17316_v29 = vld [vmem:[#allocation197_spill] sm:$0xff] (%p12620_p4) }
 0x4f1   : >> { %17124 = vst [vmem:[#allocation231_spill] sm:$0xff] %v12606_v18  ;;  %v17127_v5 = vmov %v12608_v16  ;;  %v17149_v24 = vmov %v17121_v59  ;;  %v17168_v37 = vmov %v12606_v18  ;;  %v17171_v21 = vmov %v17170_v44  ;;  %v17194_v44 = vld [vmem:[#allocation214_spill] sm:$0xff]  ;;  %v17203_v20 = vld [vmem:[#allocation227_spill] sm:$0xff]  ;;  %v17300_v61 = vld [vmem:[#allocation220_spill] sm:$0xff] (%p12620_p4) }
 0x4f2   : >> { %17126 = vst [vmem:[#allocation232_spill] sm:$0xff] %v12608_v16  ;;  %v2211_v28 = vpop.f32.mrf.mxu2  ;;  %v2276_v30 = vpop.f32.mrf.mxu3  ;;  %v17148_v16 = vmov %v16969_v14  ;;  %v17169_v18 = vmov %v17168_v37  ;;  %v17197_v37 = vld [vmem:[#allocation202_spill] sm:$0xff]  ;;  %v17323_v57 = vld [vmem:[#allocation208_spill] sm:$0xff] (%p12620_p4)  ;;  %v17327_v23 = vld [vmem:[#allocation191_spill] sm:$0xff] (%p12620_p4) }
 0x4f3   : >> { %v12612_v8 = vadd.f32 %v2211_v28, %v2010_v52   ;;  %v12614_v31 = vadd.f32 %v2276_v30, %v2018_v51   ;;  %17158 = vst [vmem:[#allocation77_spill] sm:$0xff] %v17127_v5  ;;  %v17159_v52 = vld [vmem:[#allocation228_spill] sm:$0xff]  ;;  %v17174_v30 = vld [vmem:[#allocation215_spill] sm:$0xff]  ;;  %v17183_v28 = vld [vmem:[#allocation218_spill] sm:$0xff] }
 0x4f4   : >> { %17164 = vst [vmem:[#allocation78_spill] sm:$0xff] %v17163_v33  ;;  %v17190_v33 = vld [vmem:[#allocation187_spill] sm:$0xff]  ;;  %v17199_v5 = vld [vmem:[#allocation193_spill] sm:$0xff]  ;;  %v17296_v16 = vld [vmem:[#allocation192_spill] sm:$0xff] (%p12620_p4) }
 0x4f5   : >> { %v17130_v53 = vmov %v12612_v8  ;;  %v17131_v27 = vmov %v12614_v31  ;;  %17167 = vst [vmem:[#allocation79_spill] sm:$0xff] %v17166_v50  ;;  %v17181_v50 = vld [vmem:[#allocation224_spill] sm:$0xff]  ;;  %v17193_v51 = vld [vmem:[#allocation219_spill] sm:$0xff]  ;;  %v17273_v33 = vmov (%p12620_p4), %v17070_v43  ;;  %v17322_v56 = vld [vmem:[#allocation218_spill] sm:$0xff] (%p12620_p4) }
 0x4f6   : >> { %17133 = vst [vmem:[#allocation65_spill] sm:$0xff] %v17131_v27  ;;  %v17141_v8 = vmov %v17130_v53  ;;  %v17172_v39 = vld [vmem:[#allocation229_spill] sm:$0xff]  ;;  %v17184_v31 = vld [vmem:[#allocation208_spill] sm:$0xff]  ;;  %v17276_v51 = vmov (%p12620_p4), %v16996_v47  ;;  %v17312_v18 = vld [vmem:[#allocation215_spill] sm:$0xff] (%p12620_p4) }
 0x4f7   : >> { %17173 = vst [vmem:[#allocation80_spill] sm:$0xff] %v17172_v39  ;;  %v17189_v39 = vld [vmem:[#allocation191_spill] sm:$0xff]  ;;  %v17294_v43 = vld [vmem:[#allocation196_spill] sm:$0xff] (%p12620_p4)  ;;  %v17309_v8 = vld [vmem:[#allocation230_spill] sm:$0xff] (%p12620_p4) }
 0x4f8   : >> { %17178 = vst [vmem:[#allocation81_spill] sm:$0xff] %v17177_v42  ;;  %v17192_v42 = vld [vmem:[#allocation221_spill] sm:$0xff]  ;;  %v17272_v39 = vmov (%p12620_p4), %v17095_v9  ;;  %v17298_v47 = vld [vmem:[#allocation228_spill] sm:$0xff] (%p12620_p4)  ;;  %v17308_v7 = vld [vmem:[#allocation231_spill] sm:$0xff] (%p12620_p4) }
 0x4f9   : >> { %17180 = vst [vmem:[#allocation82_spill] sm:$0xff] %v17179_v41  ;;  %v17191_v41 = vld [vmem:[#allocation226_spill] sm:$0xff]  ;;  %v17275_v42 = vmov (%p12620_p4), %v17020_v6  ;;  %v17297_v14 = vld [vmem:[#allocation232_spill] sm:$0xff] (%p12620_p4)  ;;  %v17310_v0 = vld [vmem:[#allocation229_spill] sm:$0xff] (%p12620_p4) }
 0x4fa   : >> { %17185 = vst [vmem:[#allocation83_spill] sm:$0xff] %v17184_v31  ;;  %v17186_v31 = vld [vmem:[#allocation206_spill] sm:$0xff]  ;;  %v17274_v41 = vmov (%p12620_p4), %v17035_v45  ;;  %v17302_v6 = vld [vmem:[#allocation216_spill] sm:$0xff] (%p12620_p4)  ;;  %v17321_v28 = vld [vmem:[#allocation223_spill] sm:$0xff] (%p12620_p4) }
 0x4fb   : >> { %17188 = vst [vmem:[#allocation84_spill] sm:$0xff] %v17187_v54  ;;  %v17196_v54 = vld [vmem:[#allocation204_spill] sm:$0xff]  ;;  %v17270_v31 = vmov (%p12620_p4), %v17131_v27  ;;  %v17329_v25 = vld [vmem:[#allocation187_spill] sm:$0xff] (%p12620_p4)  ;;  %v17331_v32 = vld [vmem:[#allocation226_spill] sm:$0xff] (%p12620_p4) }
 0x4fc   : >> { %17195 = vst [vmem:[#allocation85_spill] sm:$0xff] %v17194_v44  ;;  %v17209_v44 = vld [vmem:[#allocation209_spill] sm:$0xff]  ;;  %v17278_v54 = vmov (%p12620_p4), %v17130_v53  ;;  %v17290_v27 = vld [vmem:[#allocation212_spill] sm:$0xff] (%p12620_p4)  ;;  %v17333_v38 = vld [vmem:[#allocation219_spill] sm:$0xff] (%p12620_p4) }
 0x4fd   : >> { %17198 = vst [vmem:[#allocation86_spill] sm:$0xff] %v17197_v37  ;;  %v17213_v37 = vld [vmem:[#allocation195_spill] sm:$0xff]  ;;  %v17288_v53 = vld [vmem:[#allocation217_spill] sm:$0xff] (%p12620_p4)  ;;  %v17320_v50 = vld [vmem:[#allocation224_spill] sm:$0xff] (%p12620_p4) }
 0x4fe   : >> { %17200 = vst [vmem:[#allocation87_spill] sm:$0xff] %v17199_v5  ;;  %v17215_v5 = vld [vmem:[#allocation194_spill] sm:$0xff]  ;;  %v17326_v35 = vld [vmem:[#allocation200_spill] sm:$0xff] (%p12620_p4)  ;;  %v17332_v30 = vld [vmem:[#allocation221_spill] sm:$0xff] (%p12620_p4) }
 0x4ff   : >> { %17204 = vst [vmem:[#allocation89_spill] sm:$0xff] %v17203_v20  ;;  %v17219_v20 = vld [vmem:[#allocation184_spill] sm:$0xff]  ;;  %v17334_v45 = vld [vmem:[#allocation214_spill] sm:$0xff] (%p12620_p4)  ;;  %v17343_v46 = vld [vmem:[#allocation227_spill] sm:$0xff] (%p12620_p4) }
 0x500   : >> { %17206 = vst [vmem:[#allocation90_spill] sm:$0xff] %v17205_v11  ;;  %v17224_v11 = vld [vmem:[#allocation172_spill] sm:$0xff]  ;;  %v17337_v9 = vld [vmem:[#allocation202_spill] sm:$0xff] (%p12620_p4)  ;;  %v17347_v21 = vld [vmem:[#allocation213_spill] sm:$0xff] (%p12620_p4) }
 0x501   : >> { %17208 = vst [vmem:[#allocation91_spill] sm:$0xff] %v17207_v49  ;;  %v17222_v49 = vld [vmem:[#allocation176_spill] sm:$0xff]  ;;  %v17345_v58 = vld [vmem:[#allocation222_spill] sm:$0xff] (%p12620_p4)  ;;  %v17349_v52 = vld [vmem:[#allocation209_spill] sm:$0xff] (%p12620_p4) }
 0x502   : >> { %17210 = vst [vmem:[#allocation92_spill] sm:$0xff] %v17209_v44  ;;  %v17229_v44 = vld [vmem:[#allocation160_spill] sm:$0xff]  ;;  %v17351_v34 = vld [vmem:[#allocation205_spill] sm:$0xff] (%p12620_p4) }
 0x503   : >> { %17212 = vst [vmem:[#allocation93_spill] sm:$0xff] %v17211_v22  ;;  %v17227_v22 = vld [vmem:[#allocation164_spill] sm:$0xff] }
 0x504   : >> { %17214 = vst [vmem:[#allocation94_spill] sm:$0xff] %v17213_v37  ;;  %v17231_v37 = vld [vmem:[#allocation157_spill] sm:$0xff]  ;;  %v17341_v24 = vld [vmem:[#allocation188_spill] sm:$0xff] (%p12620_p4) }
 0x505   : >> { %17216 = vst [vmem:[#allocation95_spill] sm:$0xff] %v17215_v5  ;;  %v17237_v5 = vld [vmem:[#allocation171_spill] sm:$0xff] }
 0x506   : >> { %17220 = vst [vmem:[#allocation97_spill] sm:$0xff] %v17219_v20  ;;  %v17243_v20 = vld [vmem:[#allocation158_spill] sm:$0xff] }
 0x507   : >> { %17223 = vst [vmem:[#allocation99_spill] sm:$0xff] %v17222_v49  ;;  %v17245_v49 = vld [vmem:[#allocation155_spill] sm:$0xff] }
 0x508   : >> { %17225 = vst [vmem:[#allocation100_spill] sm:$0xff] %v17224_v11  ;;  %v17253_v11 = vld [vmem:[#allocation167_spill] sm:$0xff] }
 0x509   : >> { %17228 = vst [vmem:[#allocation102_spill] sm:$0xff] %v17227_v22  ;;  %v17266_v22 = vld [vmem:[#allocation161_spill] sm:$0xff] }
 0x50a   : >> { %17230 = vst [vmem:[#allocation103_spill] sm:$0xff] %v17229_v44  ;;  %v17353_v44 = vld [vmem:[#allocation195_spill] sm:$0xff] (%p12620_p4) }
 0x50b   : >> { %17232 = vst [vmem:[#allocation104_spill] sm:$0xff] %v17231_v37  ;;  %v17355_v37 = vld [vmem:[#allocation194_spill] sm:$0xff] (%p12620_p4) }
 0x50c   : >> { %17238 = vst [vmem:[#allocation108_spill] sm:$0xff] %v17237_v5  ;;  %v17357_v5 = vld [vmem:[#allocation186_spill] sm:$0xff] (%p12620_p4) }
 0x50d   : >> { %17244 = vst [vmem:[#allocation111_spill] sm:$0xff] %v17243_v20  ;;  %v17264_v20 = vld [vmem:[#allocation162_spill] sm:$0xff] }
 0x50e   : >> { %17246 = vst [vmem:[#allocation112_spill] sm:$0xff] %v17245_v49  ;;  %1018 = sbr.rel (!%p12620_p4) target bundleno = 701 (0x2bd), region = 135  ;;  %v17363_v49 = vld [vmem:[#allocation176_spill] sm:$0xff] (%p12620_p4) }
 0x50f   : >> { %17254 = vst [vmem:[#allocation117_spill] sm:$0xff] %v17253_v11  ;;  %v17261_v11 = vld [vmem:[#allocation173_spill] sm:$0xff] }
 0x510   : >> { %17262 = vst [vmem:[#allocation119_spill] sm:$0xff] %v17261_v11  ;;  %v17365_v11 = vld [vmem:[#allocation172_spill] sm:$0xff] (%p12620_p4) }
 0x511   : >> { %17265 = vst [vmem:[#allocation120_spill] sm:$0xff] %v17264_v20  ;;  %v17361_v20 = vld [vmem:[#allocation177_spill] sm:$0xff] (%p12620_p4) }
 0x512   : >> { %17267 = vst [vmem:[#allocation121_spill] sm:$0xff] %v17266_v22  ;;  %v17367_v22 = vld [vmem:[#allocation165_spill] sm:$0xff] (%p12620_p4) }
 0x513   : > { %17271 = vst [vmem:[#allocation65_spill] sm:$0xff] %v17107_v4  ;;  %v17324_v4 = vld [vmem:[#allocation206_spill] sm:$0xff] }
 0x514   : > { %17286 = vst [vmem:[#allocation69_spill] sm:$0xff] %v17121_v59  ;;  %v17318_v59 = vld [vmem:[#allocation190_spill] sm:$0xff] }
 0x515   : > { %17289 = vst [vmem:[#allocation70_spill] sm:$0xff] %v17288_v53  ;;  %v17369_v53 = vld [vmem:[#allocation164_spill] sm:$0xff] }
 0x516   : > { %17291 = vst [vmem:[#allocation71_spill] sm:$0xff] %v17290_v27  ;;  %v17371_v27 = vld [vmem:[#allocation160_spill] sm:$0xff] }
 0x517   : > { %17295 = vst [vmem:[#allocation72_spill] sm:$0xff] %v17294_v43  ;;  %v17373_v43 = vld [vmem:[#allocation157_spill] sm:$0xff] }
 0x518   : > { %17299 = vst [vmem:[#allocation73_spill] sm:$0xff] %v17298_v47  ;;  %v17375_v47 = vld [vmem:[#allocation180_spill] sm:$0xff] }
 0x519   : > { %17301 = vst [vmem:[#allocation74_spill] sm:$0xff] %v17300_v61  ;;  %v17377_v61 = vld [vmem:[#allocation179_spill] sm:$0xff] }
 0x51a   : > { %17303 = vst [vmem:[#allocation75_spill] sm:$0xff] %v17302_v6  ;;  %v17379_v6 = vld [vmem:[#allocation178_spill] sm:$0xff] }
 0x51b   : > { %17311 = vst [vmem:[#allocation76_spill] sm:$0xff] %v17310_v0  ;;  %v17381_v0 = vld [vmem:[#allocation171_spill] sm:$0xff] }
 0x51c   : > { %17315 = vst [vmem:[#allocation77_spill] sm:$0xff] %v17314_v15  ;;  %v17383_v15 = vld [vmem:[#allocation169_spill] sm:$0xff] }
 0x51d   : > { %17317 = vst [vmem:[#allocation78_spill] sm:$0xff] %v17316_v29  ;;  %v17385_v29 = vld [vmem:[#allocation166_spill] sm:$0xff] }
 0x51e   : > { %17319 = vst [vmem:[#allocation79_spill] sm:$0xff] %v17318_v59  ;;  %v17387_v59 = vld [vmem:[#allocation158_spill] sm:$0xff] }
 0x51f   : > { %17325 = vst [vmem:[#allocation80_spill] sm:$0xff] %v17324_v4  ;;  %v17389_v4 = vld [vmem:[#allocation155_spill] sm:$0xff] }
 0x520   : > { %17328 = vst [vmem:[#allocation81_spill] sm:$0xff] %v17327_v23  ;;  %v17391_v23 = vld [vmem:[#allocation183_spill] sm:$0xff] }
 0x521   : > { %17330 = vst [vmem:[#allocation82_spill] sm:$0xff] %v17329_v25  ;;  %v17393_v25 = vld [vmem:[#allocation181_spill] sm:$0xff] }
 0x522   : > { %17335 = vst [vmem:[#allocation83_spill] sm:$0xff] %v17334_v45  ;;  %v17395_v45 = vld [vmem:[#allocation175_spill] sm:$0xff] }
 0x523   : > { %17338 = vst [vmem:[#allocation84_spill] sm:$0xff] %v17337_v9  ;;  %v17397_v9 = vld [vmem:[#allocation168_spill] sm:$0xff] }
 0x524   : > { %17340 = vst [vmem:[#allocation85_spill] sm:$0xff] %v17339_v12  ;;  %v17399_v12 = vld [vmem:[#allocation167_spill] sm:$0xff] }
 0x525   : > { %17342 = vst [vmem:[#allocation86_spill] sm:$0xff] %v17341_v24  ;;  %v17406_v24 = vld [vmem:[#allocation174_spill] sm:$0xff] }
 0x526   : > { %17344 = vst [vmem:[#allocation87_spill] sm:$0xff] %v17343_v46  ;;  %v17409_v46 = vld [vmem:[#allocation162_spill] sm:$0xff] }
 0x527   : > { %17346 = vst [vmem:[#allocation88_spill] sm:$0xff] %v17345_v58  ;;  %v17404_v58 = vld [vmem:[#allocation185_spill] sm:$0xff] }
 0x528   : > { %17348 = vst [vmem:[#allocation89_spill] sm:$0xff] %v17347_v21  ;;  %v17401_v21 = vld [vmem:[#allocation163_spill] sm:$0xff] }
 0x529   : > { %17350 = vst [vmem:[#allocation90_spill] sm:$0xff] %v17349_v52  ;;  %v17405_v52 = vld [vmem:[#allocation182_spill] sm:$0xff] }
 0x52a   : > { %17352 = vst [vmem:[#allocation91_spill] sm:$0xff] %v17351_v34  ;;  %v17403_v34 = vld [vmem:[#allocation156_spill] sm:$0xff] }
 0x52b   : > { %17354 = vst [vmem:[#allocation92_spill] sm:$0xff] %v17353_v44 }
 0x52c   : > { %17356 = vst [vmem:[#allocation93_spill] sm:$0xff] %v17355_v37 }
 0x52d   : > { %17358 = vst [vmem:[#allocation94_spill] sm:$0xff] %v17357_v5 }
 0x52e   : > { %17360 = vst [vmem:[#allocation95_spill] sm:$0xff] %v17359_v40  ;;  %v17410_v40 = vld [vmem:[#allocation161_spill] sm:$0xff] }
 0x52f   : > { %17362 = vst [vmem:[#allocation96_spill] sm:$0xff] %v17361_v20 }
 0x530   : > { %17364 = vst [vmem:[#allocation97_spill] sm:$0xff] %v17363_v49 }
 0x531   : > { %17366 = vst [vmem:[#allocation98_spill] sm:$0xff] %v17365_v11 }
 0x532   : > { %17368 = vst [vmem:[#allocation99_spill] sm:$0xff] %v17367_v22 }
 0x533   : > { %17370 = vst [vmem:[#allocation100_spill] sm:$0xff] %v17369_v53 }
 0x534   : > { %17372 = vst [vmem:[#allocation101_spill] sm:$0xff] %v17371_v27 }
 0x535   : > { %17374 = vst [vmem:[#allocation102_spill] sm:$0xff] %v17373_v43  ;;  %v17408_v43 = vld [vmem:[#allocation170_spill] sm:$0xff] }
 0x536   : > { %17376 = vst [vmem:[#allocation103_spill] sm:$0xff] %v17375_v47 }
 0x537   : > { %17378 = vst [vmem:[#allocation104_spill] sm:$0xff] %v17377_v61 }
 0x538   : > { %17380 = vst [vmem:[#allocation105_spill] sm:$0xff] %v17379_v6  ;;  %v17411_v6 = vld [vmem:[#allocation154_spill] sm:$0xff] }
 0x539   : > { %17382 = vst [vmem:[#allocation106_spill] sm:$0xff] %v17381_v0 }
 0x53a   : > { %17384 = vst [vmem:[#allocation107_spill] sm:$0xff] %v17383_v15  ;;  %v17402_v15 = vld [vmem:[#allocation159_spill] sm:$0xff] }
 0x53b   : > { %17386 = vst [vmem:[#allocation108_spill] sm:$0xff] %v17385_v29 }
 0x53c   : > { %17388 = vst [vmem:[#allocation109_spill] sm:$0xff] %v17387_v59  ;;  %v17407_v59 = vld [vmem:[#allocation173_spill] sm:$0xff] }
 0x53d   : > { %17390 = vst [vmem:[#allocation110_spill] sm:$0xff] %v17389_v4 }
 0x53e   : > { %17392 = vst [vmem:[#allocation111_spill] sm:$0xff] %v17391_v23 }
 0x53f   : > { %17394 = vst [vmem:[#allocation112_spill] sm:$0xff] %v17393_v25 }
 0x540   : > { %17396 = vst [vmem:[#allocation113_spill] sm:$0xff] %v17395_v45 }
 0x541   : > { %17398 = vst [vmem:[#allocation114_spill] sm:$0xff] %v17397_v9 }
 0x542   : > { %17400 = vst [vmem:[#allocation115_spill] sm:$0xff] %v17399_v12 }
 0x543 PF: > { %17463 = vst [vmem:[#allocation233_spill] sm:$0xff] %v9846_v31  ;;  %v17464_v44 = vld [vmem:[#allocation65_spill] sm:$0xff]  ;;  %v17471_v37 = vld [vmem:[#allocation66_spill] sm:$0xff]  ;;  %v17478_v5 = vld [vmem:[#allocation67_spill] sm:$0xff]  ;;  %vm2766_vm12 = vcmask 523264   ;;  %s15467_s1 = smov 0   ;;  %v10226_v6 = vphi %v11234_v6, %v17411_v6   ;;  %v10222_v40 = vphi %v11232_v40, %v17410_v40   ;;  %v10218_v46 = vphi %v11230_v46, %v17409_v46   ;;  %v10214_v43 = vphi %v11228_v43, %v17408_v43   ;;  %v10210_v59 = vphi %v11226_v59, %v17407_v59   ;;  %v10206_v24 = vphi %v11224_v24, %v17406_v24   ;;  %v10202_v52 = vphi %v11222_v52, %v17405_v52   ;;  %v10198_v58 = vphi %v11220_v58, %v17404_v58   ;;  %v10194_v34 = vphi %v11218_v34, %v17403_v34   ;;  %v10190_v15 = vphi %v11216_v15, %v17402_v15   ;;  %v10186_v21 = vphi %v11214_v21, %v17401_v21   ;;  %v10054_v60 = vphi %v11148_v60, %v17336_v60   ;;  %v10046_v38 = vphi %v11144_v38, %v17333_v38   ;;  %v10042_v30 = vphi %v11142_v30, %v17332_v30   ;;  %v10038_v32 = vphi %v11140_v32, %v17331_v32   ;;  %v10026_v35 = vphi %v11134_v35, %v17326_v35   ;;  %v10018_v57 = vphi %v11130_v57, %v17323_v57   ;;  %v10014_v56 = vphi %v11128_v56, %v17322_v56   ;;  %v10010_v28 = vphi %v11126_v28, %v17321_v28   ;;  %v10006_v50 = vphi %v11124_v50, %v17320_v50   ;;  %v9990_v48 = vphi %v11116_v48, %v17313_v48   ;;  %v9986_v18 = vphi %v11114_v18, %v17312_v18   ;;  %v9978_v8 = vphi %v11110_v8, %v17309_v8   ;;  %v9974_v7 = vphi %v11108_v7, %v17308_v7   ;;  %v9970_v1 = vphi %v11106_v1, %v17307_v1   ;;  %v9966_v10 = vphi %v11104_v10, %v17306_v10   ;;  %v9962_v3 = vphi %v11102_v3, %v17305_v3   ;;  %v9958_v13 = vphi %v11100_v13, %v17304_v13   ;;  %v9942_v14 = vphi %v11092_v14, %v17297_v14   ;;  %v9938_v16 = vphi %v11090_v16, %v17296_v16   ;;  %v9930_v26 = vphi %v11086_v26, %v17293_v26   ;;  %v9926_v17 = vphi %v11084_v17, %v17292_v17   ;;  %v9914_v19 = vphi %v11078_v19, %v17287_v19   ;;  %v9902_v55 = vphi %v11072_v55, %v17284_v55   ;;  %v9894_v62 = vphi %v11068_v62, %v17282_v62   ;;  %v9890_v2 = vphi %v11066_v2, %v17281_v2   ;;  %v9886_v63 = vphi %v11064_v63, %v17280_v63   ;;  %v9882_v36 = vphi %v11062_v36, %v17279_v36   ;;  %v9878_v54 = vphi %v11060_v54, %v17278_v54   ;;  %v9870_v51 = vphi %v11056_v51, %v17276_v51   ;;  %v9866_v42 = vphi %v11054_v42, %v17275_v42   ;;  %v9862_v41 = vphi %v11052_v41, %v17274_v41   ;;  %v9858_v33 = vphi %v11050_v33, %v17273_v33   ;;  %v9854_v39 = vphi %v11048_v39, %v17272_v39   ;;  %v9846_v31 = vphi %v11044_v31, %v17270_v31  }
 0x544   : > { %17465 = vst [vmem:[#allocation65_spill] sm:$0xff] %v17464_v44  ;;  %v17481_v20 = vld [vmem:[#allocation68_spill] sm:$0xff]  ;;  %v17483_v49 = vld [vmem:[#allocation69_spill] sm:$0xff]  ;;  %v17486_v11 = vld [vmem:[#allocation70_spill] sm:$0xff] }
 0x545   : > { %17466 = vst [vmem:[#allocation234_spill] sm:$0xff] %v9854_v39  ;;  %v17488_v22 = vld [vmem:[#allocation71_spill] sm:$0xff]  ;;  %v17492_v53 = vld [vmem:[#allocation72_spill] sm:$0xff]  ;;  %v17496_v27 = vld [vmem:[#allocation73_spill] sm:$0xff] }
 0x546   : > { %17467 = vst [vmem:[#allocation235_spill] sm:$0xff] %v9858_v33  ;;  %v17498_v47 = vld [vmem:[#allocation74_spill] sm:$0xff]  ;;  %v17500_v61 = vld [vmem:[#allocation75_spill] sm:$0xff]  ;;  %v17508_v0 = vld [vmem:[#allocation76_spill] sm:$0xff] }
 0x547   : > { %17468 = vst [vmem:[#allocation236_spill] sm:$0xff] %v9862_v41  ;;  %v17514_v4 = vld [vmem:[#allocation78_spill] sm:$0xff]  ;;  %v17516_v23 = vld [vmem:[#allocation79_spill] sm:$0xff]  ;;  %v17522_v25 = vld [vmem:[#allocation80_spill] sm:$0xff] }
 0x548   : > { %17469 = vst [vmem:[#allocation237_spill] sm:$0xff] %v9866_v42  ;;  %v17525_v45 = vld [vmem:[#allocation81_spill] sm:$0xff]  ;;  %v17527_v9 = vld [vmem:[#allocation82_spill] sm:$0xff]  ;;  %v17532_v12 = vld [vmem:[#allocation83_spill] sm:$0xff] }
 0x549   : > { %17470 = vst [vmem:[#allocation238_spill] sm:$0xff] %v9870_v51  ;;  %v17512_v29 = vld [vmem:[#allocation77_spill] sm:$0xff]  ;;  %v17543_v31 = vld [vmem:[#allocation88_spill] sm:$0xff] }
 0x54a   : > { %17472 = vst [vmem:[#allocation66_spill] sm:$0xff] %v17471_v37  ;;  %v17537_v39 = vld [vmem:[#allocation85_spill] sm:$0xff] }
 0x54b   : > { %17473 = vst [vmem:[#allocation239_spill] sm:$0xff] %v9878_v54  ;;  %v17535_v54 = vld [vmem:[#allocation84_spill] sm:$0xff]  ;;  %v2325_v44 = vld [vmem:[%s10707_s19 + $0xb0] sm:$0xff] }
 0x54c   : > { %17474 = vst [vmem:[#allocation240_spill] sm:$0xff] %v9882_v36  ;;  %v17572_v36 = vld [vmem:[#allocation104_spill] sm:$0xff] }
 0x54d   : > { %17475 = vst [vmem:[#allocation241_spill] sm:$0xff] %v9886_v63  ;;  %v17578_v63 = vld [vmem:[#allocation108_spill] sm:$0xff] }
 0x54e   : > { %17476 = vst [vmem:[#allocation242_spill] sm:$0xff] %v9890_v2  ;;  %v17583_v2 = vld [vmem:[#allocation111_spill] sm:$0xff] }
 0x54f   : > { %17477 = vst [vmem:[#allocation243_spill] sm:$0xff] %v9894_v62  ;;  %v2328_v62 = vld [vmem:[%s10707_s19 + $0x108] sm:$0xff] }
 0x550   : > { %17479 = vst [vmem:[#allocation67_spill] sm:$0xff] %v17478_v5 }
 0x551   : > { %17480 = vst [vmem:[#allocation244_spill] sm:$0xff] %v9902_v55 }
 0x552   : > { %17482 = vst [vmem:[#allocation68_spill] sm:$0xff] %v17481_v20 }
 0x553   : > { %17484 = vst [vmem:[#allocation69_spill] sm:$0xff] %v17483_v49  ;;  %v17547_v49 = vld [vmem:[#allocation90_spill] sm:$0xff] }
 0x554   : > { %17485 = vst [vmem:[#allocation245_spill] sm:$0xff] %v9914_v19  ;;  %v17570_v19 = vld [vmem:[#allocation103_spill] sm:$0xff] }
 0x555   : > { %17487 = vst [vmem:[#allocation70_spill] sm:$0xff] %v17486_v11  ;;  %v17575_v11 = vld [vmem:[#allocation106_spill] sm:$0xff] }
 0x556   : > { %17489 = vst [vmem:[#allocation71_spill] sm:$0xff] %v17488_v22  ;;  %v17580_v22 = vld [vmem:[#allocation109_spill] sm:$0xff] }
 0x557   : > { %17490 = vst [vmem:[#allocation246_spill] sm:$0xff] %v9926_v17  ;;  %v17588_v17 = vld [vmem:[#allocation114_spill] sm:$0xff] }
 0x558   : > { %17491 = vst [vmem:[#allocation247_spill] sm:$0xff] %v9930_v26  ;;  %v2334_v26 = vld [vmem:[%s10707_s19 + $0x138] sm:$0xff] }
 0x559   : > { %17493 = vst [vmem:[#allocation72_spill] sm:$0xff] %v17492_v53  ;;  %6054 = vmatpush.xpose.msk.msra.mxu2 %vm722_vm9, %v2334_v26  ;;  %v2324_v26 = vld [vmem:[%s10707_s19 + $0xa8] sm:$0xff]  ;;  %v2327_v53 = vld [vmem:[%s10707_s19 + $0x100] sm:$0xff] }
 0x55a   : > { %17494 = vst [vmem:[#allocation248_spill] sm:$0xff] %v9938_v16 }
 0x55b   : > { %17495 = vst [vmem:[#allocation249_spill] sm:$0xff] %v9942_v14  ;;  %v2326_v14 = vld [vmem:[%s10707_s19 + $0xb8] sm:$0xff] }
 0x55c   : > { %17497 = vst [vmem:[#allocation73_spill] sm:$0xff] %v17496_v27  ;;  %6038 = vmatpush.xpose.msk.msra.mxu1 %vm722_vm9, %v2326_v14  ;;  %v2316_v14 = vld [vmem:[%s10707_s19 + $0x28] sm:$0xff] }
 0x55d   : > { %17499 = vst [vmem:[#allocation74_spill] sm:$0xff] %v17498_v47 }
 0x55e   : > { %17501 = vst [vmem:[#allocation75_spill] sm:$0xff] %v17500_v61 }
 0x55f   : > { %17502 = vst [vmem:[#allocation250_spill] sm:$0xff] %v9958_v13  ;;  %v17549_v13 = vld [vmem:[#allocation91_spill] sm:$0xff] }
 0x560   : > { %17503 = vst [vmem:[#allocation251_spill] sm:$0xff] %v9962_v3  ;;  %v17551_v3 = vld [vmem:[#allocation92_spill] sm:$0xff]  ;;  %6039 = vmatpush.xpose.msk.msra.mxu1 %vm722_vm9, %v2325_v44  ;;  %v2323_v44 = vld [vmem:[%s10707_s19 + $0xa0] sm:$0xff] }
 0x561   : > { %17504 = vst [vmem:[#allocation252_spill] sm:$0xff] %v9966_v10  ;;  %v17586_v10 = vld [vmem:[#allocation113_spill] sm:$0xff] }
 0x562   : > { %17505 = vst [vmem:[#allocation253_spill] sm:$0xff] %v9970_v1  ;;  %v17553_v1 = vld [vmem:[#allocation93_spill] sm:$0xff] }
 0x563   : > { %17506 = vst [vmem:[#allocation254_spill] sm:$0xff] %v9974_v7  ;;  %v17541_v7 = vld [vmem:[#allocation87_spill] sm:$0xff] }
 0x564   : > { %17507 = vst [vmem:[#allocation255_spill] sm:$0xff] %v9978_v8  ;;  %v2317_v8 = vld [vmem:[%s10707_s19 + $0x30] sm:$0xff]  ;;  %6040 = vmatpush.xpose.msk.msra.mxu1 %vm722_vm9, %v2324_v26  ;;  %v2322_v26 = vld [vmem:[%s10707_s19 + $0x98] sm:$0xff] }
 0x565   : > { %17509 = vst [vmem:[#allocation76_spill] sm:$0xff] %v17508_v0 }
 0x566   : > { %17510 = vst [vmem:[#allocation256_spill] sm:$0xff] %v9986_v18 }
 0x567   : > { %17511 = vst [vmem:[#allocation257_spill] sm:$0xff] %v9990_v48 }
 0x568   : > { %17513 = vst [vmem:[#allocation77_spill] sm:$0xff] %v17512_v29  ;;  %6041 = vmatpush.xpose.msk.msra.mxu1 %vm722_vm9, %v2323_v44  ;;  %v2321_v44 = vld [vmem:[%s10707_s19 + $0x90] sm:$0xff] }
 0x569   : > { %17515 = vst [vmem:[#allocation78_spill] sm:$0xff] %v17514_v4 }
 0x56a   : > { %17517 = vst [vmem:[#allocation79_spill] sm:$0xff] %v17516_v23 }
 0x56b   : > { %17518 = vst [vmem:[#allocation258_spill] sm:$0xff] %v10006_v50  ;;  %v17539_v50 = vld [vmem:[#allocation86_spill] sm:$0xff] }
 0x56c   : > { %17519 = vst [vmem:[#allocation259_spill] sm:$0xff] %v10010_v28  ;;  %v17557_v28 = vld [vmem:[#allocation95_spill] sm:$0xff]  ;;  %6042 = vmatpush.xpose.msk.msra.mxu1 %vm722_vm9, %v2322_v26  ;;  %v2320_v26 = vld [vmem:[%s10707_s19 + $0x88] sm:$0xff] }
 0x56d   : > { %17520 = vst [vmem:[#allocation260_spill] sm:$0xff] %v10014_v56  ;;  %v17574_v56 = vld [vmem:[#allocation105_spill] sm:$0xff] }
 0x56e   : > { %17521 = vst [vmem:[#allocation261_spill] sm:$0xff] %v10018_v57  ;;  %v17582_v57 = vld [vmem:[#allocation110_spill] sm:$0xff] }
 0x56f   : > { %17523 = vst [vmem:[#allocation80_spill] sm:$0xff] %v17522_v25  ;;  %v2341_v25 = vld [vmem:[%s10707_s19 + $0x1b0] sm:$0xff] }
 0x570   : > { %17524 = vst [vmem:[#allocation262_spill] sm:$0xff] %v10026_v35  ;;  %6043 = vmatpush.xpose.msk.msra.mxu1 %vm722_vm9, %v2321_v44  ;;  %v2335_v44 = vld [vmem:[%s10707_s19 + $0x180] sm:$0xff] }
 0x571   : > { %17526 = vst [vmem:[#allocation81_spill] sm:$0xff] %v17525_v45 }
 0x572   : > { %17528 = vst [vmem:[#allocation82_spill] sm:$0xff] %v17527_v9 }
 0x573   : > { %17529 = vst [vmem:[#allocation263_spill] sm:$0xff] %v10038_v32  ;;  %v17545_v32 = vld [vmem:[#allocation89_spill] sm:$0xff] }
 0x574   : > { %17530 = vst [vmem:[#allocation264_spill] sm:$0xff] %v10042_v30  ;;  %v17555_v30 = vld [vmem:[#allocation94_spill] sm:$0xff]  ;;  %6044 = vmatpush.xpose.msk.msra.mxu1 %vm722_vm9, %v2320_v26  ;;  %v17603_v26 = vld [vmem:[#allocation35_spill] sm:$0xff] }
 0x575   : > { %17531 = vst [vmem:[#allocation265_spill] sm:$0xff] %v10046_v38  ;;  %v17566_v38 = vld [vmem:[#allocation101_spill] sm:$0xff] }
 0x576   : > { %17533 = vst [vmem:[#allocation83_spill] sm:$0xff] %v17532_v12  ;;  %v17577_v12 = vld [vmem:[#allocation107_spill] sm:$0xff] }
 0x577   : > { %17534 = vst [vmem:[#allocation266_spill] sm:$0xff] %v10054_v60  ;;  %v17585_v60 = vld [vmem:[#allocation112_spill] sm:$0xff] }
 0x578   : > { %17536 = vst [vmem:[#allocation84_spill] sm:$0xff] %v17535_v54  ;;  %v2318_v54 = vld [vmem:[%s10707_s19 + $0x38] sm:$0xff] }
 0x579   : > { %17538 = vst [vmem:[#allocation85_spill] sm:$0xff] %v17537_v39  ;;  %6022 = vmatpush.xpose.msk.msra.mxu0 %vm722_vm9, %v2318_v54  ;;  %v2333_v39 = vld [vmem:[%s10707_s19 + $0x130] sm:$0xff]  ;;  %v2332_v54 = vld [vmem:[%s10707_s19 + $0x128] sm:$0xff] }
 0x57a   : > { %17540 = vst [vmem:[#allocation86_spill] sm:$0xff] %v17539_v50  ;;  %6055 = vmatpush.xpose.msk.msra.mxu2 %vm722_vm9, %v2333_v39  ;;  %v2331_v39 = vld [vmem:[%s10707_s19 + $0x120] sm:$0xff] }
 0x57b   : > { %17542 = vst [vmem:[#allocation87_spill] sm:$0xff] %v17541_v7  ;;  %v17589_v7 = vld [vmem:[#allocation115_spill] sm:$0xff] }
 0x57c   : > { %17544 = vst [vmem:[#allocation88_spill] sm:$0xff] %v17543_v31  ;;  %v17559_v31 = vld [vmem:[#allocation96_spill] sm:$0xff] }
 0x57d   : > { %17546 = vst [vmem:[#allocation89_spill] sm:$0xff] %v17545_v32  ;;  %v17561_v32 = vld [vmem:[#allocation97_spill] sm:$0xff]  ;;  %6023 = vmatpush.xpose.msk.msra.mxu0 %vm722_vm9, %v2317_v8  ;;  %v2315_v8 = vld [vmem:[%s10707_s19 + $0x20] sm:$0xff] }
 0x57e   : > { %17548 = vst [vmem:[#allocation90_spill] sm:$0xff] %v17547_v49  ;;  %v17563_v49 = vld [vmem:[#allocation98_spill] sm:$0xff]  ;;  %6056 = vmatpush.xpose.msk.msra.mxu2 %vm722_vm9, %v2332_v54 }
 0x57f   : > { %17550 = vst [vmem:[#allocation91_spill] sm:$0xff] %v17549_v13  ;;  %v17564_v13 = vld [vmem:[#allocation99_spill] sm:$0xff]  ;;  %v2330_v54 = vld [vmem:[%s10707_s19 + $0x118] sm:$0xff] }
 0x580   : > { %17552 = vst [vmem:[#allocation92_spill] sm:$0xff] %v17551_v3  ;;  %v17565_v3 = vld [vmem:[#allocation100_spill] sm:$0xff] }
 0x581   : > { %17554 = vst [vmem:[#allocation93_spill] sm:$0xff] %v17553_v1  ;;  %v2342_v1 = vld [vmem:[%s10707_s19 + $0x1b8] sm:$0xff]  ;;  %6024 = vmatpush.xpose.msk.msra.mxu0 %vm722_vm9, %v2316_v14 }
 0x582   : > { %17556 = vst [vmem:[#allocation94_spill] sm:$0xff] %v17555_v30  ;;  %v17568_v30 = vld [vmem:[#allocation102_spill] sm:$0xff]  ;;  %6070 = vmatpush.xpose.msk.msra.mxu3 %vm722_vm9, %v2342_v1  ;;  %v2340_v1 = vld [vmem:[%s10707_s19 + $0x1a8] sm:$0xff]  ;;  %6057 = vmatpush.xpose.msk.msra.mxu2 %vm722_vm9, %v2331_v39  ;;  %v2329_v39 = vld [vmem:[%s10707_s19 + $0x110] sm:$0xff] }
 0x583   : > { %17558 = vst [vmem:[#allocation95_spill] sm:$0xff] %v17557_v28  ;;  %v2314_v14 = vld [vmem:[%s10707_s19 + $0x18] sm:$0xff] }
 0x584   : > { %17560 = vst [vmem:[#allocation96_spill] sm:$0xff] %v17559_v31 }
 0x585   : > { %17562 = vst [vmem:[#allocation97_spill] sm:$0xff] %v17561_v32  ;;  %6025 = vmatpush.xpose.msk.msra.mxu0 %vm722_vm9, %v2315_v8  ;;  %v2313_v8 = vld [vmem:[%s10707_s19 + $0x10] sm:$0xff] }
 0x586   : > { %17567 = vst [vmem:[#allocation98_spill] sm:$0xff] %v17566_v38  ;;  %6071 = vmatpush.xpose.msk.msra.mxu3 %vm722_vm9, %v2341_v25  ;;  %v2339_v25 = vld [vmem:[%s10707_s19 + $0x1a0] sm:$0xff]  ;;  %6058 = vmatpush.xpose.msk.msra.mxu2 %vm722_vm9, %v2330_v54  ;;  %v2336_v54 = vld [vmem:[%s10707_s19 + $0x188] sm:$0xff] }
 0x587   : > { %17569 = vst [vmem:[#allocation99_spill] sm:$0xff] %v17568_v30 }
 0x588   : > { %17571 = vst [vmem:[#allocation100_spill] sm:$0xff] %v17570_v19 }
 0x589   : > { %17573 = vst [vmem:[#allocation101_spill] sm:$0xff] %v17572_v36  ;;  %6026 = vmatpush.xpose.msk.msra.mxu0 %vm722_vm9, %v2314_v14  ;;  %v2312_v14 = vld [vmem:[%s10707_s19 + $0x8] sm:$0xff] }
 0x58a   : > { %17576 = vst [vmem:[#allocation102_spill] sm:$0xff] %v17575_v11  ;;  %6072 = vmatpush.xpose.msk.msra.mxu3 %vm722_vm9, %v2340_v1  ;;  %v2338_v1 = vld [vmem:[%s10707_s19 + $0x198] sm:$0xff]  ;;  %6059 = vmatpush.xpose.msk.msra.mxu2 %vm722_vm9, %v2329_v39  ;;  %v17599_v39 = vld [vmem:[#allocation33_spill] sm:$0xff] }
 0x58b   : > { %17579 = vst [vmem:[#allocation103_spill] sm:$0xff] %v17578_v63 }
 0x58c   : > { %17581 = vst [vmem:[#allocation104_spill] sm:$0xff] %v17580_v22 }
 0x58d   : > { %17584 = vst [vmem:[#allocation105_spill] sm:$0xff] %v17583_v2  ;;  %6027 = vmatpush.xpose.msk.msra.mxu0 %vm722_vm9, %v2313_v8  ;;  %v2319_v8 = vld [vmem:[%s10707_s19 + $0x80] sm:$0xff] }
 0x58e   : > { %17587 = vst [vmem:[#allocation106_spill] sm:$0xff] %v17586_v10  ;;  %6073 = vmatpush.xpose.msk.msra.mxu3 %vm722_vm9, %v2339_v25  ;;  %v2337_v25 = vld [vmem:[%s10707_s19 + $0x190] sm:$0xff]  ;;  %6060 = vmatpush.xpose.msk.msra.mxu2 %vm722_vm9, %v2328_v62  ;;  %v17602_v62 = vld [vmem:[#allocation42_spill] sm:$0xff] }
 0x58f   : > { %17590 = vst [vmem:[#allocation107_spill] sm:$0xff] %v17589_v7  ;;  %6045 = vmatpush.xpose.msk.msra.mxu1 %vm722_vm9, %v2319_v8  ;;  %v17607_v8 = vld [vmem:[#allocation37_spill] sm:$0xff] }
 0x590   : > { %17591 = vst [vmem:[#allocation108_spill] sm:$0xff] %v10194_v34 }
 0x591   : > { %17592 = vst [vmem:[#allocation109_spill] sm:$0xff] %v10198_v58  ;;  %6028 = vmatpush.xpose.msk.msra.mxu0 %vm722_vm9, %v2312_v14  ;;  %v17601_v14 = vld [vmem:[#allocation39_spill] sm:$0xff] }
 0x592   : > { %17593 = vst [vmem:[#allocation110_spill] sm:$0xff] %v10202_v52  ;;  %6074 = vmatpush.xpose.msk.msra.mxu3 %vm722_vm9, %v2338_v1  ;;  %v2311_v1 = vld [vmem:[%s10707_s19] sm:$0xff]  ;;  %6061 = vmatpush.xpose.msk.msra.mxu2 %vm722_vm9, %v2327_v53  ;;  %v17605_v53 = vld [vmem:[#allocation48_spill] sm:$0xff] }
 0x593   : > { %17594 = vst [vmem:[#allocation111_spill] sm:$0xff] %v10206_v24 }
 0x594   : > { %17595 = vst [vmem:[#allocation112_spill] sm:$0xff] %v10214_v43 }
 0x595   : > { %17596 = vst [vmem:[#allocation113_spill] sm:$0xff] %v10218_v46  ;;  %6029 = vmatpush.xpose.msk.msra.mxu0 %vm722_vm9, %v2311_v1  ;;  %6062 = vmatmul.msk.f32.vlgmr.msra.gmra.mxu2 %vm722_vm9, %v17601_v14  ;;  %v17606_v1 = vld [vmem:[#allocation44_spill] sm:$0xff]  ;;  %v17611_v14 = vld [vmem:[#allocation38_spill] sm:$0xff] }
 0x596   : > { %17597 = vst [vmem:[#allocation114_spill] sm:$0xff] %v10222_v40  ;;  %6075 = vmatpush.xpose.msk.msra.mxu3 %vm722_vm9, %v2337_v25  ;;  %v17600_v25 = vld [vmem:[#allocation40_spill] sm:$0xff] }
 0x597   : > { %17598 = vst [vmem:[#allocation115_spill] sm:$0xff] %v10226_v6  ;;  %6046 = vmatmul.msk.f32.vlgmr.msra.gmra.mxu1 %vm722_vm9, %v17600_v25  ;;  %v17610_v25 = vld [vmem:[#allocation53_spill] sm:$0xff] }
 0x598   : > { %6030 = vmatmul.msk.f32.vlgmr.msra.gmra.mxu0 %vm722_vm9, %v17599_v39  ;;  %v17608_v39 = vld [vmem:[#allocation49_spill] sm:$0xff] }
 0x59a   : > { %6076 = vmatpush.xpose.msk.msra.mxu3 %vm722_vm9, %v2336_v54  ;;  %v17604_v54 = vld [vmem:[#allocation47_spill] sm:$0xff] }
 0x59d   : > { %6063 = vmatmul.msk.f32.gmra.mxu2 %vm722_vm9, %v17605_v53  ;;  %v17615_v53 = vld [vmem:[#allocation41_spill] sm:$0xff] }
 0x59e   : > { %6077 = vmatpush.xpose.msk.msra.mxu3 %vm722_vm9, %v2335_v44  ;;  %v17609_v44 = vld [vmem:[#allocation51_spill] sm:$0xff] }
 0x59f   : > { %6047 = vmatmul.msk.f32.gmra.mxu1 %vm722_vm9, %v17604_v54  ;;  %v17614_v54 = vld [vmem:[#allocation55_spill] sm:$0xff] }
 0x5a0   : > { %6031 = vmatmul.msk.f32.gmra.mxu0 %vm722_vm9, %v17603_v26  ;;  %v17613_v26 = vld [vmem:[#allocation54_spill] sm:$0xff] }
 0x5a1   : > { %6078 = vmatmul.msk.f32.vlgmr.msra.gmra.mxu3 %vm722_vm9, %v17602_v62  ;;  %v17612_v62 = vld [vmem:[#allocation56_spill] sm:$0xff] }
 0x5a5   : > { %6064 = vmatmul.msk.f32.gmra.mxu2 %vm722_vm9, %v17609_v44  ;;  %v17619_v44 = vld [vmem:[#allocation46_spill] sm:$0xff] }
 0x5a7   : > { %6048 = vmatmul.msk.f32.gmra.mxu1 %vm722_vm9, %v17608_v39  ;;  %v17618_v39 = vld [vmem:[#allocation57_spill] sm:$0xff] }
 0x5a8   : > { %6032 = vmatmul.msk.f32.gmra.mxu0 %vm722_vm9, %v17607_v8  ;;  %v17617_v8 = vld [vmem:[#allocation59_spill] sm:$0xff] }
 0x5a9   : > { %6079 = vmatmul.msk.f32.gmra.mxu3 %vm722_vm9, %v17606_v1  ;;  %v17616_v1 = vld [vmem:[#allocation58_spill] sm:$0xff] }
 0x5ad   : > { %6065 = vmatmul.msk.f32.gmra.mxu2 %vm722_vm9, %v17613_v26  ;;  %v17623_v26 = vld [vmem:[#allocation34_spill] sm:$0xff] }
 0x5af   : > { %6049 = vmatmul.msk.f32.gmra.mxu1 %vm722_vm9, %v17612_v62  ;;  %v17622_v62 = vld [vmem:[#allocation63_spill] sm:$0xff] }
 0x5b0   : > { %6033 = vmatmul.msk.f32.gmra.mxu0 %vm722_vm9, %v17611_v14  ;;  %v17621_v14 = vld [vmem:[#allocation61_spill] sm:$0xff] }
 0x5b1   : > { %6080 = vmatmul.msk.f32.gmra.mxu3 %vm722_vm9, %v17610_v25  ;;  %v17620_v25 = vld [vmem:[#allocation60_spill] sm:$0xff] }
 0x5b5   : > { %6066 = vmatmul.msk.f32.gmra.mxu2 %vm722_vm9, %v17617_v8  ;;  %v17627_v8 = vld [vmem:[#allocation36_spill] sm:$0xff] }
 0x5b7   : > { %6050 = vmatmul.msk.f32.gmra.mxu1 %vm722_vm9, %v17616_v1  ;;  %v17626_v1 = vld [vmem:[#allocation64_spill] sm:$0xff] }
 0x5b8   : > { %6034 = vmatmul.msk.f32.gmra.mxu0 %vm722_vm9, %v17615_v53  ;;  %v17625_v53 = vld [vmem:[#allocation43_spill] sm:$0xff] }
 0x5b9   : > { %6081 = vmatmul.msk.f32.gmra.mxu3 %vm722_vm9, %v17614_v54  ;;  %v17624_v54 = vld [vmem:[#allocation45_spill] sm:$0xff] }
 0x5bd   : > { %6067 = vmatmul.msk.f32.gmra.mxu2 %vm722_vm9, %v17621_v14  ;;  %v2699_v14 = vlaneseq }
 0x5bf   : > { %6051 = vmatmul.msk.f32.gmra.mxu1 %vm722_vm9, %v17620_v25  ;;  %v17630_v25 = vld [vmem:[#allocation62_spill] sm:$0xff] }
 0x5c0   : > { %6035 = vmatmul.msk.f32.gmra.mxu0 %vm722_vm9, %v17619_v44  ;;  %v17629_v44 = vld [vmem:[#allocation52_spill] sm:$0xff] }
 0x5c1   : > { %6082 = vmatmul.msk.f32.gmra.mxu3 %vm722_vm9, %v17618_v39  ;;  %v17628_v39 = vld [vmem:[#allocation50_spill] sm:$0xff] }
 0x5c5   : > { %6068 = vmatmul.msk.f32.gmra.mxu2 %vm722_vm9, %v17625_v53 }
 0x5c7   : > { %6052 = vmatmul.msk.f32.gmra.mxu1 %vm722_vm9, %v17624_v54 }
 0x5c8   : > { %6036 = vmatmul.msk.f32.gmra.mxu0 %vm722_vm9, %v17623_v26  ;;  %v13624_v26 = vand.u32 127, %v2699_v14 }
 0x5c9   : > { %6083 = vmatmul.msk.f32.gmra.mxu3 %vm722_vm9, %v17622_v62  ;;  %v13622_v62 = vshrl.u32 %v2699_v14, 7 }
 0x5cb   : > { %vm2710_vm11 = vcmp.le.s32.totalorder %v13624_v26, %v13622_v62  ;;  %v13653_v35 = vadd.s32 8, %v13622_v62  ;;  %v13679_v48 = vadd.s32 24, %v13622_v62  ;;  %v13696_v29 = vadd.s32 32, %v13622_v62 }
 0x5cc   : > { %v13734_v37 = vadd.s32 48, %v13622_v62 }
 0x5cd   : > { %6069 = vmatmul.msk.f32.gmra.mxu2 %vm722_vm9, %v17629_v44  ;;  %vm2711_vm14 = vcmp.le.s32.totalorder %v13624_v26, %v13653_v35  ;;  %vm2713_vm15 = vcmp.le.s32.totalorder %v13624_v26, %v13679_v48  ;;  %vm2714_vm0 = vcmp.le.s32.totalorder %v13624_v26, %v13696_v29 }
 0x5ce   : > { %vm2716_vm2 = vcmp.le.s32.totalorder %v13624_v26, %v13734_v37 }
 0x5cf   : > { %6053 = vmatmul.msk.f32.gmra.mxu1 %vm722_vm9, %v17628_v39 }
 0x5d0   : > { %6037 = vmatmul.msk.f32.gmra.mxu0 %vm722_vm9, %v17627_v8 }
 0x5d1   : > { %6084 = vmatmul.msk.f32.gmra.mxu3 %vm722_vm9, %v17626_v1 }
 0x5d9   : > { %6085 = vmatmul.msk.f32.gmra.mxu3 %vm722_vm9, %v17630_v25 }
 0x614   : > { %v2513_v53 = vpop.f32.mrf.mxu1 }
 0x615   : > { %v2432_v54 = vpop.f32.mrf.mxu0  ;;  %v13636_v8 = vsel %vm2710_vm11, %v2513_v53, -1e+30  ;;  %v13650_v53 = vadd.s32 16, %v13622_v62 }
 0x616   : > { %v13631_v1 = vsel %vm2710_vm11, %v2432_v54, -1e+30  ;;  %v2791_v39 = vsel %vm2766_vm12, %v13636_v8, -inf }
 0x617   : > { %2792 = vmax.xlane.f32.xlu0 %v2791_v39  ;;  %vm2712_vm13 = vcmp.le.s32.totalorder %v13624_v26, %v13650_v53 }
 0x618   : > { %v2594_v44 = vpop.f32.mrf.mxu2 }
 0x619   : > { %v13643_v25 = vsel %vm2710_vm11, %v2594_v44, -1e+30 }
 0x61a   : > { %v2815_v54 = vsel %vm2766_vm12, %v13643_v25, -inf }
 0x61b   : > { %2816 = vmax.xlane.f32.xlu2 %v2815_v54 }
 0x61d   : > { %v13645_v14 = vpop.f32.mrf.mxu0 }
 0x61e   : > { %v13820_v53 = vsel %vm2711_vm14, %v13645_v14, -1e+30 }
 0x620   : > { %v2597_v44 = vpop.f32.mrf.mxu2 }
 0x621   : > { %v13669_v5 = vsel %vm2711_vm14, %v2597_v44, -1e+30 }
 0x622   : > { %v2818_v18 = vsel %vm2766_vm12, %v13669_v5, -inf }
 0x623   : > { %2819 = vmax.xlane.f32.xlu1 %v2818_v18 }
 0x624   : > { %v2675_v0 = vpop.f32.mrf.mxu3 }
 0x625   : > { %v13658_v39 = vsel %vm2710_vm11, %v2675_v0, -1e+30  ;;  %v2438_v27 = vpop.f32.mrf.mxu0 }
 0x626   : > { %v2839_v54 = vsel %vm2766_vm12, %v13658_v39, -inf  ;;  %v13674_v0 = vsel %vm2712_vm13, %v2438_v27, -1e+30 }
 0x627   : > { %2840 = vmax.xlane.f32.xlu2 %v2839_v54  ;;  %v2773_v37 = vsel %vm2766_vm12, %v13674_v0, -inf }
 0x628   : > { %v2600_v45 = vpop.f32.mrf.mxu2 }
 0x629   : > { %v13744_v20 = vsel %vm2712_vm13, %v2600_v45, -1e+30 }
 0x62c   : > { %v2678_v33 = vpop.f32.mrf.mxu3 }
 0x62d   : > { %v13684_v44 = vsel %vm2711_vm14, %v2678_v33, -1e+30  ;;  %v2441_v41 = vpop.f32.mrf.mxu0 }
 0x62e   : > { %v2842_v27 = vsel %vm2766_vm12, %v13684_v44, -inf  ;;  %v13693_v18 = vsel %vm2713_vm15, %v2441_v41, -1e+30 }
 0x62f   : > { %2843 = vmax.xlane.f32.xlu2 %v2842_v27 }
 0x630   : > { %v2603_v61 = vpop.f32.mrf.mxu2 }
 0x634   : > { %v2681_v54 = vpop.f32.mrf.mxu3 }
 0x635   : > { %v13701_v33 = vsel %vm2712_vm13, %v2681_v54, -1e+30  ;;  %v2444_v16 = vpop.f32.mrf.mxu0  ;;  %v13715_v54 = vadd.s32 40, %v13622_v62 }
 0x636   : > { %v2845_v42 = vsel %vm2766_vm12, %v13701_v33, -inf  ;;  %v13710_v41 = vsel %vm2714_vm0, %v2444_v16, -1e+30 }
 0x637   : > { %2846 = vmax.xlane.f32.xlu2 %v2845_v42  ;;  %v2779_v27 = vsel %vm2766_vm12, %v13710_v41, -inf  ;;  %vm2715_vm1 = vcmp.le.s32.totalorder %v13624_v26, %v13715_v54  ;;  %v2516_v42 = vpop.f32.mrf.mxu1  ;;  %v2366_v54 = vld [vmem:[%s10715_s17 + $0x138] sm:$0xff] }
 0x638   : > { %2780 = vmax.xlane.f32.xlu0 %v2779_v27  ;;  %v13767_v31 = vsel %vm2711_vm14, %v2516_v42, -1e+30  ;;  %v2606_v19 = vpop.f32.mrf.mxu2  ;;  %3441 = vmatpush.msrb.mxu2 %v2366_v54  ;;  %v2362_v54 = vld [vmem:[%s10715_s17 + $0x118] sm:$0xff] }
 0x63c   : > { %v2684_v51 = vpop.f32.mrf.mxu3 }
 0x63d   : > { %v13720_v4 = vsel %vm2713_vm15, %v2684_v51, -1e+30  ;;  %v2447_v50 = vpop.f32.mrf.mxu0 }
 0x63e   : > { %v2848_v16 = vsel %vm2766_vm12, %v13720_v4, -inf  ;;  %v13729_v55 = vsel %vm2715_vm1, %v2447_v50, -1e+30 }
 0x63f   : > { %2849 = vmax.xlane.f32.xlu2 %v2848_v16  ;;  %v2782_v27 = vsel %vm2766_vm12, %v13729_v55, -inf  ;;  %v2519_v47 = vpop.f32.mrf.mxu1 }
 0x640   : > { %2783 = vmax.xlane.f32.xlu1 %v2782_v27  ;;  %v2821_v27 = vsel %vm2766_vm12, %v13744_v20, -inf }
 0x644   : > { %v2687_v51 = vpop.f32.mrf.mxu3 }
 0x645   : > { %v13739_v23 = vsel %vm2714_vm0, %v2687_v51, -1e+30  ;;  %v2450_v16 = vpop.f32.mrf.mxu0 }
 0x646   : > { %17631 = vst [vmem:[#allocation33_spill] sm:$0xff] %v13739_v23  ;;  %v2851_v50 = vsel %vm2766_vm12, %v13739_v23, -inf  ;;  %v13755_v51 = vsel %vm2716_vm2, %v2450_v16, -1e+30  ;;  %v13775_v16 = vadd.s32 56, %v13622_v62  ;;  %v2360_v23 = vld [vmem:[%s10715_s17 + $0x108] sm:$0xff] }
 0x647   : > { %2852 = vmax.xlane.f32.xlu2 %v2851_v50  ;;  %v2785_v45 = vsel %vm2766_vm12, %v13755_v51, -inf  ;;  %v13772_v50 = vsel %vm2713_vm15, %v2603_v61, -1e+30  ;;  %v2522_v62 = vpop.f32.mrf.mxu1 }
 0x648   : > { %2822 = vmax.xlane.f32.xlu1 %v2821_v27  ;;  %2786 = vmax.xlane.f32.xlu0 %v2785_v45  ;;  %v2794_v45 = vsel %vm2766_vm12, %v13767_v31, -inf  ;;  %vm2717_vm3 = vcmp.le.s32.totalorder %v13624_v26, %v13775_v16  ;;  %v2349_v16 = vld [vmem:[%s10715_s17 + $0x30] sm:$0xff] }
 0x64c   : > { %v2690_v9 = vpop.f32.mrf.mxu3 }
 0x64d   : > { %v13762_v28 = vsel %vm2715_vm1, %v2690_v9, -1e+30  ;;  %v2824_v9 = vsel %vm2766_vm12, %v13772_v50, -inf  ;;  %v2453_v43 = vpop.f32.mrf.mxu0 }
 0x64e   : > { %17632 = vst [vmem:[#allocation40_spill] sm:$0xff] %v13762_v28  ;;  %v2854_v27 = vsel %vm2766_vm12, %v13762_v28, -inf  ;;  %v13793_v28 = vsel %vm2717_vm3, %v2453_v43, -1e+30  ;;  %v13809_v43 = vsel %vm2713_vm15, %v2522_v62, -1e+30  ;;  %v2609_v62 = vpop.f32.mrf.mxu2 }
 0x64f   : > { %2855 = vmax.xlane.f32.xlu2 %v2854_v27  ;;  %v13798_v27 = vsel %vm2712_vm13, %v2519_v47, -1e+30  ;;  %v13814_v47 = vsel %vm2714_vm0, %v2606_v19, -1e+30  ;;  %v13841_v14 = vsel %vm2715_vm1, %v2609_v62, -1e+30 }
 0x650   : > { %2825 = vmax.xlane.f32.xlu1 %v2824_v9  ;;  %2795 = vmax.xlane.f32.xlu0 %v2794_v45  ;;  %v2797_v45 = vsel %vm2766_vm12, %v13798_v27, -inf  ;;  %v2827_v48 = vsel %vm2766_vm12, %v13814_v47, -inf }
 0x654   : > { %v2693_v42 = vpop.f32.mrf.mxu3 }
 0x655   : > { %v13788_v61 = vsel %vm2716_vm2, %v2693_v42, -1e+30  ;;  %v2788_v42 = vsel %vm2766_vm12, %v13793_v28, -inf }
 0x656   : > { %17633 = vst [vmem:[#allocation39_spill] sm:$0xff] %v13788_v61  ;;  %v2857_v9 = vsel %vm2766_vm12, %v13788_v61, -inf  ;;  %v2525_v61 = vpop.f32.mrf.mxu1  ;;  %v2612_v29 = vpop.f32.mrf.mxu2 }
 0x657   : > { %2858 = vmax.xlane.f32.xlu2 %v2857_v9  ;;  %v2800_v9 = vsel %vm2766_vm12, %v13809_v43, -inf  ;;  %v13836_v19 = vsel %vm2714_vm0, %v2525_v61, -1e+30  ;;  %v13857_v62 = vsel %vm2716_vm2, %v2612_v29, -1e+30  ;;  %v2364_v29 = vld [vmem:[%s10715_s17 + $0x128] sm:$0xff] }
 0x658   : > { %2798 = vmax.xlane.f32.xlu0 %v2797_v45  ;;  %2789 = vmax.xlane.f32.xlu1 %v2788_v42  ;;  %v2770_v45 = vsel %vm2766_vm12, %v13820_v53, -inf }
 0x65c   : > { %v2696_v42 = vpop.f32.mrf.mxu3 }
 0x65d   : > { %v13831_v35 = vsel %vm2717_vm3, %v2696_v42, -1e+30 }
 0x65e   : > { %17634 = vst [vmem:[#allocation42_spill] sm:$0xff] %v13831_v35  ;;  %v2528_v42 = vpop.f32.mrf.mxu1 }
 0x65f   : > { %2771 = vmax.xlane.f32.xlu2 %v2770_v45  ;;  %v2830_v45 = vsel %vm2766_vm12, %v13841_v14, -inf  ;;  %v13852_v61 = vsel %vm2715_vm1, %v2528_v42, -1e+30 }
 0x660   : > { %2801 = vmax.xlane.f32.xlu0 %v2800_v9  ;;  %2828 = vmax.xlane.f32.xlu1 %v2827_v48  ;;  %v2860_v9 = vsel %vm2766_vm12, %v13831_v35, -inf  ;;  %v2803_v48 = vsel %vm2766_vm12, %v13836_v19, -inf  ;;  %v2806_v35 = vsel %vm2766_vm12, %v13852_v61, -inf }
 0x666   : > { %v2531_v2 = vpop.f32.mrf.mxu1 }
 0x667   : > { %2861 = vmax.xlane.f32.xlu2 %v2860_v9  ;;  %v2833_v9 = vsel %vm2766_vm12, %v13857_v62, -inf }
 0x668   : > { %2804 = vmax.xlane.f32.xlu0 %v2803_v48  ;;  %2831 = vmax.xlane.f32.xlu1 %v2830_v45  ;;  %v13867_v48 = vsel %vm2716_vm2, %v2531_v2, -1e+30  ;;  %v2365_v45 = vld [vmem:[%s10715_s17 + $0x130] sm:$0xff] }
 0x669   : > { %3442 = vmatpush.msrb.mxu2 %v2365_v45  ;;  %v2809_v42 = vsel %vm2766_vm12, %v13867_v48, -inf  ;;  %v2361_v2 = vld [vmem:[%s10715_s17 + $0x110] sm:$0xff]  ;;  %v2776_v45 = vsel %vm2766_vm12, %v13693_v18, -inf }
 0x66b   : > { %3443 = vmatpush.msrb.mxu2 %v2364_v29  ;;  %v2615_v29 = vpop.f32.mrf.mxu2 }
 0x66e   : > { %v2534_v32 = vpop.f32.mrf.mxu1 }
 0x670   : > { %2807 = vmax.xlane.f32.xlu0 %v2806_v35  ;;  %2834 = vmax.xlane.f32.xlu1 %v2833_v9  ;;  %v2767_v35 = vsel %vm2766_vm12, %v13631_v1, -inf  ;;  %v2363_v9 = vld [vmem:[%s10715_s17 + $0x120] sm:$0xff] }
 0x671   : > { %3444 = vmatpush.msrb.mxu2 %v2363_v9  ;;  %v13892_v9 = vsel %vm2717_vm3, %v2615_v29, -1e+30  ;;  %v2348_v29 = vld [vmem:[%s10715_s17 + $0x28] sm:$0xff] }
 0x673   : > { %3445 = vmatpush.msrb.mxu2 %v2362_v54 }
 0x675   : > { %3446 = vmatpush.msrb.mxu2 %v2361_v2  ;;  %v2836_v2 = vsel %vm2766_vm12, %v13892_v9, -inf }
 0x677   : > { %3447 = vmatpush.msrb.mxu2 %v2360_v23 }
 0x678   : > { %2810 = vmax.xlane.f32.xlu0 %v2809_v42  ;;  %2768 = vmax.xlane.f32.xlu1 %v2767_v35  ;;  %v2359_v42 = vld [vmem:[%s10715_s17 + $0x100] sm:$0xff]  ;;  %v13887_v35 = vsel %vm2717_vm3, %v2534_v32, -1e+30  ;;  %v2350_v32 = vld [vmem:[%s10715_s17 + $0x38] sm:$0xff] }
 0x679   : > { %3448 = vmatpush.msrb.mxu2 %v2359_v42  ;;  %v2812_v54 = vsel %vm2766_vm12, %v13887_v35, -inf  ;;  %6174 = vmatpush.msrb.mxu1 %v2350_v32 }
 0x67a   : > { %6175 = vmatpush.msrb.mxu3 %v2350_v32  ;;  %3311 = vmatpush.msrb.mxu0 %v2350_v32 }
 0x67b   : > { %6176 = vmatpush.msrb.mxu1 %v2349_v16 }
 0x67c   : > { %6177 = vmatpush.msrb.mxu3 %v2349_v16  ;;  %3312 = vmatpush.msrb.mxu0 %v2349_v16 }
 0x67d   : > { %6178 = vmatpush.msrb.mxu1 %v2348_v29 }
 0x67e   : > { %6179 = vmatpush.msrb.mxu3 %v2348_v29  ;;  %3313 = vmatpush.msrb.mxu0 %v2348_v29 }
 0x680   : > { %2774 = vmax.xlane.f32.xlu0 %v2773_v37  ;;  %2777 = vmax.xlane.f32.xlu1 %v2776_v45 }
 0x688   : > { %2813 = vmax.xlane.f32.xlu0 %v2812_v54  ;;  %2837 = vmax.xlane.f32.xlu1 %v2836_v2 }
 0x68a   : > { %v2793_v23 = vpop.xlane.xlu0 %2792 }
 0x68b   : > { %v13899_v37 = vmax.f32 %v10194_v34, %v2793_v23  ;;  %v2346_v23 = vld [vmem:[%s10715_s17 + $0x18] sm:$0xff] }
 0x68c   : > { %v2358_v34 = vld [vmem:[%s10715_s17 + $0xb8] sm:$0xff] }
 0x68d   : > { %17635 = vst [vmem:[#allocation35_spill] sm:$0xff] %v13899_v37  ;;  %v2999_v26 = vsub.f32 %v13636_v8, %v13899_v37  ;;  %v2347_v8 = vld [vmem:[%s10715_s17 + $0x20] sm:$0xff] }
 0x68e   : > { %v2817_v42 = vpop.xlane.xlu2 %2816  ;;  %6180 = vmatpush.msrb.mxu1 %v2347_v8  ;;  %6181 = vmatpush.msrb.mxu3 %v2347_v8 }
 0x68f   : > { %v3039_v45 = vmul.f32 1.442695, %v2999_v26  ;;  %v13907_v54 = vmax.f32 %v17582_v57, %v2817_v42  ;;  %3314 = vmatpush.msrb.mxu0 %v2347_v8  ;;  %v2345_v26 = vld [vmem:[%s10715_s17 + $0x10] sm:$0xff] }
 0x690   : > { %6182 = vmatpush.msrb.mxu1 %v2346_v23  ;;  %6183 = vmatpush.msrb.mxu3 %v2346_v23 }
 0x691   : > { %8150 = vpow2.f32 %v3039_v45  ;;  %v3007_v2 = vsub.f32 %v13643_v25, %v13907_v54  ;;  %3315 = vmatpush.msrb.mxu0 %v2346_v23  ;;  %v2344_v45 = vld [vmem:[%s10715_s17 + $0x8] sm:$0xff]  ;;  %v2343_v23 = vld [vmem:[%s10715_s17] sm:$0xff] }
 0x692   : > { %6184 = vmatpush.msrb.mxu1 %v2345_v26  ;;  %6185 = vmatpush.msrb.mxu3 %v2345_v26 }
 0x693   : > { %v3055_v32 = vmul.f32 1.442695, %v3007_v2  ;;  %3316 = vmatpush.msrb.mxu0 %v2345_v26 }
 0x694   : > { %6186 = vmatpush.msrb.mxu1 %v2344_v45  ;;  %6187 = vmatpush.msrb.mxu3 %v2344_v45 }
 0x695   : > { %8152 = vpow2.f32 %v3055_v32  ;;  %3317 = vmatpush.msrb.mxu0 %v2344_v45 }
 0x696   : > { %v2820_v42 = vpop.xlane.xlu1 %2819  ;;  %6188 = vmatpush.msrb.mxu1 %v2343_v23  ;;  %6189 = vmatpush.msrb.mxu3 %v2343_v23 }
 0x697   : > { %v13914_v16 = vpop.eup %8150  ;;  %v13923_v2 = vmax.f32 %v17580_v22, %v2820_v42  ;;  %3318 = vmatpush.msrb.mxu0 %v2343_v23  ;;  %v2356_v22 = vld [vmem:[%s10715_s17 + $0xa8] sm:$0xff] }
 0x698   : > { %v3143_v25 = vsel %vm2766_vm12, %v13914_v16, 0.0  ;;  %3376 = vmatpush.msra.mxu1 %v2358_v34  ;;  %v2355_v34 = vld [vmem:[%s10715_s17 + $0xa0] sm:$0xff] }
 0x699   : > { %17637 = vst [vmem:[#allocation48_spill] sm:$0xff] %v13923_v2  ;;  %3144 = vadd.xlane.f32.xlu2 %v3143_v25  ;;  %v3008_v26 = vsub.f32 %v13669_v5, %v13923_v2  ;;  %v2357_v25 = vld [vmem:[%s10715_s17 + $0xb0] sm:$0xff] }
 0x69a   : > { %v2841_v29 = vpop.xlane.xlu2 %2840  ;;  %3377 = vmatpush.msra.mxu1 %v2357_v25 }
 0x69b   : > { %v13920_v8 = vmax.f32 %v17568_v30, %v2841_v29  ;;  %v8153_v37 = vpop.eup %8152  ;;  %v3057_v42 = vmul.f32 1.442695, %v3008_v26  ;;  %v2371_v30 = vld [vmem:[%s10715_s17 + $0x1a0] sm:$0xff] }
 0x69c   : > { %6102 = vmatmul.msk.f32.vlgmr.msrb.gmra.mxu2 %vm2766_vm12, %v8153_v37  ;;  %v3167_v45 = vsel %vm2766_vm12, %v8153_v37, 0.0  ;;  %3378 = vmatpush.msra.mxu1 %v2356_v22  ;;  %v2353_v37 = vld [vmem:[%s10715_s17 + $0x90] sm:$0xff] }
 0x69d   : > { %17636 = vst [vmem:[#allocation47_spill] sm:$0xff] %v13920_v8  ;;  %v3015_v32 = vsub.f32 %v13658_v39, %v13920_v8  ;;  %3168 = vadd.xlane.f32.xlu0 %v3167_v45  ;;  %v2352_v45 = vld [vmem:[%s10715_s17 + $0x88] sm:$0xff] }
 0x69e   : > { %3379 = vmatpush.msra.mxu1 %v2355_v34 }
 0x69f   : > { %v3071_v29 = vmul.f32 1.442695, %v3015_v32  ;;  %v2354_v32 = vld [vmem:[%s10715_s17 + $0x98] sm:$0xff] }
 0x6a0   : > { %3380 = vmatpush.msra.mxu1 %v2354_v32 }
 0x6a1   : > { %8154 = vpow2.f32 %v3071_v29 }
 0x6a2   : > { %v2844_v5 = vpop.xlane.xlu2 %2843  ;;  %8156 = vpow2.f32 %v3057_v42  ;;  %3381 = vmatpush.msra.mxu1 %v2353_v37  ;;  %v2351_v42 = vld [vmem:[%s10715_s17 + $0x80] sm:$0xff] }
 0x6a3   : > { %v13936_v39 = vmax.f32 %v17566_v38, %v2844_v5 }
 0x6a4   : > { %3382 = vmatpush.msra.mxu1 %v2352_v45 }
 0x6a5   : > { %17638 = vst [vmem:[#allocation44_spill] sm:$0xff] %v13936_v39  ;;  %v3016_v23 = vsub.f32 %v13684_v44, %v13936_v39  ;;  %v2372_v39 = vld [vmem:[%s10715_s17 + $0x1a8] sm:$0xff] }
 0x6a6   : > { %3383 = vmatpush.msra.mxu1 %v2351_v42  ;;  %v2374_v42 = vld [vmem:[%s10715_s17 + $0x1b8] sm:$0xff] }
 0x6a7   : > { %v3073_v26 = vmul.f32 1.442695, %v3016_v23  ;;  %v13943_v25 = vpop.eup %8154  ;;  %3506 = vmatpush.msra.mxu3 %v2374_v42  ;;  %v2370_v42 = vld [vmem:[%s10715_s17 + $0x198] sm:$0xff] }
 0x6a8   : > { %v3191_v29 = vsel %vm2766_vm12, %v13943_v25, 0.0  ;;  %v13948_v5 = vpop.eup %8156 }
 0x6a9   : > { %8158 = vpow2.f32 %v3073_v26  ;;  %3192 = vadd.xlane.f32.xlu1 %v3191_v29  ;;  %6103 = vmatmul.msk.f32.gmra.mxu2 %vm2766_vm12, %v13948_v5 }
 0x6aa   : > { %v13950_v22 = vpop.xlane.xlu2 %2846 }
 0x6ab   : > { %v2781_v44 = vpop.xlane.xlu0 %2780 }
 0x6ac   : > { %v13956_v34 = vmax.f32 %v10210_v59, %v2781_v44 }
 0x6ae   : > { %v2995_v23 = vsub.f32 %v13710_v41, %v13956_v34  ;;  %v2373_v41 = vld [vmem:[%s10715_s17 + $0x1b0] sm:$0xff] }
 0x6af   : > { %v13960_v32 = vpop.eup %8158  ;;  %3507 = vmatpush.msra.mxu3 %v2373_v41 }
 0x6b0   : > { %v3031_v26 = vmul.f32 1.442695, %v2995_v23  ;;  %v3194_v37 = vsel %vm2766_vm12, %v13960_v32, 0.0 }
 0x6b1   : > { %3195 = vadd.xlane.f32.xlu1 %v3194_v37  ;;  %3508 = vmatpush.msra.mxu3 %v2372_v39 }
 0x6b2   : > { %v13964_v29 = vpop.xlane.xlu2 %2849  ;;  %8160 = vpow2.f32 %v3031_v26 }
 0x6b3   : > { %v2784_v45 = vpop.xlane.xlu1 %2783  ;;  %3509 = vmatpush.msra.mxu3 %v2371_v30 }
 0x6b4   : > { %v13967_v44 = vmax.f32 %v10206_v24, %v2784_v45 }
 0x6b5   : > { %3510 = vmatpush.msra.mxu3 %v2370_v42 }
 0x6b6   : > { %v2996_v38 = vsub.f32 %v13729_v55, %v13967_v44 }
 0x6b8   : > { %v3033_v23 = vmul.f32 1.442695, %v2996_v38  ;;  %v13974_v37 = vpop.eup %8160 }
 0x6b9   : > { %17639 = vst [vmem:[#allocation37_spill] sm:$0xff] %v13974_v37  ;;  %6090 = vmatmul.msk.f32.vlgmr.msrb.gmra.mxu1 %vm2766_vm12, %v13974_v37  ;;  %v2369_v37 = vld [vmem:[%s10715_s17 + $0x190] sm:$0xff] }
 0x6ba   : > { %v13976_v2 = vpop.xlane.xlu2 %2852  ;;  %8162 = vpow2.f32 %v3033_v23  ;;  %3511 = vmatpush.msra.mxu3 %v2369_v37  ;;  %v2368_v23 = vld [vmem:[%s10715_s17 + $0x188] sm:$0xff] }
 0x6bb   : > { %v2823_v26 = vpop.xlane.xlu1 %2822  ;;  %v2787_v45 = vpop.xlane.xlu0 %2786 }
 0x6bc   : > { %v13982_v55 = vmax.f32 %v17578_v63, %v2823_v26  ;;  %v13985_v38 = vmax.f32 %v10202_v52, %v2787_v45  ;;  %3512 = vmatpush.msra.mxu3 %v2368_v23 }
 0x6be   : > { %v3009_v39 = vsub.f32 %v13744_v20, %v13982_v55  ;;  %v2997_v41 = vsub.f32 %v13755_v51, %v13985_v38  ;;  %v2367_v20 = vld [vmem:[%s10715_s17 + $0x180] sm:$0xff] }
 0x6bf   : > { %3513 = vmatpush.msra.mxu3 %v2367_v20 }
 0x6c0   : > { %v3059_v8 = vmul.f32 1.442695, %v3009_v39  ;;  %v13994_v24 = vpop.eup %8162  ;;  %v3035_v26 = vmul.f32 1.442695, %v2997_v41 }
 0x6c1   : > { %17640 = vst [vmem:[#allocation49_spill] sm:$0xff] %v13994_v24  ;;  %6091 = vmatmul.msk.f32.gmra.mxu1 %vm2766_vm12, %v13994_v24 }
 0x6c2   : > { %v13996_v63 = vpop.xlane.xlu2 %2855  ;;  %8164 = vpow2.f32 %v3059_v8 }
 0x6c3   : > { %v2826_v30 = vpop.xlane.xlu1 %2825  ;;  %v2796_v45 = vpop.xlane.xlu0 %2795  ;;  %8166 = vpow2.f32 %v3035_v26 }
 0x6c4   : > { %v14002_v51 = vmax.f32 %v17577_v12, %v2826_v30  ;;  %v14005_v42 = vmax.f32 %v10190_v15, %v2796_v45 }
 0x6c6   : > { %v3010_v37 = vsub.f32 %v13772_v50, %v14002_v51  ;;  %v3000_v39 = vsub.f32 %v13767_v31, %v14005_v42 }
 0x6c8   : > { %v3061_v41 = vmul.f32 1.442695, %v3010_v37  ;;  %v14011_v23 = vpop.eup %8164  ;;  %v3041_v24 = vmul.f32 1.442695, %v3000_v39 }
 0x6c9   : > { %6094 = vmatmul.msk.f32.vlgmr.msra.gmra.mxu1 %vm2766_vm12, %v13914_v16  ;;  %6104 = vmatmul.msk.f32.gmra.mxu2 %vm2766_vm12, %v14011_v23  ;;  %v14019_v30 = vpop.eup %8166 }
 0x6ca   : > { %v14013_v52 = vpop.xlane.xlu2 %2858  ;;  %17641 = vst [vmem:[#allocation51_spill] sm:$0xff] %v14019_v30  ;;  %8168 = vpow2.f32 %v3061_v41  ;;  %6092 = vmatmul.msk.f32.vlgmr.msrb.gmra.mxu3 %vm2766_vm12, %v14019_v30 }
 0x6cb   : > { %v2799_v8 = vpop.xlane.xlu0 %2798  ;;  %v2790_v26 = vpop.xlane.xlu1 %2789  ;;  %8170 = vpow2.f32 %v3041_v24 }
 0x6cc   : > { %v14022_v50 = vmax.f32 %v10186_v21, %v2799_v8  ;;  %v14025_v31 = vmax.f32 %v10198_v58, %v2790_v26 }
 0x6ce   : > { %v3001_v16 = vsub.f32 %v13798_v27, %v14022_v50  ;;  %v2998_v45 = vsub.f32 %v13793_v28, %v14025_v31 }
 0x6d0   : > { %v3043_v20 = vmul.f32 1.442695, %v3001_v16  ;;  %v14033_v37 = vpop.eup %8168  ;;  %v3037_v39 = vmul.f32 1.442695, %v2998_v45 }
 0x6d1   : > { %6105 = vmatmul.msk.f32.gmra.mxu2 %vm2766_vm12, %v14033_v37  ;;  %v14040_v24 = vpop.eup %8170 }
 0x6d2   : > { %v2772_v41 = vpop.xlane.xlu2 %2771  ;;  %8172 = vpow2.f32 %v3043_v20  ;;  %6095 = vmatmul.msk.f32.gmra.mxu1 %vm2766_vm12, %v14040_v24 }
 0x6d3   : > { %v14036_v8 = vmax.f32 %v10222_v40, %v2772_v41  ;;  %v2802_v26 = vpop.xlane.xlu0 %2801  ;;  %v2829_v30 = vpop.xlane.xlu1 %2828  ;;  %8174 = vpow2.f32 %v3037_v39 }
 0x6d4   : > { %v14043_v27 = vmax.f32 %v17589_v7, %v2802_v26  ;;  %v14046_v28 = vmax.f32 %v17575_v11, %v2829_v30 }
 0x6d5   : > { %v2992_v16 = vsub.f32 %v13820_v53, %v14036_v8 }
 0x6d6   : > { %v3002_v45 = vsub.f32 %v13809_v43, %v14043_v27  ;;  %v3011_v20 = vsub.f32 %v13814_v47, %v14046_v28 }
 0x6d7   : > { %v3025_v41 = vmul.f32 1.442695, %v2992_v16 }
 0x6d8   : > { %v3045_v40 = vmul.f32 1.442695, %v3002_v45  ;;  %v14056_v26 = vpop.eup %8172  ;;  %v3063_v30 = vmul.f32 1.442695, %v3011_v20 }
 0x6d9   : > { %8176 = vpow2.f32 %v3025_v41  ;;  %v14058_v58 = vpop.eup %8174  ;;  %v14082_v41 = vmax.f32 %v17565_v3, %v13950_v22 }
 0x6da   : > { %8178 = vpow2.f32 %v3045_v40  ;;  %6093 = vmatmul.msk.f32.gmra.mxu3 %vm2766_vm12, %v14058_v58  ;;  %6096 = vmatmul.msk.f32.gmra.mxu1 %vm2766_vm12, %v14056_v26 }
 0x6db   : > { %v2805_v11 = vpop.xlane.xlu0 %2804  ;;  %v2832_v7 = vpop.xlane.xlu1 %2831  ;;  %8180 = vpow2.f32 %v3063_v30 }
 0x6dc   : > { %v14061_v53 = vmax.f32 %v17588_v17, %v2805_v11  ;;  %v14064_v39 = vmax.f32 %v17574_v56, %v2832_v7 }
 0x6de   : > { %v3003_v43 = vsub.f32 %v13836_v19, %v14061_v53  ;;  %v3012_v47 = vsub.f32 %v13841_v14, %v14064_v39 }
 0x6df   : > { %v14074_v40 = vpop.eup %8176 }
 0x6e0   : > { %v3047_v11 = vmul.f32 1.442695, %v3003_v43  ;;  %v3122_v7 = vsel %vm2766_vm12, %v14074_v40, 0.0  ;;  %v14078_v16 = vpop.eup %8178  ;;  %v3065_v45 = vmul.f32 1.442695, %v3012_v47  ;;  %v3017_v47 = vsub.f32 %v13701_v33, %v14082_v41 }
 0x6e1   : > { %3123 = vadd.xlane.f32.xlu0 %v3122_v7  ;;  %v14084_v19 = vpop.eup %8180 }
 0x6e2   : > { %8182 = vpow2.f32 %v3047_v11  ;;  %6097 = vmatmul.msk.f32.gmra.mxu1 %vm2766_vm12, %v14078_v16  ;;  %6106 = vmatmul.msk.f32.gmra.mxu2 %vm2766_vm12, %v14084_v19 }
 0x6e3   : > { %v2808_v20 = vpop.xlane.xlu0 %2807  ;;  %v2835_v30 = vpop.xlane.xlu1 %2834  ;;  %8184 = vpow2.f32 %v3065_v45  ;;  %6110 = vmatmul.msk.f32.vlgmr.msra.gmra.mxu3 %vm2766_vm12, %v13943_v25  ;;  %v3075_v45 = vmul.f32 1.442695, %v3017_v47  ;;  %v14110_v25 = vmax.f32 %v17564_v13, %v13964_v29 }
 0x6e4   : > { %v14087_v14 = vmax.f32 %v17586_v10, %v2808_v20  ;;  %v14090_v43 = vmax.f32 %v17572_v36, %v2835_v30  ;;  %v3170_v30 = vsel %vm2766_vm12, %v13948_v5, 0.0 }
 0x6e6   : > { %17642 = vst [vmem:[#allocation53_spill] sm:$0xff] %v14087_v14  ;;  %v3004_v22 = vsub.f32 %v13852_v61, %v14087_v14  ;;  %v3013_v11 = vsub.f32 %v13857_v62, %v14090_v43 }
 0x6e8   : > { %v3049_v7 = vmul.f32 1.442695, %v3004_v22  ;;  %v3067_v20 = vmul.f32 1.442695, %v3013_v11  ;;  %v14106_v36 = vpop.eup %8182  ;;  %v3173_v11 = vsel %vm2766_vm12, %v14011_v23, 0.0  ;;  %v17644_v23 = vld [vmem:[#allocation33_spill] sm:$0xff] }
 0x6e9   : > { %3171 = vadd.xlane.f32.xlu0 %v3170_v30  ;;  %v14112_v14 = vpop.eup %8184 }
 0x6ea   : > { %8186 = vpow2.f32 %v3049_v7  ;;  %6098 = vmatmul.msk.f32.gmra.mxu1 %vm2766_vm12, %v14106_v36  ;;  %6107 = vmatmul.msk.f32.gmra.mxu2 %vm2766_vm12, %v14112_v14 }
 0x6eb   : > { %v2811_v61 = vpop.xlane.xlu0 %2810  ;;  %v2769_v10 = vpop.xlane.xlu1 %2768  ;;  %8188 = vpow2.f32 %v3067_v20  ;;  %6111 = vmatmul.msk.f32.gmra.mxu3 %vm2766_vm12, %v13960_v32 }
 0x6ec   : > { %v14115_v33 = vmax.f32 %v17585_v60, %v2811_v61  ;;  %v14118_v62 = vmax.f32 %v10226_v6, %v2769_v10  ;;  %8190 = vpow2.f32 %v3075_v45  ;;  %v3018_v10 = vsub.f32 %v13720_v4, %v14110_v25 }
 0x6ee   : > { %v3005_v5 = vsub.f32 %v13867_v48, %v14115_v33  ;;  %v2991_v29 = vsub.f32 %v13631_v1, %v14118_v62  ;;  %v3077_v32 = vmul.f32 1.442695, %v3018_v10  ;;  %v14140_v48 = vmax.f32 %v17563_v49, %v13976_v2 }
 0x6f0   : > { %v3051_v22 = vmul.f32 1.442695, %v3005_v5  ;;  %v3023_v47 = vmul.f32 1.442695, %v2991_v29  ;;  %v14134_v7 = vpop.eup %8186  ;;  %v3019_v61 = vsub.f32 %v17644_v23, %v14140_v48  ;;  %v3176_v29 = vsel %vm2766_vm12, %v14033_v37, 0.0  ;;  %v17648_v37 = vld [vmem:[#allocation100_spill] sm:$0xff] }
 0x6f1   : > { %3174 = vadd.xlane.f32.xlu0 %v3173_v11  ;;  %v14136_v20 = vpop.eup %8188  ;;  %v17645_v11 = vld [vmem:[#allocation97_spill] sm:$0xff] }
 0x6f2   : > { %8192 = vpow2.f32 %v3051_v22  ;;  %v8191_v45 = vpop.eup %8190  ;;  %6099 = vmatmul.msk.f32.gmra.mxu1 %vm2766_vm12, %v14134_v7  ;;  %6108 = vmatmul.msk.f32.gmra.mxu2 %vm2766_vm12, %v14136_v20 }
 0x6f3   : > { %v2775_v1 = vpop.xlane.xlu0 %2774  ;;  %v2778_v30 = vpop.xlane.xlu1 %2777  ;;  %8194 = vpow2.f32 %v3023_v47  ;;  %6112 = vmatmul.msk.f32.gmra.mxu3 %vm2766_vm12, %v8191_v45  ;;  %v3079_v47 = vmul.f32 1.442695, %v3019_v61  ;;  %v17649_v61 = vld [vmem:[#allocation112_spill] sm:$0xff] }
 0x6f4   : > { %v14143_v4 = vmax.f32 %v10218_v46, %v2775_v1  ;;  %8196 = vpow2.f32 %v3077_v32  ;;  %v14160_v1 = vmax.f32 %v17645_v11, %v13996_v63  ;;  %v14173_v6 = vmax.f32 %v17649_v61, %v2778_v30 }
 0x6f6   : > { %17643 = vst [vmem:[#allocation38_spill] sm:$0xff] %v14143_v4  ;;  %v2993_v2 = vsub.f32 %v13674_v0, %v14143_v4 }
 0x6f8   : > { %v3027_v5 = vmul.f32 1.442695, %v2993_v2  ;;  %v14156_v10 = vpop.eup %8192  ;;  %v17646_v2 = vld [vmem:[#allocation105_spill] sm:$0xff] }
 0x6f9   : > { %3177 = vadd.xlane.f32.xlu0 %v3176_v29  ;;  %v8195_v22 = vpop.eup %8194 }
 0x6fa   : > { %8198 = vpow2.f32 %v3027_v5  ;;  %6086 = vmatmul.msk.f32.vlgmr.msrb.gmra.mxu0 %vm2766_vm12, %v8195_v22  ;;  %v3119_v32 = vsel %vm2766_vm12, %v8195_v22, 0.0  ;;  %v14170_v29 = vpop.eup %8196  ;;  %6100 = vmatmul.msk.f32.gmra.mxu1 %vm2766_vm12, %v14156_v10  ;;  %v17650_v5 = vld [vmem:[#allocation40_spill] sm:$0xff] }
 0x6fb   : > { %v2814_v46 = vpop.xlane.xlu0 %2813  ;;  %v2838_v0 = vpop.xlane.xlu1 %2837  ;;  %3120 = vadd.xlane.f32.xlu2 %v3119_v32  ;;  %6113 = vmatmul.msk.f32.gmra.mxu3 %vm2766_vm12, %v14170_v29  ;;  %8200 = vpow2.f32 %v3079_v47  ;;  %v3020_v22 = vsub.f32 %v17650_v5, %v14160_v1  ;;  %v3179_v32 = vsel %vm2766_vm12, %v14084_v19, 0.0  ;;  %v17652_v19 = vld [vmem:[#allocation39_spill] sm:$0xff] }
 0x6fc   : > { %v14165_v23 = vmax.f32 %v17646_v2, %v2814_v46  ;;  %v14168_v4 = vmax.f32 %v17648_v37, %v2838_v0  ;;  %v2994_v37 = vsub.f32 %v13693_v18, %v14173_v6  ;;  %v3146_v18 = vsel %vm2766_vm12, %v14040_v24, 0.0 }
 0x6fd   : > { %v3197_v24 = vsel %vm2766_vm12, %v8191_v45, 0.0  ;;  %v17654_v45 = vld [vmem:[#allocation42_spill] sm:$0xff] }
 0x6fe   : > { %17647 = vst [vmem:[#allocation56_spill] sm:$0xff] %v14165_v23  ;;  %v3006_v63 = vsub.f32 %v13887_v35, %v14165_v23  ;;  %v3014_v46 = vsub.f32 %v13892_v9, %v14168_v4  ;;  %v3081_v35 = vmul.f32 1.442695, %v3020_v22  ;;  %v17651_v23 = vld [vmem:[#allocation96_spill] sm:$0xff] }
 0x6ff   : > { %v14192_v9 = vmax.f32 %v17651_v23, %v14013_v52  ;;  %v2862_v52 = vpop.xlane.xlu2 %2861 }
 0x700   : > { %v3053_v0 = vmul.f32 1.442695, %v3006_v63  ;;  %v8199_v30 = vpop.eup %8198  ;;  %v3069_v2 = vmul.f32 1.442695, %v3014_v46  ;;  %v3029_v63 = vmul.f32 1.442695, %v2994_v37 }
 0x701   : > { %3180 = vadd.xlane.f32.xlu0 %v3179_v32  ;;  %v3125_v61 = vsel %vm2766_vm12, %v8199_v30, 0.0  ;;  %v8201_v47 = vpop.eup %8200  ;;  %v3021_v46 = vsub.f32 %v17652_v19, %v14192_v9  ;;  %v17653_v37 = vld [vmem:[#allocation95_spill] sm:$0xff] }
 0x702   : > { %8202 = vpow2.f32 %v3053_v0  ;;  %3126 = vadd.xlane.f32.xlu1 %v3125_v61  ;;  %6087 = vmatmul.msk.f32.gmra.mxu0 %vm2766_vm12, %v14074_v40  ;;  %v3158_v61 = vsel %vm2766_vm12, %v14134_v7, 0.0  ;;  %v14206_v22 = vmax.f32 %v17653_v37, %v2862_v52  ;;  %v3149_v0 = vsel %vm2766_vm12, %v14056_v26, 0.0 }
 0x703   : > { %8204 = vpow2.f32 %v3069_v2  ;;  %3147 = vadd.xlane.f32.xlu2 %v3146_v18  ;;  %6114 = vmatmul.msk.f32.gmra.mxu3 %vm2766_vm12, %v8201_v47  ;;  %v3083_v2 = vmul.f32 1.442695, %v3021_v46  ;;  %v3185_v18 = vsel %vm2766_vm12, %v14136_v20, 0.0  ;;  %v3152_v26 = vsel %vm2766_vm12, %v14078_v16, 0.0 }
 0x704   : > { %8206 = vpow2.f32 %v3081_v35  ;;  %v3022_v35 = vsub.f32 %v17654_v45, %v14206_v22  ;;  %v3182_v20 = vsel %vm2766_vm12, %v14112_v14, 0.0  ;;  %v3200_v52 = vsel %vm2766_vm12, %v14170_v29, 0.0 }
 0x705   : > { %8208 = vpow2.f32 %v3029_v63  ;;  %v3161_v16 = vsel %vm2766_vm12, %v14156_v10, 0.0  ;;  %v3203_v29 = vsel %vm2766_vm12, %v8201_v47, 0.0  ;;  %v17655_v10 = vld [vmem:[#allocation111_spill] sm:$0xff] }
 0x706   : > { %8210 = vpow2.f32 %v3083_v2  ;;  %v3085_v63 = vmul.f32 1.442695, %v3022_v35  ;;  %v17657_v35 = vld [vmem:[#allocation99_spill] sm:$0xff] }
 0x708   : > { %v8203_v5 = vpop.eup %8202  ;;  %8212 = vpow2.f32 %v3085_v63  ;;  %v17659_v63 = vld [vmem:[#allocation104_spill] sm:$0xff] }
 0x709   : > { %3159 = vadd.xlane.f32.xlu0 %v3158_v61  ;;  %6101 = vmatmul.msk.f32.gmra.mxu1 %vm2766_vm12, %v8203_v5  ;;  %v8205_v40 = vpop.eup %8204 }
 0x70a   : > { %3198 = vadd.xlane.f32.xlu1 %v3197_v24  ;;  %6088 = vmatmul.msk.f32.gmra.mxu0 %vm2766_vm12, %v8199_v30  ;;  %v8207_v32 = vpop.eup %8206  ;;  %v3188_v46 = vsel %vm2766_vm12, %v8205_v40, 0.0  ;;  %v3155_v24 = vsel %vm2766_vm12, %v14106_v36, 0.0  ;;  %v17656_v36 = vld [vmem:[#allocation47_spill] sm:$0xff] }
 0x70b   : > { %6109 = vmatmul.msk.f32.gmra.mxu2 %vm2766_vm12, %v8205_v40  ;;  %3150 = vadd.xlane.f32.xlu2 %v3149_v0  ;;  %v8209_v7 = vpop.eup %8208  ;;  %v2899_v40 = vsub.f32 %v10210_v59, %v13956_v34  ;;  %v2911_v0 = vsub.f32 %v17582_v57, %v13907_v54  ;;  %v3164_v59 = vsel %vm2766_vm12, %v8203_v5, 0.0  ;;  %v17658_v34 = vld [vmem:[#allocation48_spill] sm:$0xff]  ;;  %v2921_v5 = vsub.f32 %v17565_v3, %v14082_v41  ;;  %v17668_v41 = vld [vmem:[#allocation110_spill] sm:$0xff] }
 0x70c   : > { %6115 = vmatmul.msk.f32.gmra.mxu3 %vm2766_vm12, %v8207_v32  ;;  %v3128_v30 = vsel %vm2766_vm12, %v8209_v7, 0.0  ;;  %v8211_v19 = vpop.eup %8210  ;;  %v17662_v57 = vld [vmem:[#allocation108_spill] sm:$0xff] }
 0x70d   : > { %v2935_v14 = vmul.f32 1.442695, %v2899_v40  ;;  %v3209_v2 = vsel %vm2766_vm12, %v8211_v19, 0.0  ;;  %v2959_v45 = vmul.f32 1.442695, %v2911_v0  ;;  %v2922_v40 = vsub.f32 %v17564_v13, %v14110_v25 }
 0x70e   : > { %v8213_v61 = vpop.eup %8212  ;;  %v2979_v3 = vmul.f32 1.442695, %v2921_v5  ;;  %v17676_v5 = vld [vmem:[#allocation107_spill] sm:$0xff] }
 0x70f   : > { %8214 = vpow2.f32 %v2935_v14  ;;  %v17665_v14 = vld [vmem:[#allocation75_spill] sm:$0xff]  ;;  %v3212_v13 = vsel %vm2766_vm12, %v8213_v61, 0.0 }
 0x710   : > { %8216 = vpow2.f32 %v2959_v45 }
 0x711   : > { %3186 = vadd.xlane.f32.xlu0 %v3185_v18  ;;  %v2919_v18 = vsub.f32 %v17657_v35, %v17656_v36  ;;  %v2901_v35 = vsub.f32 %v17668_v41, %v13985_v38  ;;  %v2904_v38 = vsub.f32 %v10190_v15, %v14005_v42  ;;  %v17672_v15 = vld [vmem:[#allocation109_spill] sm:$0xff] }
 0x712   : > { %3129 = vadd.xlane.f32.xlu1 %v3128_v30  ;;  %6089 = vmatmul.msk.f32.gmra.mxu0 %vm2766_vm12, %v8209_v7  ;;  %v2900_v7 = vsub.f32 %v17655_v10, %v13967_v44  ;;  %v17663_v44 = vld [vmem:[#allocation44_spill] sm:$0xff]  ;;  %v2902_v42 = vsub.f32 %v17672_v15, %v14025_v31  ;;  %v3140_v31 = vsel %vm2766_vm12, %v14058_v58, 0.0  ;;  %v17680_v41 = vld [vmem:[#allocation81_spill] sm:$0xff] }
 0x713   : > { %3153 = vadd.xlane.f32.xlu2 %v3152_v26  ;;  %v2912_v26 = vsub.f32 %v17659_v63, %v17658_v34  ;;  %v2925_v34 = vsub.f32 %v17651_v23, %v14192_v9  ;;  %v17670_v63 = vld [vmem:[#allocation82_spill] sm:$0xff]  ;;  %v17686_v15 = vld [vmem:[#allocation53_spill] sm:$0xff] }
 0x714   : > { %6116 = vmatmul.msk.f32.gmra.mxu3 %vm2766_vm12, %v8211_v19  ;;  %v2937_v30 = vmul.f32 1.442695, %v2900_v7  ;;  %v17661_v19 = vld [vmem:[#allocation35_spill] sm:$0xff] }
 0x715   : > { %v14245_v47 = vpop.eup %8214  ;;  %v2903_v54 = vsub.f32 %v17662_v57, %v17661_v19  ;;  %v17666_v7 = vld [vmem:[#allocation103_spill] sm:$0xff]  ;;  %v17671_v19 = vld [vmem:[#allocation74_spill] sm:$0xff] }
 0x716   : > { %17660 = vst [vmem:[#allocation54_spill] sm:$0xff] %v14245_v47  ;;  %8218 = vpow2.f32 %v2937_v30  ;;  %v2913_v45 = vsub.f32 %v17666_v7, %v13982_v55  ;;  %v8217_v25 = vpop.eup %8216  ;;  %v2914_v30 = vsub.f32 %v17577_v12, %v14002_v51  ;;  %v2941_v7 = vmul.f32 1.442695, %v2902_v42  ;;  %v17687_v42 = vld [vmem:[#allocation106_spill] sm:$0xff] }
 0x718   : > { %v2965_v57 = vmul.f32 1.442695, %v2914_v30 }
 0x719   : > { %3189 = vadd.xlane.f32.xlu0 %v3188_v46  ;;  %v3206_v46 = vsel %vm2766_vm12, %v8207_v32, 0.0  ;;  %v2923_v32 = vsub.f32 %v17563_v49, %v14140_v48  ;;  %v2924_v49 = vsub.f32 %v17645_v11, %v14160_v1  ;;  %v3103_v11 = vmul.f32 %v17670_v63, %v8217_v25  ;;  %v17683_v63 = vld [vmem:[#allocation78_spill] sm:$0xff] }
 0x71a   : > { %3183 = vadd.xlane.f32.xlu1 %v3182_v20  ;;  %v17664_v20 = vld [vmem:[#allocation98_spill] sm:$0xff] }
 0x71b   : > { %3201 = vadd.xlane.f32.xlu2 %v3200_v52  ;;  %v2920_v52 = vsub.f32 %v17664_v20, %v17663_v44  ;;  %v2983_v55 = vmul.f32 1.442695, %v2923_v32  ;;  %v2985_v1 = vmul.f32 1.442695, %v2924_v49  ;;  %v2945_v44 = vmul.f32 1.442695, %v2904_v38 }
 0x71c   : > { %6117 = vmatmul.msk.f32.gmra.mxu3 %vm2766_vm12, %v8213_v61  ;;  %v14269_v48 = vpop.eup %8218  ;;  %v2939_v61 = vmul.f32 1.442695, %v2901_v35  ;;  %v17674_v20 = vld [vmem:[#allocation114_spill] sm:$0xff] }
 0x71d   : > { %v2977_v10 = vmul.f32 1.442695, %v2920_v52  ;;  %17669 = vst [vmem:[#allocation41_spill] sm:$0xff] %v14269_v48  ;;  %v3252_v12 = vmul.f32 %v17671_v19, %v14269_v48  ;;  %v2896_v52 = vsub.f32 %v17674_v20, %v14036_v8  ;;  %v17678_v8 = vld [vmem:[#allocation66_spill] sm:$0xff]  ;;  %v2916_v19 = vsub.f32 %v17574_v56, %v14064_v39  ;;  %v17690_v39 = vld [vmem:[#allocation101_spill] sm:$0xff]  ;;  %v17691_v20 = vld [vmem:[#allocation237_spill] sm:$0xff] }
 0x722   : > { %3162 = vadd.xlane.f32.xlu1 %v3161_v16  ;;  %v2975_v16 = vmul.f32 1.442695, %v2919_v18  ;;  %v2981_v18 = vmul.f32 1.442695, %v2922_v40 }
 0x723   : > { %3156 = vadd.xlane.f32.xlu2 %v3155_v24  ;;  %v2961_v24 = vmul.f32 1.442695, %v2912_v26  ;;  %v2905_v26 = vsub.f32 %v10186_v21, %v14022_v50 }
 0x724   : > { %8220 = vpow2.f32 %v2975_v16  ;;  %v2987_v16 = vmul.f32 1.442695, %v2925_v34  ;;  %v2907_v34 = vsub.f32 %v17588_v17, %v14061_v53  ;;  %v17688_v17 = vld [vmem:[#allocation248_spill] sm:$0xff] }
 0x725   : > { %8222 = vpow2.f32 %v2961_v24  ;;  %v2906_v24 = vsub.f32 %v17676_v5, %v14043_v27  ;;  %v14303_v27 = vpop.f32.mrf.mxu2 }
 0x726   : > { %v2951_v5 = vmul.f32 1.442695, %v2907_v34  ;;  %v17705_v34 = vld [vmem:[#allocation113_spill] sm:$0xff] }
 0x72a   : > { %3210 = vadd.xlane.f32.xlu1 %v3209_v2  ;;  %v3251_v2 = vmul.f32 %v17665_v14, %v14245_v47  ;;  %v8221_v51 = vpop.eup %8220  ;;  %v2947_v14 = vmul.f32 1.442695, %v2905_v26 }
 0x72b   : > { %3204 = vadd.xlane.f32.xlu2 %v3203_v29  ;;  %v2943_v29 = vmul.f32 1.442695, %v2903_v54  ;;  %v17673_v54 = vld [vmem:[#allocation68_spill] sm:$0xff]  ;;  %v8223_v9 = vpop.eup %8222 }
 0x72c   : > { %v14309_v35 = vmul.f32 %v17680_v41, %v8223_v9 }
 0x72d   : > { %8224 = vpow2.f32 %v2943_v29  ;;  %v17677_v29 = vld [vmem:[#allocation79_spill] sm:$0xff] }
 0x72e   : > { %8226 = vpow2.f32 %v2977_v10  ;;  %v14296_v32 = vmul.f32 %v17677_v29, %v8221_v51 }
 0x72f   : > { %8228 = vpow2.f32 %v2979_v3  ;;  %v17679_v3 = vld [vmem:[#allocation244_spill] sm:$0xff] }
 0x730   : > { %8230 = vpow2.f32 %v2981_v18  ;;  %v14306_v58 = vmul.f32 %v17679_v3, %v8223_v9  ;;  %v17681_v18 = vld [vmem:[#allocation102_spill] sm:$0xff]  ;;  %v17697_v3 = vld [vmem:[#allocation236_spill] sm:$0xff] }
 0x731   : > { %8232 = vpow2.f32 %v2983_v55  ;;  %v2915_v49 = vsub.f32 %v17681_v18, %v14046_v28  ;;  %v17682_v55 = vld [vmem:[#allocation86_spill] sm:$0xff] }
 0x732   : > { %3165 = vadd.xlane.f32.xlu1 %v3164_v59  ;;  %v2963_v59 = vmul.f32 1.442695, %v2913_v45  ;;  %v14301_v45 = vpop.xlane.xlu1 %3192 }
 0x733   : > { %3207 = vadd.xlane.f32.xlu2 %v3206_v46  ;;  %v14285_v46 = vmul.f32 %v17673_v54, %v8217_v25  ;;  %v8225_v50 = vpop.eup %8224  ;;  %v2929_v25 = vmul.f32 1.442695, %v2896_v52  ;;  %v2908_v54 = vsub.f32 %v17687_v42, %v17686_v15  ;;  %v2967_v56 = vmul.f32 1.442695, %v2915_v49  ;;  %v17702_v49 = vld [vmem:[#allocation49_spill] sm:$0xff] }
 0x734   : > { %8234 = vpow2.f32 %v2963_v59  ;;  %v8227_v40 = vpop.eup %8226  ;;  %v3095_v30 = vmul.f32 %v17682_v55, %v8225_v50  ;;  %v3169_v59 = vpop.xlane.xlu0 %3168  ;;  %v14331_v53 = vmul.f32 %v17688_v17, %v8225_v50  ;;  %v14364_v55 = vsel %vm2766_vm12, %v17702_v49, 0.0  ;;  %v17708_v17 = vld [vmem:[#allocation73_spill] sm:$0xff]  ;;  %v17718_v49 = vld [vmem:[#allocation243_spill] sm:$0xff] }
 0x735   : > { %8236 = vpow2.f32 %v2939_v61  ;;  %v8229_v10 = vpop.eup %8228  ;;  %v2949_v61 = vmul.f32 1.442695, %v2906_v24  ;;  %v17693_v24 = vld [vmem:[#allocation77_spill] sm:$0xff]  ;;  %17703 = vst [vmem:[#allocation34_spill] sm:$0xff] %v14364_v55 }
 0x736   : > { %v3332_v0 = vpop.f32.mrf.mxu1  ;;  %8238 = vpow2.f32 %v2985_v1  ;;  %v3112_v1 = vmul.f32 %v17683_v63, %v8227_v40  ;;  %v14338_v52 = vmul.f32 %v17691_v20, %v8229_v10 }
 0x737   : > { %v14262_v36 = vadd.f32 %v3332_v0, %v3251_v2  ;;  %v3145_v2 = vpop.xlane.xlu2 %3144  ;;  %v14299_v0 = vmul.f32 %v17678_v8, %v8221_v51  ;;  %8240 = vpow2.f32 %v2965_v57  ;;  %v17684_v51 = vld [vmem:[#allocation238_spill] sm:$0xff] }
 0x738   : > { %8242 = vpow2.f32 %v2945_v44  ;;  %v14322_v28 = vmul.f32 %v17684_v51, %v8227_v40  ;;  %v2917_v44 = vsub.f32 %v17690_v39, %v14090_v43  ;;  %17692 = vst [vmem:[#allocation46_spill] sm:$0xff] %v14338_v52  ;;  %v2969_v40 = vmul.f32 1.442695, %v2916_v19  ;;  %v17695_v43 = vld [vmem:[#allocation37_spill] sm:$0xff]  ;;  %v14368_v51 = vpop.f32.mrf.mxu2  ;;  %v17709_v39 = vld [vmem:[#allocation67_spill] sm:$0xff] }
 0x739   : > { %17667 = vst [vmem:[#allocation55_spill] sm:$0xff] %v14262_v36  ;;  %8244 = vpow2.f32 %v2987_v16  ;;  %v14350_v29 = vsel %vm2766_vm12, %v17695_v43, 0.0 }
 0x73a   : > { %3213 = vadd.xlane.f32.xlu1 %v3212_v13  ;;  %v8231_v13 = vpop.eup %8230  ;;  %8246 = vpow2.f32 %v2947_v14  ;;  %v17694_v14 = vld [vmem:[#allocation115_spill] sm:$0xff]  ;;  %17696 = vst [vmem:[#allocation60_spill] sm:$0xff] %v14350_v29  ;;  %v3196_v19 = vpop.xlane.xlu1 %3195 }
 0x73b   : > { %v8233_v38 = vpop.eup %8232  ;;  %8248 = vpow2.f32 %v2941_v7  ;;  %v2953_v7 = vmul.f32 1.442695, %v2908_v54 }
 0x73c   : > { %v8235_v26 = vpop.eup %8234  ;;  %8250 = vpow2.f32 %v2929_v25  ;;  %v2971_v25 = vmul.f32 1.442695, %v2917_v44 }
 0x73d   : > { %v14324_v57 = vpop.eup %8236  ;;  %8252 = vpow2.f32 %v2949_v61  ;;  %v17704_v61 = vld [vmem:[#allocation38_spill] sm:$0xff]  ;;  %v14376_v44 = vmul.f32 %v17709_v39, %v8235_v26 }
 0x73e   : > { %v3335_v23 = vpop.f32.mrf.mxu1  ;;  %17685 = vst [vmem:[#allocation59_spill] sm:$0xff] %v14324_v57  ;;  %v14333_v9 = vpop.eup %8238  ;;  %v2897_v63 = vsub.f32 %v17705_v34, %v17704_v61  ;;  %v17719_v34 = vld [vmem:[#allocation80_spill] sm:$0xff] }
 0x73f   : > { %v14289_v21 = vadd.f32 %v3335_v23, %v3252_v12  ;;  %v14319_v12 = vadd.f32 %v3145_v2, %v3095_v30  ;;  %v14328_v23 = vadd.f32 %v3169_v59, %v3103_v11  ;;  %17689 = vst [vmem:[#allocation57_spill] sm:$0xff] %v14333_v9  ;;  %v8241_v16 = vpop.eup %8240  ;;  %v2909_v11 = vsub.f32 %v17585_v60, %v14115_v33  ;;  %v17699_v33 = vld [vmem:[#allocation257_spill] sm:$0xff] }
 0x740   : > { %v8243_v50 = vpop.eup %8242  ;;  %v2895_v2 = vsub.f32 %v17694_v14, %v14118_v62  ;;  %v14354_v60 = vmul.f32 %v17697_v3, %v8231_v13  ;;  %v17700_v62 = vld [vmem:[#allocation235_spill] sm:$0xff]  ;;  %v17712_v3 = vld [vmem:[#allocation51_spill] sm:$0xff]  ;;  %v14409_v61 = vmul.f32 %v17718_v49, %v8241_v16 }
 0x741   : > { %17675 = vst [vmem:[#allocation58_spill] sm:$0xff] %v14289_v21  ;;  %8254 = vrcp.f32 %v14319_v12  ;;  %v8245_v8 = vpop.eup %8244  ;;  %v14360_v18 = vmul.f32 %v17700_v62, %v8233_v38  ;;  %v2955_v59 = vmul.f32 1.442695, %v2909_v11  ;;  %v14382_v11 = vadd.f32 %v14301_v45, %v14296_v32  ;;  %v17714_v32 = vld [vmem:[#allocation112_spill] sm:$0xff] }
 0x742   : > { %3141 = vadd.xlane.f32.xlu1 %v3140_v31  ;;  %v14343_v31 = vmul.f32 %v17693_v24, %v8229_v10  ;;  %8256 = vrcp.f32 %v14328_v23  ;;  %17698 = vst [vmem:[#allocation61_spill] sm:$0xff] %v14354_v60  ;;  %v14357_v10 = vmul.f32 %v17699_v33, %v8231_v13  ;;  %v8247_v41 = vpop.eup %8246  ;;  %v17706_v13 = vld [vmem:[#allocation256_spill] sm:$0xff]  ;;  %v2927_v54 = vmul.f32 1.442695, %v2895_v2  ;;  %v17710_v24 = vld [vmem:[#allocation262_spill] sm:$0xff]  ;;  %v17729_v21 = vld [vmem:[#allocation84_spill] sm:$0xff] }
 0x743   : > { %8258 = vpow2.f32 %v2967_v56  ;;  %17701 = vst [vmem:[#allocation63_spill] sm:$0xff] %v14360_v18  ;;  %v8249_v30 = vpop.eup %8248  ;;  %v14371_v15 = vmul.f32 %v17706_v13, %v8233_v38  ;;  %v3253_v56 = vmul.f32 %v17708_v17, %v14324_v57  ;;  %v14385_v14 = vmul.f32 %v17710_v24, %v8235_v26  ;;  %v17715_v26 = vld [vmem:[#allocation76_spill] sm:$0xff]  ;;  %v17721_v17 = vld [vmem:[#allocation85_spill] sm:$0xff] }
 0x744   : > { %8260 = vpow2.f32 %v2951_v5  ;;  %v8251_v42 = vpop.eup %8250  ;;  %v2926_v5 = vsub.f32 %v17653_v37, %v14206_v22  ;;  %v14389_v2 = vadd.f32 %v3196_v19, %v3112_v1  ;;  %v14395_v33 = vsel %vm2766_vm12, %v17712_v3, 0.0  ;;  %v17717_v1 = vld [vmem:[#allocation72_spill] sm:$0xff]  ;;  %v17722_v24 = vld [vmem:[#allocation65_spill] sm:$0xff] }
 0x745   : > { %17707 = vst [vmem:[#allocation45_spill] sm:$0xff] %v14371_v15  ;;  %8262 = vpow2.f32 %v2969_v40  ;;  %v8253_v20 = vpop.eup %8252  ;;  %v2931_v22 = vmul.f32 1.442695, %v2897_v63  ;;  %v2898_v45 = vsub.f32 %v17714_v32, %v14173_v6  ;;  %v14406_v62 = vmul.f32 %v17717_v1, %v8243_v50  ;;  %v17720_v6 = vld [vmem:[#allocation93_spill] sm:$0xff]  ;;  %v17724_v1 = vld [vmem:[#allocation255_spill] sm:$0xff] }
 0x746   : > { %8264 = vpow2.f32 %v2953_v7  ;;  %17713 = vst [vmem:[#allocation64_spill] sm:$0xff] %v14395_v33  ;;  %v14403_v7 = vmul.f32 %v17715_v26, %v14333_v9  ;;  %v14412_v19 = vmul.f32 %v17719_v34, %v8241_v16  ;;  %v2989_v63 = vmul.f32 1.442695, %v2926_v5 }
 0x747   : > { %v14387_v40 = vpop.eup %8254  ;;  %8266 = vpow2.f32 %v2971_v25  ;;  %v3088_v13 = vmul.f32 %v17720_v6, %v8251_v42  ;;  %v14425_v3 = vmul.f32 %v17722_v24, %v8245_v8  ;;  %v2933_v32 = vmul.f32 1.442695, %v2898_v45  ;;  %v17726_v6 = vld [vmem:[#allocation247_spill] sm:$0xff]  ;;  %v17730_v24 = vld [vmem:[#allocation87_spill] sm:$0xff]  ;;  %v17732_v45 = vld [vmem:[#allocation246_spill] sm:$0xff] }
 0x748   : > { %v14397_v37 = vpop.eup %8256  ;;  %8268 = vpow2.f32 %v2955_v59  ;;  %17716 = vst [vmem:[#allocation36_spill] sm:$0xff] %v14403_v7  ;;  %v14432_v49 = vmul.f32 %v17724_v1, %v8245_v8  ;;  %v14439_v36 = vmul.f32 %v17729_v21, %v8247_v41  ;;  %v14442_v48 = vmul.f32 %v17730_v24, %v8249_v30  ;;  %v17735_v1 = vld [vmem:[#allocation266_spill] sm:$0xff]  ;;  %v17752_v7 = vld [vmem:[#allocation265_spill] sm:$0xff] }
 0x749   : > { %v8259_v25 = vpop.eup %8258  ;;  %8270 = vpow2.f32 %v2927_v54  ;;  %v3684_v54 = vmul.f32 %v14387_v40, %v14319_v12  ;;  %17723 = vst [vmem:[#allocation50_spill] sm:$0xff] %v14425_v3  ;;  %v14451_v47 = vmul.f32 %v17735_v1, %v8253_v20  ;;  %v17736_v3 = vld [vmem:[#allocation242_spill] sm:$0xff]  ;;  %vm3689_vm4 = vweird.f32 %v14387_v40 }
 0x74a   : > { %v8261_v59 = vpop.eup %8260  ;;  %8272 = vrcp.f32 %v14382_v11  ;;  %17725 = vst [vmem:[#allocation52_spill] sm:$0xff] %v14432_v49  ;;  %v14454_v21 = vmul.f32 %v17736_v3, %v8259_v25  ;;  %v17744_v3 = vld [vmem:[#allocation105_spill] sm:$0xff]  ;;  %vm3801_vm5 = vweird.f32 %v14397_v37  ;;  %vm3688_vm6 = vweird.f32 %v14319_v12 }
 0x74b   : > { %v8263_v39 = vpop.eup %8262  ;;  %8274 = vrcp.f32 %v14389_v2  ;;  %17731 = vst [vmem:[#allocation33_spill] sm:$0xff] %v14442_v48  ;;  %v3685_v9 = vsub.f32 1.0, %v3684_v54  ;;  %v17746_v48 = vld [vmem:[#allocation70_spill] sm:$0xff]  ;;  %vm3800_vm7 = vweird.f32 %v14328_v23  ;;  %vm14543_vm8 = vmor %vm3688_vm6, %vm3689_vm4  ;;  %vm3912_vm14 = vweird.f32 %v14382_v11 }
 0x74c   : > { %v8265_v5 = vpop.eup %8264  ;;  %8276 = vpow2.f32 %v2931_v22  ;;  %v14427_v26 = vpop.f32.mrf.mxu2  ;;  %vm14554_vm11 = vmor %vm3800_vm7, %vm3801_vm5  ;;  %vm3926_vm4 = vweird.f32 %v14389_v2 }
 0x74d   : > { %v3338_v38 = vpop.f32.mrf.mxu3  ;;  %v8267_v34 = vpop.eup %8266  ;;  %8278 = vpow2.f32 %v2989_v63  ;;  %v17738_v63 = vld [vmem:[#allocation71_spill] sm:$0xff]  ;;  %v14477_v18 = vmul.f32 %v17746_v48, %v8265_v5  ;;  %v14489_v15 = vmul.f32 %v17752_v7, %v8265_v5 }
 0x74e   : > { %v14391_v43 = vadd.f32 %v3338_v38, %v3253_v56  ;;  %v14417_v56 = vmul.f32 %v17721_v17, %v8243_v50  ;;  %v3796_v38 = vmul.f32 %v14397_v37, %v14328_v23  ;;  %v14435_v17 = vmul.f32 %v17726_v6, %v8247_v41  ;;  %v8269_v22 = vpop.eup %8268  ;;  %v17737_v41 = vld [vmem:[#allocation261_spill] sm:$0xff]  ;;  %v14495_v48 = vpop.f32.mrf.mxu1 }
 0x74f   : > { %v8271_v6 = vpop.eup %8270  ;;  %8280 = vpow2.f32 %v2933_v32  ;;  %17747 = vst [vmem:[#allocation39_spill] sm:$0xff] %v14477_v18  ;;  %v17748_v32 = vld [vmem:[#allocation260_spill] sm:$0xff]  ;;  %v3694_v18 = vand.u32 2147483648, %v14319_v12 }
 0x750   : > { %17711 = vst [vmem:[#allocation43_spill] sm:$0xff] %v14391_v43  ;;  %v17728_v43 = vld [vmem:[#allocation249_spill] sm:$0xff]  ;;  %v14459_v24 = vpop.eup %8272 }
 0x751   : > { %17727 = vst [vmem:[#allocation62_spill] sm:$0xff] %v14435_v17  ;;  %v3254_v57 = vmul.f32 %v17728_v43, %v8249_v30  ;;  %v3797_v43 = vsub.f32 1.0, %v3796_v38  ;;  %v14457_v30 = vmul.f32 %v17737_v41, %v8259_v25  ;;  %v14470_v54 = vpop.eup %8274  ;;  %v17743_v38 = vld [vmem:[#allocation56_spill] sm:$0xff]  ;;  %v3908_v7 = vmul.f32 %v14459_v24, %v14382_v11 }
 0x752   : > { %v2910_v33 = vsub.f32 %v17744_v3, %v17743_v38  ;;  %v17745_v25 = vld [vmem:[#allocation100_spill] sm:$0xff]  ;;  %v8277_v60 = vpop.eup %8276  ;;  %v17753_v38 = vld [vmem:[#allocation259_spill] sm:$0xff]  ;;  %v3922_v5 = vmul.f32 %v14470_v54, %v14389_v2  ;;  %vm3913_vm15 = vweird.f32 %v14459_v24  ;;  %vm3927_vm1 = vweird.f32 %v14470_v54 }
 0x753   : > { %v2918_v41 = vsub.f32 %v17745_v25, %v14168_v4  ;;  %v14492_v3 = vmul.f32 %v17753_v38, %v8267_v34  ;;  %v3798_v4 = vmul.f32 %v14397_v37, %v3797_v43  ;;  %v17757_v38 = vld [vmem:[#allocation92_spill] sm:$0xff]  ;;  %vm14607_vm3 = vmor %vm3912_vm14, %vm3913_vm15 }
 0x754   : > { %v3124_v16 = vpop.xlane.xlu0 %3123  ;;  %v3923_v17 = vsub.f32 1.0, %v3922_v5  ;;  %v3695_v5 = vor.u32 1.1754944e-38, %v3694_v18  ;;  %vm14613_vm5 = vmor %vm3926_vm4, %vm3927_vm1 }
 0x755   : > { %v14429_v50 = vadd.f32 %v3124_v16, %v3088_v13  ;;  %v14445_v13 = vmul.f32 %v17732_v45, %v8253_v20  ;;  %v17734_v16 = vld [vmem:[#allocation252_spill] sm:$0xff]  ;;  %v14462_v45 = vmul.f32 %v17738_v63, %v8261_v59  ;;  %v14480_v63 = vmul.f32 %v17748_v32, %v8263_v39  ;;  %v17754_v32 = vld [vmem:[#allocation94_spill] sm:$0xff] }
 0x756   : > { %v14448_v8 = vmul.f32 %v17734_v16, %v8251_v42  ;;  %v17740_v42 = vld [vmem:[#allocation241_spill] sm:$0xff]  ;;  %v17741_v20 = vld [vmem:[#allocation83_spill] sm:$0xff]  ;;  %v14499_v55 = vmul.f32 %v17754_v32, %v8271_v6  ;;  %v2973_v43 = vmul.f32 1.442695, %v2918_v41  ;;  %v14515_v32 = vmul.f32 %v17757_v38, %v8277_v60 }
 0x757   : > { %17733 = vst [vmem:[#allocation97_spill] sm:$0xff] %v14445_v13  ;;  %v14465_v16 = vmul.f32 %v17740_v42, %v8263_v39  ;;  %v14468_v1 = vmul.f32 %v17741_v20, %v8261_v59  ;;  %v17749_v42 = vld [vmem:[#allocation240_spill] sm:$0xff]  ;;  %v17750_v59 = vld [vmem:[#allocation245_spill] sm:$0xff]  ;;  %v3686_v39 = vmul.f32 %v14387_v40, %v3685_v9  ;;  %8282 = vrcp.f32 %v14429_v50 }
 0x758   : > { %17739 = vst [vmem:[#allocation40_spill] sm:$0xff] %v14462_v45  ;;  %v14483_v52 = vmul.f32 %v17749_v42, %v8267_v34  ;;  %v14486_v20 = vmul.f32 %v17750_v59, %v8269_v22  ;;  %v17755_v42 = vld [vmem:[#allocation264_spill] sm:$0xff]  ;;  %v14504_v59 = vpop.eup %8278  ;;  %v2957_v9 = vmul.f32 1.442695, %v2910_v33  ;;  %v14522_v45 = vpop.f32.mrf.mxu2  ;;  %v3804_v33 = vand.u32 2147483647, %v14328_v23 }
 0x759   : > { %17742 = vst [vmem:[#allocation96_spill] sm:$0xff] %v14468_v1  ;;  %v14502_v49 = vmul.f32 %v17755_v42, %v8269_v22  ;;  %v17758_v22 = vld [vmem:[#allocation253_spill] sm:$0xff]  ;;  %v8281_v29 = vpop.eup %8280  ;;  %v3687_v41 = vadd.f32 %v14387_v40, %v3686_v39  ;;  %v3909_v38 = vsub.f32 1.0, %v3908_v7 }
 0x75a   : > { %17751 = vst [vmem:[#allocation95_spill] sm:$0xff] %v14486_v20  ;;  %v14518_v42 = vmul.f32 %v17758_v22, %v8271_v6  ;;  %v3692_v20 = vand.u32 2147483647, %v14319_v12  ;;  %v3799_v22 = vadd.f32 %v14397_v37, %v3798_v4  ;;  %v17766_v4 = vld [vmem:[#allocation250_spill] sm:$0xff]  ;;  %vm14558_vm13 = vcmp.eq.f32.partialorder %v3804_v33, 8.507059e+37 }
 0x75b   : > { %17756 = vst [vmem:[#allocation42_spill] sm:$0xff] %v14504_v59  ;;  %v3806_v59 = vand.u32 2147483648, %v14328_v23  ;;  %v14552_v39 = vmul.f32 %v17766_v4, %v8281_v29  ;;  %v3691_v23 = vsel %vm14543_vm8, %v14387_v40, %v3687_v41  ;;  %v3910_v33 = vmul.f32 %v14459_v24, %v3909_v38 }
 0x75c   : > { %v3172_v25 = vpop.xlane.xlu0 %3171  ;;  %vm14547_vm10 = vcmp.eq.f32.partialorder %v3692_v20, 8.507059e+37  ;;  %v3924_v4 = vmul.f32 %v14470_v54, %v3923_v17 }
 0x75d   : > { %v14512_v34 = vadd.f32 %v3172_v25, %v14309_v35  ;;  %v3341_v13 = vpop.f32.mrf.mxu3  ;;  %v17759_v35 = vld [vmem:[#allocation251_spill] sm:$0xff]  ;;  %v14540_v1 = vpop.eup %8282  ;;  %17767 = vst [vmem:[#allocation47_spill] sm:$0xff] %v14552_v39  ;;  %v3911_v12 = vadd.f32 %v14459_v24, %v3910_v33  ;;  %v3932_v33 = vand.u32 2147483648, %v14389_v2 }
 0x75e   : > { %v14526_v25 = vmul.f32 %v17759_v35, %v8277_v60  ;;  %v14531_v6 = vadd.f32 %v3341_v13, %v3254_v57  ;;  %v17761_v60 = vld [vmem:[#allocation91_spill] sm:$0xff]  ;;  %v14574_v39 = vpop.f32.mrf.mxu1  ;;  %v3586_v18 = vmul.f32 %v14540_v1, %v14429_v50 }
 0x75f   : > { %8284 = vrcp.f32 %v14512_v34  ;;  %v14538_v35 = vmul.f32 %v17761_v60, %v8281_v29  ;;  %v3803_v29 = vsel %vm14554_vm11, %v14397_v37, %v3799_v22  ;;  %v3555_v37 = vadd.f32 %v14303_v27, %v14285_v46  ;;  %v17783_v46 = vld [vmem:[#allocation263_spill] sm:$0xff] }
 0x760   : > { %17760 = vst [vmem:[#allocation111_spill] sm:$0xff] %v14531_v6  ;;  %8286 = vpow2.f32 %v2957_v9  ;;  %v3916_v9 = vand.u32 2147483647, %v14382_v11  ;;  %v3807_v6 = vor.u32 1.1754944e-38, %v3806_v59  ;;  %v3918_v59 = vand.u32 2147483648, %v14382_v11  ;;  %v17781_v11 = vld [vmem:[#allocation69_spill] sm:$0xff] }
 0x761   : > { %8288 = vpow2.f32 %v2973_v43  ;;  %v3930_v27 = vand.u32 2147483647, %v14389_v2  ;;  %v3587_v7 = vsub.f32 1.0, %v3586_v18  ;;  %vm3814_vm7 = vweird.f32 %v14512_v34 }
 0x762   : > { %v3808_v38 = vsel %vm14558_vm13, %v3807_v6, %v3803_v29  ;;  %vm14593_vm0 = vcmp.eq.f32.partialorder %v3916_v9, 8.507059e+37  ;;  %v3820_v6 = vand.u32 2147483648, %v14512_v34  ;;  %v3556_v2 = vadd.f32 %v14368_v51, %v14306_v58 }
 0x763   : > { %v4035_v9 = vmul.f32 %v3808_v38, %v3555_v37  ;;  %vm14617_vm6 = vcmp.eq.f32.partialorder %v3930_v27, 8.507059e+37  ;;  %vm3591_vm11 = vweird.f32 %v14540_v1  ;;  %v14671_v18 = vadd.f32 %v14427_v26, %v14376_v44 }
 0x764   : > { %v3175_v20 = vpop.xlane.xlu0 %3174  ;;  %vm3590_vm13 = vweird.f32 %v14429_v50 }
 0x765   : > { %v8285_v43 = vpop.eup %8284  ;;  %v14570_v60 = vadd.f32 %v3175_v20, %v14385_v14  ;;  %v14584_v14 = vsel %vm14547_vm10, %v3695_v5, %v3691_v23  ;;  %v14587_v17 = vpop.f32.mrf.mxu2  ;;  %v3925_v23 = vadd.f32 %v14470_v54, %v3924_v4  ;;  %v3818_v20 = vand.u32 2147483647, %v14512_v34  ;;  %vm14686_vm14 = vmor %vm3590_vm13, %vm3591_vm11 }
 0x766   : > { %v3810_v40 = vmul.f32 %v8285_v43, %v14512_v34  ;;  %v8287_v41 = vpop.eup %8286  ;;  %v3515_v57 = vpop.f32.mrf.mxu3  ;;  %vm3815_vm2 = vweird.f32 %v8285_v43 }
 0x767   : > { %8290 = vrcp.f32 %v14570_v60  ;;  %v14598_v13 = vpop.eup %8288  ;;  %v14623_v38 = vmul.f32 %v17781_v11, %v8287_v41  ;;  %vm3816_vm8 = vmor %vm3814_vm7, %vm3815_vm2  ;;  %v3929_v34 = vsel %vm14613_vm5, %v14470_v54, %v3925_v23  ;;  %vm3819_vm10 = vcmp.eq.f32.partialorder %v3818_v20, 8.507059e+37  ;;  %v14642_v29 = vpop.f32.mrf.mxu1 }
 0x768   : > { %v3811_v22 = vsub.f32 1.0, %v3810_v40  ;;  %17774 = vst [vmem:[#allocation99_spill] sm:$0xff] %v14598_v13  ;;  %v3919_v40 = vor.u32 1.1754944e-38, %v3918_v59  ;;  %v3563_v58 = vadd.f32 %v3515_v57, %v14299_v0  ;;  %v3594_v20 = vand.u32 2147483647, %v14429_v50 }
 0x769   : > { %17782 = vst [vmem:[#allocation48_spill] sm:$0xff] %v14623_v38  ;;  %v3588_v38 = vmul.f32 %v14540_v1, %v3587_v7 }
 0x76a   : > { %v3812_v5 = vmul.f32 %v8285_v43, %v3811_v22  ;;  %v3915_v22 = vsel %vm14607_vm3, %v14459_v24, %v3911_v12  ;;  %v3933_v24 = vor.u32 1.1754944e-38, %v3932_v33  ;;  %vm14690_vm15 = vcmp.eq.f32.partialorder %v3594_v20, 8.507059e+37 }
 0x76b   : > { %v3920_v0 = vsel %vm14593_vm0, %v3919_v40, %v3915_v22  ;;  %v14663_v40 = vmul.f32 %v17783_v46, %v8287_v41  ;;  %v14679_v41 = vadd.f32 %v14522_v45, %v14409_v61  ;;  %v3834_v45 = vand.u32 2147483648, %v14570_v60 }
 0x76c   : > { %v3178_v4 = vpop.xlane.xlu0 %3177  ;;  %v3813_v37 = vadd.f32 %v8285_v43, %v3812_v5  ;;  %v3821_v5 = vor.u32 1.1754944e-38, %v3820_v6  ;;  %v3934_v7 = vsel %vm14617_vm6, %v3933_v24, %v3929_v34  ;;  %vm3828_vm0 = vweird.f32 %v14570_v60 }
 0x76d   : > { %v14625_v59 = vpop.eup %8290  ;;  %v14633_v27 = vadd.f32 %v3178_v4, %v14412_v19  ;;  %v3465_v51 = vpop.f32.mrf.mxu2 }
 0x76e   : > { %v3817_v11 = vsel %vm3816_vm8, %v8285_v43, %v3813_v37  ;;  %v3121_v12 = vpop.xlane.xlu2 %3120  ;;  %v3824_v6 = vmul.f32 %v14625_v59, %v14570_v60  ;;  %v14647_v13 = vadd.f32 %v3465_v51, %v14465_v16  ;;  %v3518_v54 = vpop.f32.mrf.mxu3  ;;  %v3589_v16 = vadd.f32 %v14540_v1, %v3588_v38 }
 0x76f   : > { %8292 = vrcp.f32 %v14633_v27  ;;  %v3822_v19 = vsel %vm3819_vm10, %v3821_v5, %v3817_v11  ;;  %v14650_v43 = vadd.f32 %v3121_v12, %v14499_v55  ;;  %v3564_v57 = vadd.f32 %v3518_v54, %v14322_v28 }
 0x770   : > { %v4036_v23 = vmul.f32 %v3822_v19, %v3556_v2  ;;  %v4043_v55 = vmul.f32 %v3920_v0, %v3563_v58  ;;  %v3596_v37 = vand.u32 2147483648, %v14429_v50  ;;  %v14667_v28 = vadd.f32 %v14495_v48, %v14331_v53  ;;  %v14717_v0 = vpop.f32.mrf.mxu1 }
 0x771   : > { %8294 = vrcp.f32 %v14650_v43  ;;  %v4044_v4 = vmul.f32 %v3934_v7, %v3564_v57  ;;  %v3846_v11 = vand.u32 2147483647, %v14633_v27  ;;  %v3848_v58 = vand.u32 2147483648, %v14633_v27 }
 0x772   : > { %v8100_v33 = vpack.i.bf16 %v4036_v23, %v4035_v9  ;;  %v3825_v9 = vsub.f32 1.0, %v3824_v6  ;;  %v3597_v34 = vor.u32 1.1754944e-38, %v3596_v37  ;;  %v3580_v6 = vand.u32 2147483647, %v14650_v43 }
 0x773   : > { %v8120_v53 = vpack.i.bf16 %v4044_v4, %v4043_v55  ;;  %v3832_v23 = vand.u32 2147483647, %v14570_v60  ;;  %v14722_v57 = vor.u32 1.1754944e-38, %v3834_v45  ;;  %vm3829_vm1 = vweird.f32 %v14625_v59 }
 0x774   : > { %v3181_v2 = vpop.xlane.xlu0 %3180  ;;  %8101 = vrot.lane.b32.xlu0 %v8100_v33, %s10275_s21  ;;  %v3826_v12 = vmul.f32 %v14625_v59, %v3825_v9  ;;  %vm3842_vm2 = vweird.f32 %v14633_v27  ;;  %vm14726_vm3 = vcmp.eq.f32.partialorder %v3846_v11, 8.507059e+37  ;;  %vm3576_vm4 = vweird.f32 %v14650_v43  ;;  %vm14758_vm11 = vmor %vm3828_vm0, %vm3829_vm1 }
 0x775   : > { %v14675_v38 = vpop.eup %8292  ;;  %v14682_v22 = vadd.f32 %v3181_v2, %v14457_v30  ;;  %v3127_v48 = vpop.xlane.xlu1 %3126  ;;  %v3593_v30 = vsel %vm14686_vm14, %v14540_v1, %v3589_v16  ;;  %8121 = vrot.lane.b32.xlu1 %v8120_v53, %s10276_s23  ;;  %v3849_v4 = vor.u32 1.1754944e-38, %v3848_v58  ;;  %vm14735_vm6 = vcmp.eq.f32.partialorder %v3580_v6, 8.507059e+37 }
 0x776   : > { %v3838_v50 = vmul.f32 %v14675_v38, %v14633_v27  ;;  %v14697_v61 = vadd.f32 %v3127_v48, %v14515_v32  ;;  %v3148_v5 = vpop.xlane.xlu2 %3147  ;;  %v3598_v54 = vsel %vm14690_vm15, %v3597_v34, %v3593_v30  ;;  %v3827_v16 = vadd.f32 %v14625_v59, %v3826_v12 }
 0x777   : > { %8296 = vrcp.f32 %v14682_v22  ;;  %v8295_v51 = vpop.eup %8294  ;;  %v14708_v32 = vadd.f32 %v3148_v5, %v14417_v56  ;;  %v3320_v1 = vpop.f32.mrf.mxu0  ;;  %v3582_v56 = vand.u32 2147483648, %v14650_v43  ;;  %vm14742_vm7 = vcmp.eq.f32.partialorder %v3832_v23, 8.507059e+37 }
 0x778   : > { %v3839_v24 = vsub.f32 1.0, %v3838_v50  ;;  %8298 = vrcp.f32 %v14697_v61  ;;  %v3572_v19 = vmul.f32 %v8295_v51, %v14650_v43  ;;  %vm3577_vm5 = vweird.f32 %v8295_v51 }
 0x779   : > { %8300 = vrcp.f32 %v14708_v32  ;;  %v3539_v26 = vadd.f32 %v3320_v1, %v14518_v42  ;;  %v3583_v50 = vor.u32 1.1754944e-38, %v3582_v56  ;;  %vm3843_vm8 = vweird.f32 %v14675_v38  ;;  %vm3578_vm13 = vmor %vm3576_vm4, %vm3577_vm5 }
 0x77a   : > { %v3573_v7 = vsub.f32 1.0, %v3572_v19  ;;  %v3840_v55 = vmul.f32 %v14675_v38, %v3839_v24  ;;  %vm3604_vm10 = vweird.f32 %v14697_v61  ;;  %v3610_v24 = vand.u32 2147483648, %v14697_v61  ;;  %vm3844_vm15 = vmor %vm3842_vm2, %vm3843_vm8 }
 0x77b   : > { %v3831_v60 = vsel %vm14758_vm11, %v14625_v59, %v3827_v16  ;;  %v14790_v16 = vpop.f32.mrf.mxu1  ;;  %v4027_v48 = vmul.f32 %v14584_v14, %v14667_v28  ;;  %v3548_v42 = vadd.f32 %v14574_v39, %v14406_v62 }
 0x77c   : > { %v3160_v33 = vpop.xlane.xlu0 %3159  ;;  %v3574_v46 = vmul.f32 %v8295_v51, %v3573_v7  ;;  %v3841_v1 = vadd.f32 %v14675_v38, %v3840_v55 }
 0x77d   : > { %v14733_v37 = vpop.eup %8296  ;;  %v14740_v2 = vadd.f32 %v3160_v33, %v14489_v15  ;;  %v3199_v53 = vpop.xlane.xlu1 %3198  ;;  %v3608_v15 = vand.u32 2147483647, %v14697_v61 }
 0x77e   : > { %v8299_v44 = vpop.eup %8298  ;;  %v14748_v30 = vadd.f32 %v3199_v53, %v14343_v31  ;;  %v3575_v5 = vadd.f32 %v8295_v51, %v3574_v46  ;;  %v3151_v34 = vpop.xlane.xlu2 %3150  ;;  %v3852_v11 = vmul.f32 %v14733_v37, %v14682_v22  ;;  %v3845_v33 = vsel %vm3844_vm15, %v14675_v38, %v3841_v1 }
 0x77f   : > { %v3600_v45 = vmul.f32 %v8299_v44, %v14697_v61  ;;  %v14762_v31 = vpop.eup %8300  ;;  %v3323_v58 = vpop.f32.mrf.mxu0  ;;  %8302 = vrcp.f32 %v14740_v2  ;;  %v14780_v23 = vadd.f32 %v3151_v34, %v14439_v36  ;;  %vm3605_vm14 = vweird.f32 %v8299_v44 }
 0x780   : > { %v3698_v12 = vmul.f32 %v14762_v31, %v14708_v32  ;;  %v3579_v6 = vsel %vm3578_vm13, %v8295_v51, %v3575_v5  ;;  %v3540_v56 = vadd.f32 %v3323_v58, %v14448_v8  ;;  %vm14794_vm0 = vcmp.eq.f32.partialorder %v3608_v15, 8.507059e+37  ;;  %vm3606_vm1 = vmor %vm3604_vm10, %vm3605_vm14 }
 0x781   : > { %v3601_v19 = vsub.f32 1.0, %v3600_v45  ;;  %v3584_v43 = vsel %vm14735_vm6, %v3583_v50, %v3579_v6  ;;  %v3611_v8 = vor.u32 1.1754944e-38, %v3610_v24  ;;  %v3850_v27 = vsel %vm14726_vm3, %v3849_v4, %v3845_v33  ;;  %v14870_v33 = vpop.f32.mrf.mxu3 }
 0x782   : > { %v3699_v59 = vsub.f32 1.0, %v3698_v12  ;;  %v14787_v7 = vmul.f32 %v3584_v43, %v3539_v26  ;;  %v14792_v55 = vmul.f32 %v3598_v54, %v3540_v56  ;;  %v3853_v9 = vsub.f32 1.0, %v3852_v11 }
 0x783   : > { %v3602_v51 = vmul.f32 %v8299_v44, %v3601_v19  ;;  %8304 = vrcp.f32 %v14748_v30  ;;  %v3836_v4 = vsel %vm14742_vm7, %v14722_v57, %v3831_v60  ;;  %v3708_v5 = vand.u32 2147483648, %v14708_v32  ;;  %v14862_v43 = vpop.f32.mrf.mxu1 }
 0x784   : > { %v3187_v36 = vpop.xlane.xlu0 %3186  ;;  %8306 = vrcp.f32 %v14780_v23  ;;  %v3700_v20 = vmul.f32 %v14762_v31, %v3699_v59  ;;  %vm3703_vm2 = vweird.f32 %v14762_v31  ;;  %v3706_v57 = vand.u32 2147483647, %v14708_v32 }
 0x785   : > { %v14802_v53 = vadd.f32 %v3187_v36, %v14492_v3  ;;  %v3130_v38 = vpop.xlane.xlu1 %3129  ;;  %v3603_v26 = vadd.f32 %v8299_v44, %v3602_v51  ;;  %v14815_v50 = vpop.eup %8302  ;;  %v14831_v15 = vmul.f32 %v3836_v4, %v14671_v18  ;;  %v14838_v11 = vadd.f32 %v14587_v17, %v14454_v21 }
 0x786   : > { %v14806_v54 = vadd.f32 %v3130_v38, %v14538_v35  ;;  %v3154_v3 = vpop.xlane.xlu2 %3153  ;;  %v14820_v35 = vmul.f32 %v3850_v27, %v14679_v41  ;;  %v3854_v41 = vmul.f32 %v14733_v37, %v3853_v9  ;;  %v3701_v58 = vadd.f32 %v14762_v31, %v3700_v20  ;;  %v3468_v21 = vpop.f32.mrf.mxu2 }
 0x787   : > { %8308 = vrcp.f32 %v14802_v53  ;;  %v3607_v45 = vsel %vm3606_vm1, %v8299_v44, %v3603_v26  ;;  %v3326_v61 = vpop.f32.mrf.mxu0  ;;  %vm3702_vm3 = vweird.f32 %v14708_v32  ;;  %v3709_v28 = vor.u32 1.1754944e-38, %v3708_v5 }
 0x788   : > { %8310 = vrcp.f32 %v14806_v54  ;;  %v3612_v34 = vsel %vm14794_vm0, %v3611_v8, %v3607_v45  ;;  %v3541_v44 = vadd.f32 %v3326_v61, %v14526_v25  ;;  %v14846_v25 = vmul.f32 %v14815_v50, %v14740_v2  ;;  %vm3704_vm4 = vmor %vm3702_vm3, %vm3703_vm2 }
 0x789   : > { %v14842_v24 = vpop.eup %8304  ;;  %v8110_v62 = vpack.i.bf16 %v14820_v35, %v14831_v15  ;;  %v14855_v17 = vadd.f32 %v3154_v3, %v14451_v47  ;;  %v3705_v18 = vsel %vm3704_vm4, %v14762_v31, %v3701_v58  ;;  %vm3707_vm5 = vcmp.eq.f32.partialorder %v3706_v57, 8.507059e+37 }
 0x78a   : > { %v14848_v14 = vmul.f32 %v3612_v34, %v3541_v44  ;;  %v14852_v39 = vpop.eup %8306  ;;  %vm3856_vm6 = vweird.f32 %v14682_v22  ;;  %v3710_v60 = vsel %vm3707_vm5, %v3709_v28, %v3705_v18  ;;  %v3855_v12 = vadd.f32 %v14733_v37, %v3854_v41  ;;  %v17802_v18 = vld [vmem:[#allocation47_spill] sm:$0xff] }
 0x78b   : > { %vm3857_vm7 = vweird.f32 %v14733_v37  ;;  %v3860_v19 = vand.u32 2147483647, %v14682_v22  ;;  %v4028_v56 = vmul.f32 %v3710_v60, %v3548_v42  ;;  %v3862_v59 = vand.u32 2147483648, %v14682_v22 }
 0x78c   : > { %v3561_v51 = vadd.f32 %v3468_v21, %v14483_v52  ;;  %v3755_v36 = vsub.f32 1.0, %v14846_v25  ;;  %v14875_v46 = vmul.f32 %v14842_v24, %v14748_v30  ;;  %v14880_v9 = vmul.f32 %v14852_v39, %v14780_v23  ;;  %vm14887_vm8 = vmor %vm3856_vm6, %vm3857_vm7  ;;  %v17806_v52 = vld [vmem:[#allocation254_spill] sm:$0xff] }
 0x78d   : > { %v8309_v32 = vpop.eup %8308  ;;  %v3184_v1 = vpop.xlane.xlu1 %3183  ;;  %8312 = vrcp.f32 %v14855_v17  ;;  %v8105_v38 = vpack.i.bf16 %v4028_v56, %v4027_v48  ;;  %v3622_v20 = vand.u32 2147483647, %v14806_v54  ;;  %v3624_v4 = vand.u32 2147483648, %v14806_v54 }
 0x78e   : > { %v8311_v6 = vpop.eup %8310  ;;  %v3880_v47 = vmul.f32 %v8309_v32, %v14802_v53  ;;  %v14866_v31 = vadd.f32 %v3184_v1, %v14480_v63  ;;  %v3202_v27 = vpop.xlane.xlu2 %3201  ;;  %v3859_v3 = vsel %vm14887_vm8, %v14733_v37, %v3855_v12  ;;  %vm3861_vm10 = vcmp.eq.f32.partialorder %v3860_v19, 8.507059e+37 }
 0x78f   : > { %v3614_v8 = vmul.f32 %v8311_v6, %v14806_v54  ;;  %8106 = vrot.lane.b32.xlu2 %v8105_v38, %s10277_s20  ;;  %v3863_v45 = vor.u32 1.1754944e-38, %v3862_v59  ;;  %vm3885_vm11 = vweird.f32 %v8309_v32  ;;  %vm3619_vm13 = vweird.f32 %v8311_v6  ;;  %v3329_v57 = vpop.f32.mrf.mxu0 }
 0x790   : > { %v3881_v63 = vsub.f32 1.0, %v3880_v47  ;;  %v3888_v61 = vand.u32 2147483647, %v14802_v53  ;;  %v3890_v34 = vand.u32 2147483648, %v14802_v53  ;;  %vm3618_vm14 = vweird.f32 %v14806_v54 }
 0x791   : > { %v3615_v26 = vsub.f32 1.0, %v3614_v8  ;;  %v3864_v48 = vsel %vm3861_vm10, %v3863_v45, %v3859_v3  ;;  %vm3884_vm15 = vweird.f32 %v14802_v53  ;;  %vm14901_vm0 = vcmp.eq.f32.partialorder %v3622_v20, 8.507059e+37  ;;  %vm3620_vm2 = vmor %vm3618_vm14, %vm3619_vm13  ;;  %v14926_v8 = vpop.f32.mrf.mxu3  ;;  %v17808_v45 = vld [vmem:[#allocation97_spill] sm:$0xff] }
 0x792   : > { %v3882_v5 = vmul.f32 %v8309_v32, %v3881_v63  ;;  %v3625_v42 = vor.u32 1.1754944e-38, %v3624_v4  ;;  %vm3886_vm1 = vmor %vm3884_vm15, %vm3885_vm11  ;;  %v3891_v25 = vor.u32 1.1754944e-38, %v3890_v34  ;;  %v14908_v21 = vadd.f32 %v3202_v27, %v14357_v10  ;;  %v17803_v10 = vld [vmem:[#allocation96_spill] sm:$0xff]  ;;  %v17804_v63 = vld [vmem:[#allocation42_spill] sm:$0xff] }
 0x793   : > { %v3616_v22 = vmul.f32 %v8311_v6, %v3615_v26  ;;  %v14905_v28 = vpop.eup %8312  ;;  %vm3889_vm3 = vcmp.eq.f32.partialorder %v3888_v61, 8.507059e+37  ;;  %v3542_v60 = vadd.f32 %v3329_v57, %v17802_v18  ;;  %v14916_v47 = vmul.f32 %v3864_v48, %v14838_v11  ;;  %v17805_v11 = vld [vmem:[#allocation233_spill] sm:$0xff]  ;;  %v17807_v4 = vld [vmem:[#allocation62_spill] sm:$0xff]  ;;  %v17810_v34 = vld [vmem:[#allocation39_spill] sm:$0xff] }
 0x794   : > { %v3883_v44 = vadd.f32 %v8309_v32, %v3882_v5  ;;  %v14933_v38 = vmul.f32 %v17805_v11, %v17804_v63  ;;  %v14937_v26 = vmul.f32 %v17806_v52, %v17804_v63  ;;  %v3726_v20 = vmul.f32 %v14905_v28, %v14855_v17  ;;  %v17811_v48 = vld [vmem:[#allocation95_spill] sm:$0xff]  ;;  %v17814_v52 = vld [vmem:[#allocation34_spill] sm:$0xff] }
 0x795   : > { %v3617_v37 = vadd.f32 %v8311_v6, %v3616_v22  ;;  %v3163_v58 = vpop.xlane.xlu1 %3162  ;;  %v14947_v3 = vadd.f32 %v14642_v29, %v17807_v4  ;;  %v14951_v5 = vadd.f32 %v14717_v0, %v17808_v45  ;;  %v17809_v22 = vld [vmem:[#allocation40_spill] sm:$0xff]  ;;  %v14959_v57 = vadd.f32 %v14862_v43, %v17810_v34 }
 0x796   : > { %v14912_v54 = vadd.f32 %v3163_v58, %v14502_v49  ;;  %v3887_v53 = vsel %vm3886_vm1, %v8309_v32, %v3883_v44  ;;  %v3157_v12 = vpop.xlane.xlu2 %3156  ;;  %v3403_v32 = vpop.f32.mrf.mxu1  ;;  %v14955_v61 = vadd.f32 %v14790_v16, %v17809_v22  ;;  %v3727_v58 = vsub.f32 1.0, %v3726_v20 }
 0x797   : > { %v3621_v1 = vsel %vm3620_vm2, %v8311_v6, %v3617_v37  ;;  %v3892_v19 = vsel %vm3889_vm3, %v3891_v25, %v3887_v53  ;;  %v14921_v59 = vadd.f32 %v3157_v12, %v17803_v10  ;;  %v3713_v6 = vsub.f32 1.0, %v14880_v9  ;;  %v17812_v25 = vld [vmem:[#allocation60_spill] sm:$0xff] }
 0x798   : > { %v3626_v56 = vsel %vm14901_vm0, %v3625_v42, %v3621_v1  ;;  %8314 = vrcp.f32 %v14912_v54  ;;  %v14924_v49 = vmul.f32 %v3892_v19, %v3561_v51  ;;  %v3756_v9 = vmul.f32 %v14815_v50, %v3755_v36 }
 0x799   : > { %v14929_v27 = vmul.f32 %v3626_v56, %v3542_v60  ;;  %8316 = vrcp.f32 %v14921_v59  ;;  %v14962_v44 = vadd.f32 %v3403_v32, %v17811_v48  ;;  %v3937_v36 = vsub.f32 1.0, %v14875_v46  ;;  %v17813_v56 = vld [vmem:[#allocation52_spill] sm:$0xff]  ;;  %v15002_v48 = vpop.f32.mrf.mxu3  ;;  %v17830_v46 = vld [vmem:[#allocation63_spill] sm:$0xff] }
 0x79a   : > { %v8125_v51 = vpack.i.bf16 %v14916_v47, %v14924_v49  ;;  %8318 = vrcp.f32 %v14908_v21  ;;  %v3750_v29 = vand.u32 2147483648, %v14921_v59  ;;  %v3748_v0 = vand.u32 2147483647, %v14921_v59 }
 0x79b   : > { %v3776_v41 = vand.u32 2147483647, %v14912_v54  ;;  %v3778_v16 = vand.u32 2147483648, %v14912_v54  ;;  %v3714_v42 = vmul.f32 %v14852_v39, %v3713_v6  ;;  %v14973_v53 = vadd.f32 %v14815_v50, %v3756_v9 }
 0x79c   : > { %vm3759_vm4 = vweird.f32 %v14815_v50  ;;  %v3762_v18 = vand.u32 2147483647, %v14740_v2  ;;  %vm3744_vm5 = vweird.f32 %v14921_v59  ;;  %vm3772_vm6 = vweird.f32 %v14912_v54 }
 0x79d   : > { %v3211_v37 = vpop.xlane.xlu1 %3210  ;;  %v3764_v12 = vand.u32 2147483648, %v14740_v2  ;;  %v3751_v32 = vor.u32 1.1754944e-38, %v3750_v29  ;;  %vm3758_vm7 = vweird.f32 %v14740_v2  ;;  %v3715_v6 = vadd.f32 %v14852_v39, %v3714_v42 }
 0x79e   : > { %v8315_v43 = vpop.eup %8314  ;;  %3132 = vadd.xlane.f32.xlu0 %v17812_v25  ;;  %v3205_v1 = vpop.xlane.xlu2 %3204  ;;  %v14982_v10 = vadd.f32 %v3211_v37, %v17813_v56  ;;  %vm3717_vm8 = vweird.f32 %v14852_v39  ;;  %vm14989_vm10 = vcmp.eq.f32.partialorder %v3748_v0, 8.507059e+37  ;;  %vm14993_vm11 = vcmp.eq.f32.partialorder %v3776_v41, 8.507059e+37  ;;  %v17819_v37 = vld [vmem:[#allocation45_spill] sm:$0xff] }
 0x79f   : > { %v3768_v60 = vmul.f32 %v8315_v43, %v14912_v54  ;;  %v8317_v19 = vpop.eup %8316  ;;  %3135 = vadd.xlane.f32.xlu1 %v17814_v52  ;;  %v3779_v4 = vor.u32 1.1754944e-38, %v3778_v16  ;;  %vm3773_vm13 = vweird.f32 %v8315_v43  ;;  %vm3716_vm14 = vweird.f32 %v14780_v23  ;;  %v17827_v16 = vld [vmem:[#allocation46_spill] sm:$0xff] }
 0x7a0   : > { %v3740_v63 = vmul.f32 %v8317_v19, %v14921_v59  ;;  %v14997_v45 = vpop.eup %8318  ;;  %v3720_v22 = vand.u32 2147483647, %v14780_v23  ;;  %v3722_v34 = vand.u32 2147483648, %v14780_v23  ;;  %v15005_v0 = vadd.f32 %v3205_v1, %v17819_v37  ;;  %vm15009_vm15 = vmor %vm3716_vm14, %vm3717_vm8 }
 0x7a1   : > { %v3769_v11 = vsub.f32 1.0, %v3768_v60  ;;  %v3728_v42 = vmul.f32 %v14905_v28, %v3727_v58  ;;  %8320 = vrcp.f32 %v14982_v10  ;;  %vm3745_vm0 = vweird.f32 %v8317_v19  ;;  %vm3774_vm2 = vmor %vm3772_vm6, %vm3773_vm13 }
 0x7a2   : > { %v3741_v29 = vsub.f32 1.0, %v3740_v63  ;;  %v3719_v23 = vsel %vm15009_vm15, %v14852_v39, %v3715_v6  ;;  %vm3731_vm1 = vweird.f32 %v14905_v28  ;;  %v3736_v63 = vand.u32 2147483648, %v14855_v17  ;;  %vm3746_vm6 = vmor %vm3744_vm5, %vm3745_vm0 }
 0x7a3   : > { %v3770_v41 = vmul.f32 %v8315_v43, %v3769_v11  ;;  %v3729_v56 = vadd.f32 %v14905_v28, %v3728_v42  ;;  %v3723_v58 = vor.u32 1.1754944e-38, %v3722_v34  ;;  %vm3730_vm3 = vweird.f32 %v14855_v17  ;;  %vm15055_vm5 = vmor %vm3758_vm7, %vm3759_vm4  ;;  %v4187_v42 = vld [vmem:[#allocation9 + $0x78] sm:$0xff] }
 0x7a4   : > { %v3742_v60 = vmul.f32 %v8317_v19, %v3741_v29  ;;  %v3734_v39 = vand.u32 2147483647, %v14855_v17  ;;  %8322 = vrcp.f32 %v15005_v0  ;;  %vm3721_vm8 = vcmp.eq.f32.partialorder %v3720_v22, 8.507059e+37  ;;  %vm15032_vm14 = vmor %vm3730_vm3, %vm3731_vm1  ;;  %v17824_v22 = vld [vmem:[#allocation36_spill] sm:$0xff]  ;;  %4188 = vmatpush.msra.mxu0 %v4187_v42  ;;  %6190 = vmatpush.msra.mxu2 %v4187_v42 }
 0x7a5   : > { %v3166_v25 = vpop.xlane.xlu1 %3165  ;;  %v3771_v1 = vadd.f32 %v8315_v43, %v3770_v41  ;;  %v3724_v54 = vsel %vm3721_vm8, %v3723_v58, %v3719_v23  ;;  %v3737_v9 = vor.u32 1.1754944e-38, %v3736_v63  ;;  %v3406_v23 = vpop.f32.mrf.mxu1  ;;  %vm3763_vm7 = vcmp.eq.f32.partialorder %v3762_v18, 8.507059e+37  ;;  %v17829_v18 = vld [vmem:[#allocation48_spill] sm:$0xff] }
 0x7a6   : > { %v15022_v11 = vadd.f32 %v3166_v25, %v14663_v40  ;;  %v3208_v6 = vpop.xlane.xlu2 %3207  ;;  %v3743_v52 = vadd.f32 %v8317_v19, %v3742_v60  ;;  %vm3735_vm4 = vcmp.eq.f32.partialorder %v3734_v39, 8.507059e+37  ;;  %v3950_v25 = vmul.f32 %v14997_v45, %v14908_v21 }
 0x7a7   : > { %v3775_v29 = vsel %vm3774_vm2, %v8315_v43, %v3771_v1  ;;  %v3733_v43 = vsel %vm15032_vm14, %v14905_v28, %v3729_v56  ;;  %v15046_v34 = vadd.f32 %v3208_v6, %v17824_v22  ;;  %v15063_v28 = vadd.f32 %v14870_v33, %v17827_v16  ;;  %v15092_v56 = vpop.f32.mrf.mxu3  ;;  %v4186_v16 = vld [vmem:[#allocation9 + $0x70] sm:$0xff] }
 0x7a8   : > { %8324 = vrcp.f32 %v15022_v11  ;;  %v3780_v17 = vsel %vm14993_vm11, %v3779_v4, %v3775_v29  ;;  %v3747_v37 = vsel %vm3746_vm6, %v8317_v19, %v3743_v52  ;;  %v15059_v4 = vpop.eup %8320  ;;  %v3765_v33 = vor.u32 1.1754944e-38, %v3764_v12  ;;  %4189 = vmatpush.msra.mxu0 %v4186_v16  ;;  %6191 = vmatpush.msra.mxu2 %v4186_v16  ;;  %v4182_v16 = vld [vmem:[#allocation9 + $0x50] sm:$0xff] }
 0x7a9   : > { %v15049_v41 = vmul.f32 %v3780_v17, %v14962_v44  ;;  %v3752_v19 = vsel %vm14989_vm10, %v3751_v32, %v3747_v37  ;;  %v3761_v44 = vsel %vm15055_vm5, %v14815_v50, %v14973_v53  ;;  %v3738_v20 = vsel %vm3735_vm4, %v3737_v9, %v3733_v43  ;;  %v17828_v32 = vld [vmem:[#allocation61_spill] sm:$0xff] }
 0x7aa   : > { %v15074_v60 = vmul.f32 %v3752_v19, %v14955_v61  ;;  %v15080_v1 = vadd.f32 %v14926_v8, %v17828_v32  ;;  %v15085_v50 = vmul.f32 %v3724_v54, %v14947_v3  ;;  %v15088_v53 = vmul.f32 %v3738_v20, %v14951_v5  ;;  %v15090_v61 = vpop.eup %8322  ;;  %v4185_v19 = vld [vmem:[#allocation9 + $0x68] sm:$0xff] }
 0x7ab   : > { %8326 = vrcp.f32 %v15046_v34  ;;  %v3766_v63 = vsel %vm3763_vm7, %v3765_v33, %v3761_v44  ;;  %v3938_v2 = vmul.f32 %v14842_v24, %v3937_v36  ;;  %v15101_v58 = vadd.f32 %v3406_v23, %v17829_v18  ;;  %4190 = vmatpush.msra.mxu0 %v4185_v19  ;;  %6192 = vmatpush.msra.mxu2 %v4185_v19  ;;  %v4180_v19 = vld [vmem:[#allocation9 + $0x40] sm:$0xff] }
 0x7ac   : > { %v8135_v8 = vpack.i.bf16 %v15074_v60, %v15049_v41  ;;  %8328 = vrcp.f32 %v14866_v31  ;;  %v8115_v39 = vpack.i.bf16 %v15088_v53, %v15085_v50  ;;  %v3951_v6 = vsub.f32 1.0, %v3950_v25  ;;  %v4184_v25 = vld [vmem:[#allocation9 + $0x60] sm:$0xff] }
 0x7ad   : > { %v3214_v12 = vpop.xlane.xlu1 %3213  ;;  %v3939_v29 = vadd.f32 %v14842_v24, %v3938_v2  ;;  %vm3941_vm10 = vweird.f32 %v14842_v24  ;;  %v15114_v36 = vadd.f32 %v15002_v48, %v17830_v46  ;;  %v3792_v40 = vand.u32 2147483648, %v15022_v11  ;;  %4191 = vmatpush.msra.mxu0 %v4184_v25  ;;  %6193 = vmatpush.msra.mxu2 %v4184_v25 }
 0x7ae   : > { %v8325_v3 = vpop.eup %8324  ;;  %v15105_v5 = vadd.f32 %v3214_v12, %v14937_v26  ;;  %v15119_v26 = vmul.f32 %v3766_v63, %v14959_v57  ;;  %v15123_v17 = vmul.f32 %v15059_v4, %v14982_v10  ;;  %vm3786_vm11 = vweird.f32 %v15022_v11  ;;  %v17833_v63 = vld [vmem:[#allocation33_spill] sm:$0xff] }
 0x7af   : > { %v3782_v52 = vmul.f32 %v8325_v3, %v15022_v11  ;;  %vm3940_vm13 = vweird.f32 %v14748_v30  ;;  %v15129_v48 = vmul.f32 %v15090_v61, %v15005_v0  ;;  %v3790_v57 = vand.u32 2147483647, %v15022_v11 }
 0x7b0   : > { %8330 = vrcp.f32 %v15105_v5  ;;  %vm15136_vm15 = vmor %vm3940_vm13, %vm3941_vm10  ;;  %v3944_v22 = vand.u32 2147483647, %v14748_v30  ;;  %v3946_v37 = vand.u32 2147483648, %v14748_v30  ;;  %vm3787_vm0 = vweird.f32 %v8325_v3 }
 0x7b1   : > { %v3783_v54 = vsub.f32 1.0, %v3782_v52  ;;  %v15142_v59 = vpop.eup %8326  ;;  %v3943_v35 = vsel %vm15136_vm15, %v14842_v24, %v3939_v29  ;;  %v3952_v15 = vmul.f32 %v14997_v45, %v3951_v6  ;;  %v3793_v44 = vor.u32 1.1754944e-38, %v3792_v40  ;;  %vm3788_vm3 = vmor %vm3786_vm11, %vm3787_vm0  ;;  %v15167_v6 = vpop.f32.mrf.mxu3 }
 0x7b2   : > { %8111 = vrot.lane.b32.xlu0 %v8110_v62, %s10275_s21  ;;  %v15148_v62 = vpop.eup %8328  ;;  %vm3945_vm1 = vcmp.eq.f32.partialorder %v3944_v22, 8.507059e+37  ;;  %v3947_v42 = vor.u32 1.1754944e-38, %v3946_v37  ;;  %vm3955_vm2 = vweird.f32 %v14997_v45  ;;  %v3958_v20 = vand.u32 2147483647, %v14908_v21 }
 0x7b3   : > { %v3784_v9 = vmul.f32 %v8325_v3, %v3783_v54  ;;  %v3953_v33 = vadd.f32 %v14997_v45, %v3952_v15  ;;  %v3960_v24 = vand.u32 2147483648, %v14908_v21  ;;  %v15158_v12 = vmul.f32 %v15142_v59, %v15046_v34 }
 0x7b4   : > { %v3948_v18 = vsel %vm3945_vm1, %v3947_v42, %v3943_v35  ;;  %vm3954_vm8 = vweird.f32 %v14908_v21  ;;  %v3993_v52 = vsub.f32 1.0, %v15123_v17  ;;  %vm3791_vm14 = vcmp.eq.f32.partialorder %v3790_v57, 8.507059e+37  ;;  %v4183_v21 = vld [vmem:[#allocation9 + $0x58] sm:$0xff] }
 0x7b5   : > { %v3142_v30 = vpop.xlane.xlu1 %3141  ;;  %v3785_v23 = vadd.f32 %v8325_v3, %v3784_v9  ;;  %vm15174_vm6 = vmor %vm3954_vm8, %vm3955_vm2  ;;  %v3965_v11 = vsub.f32 1.0, %v15129_v48  ;;  %v3961_v43 = vor.u32 1.1754944e-38, %v3960_v24  ;;  %vm3959_vm5 = vcmp.eq.f32.partialorder %v3958_v20, 8.507059e+37  ;;  %4192 = vmatpush.msra.mxu0 %v4183_v21  ;;  %6194 = vmatpush.msra.mxu2 %v4183_v21  ;;  %v4179_v24 = vld [vmem:[#allocation9 + $0x38] sm:$0xff] }
 0x7b6   : > { %v15154_v32 = vpop.eup %8330  ;;  %v15161_v2 = vadd.f32 %v3142_v30, %v17833_v63  ;;  %v3957_v17 = vsel %vm15174_vm6, %v14997_v45, %v3953_v33  ;;  %v15184_v22 = vmul.f32 %v3948_v18, %v15063_v28  ;;  %v15188_v37 = vmul.f32 %v15148_v62, %v14866_v31  ;;  %v17836_v28 = vld [vmem:[#allocation64_spill] sm:$0xff]  ;;  %v3190_v33 = vpop.xlane.xlu0 %3189  ;;  %v17841_v18 = vld [vmem:[#allocation99_spill] sm:$0xff] }
 0x7b7   : > { %v4006_v29 = vmul.f32 %v15154_v32, %v15105_v5  ;;  %v3789_v46 = vsel %vm3788_vm3, %v8325_v3, %v3785_v23  ;;  %v3979_v45 = vsub.f32 1.0, %v15158_v12  ;;  %vm3968_vm4 = vweird.f32 %v15005_v0  ;;  %4193 = vmatpush.msra.mxu0 %v4182_v16  ;;  %6195 = vmatpush.msra.mxu2 %v4182_v16  ;;  %v4176_v16 = vld [vmem:[#allocation9 + $0x20] sm:$0xff] }
 0x7b8   : > { %v3794_v54 = vsel %vm3791_vm14, %v3793_v44, %v3789_v46  ;;  %8126 = vrot.lane.b32.xlu1 %v8125_v51, %s10275_s21  ;;  %3138 = vadd.xlane.f32.xlu2 %v17836_v28  ;;  %vm3969_vm7 = vweird.f32 %v15090_v61  ;;  %v3974_v47 = vand.u32 2147483648, %v15005_v0  ;;  %v4181_v51 = vld [vmem:[#allocation9 + $0x48] sm:$0xff]  ;;  %v3966_v41 = vmul.f32 %v15090_v61, %v3965_v11 }
 0x7b9   : > { %v4034_v3 = vmul.f32 %v3794_v54, %v15101_v58  ;;  %v4007_v57 = vsub.f32 1.0, %v4006_v29  ;;  %v3962_v58 = vsel %vm3959_vm5, %v3961_v43, %v3957_v17  ;;  %v3972_v60 = vand.u32 2147483647, %v15005_v0  ;;  %vm15222_vm15 = vmor %vm3968_vm4, %vm3969_vm7  ;;  %4194 = vmatpush.msra.mxu0 %v4181_v51  ;;  %6196 = vmatpush.msra.mxu2 %v4181_v51  ;;  %v3536_v46 = vpop.f32.mrf.mxu3  ;;  %v17845_v54 = vld [vmem:[#allocation50_spill] sm:$0xff] }
 0x7ba   : > { %8136 = vrot.lane.b32.xlu0 %v8135_v8, %s10277_s20  ;;  %v15206_v49 = vmul.f32 %v3962_v58, %v15080_v1  ;;  %v3994_v8 = vmul.f32 %v15059_v4, %v3993_v52  ;;  %vm4011_vm10 = vweird.f32 %v15154_v32  ;;  %vm3996_vm11 = vweird.f32 %v14982_v10  ;;  %v17842_v52 = vld [vmem:[#allocation258_spill] sm:$0xff]  ;;  %v4177_v58 = vld [vmem:[#allocation9 + $0x28] sm:$0xff] }
 0x7bb   : > { %v8140_v48 = vpack.i.bf16 %v15119_v26, %v4034_v3  ;;  %v4008_v9 = vmul.f32 %v15154_v32, %v4007_v57  ;;  %vm3997_vm13 = vweird.f32 %v15059_v4  ;;  %v3967_v35 = vadd.f32 %v15090_v61, %v3966_v41  ;;  %4195 = vmatpush.msra.mxu0 %v4180_v19  ;;  %6197 = vmatpush.msra.mxu2 %v4180_v19  ;;  %v4178_v57 = vld [vmem:[#allocation9 + $0x30] sm:$0xff] }
 0x7bc   : > { %v8130_v1 = vpack.i.bf16 %v15206_v49, %v15184_v22  ;;  %v3995_v44 = vadd.f32 %v15059_v4, %v3994_v8  ;;  %v4000_v42 = vand.u32 2147483647, %v14982_v10  ;;  %vm4010_vm0 = vweird.f32 %v15105_v5  ;;  %vm15230_vm1 = vmor %vm3996_vm11, %vm3997_vm13  ;;  %v3471_v49 = vpop.f32.mrf.mxu2 }
 0x7bd   : > { %v4009_v26 = vadd.f32 %v15154_v32, %v4008_v9  ;;  %v4016_v30 = vand.u32 2147483648, %v15105_v5  ;;  %v3975_v23 = vor.u32 1.1754944e-38, %v3974_v47  ;;  %v4002_v0 = vand.u32 2147483648, %v14982_v10  ;;  %vm15248_vm3 = vmor %vm4010_vm0, %vm4011_vm10  ;;  %4196 = vmatpush.msra.mxu0 %v4179_v24  ;;  %6198 = vmatpush.msra.mxu2 %v4179_v24 }
 0x7be   : > { %v4014_v20 = vand.u32 2147483647, %v15105_v5  ;;  %v3971_v12 = vsel %vm15222_vm15, %v15090_v61, %v3967_v35  ;;  %vm3973_vm2 = vcmp.eq.f32.partialorder %v3972_v60, 8.507059e+37  ;;  %v3999_v63 = vsel %vm15230_vm1, %v15059_v4, %v3995_v44  ;;  %v4175_v35 = vld [vmem:[#allocation9 + $0x18] sm:$0xff]  ;;  %v17848_v44 = vld [vmem:[#allocation57_spill] sm:$0xff] }
 0x7bf   : > { %v3110_v29 = vmul.f32 %v17842_v52, %v17841_v18  ;;  %v3980_v61 = vmul.f32 %v15142_v59, %v3979_v45  ;;  %v3976_v40 = vsel %vm3973_vm2, %v3975_v23, %v3971_v12  ;;  %v4003_v11 = vor.u32 1.1754944e-38, %v4002_v0  ;;  %4197 = vmatpush.msra.mxu0 %v4178_v57  ;;  %6199 = vmatpush.msra.mxu2 %v4178_v57 }
 0x7c0   : > { %v3569_v4 = vadd.f32 %v15167_v6, %v17845_v54  ;;  %v4013_v21 = vsel %vm15248_vm3, %v15154_v32, %v4009_v26  ;;  %vm4001_vm8 = vcmp.eq.f32.partialorder %v4000_v42, 8.507059e+37  ;;  %v15260_v5 = vmul.f32 %v3976_v40, %v15114_v36  ;;  %v17849_v42 = vld [vmem:[#allocation234_spill] sm:$0xff] }
 0x7c1   : > { %v15262_v17 = vadd.f32 %v3190_v33, %v3110_v29  ;;  %v4017_v43 = vor.u32 1.1754944e-38, %v4016_v30  ;;  %v4004_v3 = vsel %vm4001_vm8, %v4003_v11, %v3999_v63  ;;  %v3570_v45 = vadd.f32 %v3536_v46, %v14933_v38  ;;  %4198 = vmatpush.msra.mxu0 %v4177_v58  ;;  %6200 = vmatpush.msra.mxu2 %v4177_v58  ;;  %v4174_v33 = vld [vmem:[#allocation9 + $0x10] sm:$0xff]  ;;  %v4172_v63 = vld [vmem:[#allocation9] sm:$0xff] }
 0x7c2   : > { %8141 = vrot.lane.b32.xlu0 %v8140_v48, %s10277_s20  ;;  %vm4015_vm14 = vcmp.eq.f32.partialorder %v4014_v20, 8.507059e+37  ;;  %v15265_v6 = vmul.f32 %v4004_v3, %v3569_v4  ;;  %v3867_v28 = vsub.f32 1.0, %v15188_v37  ;;  %v3981_v36 = vadd.f32 %v15142_v59, %v3980_v61  ;;  %v4173_v20 = vld [vmem:[#allocation9 + $0x8] sm:$0xff]  ;;  %v17850_v11 = vld [vmem:[#allocation111_spill] sm:$0xff] }
 0x7c3   : > { %v4018_v32 = vsel %vm4015_vm14, %v4017_v43, %v4013_v21  ;;  %vm3983_vm6 = vweird.f32 %v15142_v59  ;;  %v3876_v48 = vand.u32 2147483648, %v14866_v31  ;;  %vm3871_vm5 = vweird.f32 %v15148_v62  ;;  %4199 = vmatpush.msra.mxu0 %v4176_v16  ;;  %6201 = vmatpush.msra.mxu2 %v4176_v16  ;;  %v17851_v43 = vld [vmem:[#allocation239_spill] sm:$0xff] }
 0x7c4   : > { %v8145_v9 = vpack.i.bf16 %v15260_v5, %v15265_v6  ;;  %v3868_v38 = vmul.f32 %v15148_v62, %v3867_v28  ;;  %v3874_v47 = vand.u32 2147483647, %v14866_v31  ;;  %8332 = vrcp.f32 %v15161_v2 }
 0x7c5   : > { %vm3982_vm4 = vweird.f32 %v15046_v34  ;;  %v3988_v37 = vand.u32 2147483648, %v15046_v34  ;;  %v4050_v51 = vmul.f32 %v4018_v32, %v3570_v45  ;;  %v3986_v60 = vand.u32 2147483647, %v15046_v34  ;;  %4200 = vmatpush.msra.mxu0 %v4175_v35  ;;  %6202 = vmatpush.msra.mxu2 %v4175_v35  ;;  %v17854_v35 = vld [vmem:[#allocation41_spill] sm:$0xff] }
 0x7c6   : > { %vm15279_vm7 = vmor %vm3982_vm4, %vm3983_vm6  ;;  %v3869_v8 = vadd.f32 %v15148_v62, %v3868_v38  ;;  %vm3870_vm10 = vweird.f32 %v14866_v31  ;;  %v3877_v26 = vor.u32 1.1754944e-38, %v3876_v48  ;;  %8334 = vrcp.f32 %v15262_v17 }
 0x7c7   : > { %vm3872_vm11 = vmor %vm3870_vm10, %vm3871_vm5  ;;  %v3985_v19 = vsel %vm15279_vm7, %v15142_v59, %v3981_v36  ;;  %vm3875_vm13 = vcmp.eq.f32.partialorder %v3874_v47, 8.507059e+37  ;;  %v3989_v34 = vor.u32 1.1754944e-38, %v3988_v37  ;;  %v3276_v30 = vmul.f32 %v17849_v42, %v17848_v44  ;;  %4201 = vmatpush.msra.mxu0 %v4174_v33  ;;  %6203 = vmatpush.msra.mxu2 %v4174_v33 }
 0x7c8   : > { %v3873_v15 = vsel %vm3872_vm11, %v15148_v62, %v3869_v8  ;;  %vm3987_vm15 = vcmp.eq.f32.partialorder %v3986_v60, 8.507059e+37  ;;  %v3680_v29 = vand.u32 2147483648, %v15161_v2  ;;  %v3678_v10 = vand.u32 2147483647, %v15161_v2  ;;  %v17852_v60 = vld [vmem:[#allocation54_spill] sm:$0xff] }
 0x7c9   : > { %v3878_v31 = vsel %vm3875_vm13, %v3877_v26, %v3873_v15  ;;  %v3990_v0 = vsel %vm3987_vm15, %v3989_v34, %v3985_v19  ;;  %v3568_v59 = vadd.f32 %v15092_v56, %v3276_v30  ;;  %4202 = vmatpush.msra.mxu0 %v4173_v20  ;;  %6204 = vmatpush.msra.mxu2 %v4173_v20  ;;  %vm3674_vm1 = vweird.f32 %v15161_v2  ;;  %v17855_v15 = vld [vmem:[#allocation89_spill] sm:$0xff] }
 0x7ca   : > { %4137 = vrot.lane.b32.xlu0 %v4050_v51, %s10276_s23  ;;  %v15295_v23 = vmul.f32 %v3878_v31, %v14647_v13  ;;  %v8333_v25 = vpop.eup %8332  ;;  %v3681_v53 = vor.u32 1.1754944e-38, %v3680_v29  ;;  %vm3679_vm3 = vcmp.eq.f32.partialorder %v3678_v10, 8.507059e+37  ;;  %v3904_v21 = vand.u32 2147483648, %v15262_v17 }
 0x7cb   : > { %v3670_v24 = vmul.f32 %v8333_v25, %v15161_v2  ;;  %v4048_v12 = vmul.f32 %v3990_v0, %v3568_v59  ;;  %4203 = vmatpush.msra.mxu0 %v4172_v63  ;;  %6205 = vmatpush.msra.mxu2 %v4172_v63  ;;  %vm3675_vm0 = vweird.f32 %v8333_v25  ;;  %vm3898_vm14 = vweird.f32 %v15262_v17 }
 0x7cc   : > { %v8335_v62 = vpop.eup %8334  ;;  %vm3676_vm2 = vmor %vm3674_vm1, %vm3675_vm0  ;;  %v3902_v2 = vand.u32 2147483647, %v15262_v17  ;;  %v3270_v3 = vmul.f32 %v17851_v43, %v17841_v18  ;;  %vm4163_vm4 = vcmask 785408   ;;  %v3092_v34 = vmul.f32 %v17855_v15, %v17854_v35 }
 0x7cd   : > { %v3894_v13 = vmul.f32 %v8335_v62, %v15262_v17  ;;  %v3671_v56 = vsub.f32 1.0, %v3670_v24  ;;  %vm3899_vm8 = vweird.f32 %v8335_v62 }
 0x7ce   : > { %vm3900_vm6 = vmor %vm3898_vm14, %vm3899_vm8  ;;  %vm3903_vm5 = vcmp.eq.f32.partialorder %v3902_v2, 8.507059e+37  ;;  %v3562_v45 = vadd.f32 %v3471_v49, %v3270_v3 }
 0x7cf   : > { %v3895_v52 = vsub.f32 1.0, %v3894_v13  ;;  %v3672_v46 = vmul.f32 %v8333_v25, %v3671_v56  ;;  %v17856_v56 = vld [vmem:[#allocation55_spill] sm:$0xff] }
 0x7d0   : > { %8116 = vrot.lane.b32.xlu2 %v8115_v39, %s10277_s20 }
 0x7d1   : > { %v3673_v61 = vadd.f32 %v8333_v25, %v3672_v46  ;;  %v3896_v50 = vmul.f32 %v8335_v62, %v3895_v52 }
 0x7d2   : > { %4133 = vrot.lane.b32.xlu0 %v4048_v12, %s10276_s23 }
 0x7d3   : > { %v3677_v39 = vsel %vm3676_vm2, %v8333_v25, %v3673_v61  ;;  %v3897_v4 = vadd.f32 %v8335_v62, %v3896_v50 }
 0x7d4   : > { %v3682_v40 = vsel %vm3679_vm3, %v3681_v53, %v3677_v39  ;;  %v17857_v39 = vld [vmem:[#allocation58_spill] sm:$0xff] }
 0x7d5   : > { %v15313_v54 = vmul.f32 %v3682_v40, %v17850_v11  ;;  %v3901_v22 = vsel %vm3900_vm6, %v8335_v62, %v3897_v4  ;;  %v17858_v11 = vld [vmem:[#allocation59_spill] sm:$0xff]  ;;  %v17859_v4 = vld [vmem:[#allocation88_spill] sm:$0xff] }
 0x7d8   : > { %8131 = vrot.lane.b32.xlu2 %v8130_v1, %s10276_s23  ;;  %v3905_v1 = vor.u32 1.1754944e-38, %v3904_v21  ;;  %v3093_v21 = vmul.f32 %v17859_v4, %v17858_v11 }
 0x7da   : > { %v3906_v57 = vsel %vm3903_vm5, %v3905_v1, %v3901_v22 }
 0x7db   : > { %v4042_v58 = vmul.f32 %v3906_v57, %v3562_v45 }
 0x7e0   : > { %8146 = vrot.lane.b32.xlu2 %v8145_v9, %s10276_s23 }
 0x7e6   : > { %v8102_v28 = vpop.permute.xlu0 %8101 }
 0x7e7   : > { %v8122_v17 = vpop.permute.xlu1 %8121  ;;  %v8103_v48 = vunpack.i.l.bf16 %v8102_v28  ;;  %v8104_v47 = vunpack.i.h.bf16 %v8102_v28 }
 0x7e8   : > { %4105 = vrot.lane.b32.xlu2 %v4042_v58, %s10275_s21  ;;  %v8123_v5 = vunpack.i.l.bf16 %v8122_v17  ;;  %v8124_v51 = vunpack.i.h.bf16 %v8122_v17 }
 0x7e9   : > { %v8107_v32 = vpop.permute.xlu2 %8106 }
 0x7ea   : > { %v8108_v36 = vunpack.i.l.bf16 %v8107_v32  ;;  %v8109_v6 = vunpack.i.h.bf16 %v8107_v32 }
 0x7ec   : > { %v4147_v9 = vsel %vm722_vm9, %v14787_v7, %v8108_v36  ;;  %v4148_v38 = vsel %vm722_vm9, %v14792_v55, %v8109_v6  ;;  %v17853_v7 = vld [vmem:[#allocation90_spill] sm:$0xff] }
 0x7ed   : > { %v4155_v16 = vsel %vm2766_vm12, %v4147_v9, %v8103_v48  ;;  %v4156_v37 = vsel %vm2766_vm12, %v4148_v38, %v8104_v47  ;;  %v3091_v8 = vmul.f32 %v17853_v7, %v17852_v60 }
 0x7ee   : > { %v4164_v18 = vsel %vm4163_vm4, %v4155_v16, %v8123_v5  ;;  %v4165_v41 = vsel %vm4163_vm4, %v4156_v37, %v8124_v51 }
 0x7ef   : > { %4204 = vmatmul.f32.vlgmr.msra.gmra.mxu0 %v4164_v18 }
 0x7f0   : > { %4101 = vrot.lane.b32.xlu2 %v15295_v23, %s10275_s21 }
 0x7f7   : > { %4207 = vmatmul.f32.gmra.mxu0 %v4165_v41  ;;  %v17860_v41 = vld [vmem:[#allocation43_spill] sm:$0xff] }
 0x811   : > { %v3133_v26 = vpop.xlane.xlu0 %3132 }
 0x812   : > { %v3219_v19 = vadd.f32 %v3133_v26, %v3091_v8  ;;  %v3136_v55 = vpop.xlane.xlu1 %3135 }
 0x813   : > { %v3220_v31 = vadd.f32 %v3136_v55, %v3092_v34 }
 0x814   : > { %8336 = vrcp.f32 %v3219_v19  ;;  %v3638_v0 = vand.u32 2147483648, %v3219_v19  ;;  %v3636_v33 = vand.u32 2147483647, %v3219_v19  ;;  %vm3632_vm10 = vweird.f32 %v3219_v19 }
 0x815   : > { %8338 = vrcp.f32 %v3220_v31  ;;  %v3650_v29 = vand.u32 2147483647, %v3220_v31  ;;  %vm3646_vm0 = vweird.f32 %v3220_v31  ;;  %v3652_v10 = vand.u32 2147483648, %v3220_v31 }
 0x816   : > { %v3639_v24 = vor.u32 1.1754944e-38, %v3638_v0  ;;  %vm3637_vm13 = vcmp.eq.f32.partialorder %v3636_v33, 8.507059e+37 }
 0x817   : > { %v3653_v50 = vor.u32 1.1754944e-38, %v3652_v10  ;;  %vm3651_vm2 = vcmp.eq.f32.partialorder %v3650_v29, 8.507059e+37 }
 0x81a   : > { %v8337_v44 = vpop.eup %8336 }
 0x81b   : > { %v3628_v42 = vmul.f32 %v8337_v44, %v3219_v19  ;;  %v8339_v30 = vpop.eup %8338  ;;  %vm3633_vm7 = vweird.f32 %v8337_v44 }
 0x81c   : > { %v3642_v25 = vmul.f32 %v8339_v30, %v3220_v31  ;;  %vm3634_vm11 = vmor %vm3632_vm10, %vm3633_vm7  ;;  %vm3647_vm15 = vweird.f32 %v8339_v30 }
 0x81d   : > { %v3629_v23 = vsub.f32 1.0, %v3628_v42  ;;  %vm3648_vm1 = vmor %vm3646_vm0, %vm3647_vm15 }
 0x81e   : > { %v3643_v20 = vsub.f32 1.0, %v3642_v25 }
 0x81f   : > { %v3630_v59 = vmul.f32 %v8337_v44, %v3629_v23 }
 0x820   : > { %v3644_v13 = vmul.f32 %v8339_v30, %v3643_v20 }
 0x821   : > { %v3631_v62 = vadd.f32 %v8337_v44, %v3630_v59 }
 0x822   : > { %v3645_v46 = vadd.f32 %v8339_v30, %v3644_v13 }
 0x823   : > { %v3635_v12 = vsel %vm3634_vm11, %v8337_v44, %v3631_v62 }
 0x824   : > { %v3640_v63 = vsel %vm3637_vm13, %v3639_v24, %v3635_v12  ;;  %v3649_v61 = vsel %vm3648_vm1, %v8339_v30, %v3645_v46  ;;  %v8112_v22 = vpop.permute.xlu0 %8111 }
 0x825   : > { %v4023_v52 = vmul.f32 %v3640_v63, %v17856_v56  ;;  %v3654_v53 = vsel %vm3651_vm2, %v3653_v50, %v3649_v61  ;;  %v8113_v48 = vunpack.i.l.bf16 %v8112_v22  ;;  %v8114_v15 = vunpack.i.h.bf16 %v8112_v22 }
 0x826   : > { %v15341_v40 = vmul.f32 %v3654_v53, %v17857_v39  ;;  %v17861_v53 = vld [vmem:[#allocation24_spill] sm:$0xff] }
 0x82a   : > { %v8127_v7 = vpop.permute.xlu1 %8126 }
 0x82b   : > { %v3139_v2 = vpop.xlane.xlu2 %3138  ;;  %v8128_v34 = vunpack.i.l.bf16 %v8127_v7  ;;  %v8129_v20 = vunpack.i.h.bf16 %v8127_v7 }
 0x82c   : > { %v3221_v49 = vadd.f32 %v3139_v2, %v3093_v21  ;;  %v8137_v57 = vpop.permute.xlu0 %8136  ;;  %v17863_v21 = vld [vmem:[#allocation27_spill] sm:$0xff] }
 0x82d   : > { %v8139_v30 = vunpack.i.h.bf16 %v8137_v57 }
 0x82e   : > { %8340 = vrcp.f32 %v3221_v49  ;;  %v3666_v28 = vand.u32 2147483648, %v3221_v49  ;;  %v3664_v32 = vand.u32 2147483647, %v3221_v49  ;;  %vm3660_vm8 = vweird.f32 %v3221_v49 }
 0x82f   : > { %v4151_v59 = vsel %vm722_vm9, %v4023_v52, %v8139_v30 }
 0x830   : > { %v3667_v9 = vor.u32 1.1754944e-38, %v3666_v28  ;;  %vm3665_vm6 = vcmp.eq.f32.partialorder %v3664_v32, 8.507059e+37  ;;  %v4159_v63 = vsel %vm2766_vm12, %v4151_v59, %v8129_v20 }
 0x833   : > { %v8117_v1 = vpop.permute.xlu2 %8116 }
 0x834   : > { %v8341_v43 = vpop.eup %8340  ;;  %v8118_v45 = vunpack.i.l.bf16 %v8117_v1  ;;  %v8119_v37 = vunpack.i.h.bf16 %v8117_v1  ;;  %v8142_v8 = vpop.permute.xlu0 %8141 }
 0x835   : > { %v3656_v3 = vmul.f32 %v8341_v43, %v3221_v49  ;;  %vm3661_vm3 = vweird.f32 %v8341_v43  ;;  %v8143_v0 = vunpack.i.l.bf16 %v8142_v8  ;;  %v8144_v29 = vunpack.i.h.bf16 %v8142_v8  ;;  %v17865_v49 = vld [vmem:[#allocation25_spill] sm:$0xff] }
 0x836   : > { %v4149_v36 = vsel %vm722_vm9, %v14848_v14, %v8118_v45  ;;  %vm3662_vm14 = vmor %vm3660_vm8, %vm3661_vm3  ;;  %v8138_v14 = vunpack.i.l.bf16 %v8137_v57  ;;  %v4150_v19 = vsel %vm722_vm9, %v14929_v27, %v8119_v37  ;;  %v17867_v57 = vld [vmem:[#allocation28_spill] sm:$0xff]  ;;  %v17875_v37 = vld [vmem:[#allocation29_spill] sm:$0xff] }
 0x837   : > { %v3657_v58 = vsub.f32 1.0, %v3656_v3  ;;  %v4157_v38 = vsel %vm2766_vm12, %v4149_v36, %v8113_v48  ;;  %v4158_v44 = vsel %vm2766_vm12, %v4150_v19, %v8114_v15  ;;  %v4154_v62 = vsel %vm722_vm9, %v15313_v54, %v8143_v0  ;;  %v17871_v48 = vld [vmem:[#allocation26_spill] sm:$0xff]  ;;  %v17878_v0 = vld [vmem:[#allocation23_spill] sm:$0xff] }
 0x838   : > { %v4152_v52 = vsel %vm722_vm9, %v15341_v40, %v8144_v29  ;;  %v15411_v59 = vperm.slane %v17878_v0, 0 }
 0x839   : > { %v3658_v17 = vmul.f32 %v8341_v43, %v3657_v58 }
 0x83b   : > { %v3659_v5 = vadd.f32 %v8341_v43, %v3658_v17  ;;  %v8132_v6 = vpop.permute.xlu2 %8131  ;;  %v17869_v17 = vld [vmem:[#allocation30_spill] sm:$0xff] }
 0x83c   : > { %v8133_v16 = vunpack.i.l.bf16 %v8132_v6  ;;  %v8134_v35 = vunpack.i.h.bf16 %v8132_v6  ;;  %v4138_v27 = vpop.permute.xlu0 %4137 }
 0x83d   : > { %v3663_v18 = vsel %vm3662_vm14, %v8341_v43, %v3659_v5 }
 0x83e   : > { %v3668_v47 = vsel %vm3665_vm6, %v3667_v9, %v3663_v18  ;;  %v4166_v51 = vsel %vm4163_vm4, %v4157_v38, %v8133_v16  ;;  %v4167_v23 = vsel %vm4163_vm4, %v4158_v44, %v8134_v35  ;;  %v17873_v18 = vld [vmem:[#allocation31_spill] sm:$0xff] }
 0x83f   : > { %v4025_v60 = vmul.f32 %v3668_v47, %v17860_v41  ;;  %4210 = vmatmul.f32.gmra.mxu0 %v4166_v51 }
 0x841   : > { %v4153_v26 = vsel %vm722_vm9, %v4025_v60, %v8138_v14  ;;  %v17877_v14 = vld [vmem:[#allocation32_spill] sm:$0xff] }
 0x842   : > { %v4161_v42 = vsel %vm2766_vm12, %v4153_v26, %v8128_v34 }
 0x843   : > { %v8147_v55 = vpop.permute.xlu2 %8146 }
 0x844   : > { %v8148_v31 = vunpack.i.l.bf16 %v8147_v55  ;;  %v8149_v33 = vunpack.i.h.bf16 %v8147_v55  ;;  %v4134_v10 = vpop.permute.xlu0 %4133 }
 0x846   : > { %v4170_v25 = vsel %vm4163_vm4, %v4161_v42, %v8148_v31  ;;  %v4168_v56 = vsel %vm4163_vm4, %v4159_v63, %v8149_v33 }
 0x847   : > { %4213 = vmatmul.f32.gmra.mxu0 %v4167_v23  ;;  %4222 = vmatmul.f32.vlgmr.msra.gmra.mxu2 %v4170_v25 }
 0x84b   : > { %v4106_v24 = vpop.permute.xlu2 %4105 }
 0x84c   : > { %v4162_v12 = vsel %vm2766_vm12, %v4154_v62, %v4106_v24 }
 0x84d   : > { %v4171_v13 = vsel %vm4163_vm4, %v4162_v12, %v4138_v27 }
 0x84f   : > { %4216 = vmatmul.f32.gmra.mxu0 %v4168_v56  ;;  %4225 = vmatmul.f32.gmra.mxu2 %v4171_v13 }
 0x853   : > { %v4102_v46 = vpop.permute.xlu2 %4101 }
 0x854   : > { %v4160_v61 = vsel %vm2766_vm12, %v4152_v52, %v4102_v46 }
 0x855   : > { %v4169_v54 = vsel %vm4163_vm4, %v4160_v61, %v4134_v10 }
 0x857   : > { %4219 = vmatmul.f32.gmra.mxu0 %v4169_v54 }
 0x86c   : > { %v4205_v50 = vpop.f32.mrf.mxu0 }
 0x86d   : > { %v15369_v39 = vadd.f32 %v4205_v50, %v17861_v53 }
 0x86f   : > { %17862 = vst [vmem:[#allocation104_spill] sm:$0xff] %v15369_v39  ;;  %v4237_v11 = vmul.f32 %v15369_v39, %v15369_v39 }
 0x871   : > { %4245 = vadd.xlane.f32.xlu1 %v4237_v11 }
 0x874   : > { %v4208_v4 = vpop.f32.mrf.mxu0 }
 0x875   : > { %v15374_v2 = vadd.f32 %v4208_v4, %v17863_v21 }
 0x877   : > { %17864 = vst [vmem:[#allocation35_spill] sm:$0xff] %v15374_v2  ;;  %v4238_v40 = vmul.f32 %v15374_v2, %v15374_v2 }
 0x879   : > { %4247 = vadd.xlane.f32.xlu2 %v4238_v40 }
 0x8bc   : > { %v4211_v22 = vpop.f32.mrf.mxu0 }
 0x8bd   : > { %v15379_v1 = vadd.f32 %v4211_v22, %v17865_v49 }
 0x8bf   : > { %17866 = vst [vmem:[#allocation108_spill] sm:$0xff] %v15379_v1  ;;  %v4239_v43 = vmul.f32 %v15379_v1, %v15379_v1 }
 0x8c1   : > { %4249 = vadd.xlane.f32.xlu0 %v4239_v43 }
 0x8c4   : > { %v4214_v3 = vpop.f32.mrf.mxu0 }
 0x8c5   : > { %v15384_v45 = vadd.f32 %v4214_v3, %v17867_v57 }
 0x8c7   : > { %17868 = vst [vmem:[#allocation44_spill] sm:$0xff] %v15384_v45  ;;  %v4240_v58 = vmul.f32 %v15384_v45, %v15384_v45 }
 0x8c9   : > { %4251 = vadd.xlane.f32.xlu1 %v4240_v58 }
 0x8ca   : > { %v4223_v28 = vpop.f32.mrf.mxu2 }
 0x8cb   : > { %v15389_v32 = vadd.f32 %v4223_v28, %v17869_v17 }
 0x8cc   : > { %v4217_v36 = vpop.f32.mrf.mxu0 }
 0x8cd   : > { %17870 = vst [vmem:[#allocation98_spill] sm:$0xff] %v15389_v32  ;;  %v15392_v5 = vadd.f32 %v4217_v36, %v17871_v48  ;;  %v4243_v6 = vmul.f32 %v15389_v32, %v15389_v32 }
 0x8cf   : > { %17872 = vst [vmem:[#allocation75_spill] sm:$0xff] %v15392_v5  ;;  %v4241_v9 = vmul.f32 %v15392_v5, %v15392_v5 }
 0x8d1   : > { %4257 = vadd.xlane.f32.xlu1 %v4243_v6  ;;  %4253 = vadd.xlane.f32.xlu2 %v4241_v9 }
 0x8d2   : > { %v4226_v16 = vpop.f32.mrf.mxu2 }
 0x8d3   : > { %v15399_v38 = vadd.f32 %v4226_v16, %v17873_v18 }
 0x8d4   : > { %v4220_v47 = vpop.f32.mrf.mxu0 }
 0x8d5   : > { %17874 = vst [vmem:[#allocation103_spill] sm:$0xff] %v15399_v38  ;;  %v15402_v51 = vadd.f32 %v4220_v47, %v17875_v37  ;;  %v4244_v41 = vmul.f32 %v15399_v38, %v15399_v38 }
 0x8d7   : > { %17876 = vst [vmem:[#allocation110_spill] sm:$0xff] %v15402_v51  ;;  %v4242_v60 = vmul.f32 %v15402_v51, %v15402_v51 }
 0x8d9   : > { %4259 = vadd.xlane.f32.xlu2 %v4244_v41  ;;  %4255 = vadd.xlane.f32.xlu0 %v4242_v60 }
 0x8e4   : > { %v4246_v7 = vpop.xlane.xlu1 %4245 }
 0x8e5   : > { %v4261_v8 = vmul.f32 %v4246_v7, %v17877_v14 }
 0x8e7   : > { %v4269_v26 = vadd.f32 1e-05, %v4261_v8 }
 0x8e9   : > { %8342 = vrsqrt.f32 %v4269_v26  ;;  %vm4283_vm12 = vweird.f32 %v4269_v26 }
 0x8ec   : > { %v4248_v19 = vpop.xlane.xlu2 %4247 }
 0x8ed   : > { %v4262_v35 = vmul.f32 %v4248_v19, %v17877_v14 }
 0x8ef   : > { %v8343_v15 = vpop.eup %8342  ;;  %v4270_v34 = vadd.f32 1e-05, %v4262_v35 }
 0x8f0   : > { %v4278_v55 = vmul.f32 %v8343_v15, %v4269_v26  ;;  %vm4284_vm9 = vweird.f32 %v8343_v15 }
 0x8f1   : > { %8344 = vrsqrt.f32 %v4270_v34  ;;  %vm4285_vm5 = vmor %vm4283_vm12, %vm4284_vm9  ;;  %vm4293_vm7 = vweird.f32 %v4270_v34 }
 0x8f2   : > { %v4279_v31 = vmul.f32 %v8343_v15, %v4278_v55 }
 0x8f4   : > { %v4280_v44 = vmul.f32 0.5, %v4279_v31 }
 0x8f6   : > { %v4281_v42 = vsub.f32 1.5, %v4280_v44 }
 0x8f7   : > { %v8345_v30 = vpop.eup %8344 }
 0x8f8   : > { %v4282_v23 = vmul.f32 %v8343_v15, %v4281_v42  ;;  %v4288_v25 = vmul.f32 %v8345_v30, %v4270_v34  ;;  %vm4294_vm4 = vweird.f32 %v8345_v30 }
 0x8f9   : > { %vm4295_vm10 = vmor %vm4293_vm7, %vm4294_vm4 }
 0x8fa   : > { %v4286_v27 = vsel %vm4285_vm5, %v8343_v15, %v4282_v23  ;;  %v4289_v33 = vmul.f32 %v8345_v30, %v4288_v25 }
 0x8fb   : > { %v4357_v20 = vmul.f32 %v4286_v27, %v15369_v39 }
 0x8fc   : > { %v4290_v62 = vmul.f32 0.5, %v4289_v33 }
 0x8fd   : > { %v15415_v24 = vmul.f32 %v15411_v59, %v4357_v20 }
 0x8fe   : > { %v4291_v12 = vsub.f32 1.5, %v4290_v62 }
 0x8ff   : > { %17879 = vst [vmem:[#allocation82_spill] sm:$0xff] %v15415_v24 }
 0x900   : > { %v4292_v63 = vmul.f32 %v8345_v30, %v4291_v12 }
 0x902   : > { %v4296_v13 = vsel %vm4295_vm10, %v8345_v30, %v4292_v63 }
 0x903   : > { %v4358_v56 = vmul.f32 %v4296_v13, %v15374_v2 }
 0x905   : > { %v15419_v29 = vmul.f32 %v15411_v59, %v4358_v56 }
 0x907   : > { %17880 = vst [vmem:[#allocation74_spill] sm:$0xff] %v15419_v29 }
 0x934   : > { %v4250_v52 = vpop.xlane.xlu0 %4249 }
 0x935   : > { %v4263_v46 = vmul.f32 %v4250_v52, %v17877_v14 }
 0x937   : > { %v4271_v10 = vadd.f32 1e-05, %v4263_v46 }
 0x939   : > { %8346 = vrsqrt.f32 %v4271_v10  ;;  %vm4303_vm13 = vweird.f32 %v4271_v10 }
 0x93c   : > { %v4252_v61 = vpop.xlane.xlu1 %4251 }
 0x93d   : > { %v4264_v54 = vmul.f32 %v4252_v61, %v17877_v14 }
 0x93f   : > { %v8347_v50 = vpop.eup %8346  ;;  %v4272_v53 = vadd.f32 1e-05, %v4264_v54 }
 0x940   : > { %v4298_v11 = vmul.f32 %v8347_v50, %v4271_v10  ;;  %vm4304_vm11 = vweird.f32 %v8347_v50 }
 0x941   : > { %8348 = vrsqrt.f32 %v4272_v53  ;;  %vm4305_vm15 = vmor %vm4303_vm13, %vm4304_vm11  ;;  %vm4313_vm1 = vweird.f32 %v4272_v53 }
 0x942   : > { %v4299_v4 = vmul.f32 %v8347_v50, %v4298_v11 }
 0x944   : > { %v4300_v21 = vmul.f32 0.5, %v4299_v4  ;;  %v4258_v40 = vpop.xlane.xlu1 %4257  ;;  %v4254_v22 = vpop.xlane.xlu2 %4253 }
 0x945   : > { %v4267_v49 = vmul.f32 %v4258_v40, %v17877_v14  ;;  %v4265_v43 = vmul.f32 %v4254_v22, %v17877_v14 }
 0x946   : > { %v4301_v3 = vsub.f32 1.5, %v4300_v21 }
 0x947   : > { %v8349_v57 = vpop.eup %8348  ;;  %v4275_v58 = vadd.f32 1e-05, %v4267_v49  ;;  %v4273_v28 = vadd.f32 1e-05, %v4265_v43 }
 0x948   : > { %v4302_v17 = vmul.f32 %v8347_v50, %v4301_v3  ;;  %v4308_v36 = vmul.f32 %v8349_v57, %v4272_v53  ;;  %vm4314_vm0 = vweird.f32 %v8349_v57 }
 0x949   : > { %8350 = vrsqrt.f32 %v4275_v58  ;;  %vm4315_vm2 = vmor %vm4313_vm1, %vm4314_vm0  ;;  %vm4343_vm14 = vweird.f32 %v4275_v58  ;;  %vm4323_vm9 = vweird.f32 %v4273_v28 }
 0x94a   : > { %v4306_v48 = vsel %vm4305_vm15, %v8347_v50, %v4302_v17  ;;  %v4309_v6 = vmul.f32 %v8349_v57, %v4308_v36  ;;  %8352 = vrsqrt.f32 %v4273_v28  ;;  %v15451_v36 = vmov 0.0  }
 0x94b   : > { %v4359_v9 = vmul.f32 %v4306_v48, %v15379_v1  ;;  %v15453_v48 = vmov 0.0  }
 0x94c   : > { %v4310_v16 = vmul.f32 0.5, %v4309_v6  ;;  %v4260_v18 = vpop.xlane.xlu2 %4259  ;;  %v4256_v47 = vpop.xlane.xlu0 %4255  ;;  %v15455_v6 = vmov 0.0  }
 0x94d   : > { %v15427_v37 = vmul.f32 %v15411_v59, %v4359_v9  ;;  %v4268_v41 = vmul.f32 %v4260_v18, %v17877_v14  ;;  %v4266_v60 = vmul.f32 %v4256_v47, %v17877_v14  ;;  %v15457_v9 = vmov 0.0  }
 0x94e   : > { %v4311_v7 = vsub.f32 1.5, %v4310_v16  ;;  %v15459_v16 = vmov 0.0   ;;  %v15461_v18 = vmov 0.0   ;;  %v15463_v47 = vmov 0.0  }
 0x94f   : > { %17881 = vst [vmem:[#allocation109_spill] sm:$0xff] %v15427_v37  ;;  %v8351_v8 = vpop.eup %8350  ;;  %v4276_v26 = vadd.f32 1e-05, %v4268_v41  ;;  %v4274_v19 = vadd.f32 1e-05, %v4266_v60  ;;  %v15465_v41 = vmov 0.0  }
 0x950   : > { %v8353_v35 = vpop.eup %8352  ;;  %v4312_v15 = vmul.f32 %v8349_v57, %v4311_v7  ;;  %v4338_v34 = vmul.f32 %v8351_v8, %v4275_v58  ;;  %vm4344_vm3 = vweird.f32 %v8351_v8 }
 0x951   : > { %v4318_v55 = vmul.f32 %v8353_v35, %v4273_v28  ;;  %8354 = vrsqrt.f32 %v4276_v26  ;;  %vm4324_vm8 = vweird.f32 %v8353_v35  ;;  %vm4345_vm6 = vmor %vm4343_vm14, %vm4344_vm3  ;;  %vm4353_vm7 = vweird.f32 %v4276_v26 }
 0x952   : > { %v4316_v31 = vsel %vm4315_vm2, %v8349_v57, %v4312_v15  ;;  %v4339_v44 = vmul.f32 %v8351_v8, %v4338_v34  ;;  %8356 = vrsqrt.f32 %v4274_v19  ;;  %vm4325_vm12 = vmor %vm4323_vm9, %vm4324_vm8  ;;  %vm4333_vm11 = vweird.f32 %v4274_v19 }
 0x953   : > { %v4360_v42 = vmul.f32 %v4316_v31, %v15384_v45  ;;  %v4319_v30 = vmul.f32 %v8353_v35, %v4318_v55 }
 0x954   : > { %v4340_v23 = vmul.f32 0.5, %v4339_v44 }
 0x955   : > { %v15433_v14 = vmul.f32 %v15411_v59, %v4360_v42  ;;  %v4320_v25 = vmul.f32 0.5, %v4319_v30 }
 0x956   : > { %v4341_v0 = vsub.f32 1.5, %v4340_v23 }
 0x957   : > { %17882 = vst [vmem:[#allocation68_spill] sm:$0xff] %v15433_v14  ;;  %v8355_v27 = vpop.eup %8354  ;;  %v4321_v33 = vsub.f32 1.5, %v4320_v25 }
 0x958   : > { %v8357_v20 = vpop.eup %8356  ;;  %v4342_v62 = vmul.f32 %v8351_v8, %v4341_v0  ;;  %v4348_v12 = vmul.f32 %v8355_v27, %v4276_v26  ;;  %vm4354_vm5 = vweird.f32 %v8355_v27 }
 0x959   : > { %v4322_v63 = vmul.f32 %v8353_v35, %v4321_v33  ;;  %v4328_v13 = vmul.f32 %v8357_v20, %v4274_v19  ;;  %vm4334_vm4 = vweird.f32 %v8357_v20  ;;  %vm4355_vm10 = vmor %vm4353_vm7, %vm4354_vm5 }
 0x95a   : > { %v4346_v56 = vsel %vm4345_vm6, %v8351_v8, %v4342_v62  ;;  %v4349_v52 = vmul.f32 %v8355_v27, %v4348_v12  ;;  %vm4335_vm13 = vmor %vm4333_vm11, %vm4334_vm4 }
 0x95b   : > { %v4363_v46 = vmul.f32 %v4346_v56, %v15389_v32  ;;  %v4326_v10 = vsel %vm4325_vm12, %v8353_v35, %v4322_v63  ;;  %v4329_v61 = vmul.f32 %v8357_v20, %v4328_v13 }
 0x95c   : > { %v4361_v54 = vmul.f32 %v4326_v10, %v15392_v5  ;;  %v4350_v50 = vmul.f32 0.5, %v4349_v52 }
 0x95d   : > { %v15438_v53 = vmul.f32 %v15411_v59, %v4363_v46  ;;  %v4330_v11 = vmul.f32 0.5, %v4329_v61 }
 0x95e   : > { %v15441_v4 = vmul.f32 %v15411_v59, %v4361_v54  ;;  %v4351_v21 = vsub.f32 1.5, %v4350_v50 }
 0x95f   : > { %17883 = vst [vmem:[#allocation114_spill] sm:$0xff] %v15438_v53  ;;  %v4331_v40 = vsub.f32 1.5, %v4330_v11 }
 0x960   : > { %17884 = vst [vmem:[#allocation107_spill] sm:$0xff] %v15441_v4  ;;  %v4352_v22 = vmul.f32 %v8355_v27, %v4351_v21 }
 0x961   : > { %v4332_v49 = vmul.f32 %v8357_v20, %v4331_v40 }
 0x962   : > { %v4356_v43 = vsel %vm4355_vm10, %v8355_v27, %v4352_v22 }
 0x963   : > { %v4364_v3 = vmul.f32 %v4356_v43, %v15399_v38  ;;  %v4336_v57 = vsel %vm4335_vm13, %v8357_v20, %v4332_v49 }
 0x964   : > { %v4362_v58 = vmul.f32 %v4336_v57, %v15402_v51 }
 0x965   : > { %v15446_v28 = vmul.f32 %v15411_v59, %v4364_v3 }
 0x966   : > { %v15449_v17 = vmul.f32 %v15411_v59, %v4362_v58 }
 0x967   : > { %17885 = vst [vmem:[#allocation79_spill] sm:$0xff] %v15446_v28 }
 0x968   : > { %17886 = vst [vmem:[#allocation66_spill] sm:$0xff] %v15449_v17 }
 0x969 LB: >> { %v17887_v53 = vld [vmem:[#allocation114_spill] sm:$0xff]  ;;  %v17888_v37 = vld [vmem:[#allocation109_spill] sm:$0xff]  ;;  %v17893_v14 = vld [vmem:[#allocation68_spill] sm:$0xff]  ;;  %17895 = vst [vmem:[#allocation267_spill] sm:$0xff] %v10230_v36  ;;  %s6118_s7 = sshll.u32 %s10262_s1, 8  ;;  %s4381_s1 = sadd.s32 1, %s10262_s1   ;;  %v10258_v41 = vphi %v15465_v41, %v17946_v41   ;;  %v10254_v47 = vphi %v15463_v47, %v17945_v47   ;;  %v10250_v18 = vphi %v15461_v18, %v17944_v18   ;;  %v10246_v16 = vphi %v15459_v16, %v17943_v16   ;;  %v10242_v9 = vphi %v15457_v9, %v17942_v9   ;;  %v10238_v6 = vphi %v15455_v6, %v17941_v6   ;;  %v10234_v48 = vphi %v15453_v48, %v17940_v48   ;;  %v10230_v36 = vphi %v15451_v36, %v17939_v36   ;;  %s10262_s1 = sphi %s15467_s1, %s4381_s1  }
 0x96a   : >> { %v17889_v29 = vld [vmem:[#allocation74_spill] sm:$0xff]  ;;  %v17894_v4 = vld [vmem:[#allocation107_spill] sm:$0xff]  ;;  %17896 = vst [vmem:[#allocation268_spill] sm:$0xff] %v10234_v48  ;;  %s4391_s28 = sshra.s32 %s6118_s7, 7  ;;  %s15551_s13 = scalar_lea.vmem [#allocation12], %s6118_s7 }
 0x96b   : >> { %v17891_v24 = vld [vmem:[#allocation82_spill] sm:$0xff]  ;;  %17897 = vst [vmem:[#allocation269_spill] sm:$0xff] %v10238_v6  ;;  %s6119_s18 = sshll.u32 %s4391_s28, 3  ;;  %v5228_v22 = vld [vmem:[%s15551_s13 + $0x70] sm:$0xff]  ;;  %v5227_v43 = vld [vmem:[%s15551_s13 + $0x68] sm:$0xff]  ;;  %p4378_p8 = scmp.ge.s32.totalorder %s4381_s1, 2  }
 0x96c   : >> { %17898 = vst [vmem:[#allocation270_spill] sm:$0xff] %v10242_v9  ;;  %s15499_s11 = scalar_lea.vmem [#allocation10], %s6119_s18  ;;  %v5229_v21 = vld [vmem:[%s15551_s13 + $0x78] sm:$0xff]  ;;  %v5244_v49 = vld [vmem:[%s15551_s13 + $0xf0] sm:$0xff]  ;;  %v5243_v3 = vld [vmem:[%s15551_s13 + $0xe8] sm:$0xff]  ;;  %s17948_s14 = sld [smem:[#allocation19_spill]] (%p4378_p8) }
 0x96d   : >> { %17899 = vst [vmem:[#allocation271_spill] sm:$0xff] %v10246_v16  ;;  %v4425_v59 = vld [vmem:[%s15499_s11 + $0x1e0] sm:$0xff]  ;;  %v4426_v60 = vld [vmem:[%s15499_s11 + $0x1e8] sm:$0xff]  ;;  %v5245_v40 = vld [vmem:[%s15551_s13 + $0xf8] sm:$0xff]  ;;  %5246 = vmatpush.msra.mxu2 %v5229_v21  ;;  %s6137_s19 = sshll.u32 (%p4378_p8), %s9438_s27, 3  ;;  %s5367_s20 = sshll.u32 (%p4378_p8), %s11041_s24, 4  ;;  %s5368_s20 = int_to_ptr.vmem [resolvable:$true] %s5367_s20 }
 0x96e   : >> { %v17890_v28 = vld [vmem:[#allocation79_spill] sm:$0xff]  ;;  %17900 = vst [vmem:[#allocation272_spill] sm:$0xff] %v10250_v18  ;;  %4427 = vmatpush.msra.mxu0 %v4425_v59  ;;  %4468 = vmatpush.msra.mxu1 %v4426_v60  ;;  %v4424_v8 = vld [vmem:[%s15499_s11 + $0x1c8] sm:$0xff]  ;;  %s17955_s12 = sld [smem:[#allocation286_spill]] (%p4378_p8)  ;;  %s5353_s4 = scalar_lea.sflag (%p4378_p8), [#allocation6], %s10467_s16 }
 0x96f   : >> { %v17892_v17 = vld [vmem:[#allocation66_spill] sm:$0xff]  ;;  %17901 = vst [vmem:[#allocation273_spill] sm:$0xff] %v10254_v47  ;;  %v4423_v7 = vld [vmem:[%s15499_s11 + $0x1c0] sm:$0xff]  ;;  %v4422_v19 = vld [vmem:[%s15499_s11 + $0x1a8] sm:$0xff]  ;;  %5287 = vmatpush.msra.mxu3 %v5245_v40  ;;  %5247 = vmatpush.msra.mxu2 %v5228_v22 }
 0x970   : >> { %17902 = vst [vmem:[#allocation274_spill] sm:$0xff] %v10258_v41  ;;  %v4421_v26 = vld [vmem:[%s15499_s11 + $0x1a0] sm:$0xff]  ;;  %4428 = vmatpush.msra.mxu0 %v4423_v7  ;;  %4469 = vmatpush.msra.mxu1 %v4424_v8  ;;  %v4420_v15 = vld [vmem:[%s15499_s11 + $0x188] sm:$0xff]  ;;  %v5225_v7 = vld [vmem:[%s15551_s13 + $0x58] sm:$0xff] }
 0x971   : >> { %v4419_v35 = vld [vmem:[%s15499_s11 + $0x180] sm:$0xff]  ;;  %v4418_v55 = vld [vmem:[%s15499_s11 + $0x168] sm:$0xff]  ;;  %5288 = vmatpush.msra.mxu3 %v5244_v49  ;;  %5248 = vmatpush.msra.mxu2 %v5227_v43  ;;  %v5241_v8 = vld [vmem:[%s15551_s13 + $0xd8] sm:$0xff] }
 0x972   : >> { %4429 = vmatpush.msra.mxu0 %v4421_v26  ;;  %4470 = vmatpush.msra.mxu1 %v4422_v19  ;;  %v4417_v34 = vld [vmem:[%s15499_s11 + $0x160] sm:$0xff]  ;;  %v4416_v44 = vld [vmem:[%s15499_s11 + $0x148] sm:$0xff]  ;;  %s6138_s21 = sshll.u32 (%p4378_p8), %s17948_s14, 4 }
 0x973   : >> { %v4415_v31 = vld [vmem:[%s15499_s11 + $0x140] sm:$0xff]  ;;  %v4414_v30 = vld [vmem:[%s15499_s11 + $0x128] sm:$0xff]  ;;  %5289 = vmatpush.msra.mxu3 %v5243_v3  ;;  %s5364_s23 = sadd.s32 (%p4378_p8), %s6138_s21, %s6137_s19 }
 0x974   : >> { %4430 = vmatpush.msra.mxu0 %v4419_v35  ;;  %4471 = vmatpush.msra.mxu1 %v4420_v15  ;;  %v4413_v42 = vld [vmem:[%s15499_s11 + $0x120] sm:$0xff]  ;;  %v4412_v25 = vld [vmem:[%s15499_s11 + $0x108] sm:$0xff]  ;;  %v5224_v35 = vld [vmem:[%s15551_s13 + $0x50] sm:$0xff]  ;;  %s6139_s17 = sshll.u32 (%p4378_p8), %s5364_s23, 3 }
 0x975   : >> { %v4411_v23 = vld [vmem:[%s15499_s11 + $0x100] sm:$0xff]  ;;  %v4410_v27 = vld [vmem:[%s15499_s11 + $0xe8] sm:$0xff]  ;;  %v5240_v15 = vld [vmem:[%s15551_s13 + $0xd0] sm:$0xff]  ;;  %s5366_s10 = scalar_lea.hbm (%p4378_p8), %s17955_s12, %s6139_s17 }
 0x976   : >> { %4431 = vmatpush.msra.mxu0 %v4417_v34  ;;  %4472 = vmatpush.msra.mxu1 %v4418_v55  ;;  %v4409_v0 = vld [vmem:[%s15499_s11 + $0xe0] sm:$0xff]  ;;  %v4408_v20 = vld [vmem:[%s15499_s11 + $0xc8] sm:$0xff]  ;;  %s5369_s15 = sshll.u32 (%p4378_p8), %s5366_s10, 4  ;;  %s5370_s15 = int_to_ptr.hbm [resolvable:$true] %s5369_s15 }
 0x977   : >> { %v4407_v33 = vld [vmem:[%s15499_s11 + $0xc0] sm:$0xff]  ;;  %v4406_v12 = vld [vmem:[%s15499_s11 + $0xa8] sm:$0xff]  ;;  %s8554_s1 = sshra.s32 (%p4378_p8), %s5370_s15, 4  ;;  %s8555_s1 = int_to_ptr.hbm [resolvable:$true] %s8554_s1 }
 0x978   : >> { %4432 = vmatpush.msra.mxu0 %v4415_v31  ;;  %4473 = vmatpush.msra.mxu1 %v4416_v44  ;;  %v4405_v62 = vld [vmem:[%s15499_s11 + $0xa0] sm:$0xff]  ;;  %v4404_v13 = vld [vmem:[%s15499_s11 + $0x88] sm:$0xff]  ;;  %s8556_s7 = scalar_lea.hbm (%p4378_p8), %s8555_s1, 64  ;;  %p8561_p13 = scmp.lt.s32.totalorder (%p4378_p8), %s8555_s1, %s17955_s12 }
 0x979   : >> { %v4403_v63 = vld [vmem:[%s15499_s11 + $0x80] sm:$0xff]  ;;  %v4402_v52 = vld [vmem:[%s15499_s11 + $0x68] sm:$0xff]  ;;  %p8557_p10 = scmp.ne.s32.totalorder (%p4378_p8), %s8555_s1, %s8556_s7 }
 0x97a   : >> { %4433 = vmatpush.msra.mxu0 %v4413_v42  ;;  %4474 = vmatpush.msra.mxu1 %v4414_v30  ;;  %v4401_v56 = vld [vmem:[%s15499_s11 + $0x60] sm:$0xff]  ;;  %v4400_v10 = vld [vmem:[%s15499_s11 + $0x48] sm:$0xff] }
 0x97b   : >> { %v4399_v46 = vld [vmem:[%s15499_s11 + $0x40] sm:$0xff]  ;;  %v4398_v54 = vld [vmem:[%s15499_s11 + $0x28] sm:$0xff]  ;;  %p8558_p11 = pnand (%p4378_p8), %p8557_p10, %p10439_p5 }
 0x97c   : >> { %4434 = vmatpush.msra.mxu0 %v4411_v23  ;;  %4475 = vmatpush.msra.mxu1 %v4412_v25  ;;  %v4397_v61 = vld [vmem:[%s15499_s11 + $0x20] sm:$0xff]  ;;  %v4396_v11 = vld [vmem:[%s15499_s11 + $0x8] sm:$0xff] }
 0x97d   : >> { %v4395_v50 = vld [vmem:[%s15499_s11] sm:$0xff]  ;;  %v5223_v42 = vld [vmem:[%s15551_s13 + $0x48] sm:$0xff]  ;;  %p8559_p12 = pneg (%p4378_p8), %p8558_p11  ;;  %s8560_s11 = scalar_lea.hbm (%p4378_p8), %s17955_s12, 256 }
 0x97e   : >> { %4435 = vmatpush.msra.mxu0 %v4409_v0  ;;  %4476 = vmatpush.msra.mxu1 %v4410_v27  ;;  %v5226_v57 = vld [vmem:[%s15551_s13 + $0x60] sm:$0xff]  ;;  %v5239_v30 = vld [vmem:[%s15551_s13 + $0xc8] sm:$0xff]  ;;  %p8562_p0 = scmp.lt.s32.totalorder (%p4378_p8), %s8560_s11, %s8556_s7 }
 0x97f   : >> { %v5242_v58 = vld [vmem:[%s15551_s13 + $0xe0] sm:$0xff]  ;;  %5249 = vmatpush.msra.mxu2 %v5226_v57  ;;  %v5235_v21 = vld [vmem:[%s15551_s13 + $0xa8] sm:$0xff] }
 0x980   : >> { %4436 = vmatpush.msra.mxu0 %v4407_v33  ;;  %4477 = vmatpush.msra.mxu1 %v4408_v20  ;;  %v5222_v0 = vld [vmem:[%s15551_s13 + $0x40] sm:$0xff]  ;;  %p8563_p3 = por (%p4378_p8), %p8562_p0, %p8561_p13 }
 0x981   : >> { %5290 = vmatpush.msra.mxu3 %v5242_v58  ;;  %5250 = vmatpush.msra.mxu2 %v5225_v7  ;;  %v5238_v27 = vld [vmem:[%s15551_s13 + $0xc0] sm:$0xff] }
 0x982   : >> { %4437 = vmatpush.msra.mxu0 %v4405_v62  ;;  %4478 = vmatpush.msra.mxu1 %v4406_v12  ;;  %v5218_v3 = vld [vmem:[%s15551_s13 + $0x20] sm:$0xff]  ;;  %p8564_p7 = pnand (%p4378_p8), %p8563_p3, %p8559_p12 }
 0x983   : >> { %5291 = vmatpush.msra.mxu3 %v5241_v8  ;;  %5251 = vmatpush.msra.mxu2 %v5224_v35  ;;  %v5234_v57 = vld [vmem:[%s15551_s13 + $0xa0] sm:$0xff] }
 0x984   : >> { %4438 = vmatpush.msra.mxu0 %v4403_v63  ;;  %4479 = vmatpush.msra.mxu1 %v4404_v13 }
 0x985   : >> { %5292 = vmatpush.msra.mxu3 %v5240_v15  ;;  %5252 = vmatpush.msra.mxu2 %v5223_v42 }
 0x986   : >> { %4439 = vmatpush.msra.mxu0 %v4401_v56  ;;  %4480 = vmatpush.msra.mxu1 %v4402_v52  ;;  %v5221_v56 = vld [vmem:[%s15551_s13 + $0x38] sm:$0xff] }
 0x987   : >> { %5293 = vmatpush.msra.mxu3 %v5239_v30  ;;  %5253 = vmatpush.msra.mxu2 %v5222_v0  ;;  %v5237_v52 = vld [vmem:[%s15551_s13 + $0xb8] sm:$0xff] }
 0x988   : >> { %4440 = vmatpush.msra.mxu0 %v4399_v46  ;;  %4481 = vmatpush.msra.mxu1 %v4400_v10  ;;  %v5220_v10 = vld [vmem:[%s15551_s13 + $0x30] sm:$0xff]  ;;  %v5217_v0 = vld [vmem:[%s15551_s13 + $0x18] sm:$0xff] }
 0x989   : >> { %5294 = vmatpush.msra.mxu3 %v5238_v27  ;;  %5254 = vmatpush.msra.mxu2 %v5221_v56  ;;  %v5233_v27 = vld [vmem:[%s15551_s13 + $0x98] sm:$0xff] }
 0x98a   : >> { %4441 = vmatpush.msra.mxu0 %v4397_v61  ;;  %4482 = vmatpush.msra.mxu1 %v4398_v54  ;;  %v5236_v61 = vld [vmem:[%s15551_s13 + $0xb0] sm:$0xff] }
 0x98b   : >> { %5295 = vmatpush.msra.mxu3 %v5237_v52  ;;  %5255 = vmatpush.msra.mxu2 %v5220_v10 }
 0x98c   : >> { %4442 = vmatpush.msra.mxu0 %v4395_v50  ;;  %4483 = vmatpush.msra.mxu1 %v4396_v11  ;;  %v5219_v11 = vld [vmem:[%s15551_s13 + $0x28] sm:$0xff] }
 0x98d   : >> { %4443 = vmatmul.f32.vlgmr.msra.gmra.mxu0 %v17891_v24  ;;  %4484 = vmatmul.f32.vlgmr.msra.gmra.mxu1 %v17891_v24 }
 0x98e   : >> { %5296 = vmatpush.msra.mxu3 %v5236_v61  ;;  %5256 = vmatpush.msra.mxu2 %v5219_v11 }
 0x990   : >> { %5297 = vmatpush.msra.mxu3 %v5235_v21  ;;  %5257 = vmatpush.msra.mxu2 %v5218_v3  ;;  %v5231_v3 = vld [vmem:[%s15551_s13 + $0x88] sm:$0xff] }
 0x992   : >> { %5298 = vmatpush.msra.mxu3 %v5234_v57  ;;  %5258 = vmatpush.msra.mxu2 %v5217_v0 }
 0x994   : >> { %5299 = vmatpush.msra.mxu3 %v5233_v27  ;;  %v5214_v27 = vld [vmem:[%s15551_s13] sm:$0xff] }
 0x995   : >> { %4446 = vmatmul.f32.gmra.mxu0 %v17889_v29  ;;  %4487 = vmatmul.f32.gmra.mxu1 %v17889_v29 }
 0x99d   : >> { %4449 = vmatmul.f32.gmra.mxu0 %v17888_v37  ;;  %4490 = vmatmul.f32.gmra.mxu1 %v17888_v37 }
 0x9a5   : >> { %4452 = vmatmul.f32.gmra.mxu0 %v17893_v14  ;;  %4493 = vmatmul.f32.gmra.mxu1 %v17893_v14 }
 0x9ad   : >> { %4455 = vmatmul.f32.gmra.mxu0 %v17894_v4  ;;  %4496 = vmatmul.f32.gmra.mxu1 %v17894_v4 }
 0x9b5   : >> { %4458 = vmatmul.f32.gmra.mxu0 %v17892_v17  ;;  %4499 = vmatmul.f32.gmra.mxu1 %v17892_v17 }
 0x9bd   : >> { %4461 = vmatmul.f32.gmra.mxu0 %v17887_v53  ;;  %4502 = vmatmul.f32.gmra.mxu1 %v17887_v53 }
 0x9c5   : >> { %4464 = vmatmul.f32.gmra.mxu0 %v17890_v28  ;;  %4505 = vmatmul.f32.gmra.mxu1 %v17890_v28 }
 0xa0a   : >> { %v15561_v59 = vpop.f32.mrf.mxu0  ;;  %v15563_v60 = vpop.f32.mrf.mxu1 }
 0xa0b   : >> { %v15568_v26 = vmul.f32 0.70710677, %v15561_v59  ;;  %v15571_v19 = vmul.f32 0.70710677, %v15563_v60  ;;  %v15697_v17 = vmul.f32 0.5, %v15563_v60 }
 0xa0d   : >> { %v4541_v34 = vmul.f32 %v15568_v26, %v15568_v26  ;;  %v4581_v55 = vmul.f32 %v15571_v19, %v15571_v19 }
 0xa0f   : >> { %v15579_v31 = vmin.f32 %v4541_v34, 16.0  ;;  %v15581_v44 = vmin.f32 %v4581_v55, 16.0 }
 0xa11   : >> { %v4543_v23 = vmul.f32 2.1237322e-06, %v15579_v31  ;;  %v4583_v25 = vmul.f32 2.1237322e-06, %v15581_v44  ;;  %v4554_v62 = vmul.f32 3.8918573e-05, %v15579_v31 }
 0xa12   : >> { %v15589_v33 = vpop.f32.mrf.mxu0  ;;  %v15591_v20 = vpop.f32.mrf.mxu1  ;;  %v4594_v15 = vmul.f32 3.8918573e-05, %v15581_v44 }
 0xa13   : >> { %v4544_v12 = vadd.f32 0.00028619796, %v4543_v23  ;;  %v4584_v63 = vadd.f32 0.00028619796, %v4583_v25  ;;  %v15595_v13 = vmul.f32 0.70710677, %v15589_v33 }
 0xa14   : >> { %v15600_v46 = vmul.f32 0.70710677, %v15591_v20  ;;  %v4555_v54 = vadd.f32 0.001143296, %v4554_v62  ;;  %v5216_v62 = vld [vmem:[%s15551_s13 + $0x10] sm:$0xff]  ;;  %v15707_v53 = vmul.f32 0.5, %v15591_v20 }
 0xa15   : >> { %v4545_v50 = vmul.f32 %v4544_v12, %v15579_v31  ;;  %v4585_v22 = vmul.f32 %v4584_v63, %v15581_v44  ;;  %v4621_v49 = vmul.f32 %v15595_v13, %v15595_v13  ;;  %v5232_v63 = vld [vmem:[%s15551_s13 + $0x90] sm:$0xff]  ;;  %5259 = vmatpush.msra.mxu2 %v5216_v62  ;;  %v5230_v62 = vld [vmem:[%s15551_s13 + $0x80] sm:$0xff] }
 0xa16   : >> { %v4556_v40 = vmul.f32 %v4555_v54, %v15579_v31  ;;  %v4661_v43 = vmul.f32 %v15600_v46, %v15600_v46  ;;  %5300 = vmatpush.msra.mxu3 %v5232_v63  ;;  %v4595_v54 = vadd.f32 0.001143296, %v4594_v15 }
 0xa17   : >> { %v4546_v35 = vadd.f32 0.0036580483, %v4545_v50  ;;  %v4586_v34 = vadd.f32 0.0036580483, %v4585_v22  ;;  %v15620_v55 = vmin.f32 %v4621_v49, 16.0 }
 0xa18   : >> { %v4557_v58 = vadd.f32 0.014752088, %v4556_v40  ;;  %v15626_v23 = vmin.f32 %v4661_v43, 16.0  ;;  %v5215_v43 = vld [vmem:[%s15551_s13 + $0x8] sm:$0xff]  ;;  %5301 = vmatpush.msra.mxu3 %v5231_v3 }
 0xa19   : >> { %v4547_v10 = vmul.f32 %v4546_v35, %v15579_v31  ;;  %v4587_v50 = vmul.f32 %v4586_v34, %v15581_v44  ;;  %v4623_v11 = vmul.f32 2.1237322e-06, %v15620_v55  ;;  %5260 = vmatpush.msra.mxu2 %v5215_v43  ;;  %v4596_v34 = vmul.f32 %v4595_v54, %v15581_v44 }
 0xa1a   : >> { %v15615_v7 = vpop.f32.mrf.mxu0  ;;  %v15617_v8 = vpop.f32.mrf.mxu1  ;;  %v4558_v30 = vmul.f32 %v4557_v58, %v15579_v31  ;;  %v4663_v21 = vmul.f32 2.1237322e-06, %v15626_v23  ;;  %5302 = vmatpush.msra.mxu3 %v5230_v62 }
 0xa1b   : >> { %v15623_v42 = vmul.f32 0.70710677, %v15615_v7  ;;  %v15629_v25 = vmul.f32 0.70710677, %v15617_v8  ;;  %v4548_v35 = vadd.f32 0.05243302, %v4547_v10  ;;  %5261 = vmatpush.msra.mxu2 %v5214_v27 }
 0xa1c   : >> { %v4559_v56 = vadd.f32 0.112945676, %v4558_v30  ;;  %v4588_v30 = vadd.f32 0.05243302, %v4587_v50  ;;  %v4624_v0 = vadd.f32 0.00028619796, %v4623_v11 }
 0xa1d   : >> { %v4701_v12 = vmul.f32 %v15623_v42, %v15623_v42  ;;  %v4741_v52 = vmul.f32 %v15629_v25, %v15629_v25  ;;  %v4549_v54 = vmul.f32 %v4548_v35, %v15579_v31  ;;  %v4597_v11 = vadd.f32 0.014752088, %v4596_v34 }
 0xa1e   : >> { %v4560_v61 = vmul.f32 %v4559_v56, %v15579_v31  ;;  %v4589_v3 = vmul.f32 %v4588_v30, %v15581_v44  ;;  %v15721_v20 = vmul.f32 0.5, %v15615_v7 }
 0xa1f   : >> { %v15644_v40 = vmin.f32 %v4701_v12, 16.0  ;;  %v15652_v58 = vmin.f32 %v4741_v52, 16.0  ;;  %v4664_v12 = vadd.f32 0.00028619796, %v4663_v21  ;;  %v4625_v21 = vmul.f32 %v4624_v0, %v15620_v55 }
 0xa20   : >> { %v4561_v57 = vadd.f32 0.4994258, %v4560_v61  ;;  %v15689_v0 = vmul.f32 0.5, %v15561_v59  ;;  %v4550_v30 = vadd.f32 0.18741608, %v4549_v54 }
 0xa21   : >> { %v4703_v63 = vmul.f32 2.1237322e-06, %v15644_v40  ;;  %v4743_v52 = vmul.f32 2.1237322e-06, %v15652_v58  ;;  %v4590_v24 = vadd.f32 0.18741608, %v4589_v3 }
 0xa22   : >> { %v15646_v22 = vpop.f32.mrf.mxu0  ;;  %v15648_v49 = vpop.f32.mrf.mxu1  ;;  %v4562_v15 = vmul.f32 %v4561_v57, %v15579_v31  ;;  %v4665_v57 = vmul.f32 %v4664_v12, %v15626_v23  ;;  %v4598_v12 = vmul.f32 %v4597_v11, %v15581_v44 }
 0xa23   : >> { %v15660_v56 = vmul.f32 0.70710677, %v15646_v22  ;;  %v15664_v10 = vmul.f32 0.70710677, %v15648_v49  ;;  %v4704_v27 = vadd.f32 0.00028619796, %v4703_v63 }
 0xa24   : >> { %v15666_v61 = vadd.f32 1.0, %v4562_v15  ;;  %v4744_v4 = vadd.f32 0.00028619796, %v4743_v52  ;;  %v4626_v63 = vadd.f32 0.0036580483, %v4625_v21  ;;  %v15704_v21 = vmul.f32 0.5, %v15589_v33 }
 0xa25   : >> { %v4781_v50 = vmul.f32 %v15660_v56, %v15660_v56  ;;  %v4821_v43 = vmul.f32 %v15664_v10, %v15664_v10  ;;  %v4666_v28 = vadd.f32 0.0036580483, %v4665_v57  ;;  %v4705_v29 = vmul.f32 %v4704_v27, %v15644_v40 }
 0xa26   : >> { %8358 = vrcp.f32 %v15666_v61  ;;  %v4745_v59 = vmul.f32 %v4744_v4, %v15652_v58  ;;  %v4599_v60 = vadd.f32 0.112945676, %v4598_v12  ;;  %v4551_v57 = vmul.f32 %v4550_v30, %v15579_v31 }
 0xa27   : >> { %v15676_v62 = vmin.f32 %v4781_v50, 16.0  ;;  %v15680_v35 = vmin.f32 %v4821_v43, 16.0  ;;  %v4627_v4 = vmul.f32 %v4626_v63, %v15620_v55  ;;  %v4591_v33 = vmul.f32 %v4590_v24, %v15581_v44 }
 0xa28   : >> { %v4706_v32 = vadd.f32 0.0036580483, %v4705_v29  ;;  %v4746_v31 = vadd.f32 0.0036580483, %v4745_v59  ;;  %v4552_v7 = vadd.f32 1.1283791, %v4551_v57  ;;  %v15741_v29 = vmul.f32 %v4599_v60, %v15581_v44 }
 0xa29   : >> { %v4783_v50 = vmul.f32 2.1237322e-06, %v15676_v62  ;;  %v4823_v52 = vmul.f32 2.1237322e-06, %v15680_v35  ;;  %v4628_v5 = vadd.f32 0.05243302, %v4627_v4  ;;  %vm4569_vm0 = vweird.f32 %v15666_v61 }
 0xa2a   : >> { %v15678_v15 = vpop.f32.mrf.mxu0  ;;  %v15685_v34 = vpop.f32.mrf.mxu1  ;;  %v4707_v2 = vmul.f32 %v4706_v32, %v15644_v40  ;;  %v4747_v57 = vmul.f32 %v4746_v31, %v15652_v58  ;;  %v15759_v48 = vmul.f32 0.5, %v15646_v22 }
 0xa2b   : >> { %v15683_v14 = vmul.f32 0.70710677, %v15678_v15  ;;  %v4784_v54 = vadd.f32 0.00028619796, %v4783_v50  ;;  %v4824_v37 = vadd.f32 0.00028619796, %v4823_v52  ;;  %v4667_v52 = vmul.f32 %v4666_v28, %v15626_v23 }
 0xa2c   : >> { %v15710_v38 = vmul.f32 0.70710677, %v15685_v34  ;;  %v15712_v3 = vpop.eup %8358  ;;  %v4629_v36 = vmul.f32 %v4628_v5, %v15620_v55  ;;  %v15770_v5 = vmul.f32 0.5, %v15648_v49 }
 0xa2d   : >> { %v4861_v43 = vmul.f32 %v15683_v14, %v15683_v14  ;;  %v4785_v27 = vmul.f32 %v4784_v54, %v15676_v62  ;;  %v4825_v30 = vmul.f32 %v4824_v37, %v15680_v35  ;;  %v15729_v54 = vmul.f32 0.5, %v15617_v8 }
 0xa2e   : >> { %v4901_v12 = vmul.f32 %v15710_v38, %v15710_v38  ;;  %v4565_v28 = vmul.f32 %v15712_v3, %v15666_v61  ;;  %v4592_v37 = vadd.f32 1.1283791, %v4591_v33  ;;  %17905 = vst [vmem:[#allocation277_spill] sm:$0xff] %v15770_v5  ;;  %v4630_v9 = vadd.f32 0.18741608, %v4629_v36 }
 0xa2f   : >> { %v15701_v11 = vmin.f32 %v4861_v43, 16.0  ;;  %v4786_v45 = vadd.f32 0.0036580483, %v4785_v27  ;;  %v4826_v4 = vadd.f32 0.0036580483, %v4825_v30  ;;  %vm4570_vm15 = vweird.f32 %v15712_v3 }
 0xa30   : >> { %v15731_v51 = vmin.f32 %v4901_v12, 16.0  ;;  %v4668_v12 = vadd.f32 0.05243302, %v4667_v52  ;;  %v4566_v33 = vsub.f32 1.0, %v4565_v28  ;;  %v4708_v28 = vadd.f32 0.05243302, %v4707_v2  ;;  %vm15803_vm1 = vmor %vm4569_vm0, %vm4570_vm15 }
 0xa31   : >> { %v4863_v50 = vmul.f32 2.1237322e-06, %v15701_v11  ;;  %v4787_v32 = vmul.f32 %v4786_v45, %v15676_v62  ;;  %v4827_v22 = vmul.f32 %v4826_v4, %v15680_v35  ;;  %v15777_v6 = vmul.f32 %v4592_v37, %v15571_v19 }
 0xa32   : >> { %v15725_v43 = vpop.f32.mrf.mxu0  ;;  %v15738_v1 = vpop.f32.mrf.mxu1  ;;  %v4903_v59 = vmul.f32 2.1237322e-06, %v15731_v51 }
 0xa33   : >> { %v4864_v63 = vadd.f32 0.00028619796, %v4863_v50  ;;  %v15734_v24 = vmul.f32 0.70710677, %v15725_v43  ;;  %17903 = vst [vmem:[#allocation275_spill] sm:$0xff] %v15738_v1 }
 0xa34   : >> { %v4904_v27 = vadd.f32 0.00028619796, %v4903_v59  ;;  %v15752_v60 = vmul.f32 0.70710677, %v15738_v1  ;;  %v4788_v16 = vadd.f32 0.05243302, %v4787_v32 }
 0xa35   : >> { %v4865_v8 = vmul.f32 %v4864_v63, %v15701_v11  ;;  %v4941_v50 = vmul.f32 %v15734_v24, %v15734_v24  ;;  %v15755_v63 = vmul.f32 %v4552_v7, %v15568_v26  ;;  %v4669_v26 = vmul.f32 %v4668_v12, %v15626_v23 }
 0xa36   : >> { %v4905_v31 = vmul.f32 %v4904_v27, %v15731_v51  ;;  %v4981_v59 = vmul.f32 %v15752_v60, %v15752_v60  ;;  %v4748_v7 = vadd.f32 0.05243302, %v4747_v57  ;;  %v4567_v27 = vmul.f32 %v15712_v3, %v4566_v33 }
 0xa37   : >> { %v15749_v39 = vmin.f32 %v4941_v50, 16.0  ;;  %v4866_v52 = vadd.f32 0.0036580483, %v4865_v8  ;;  %v4670_v4 = vadd.f32 0.18741608, %v4669_v26  ;;  %v4631_v26 = vmul.f32 %v4630_v9, %v15620_v55 }
 0xa38   : >> { %v15773_v8 = vmin.f32 %v4981_v59, 16.0  ;;  %v4906_v12 = vadd.f32 0.0036580483, %v4905_v31  ;;  %v4749_v33 = vmul.f32 %v4748_v7, %v15652_v58  ;;  %v4828_v36 = vadd.f32 0.05243302, %v4827_v22 }
 0xa39   : >> { %v4943_v30 = vmul.f32 2.1237322e-06, %v15749_v39  ;;  %v4867_v2 = vmul.f32 %v4866_v52, %v15701_v11  ;;  %v4568_v32 = vadd.f32 %v15712_v3, %v4567_v27  ;;  %v4789_v52 = vmul.f32 %v4788_v16, %v15676_v62 }
 0xa3a   : >> { %v15766_v50 = vpop.f32.mrf.mxu0  ;;  %v4983_v57 = vmul.f32 2.1237322e-06, %v15773_v8  ;;  %v4573_v59 = vand.u32 2147483647, %v15666_v61  ;;  %v4907_v7 = vmul.f32 %v4906_v12, %v15731_v51  ;;  %v4671_v22 = vmul.f32 %v4670_v4, %v15626_v23  ;;  %v15801_v47 = vpop.f32.mrf.mxu1 }
 0xa3b   : >> { %17904 = vst [vmem:[#allocation276_spill] sm:$0xff] %v15766_v50  ;;  %v4944_v45 = vadd.f32 0.00028619796, %v4943_v30  ;;  %v15780_v18 = vmul.f32 0.70710677, %v15766_v50  ;;  %v4709_v30 = vmul.f32 %v4708_v28, %v15644_v40  ;;  %v4572_v12 = vsel %vm15803_vm1, %v15712_v3, %v4568_v32 }
 0xa3c   : >> { %v4984_v37 = vadd.f32 0.00028619796, %v4983_v57  ;;  %v4868_v28 = vadd.f32 0.05243302, %v4867_v2  ;;  %v4750_v9 = vadd.f32 0.18741608, %v4749_v33  ;;  %v4829_v2 = vmul.f32 %v4828_v36, %v15680_v35 }
 0xa3d   : >> { %17906 = vst [vmem:[#allocation278_spill] sm:$0xff] %v15780_v18  ;;  %v4945_v49 = vmul.f32 %v4944_v45, %v15749_v39  ;;  %v5021_v19 = vmul.f32 %v15780_v18, %v15780_v18  ;;  %v4710_v41 = vadd.f32 0.18741608, %v4709_v30  ;;  %vm4574_vm2 = vcmp.eq.f32.partialorder %v4573_v59, 8.507059e+37 }
 0xa3e   : >> { %v4985_v27 = vmul.f32 %v4984_v37, %v15773_v8  ;;  %v4601_v37 = vadd.f32 0.4994258, %v15741_v29  ;;  %v4869_v50 = vmul.f32 %v4868_v28, %v15701_v11  ;;  %v4908_v18 = vadd.f32 0.05243302, %v4907_v7 }
 0xa3f   : >> { %v15792_v31 = vmin.f32 %v5021_v19, 16.0  ;;  %v4946_v45 = vadd.f32 0.0036580483, %v4945_v49  ;;  %v4575_v19 = vand.u32 2147483648, %v15666_v61  ;;  %v4790_v49 = vadd.f32 0.18741608, %v4789_v52 }
 0xa40   : >> { %v15816_v61 = vmul.f32 0.70710677, %v15801_v47  ;;  %v4986_v30 = vadd.f32 0.0036580483, %v4985_v27  ;;  %v4602_v5 = vmul.f32 %v4601_v37, %v15581_v44  ;;  %v4632_v16 = vadd.f32 1.1283791, %v4631_v26 }
 0xa41   : >> { %v5023_v57 = vmul.f32 2.1237322e-06, %v15792_v31  ;;  %v4576_v4 = vor.u32 1.1754944e-38, %v4575_v19  ;;  %v4947_v1 = vmul.f32 %v4946_v45, %v15749_v39  ;;  %v4711_v3 = vmul.f32 %v4710_v41, %v15644_v40 }
 0xa42   : >> { %v4751_v32 = vmul.f32 %v4750_v9, %v15652_v58  ;;  %v4672_v52 = vadd.f32 1.1283791, %v4671_v22  ;;  %v4791_v59 = vmul.f32 %v4790_v49, %v15676_v62  ;;  %v4830_v28 = vadd.f32 0.18741608, %v4829_v2 }
 0xa43   : >> { %v5024_v33 = vadd.f32 0.00028619796, %v5023_v57  ;;  %v4577_v36 = vsel %vm4574_vm2, %v4576_v4, %v4572_v12  ;;  %v15823_v7 = vadd.f32 1.0, %v4602_v5  ;;  %v4870_v45 = vadd.f32 0.18741608, %v4869_v50 }
 0xa44   : >> { %v4578_v29 = vmul.f32 %v4577_v36, %v15755_v63  ;;  %v4909_v27 = vmul.f32 %v4908_v18, %v15731_v51  ;;  %v4948_v57 = vadd.f32 0.05243302, %v4947_v1  ;;  %v4987_v44 = vmul.f32 %v4986_v30, %v15773_v8  ;;  %v15844_v30 = vpop.f32.mrf.mxu0 }
 0xa45   : >> { %v5025_v26 = vmul.f32 %v5024_v33, %v15792_v31  ;;  %v5061_v41 = vmul.f32 %v15816_v61, %v15816_v61  ;;  %8360 = vrcp.f32 %v15823_v7  ;;  %v4712_v63 = vadd.f32 1.1283791, %v4711_v3  ;;  %17909 = vst [vmem:[#allocation279_spill] sm:$0xff] %v15844_v30 }
 0xa46   : >> { %v6120_v19 = vclamps-f32 %v4578_v29, 1.0  ;;  %v4752_v22 = vadd.f32 1.1283791, %v4751_v32  ;;  %v15832_v9 = vmul.f32 0.5, %v15678_v15  ;;  %v15835_v50 = vmul.f32 %v4632_v16, %v15595_v13 }
 0xa47   : >> { %v15838_v1 = vmul.f32 %v4672_v52, %v15600_v46  ;;  %v4792_v18 = vadd.f32 1.1283791, %v4791_v59  ;;  %v4831_v2 = vmul.f32 %v4830_v28, %v15680_v35  ;;  %v4871_v12 = vmul.f32 %v4870_v45, %v15701_v11  ;;  %v15876_v45 = vpop.f32.mrf.mxu1 }
 0xa48   : >> { %v5181_v5 = vadd.f32 1.0, %v6120_v19  ;;  %v4910_v49 = vadd.f32 0.18741608, %v4909_v27  ;;  %v4949_v4 = vmul.f32 %v4948_v57, %v15749_v39  ;;  %v15847_v15 = vmul.f32 0.5, %v15685_v34  ;;  %17910 = vst [vmem:[#allocation280_spill] sm:$0xff] %v15876_v45 }
 0xa49   : >> { %v4988_v13 = vadd.f32 0.05243302, %v4987_v44  ;;  %v5026_v33 = vadd.f32 0.0036580483, %v5025_v26  ;;  %v15849_v36 = vmin.f32 %v5061_v41, 16.0  ;;  %v15852_v46 = vmul.f32 %v4712_v63, %v15623_v42 }
 0xa4a   : >> { %v5197_v37 = vmul.f32 %v5181_v5, %v15689_v0  ;;  %v15855_v16 = vmul.f32 %v4752_v22, %v15629_v25  ;;  %v15858_v3 = vmul.f32 0.5, %v15725_v43  ;;  %v4634_v0 = vmul.f32 3.8918573e-05, %v15620_v55 }
 0xa4b   : >> { %v8361_v32 = vpop.eup %8360  ;;  %v15862_v34 = vmul.f32 %v4792_v18, %v15660_v56  ;;  %v15864_v29 = vadd.f32 1.1283791, %v4831_v2  ;;  %v15867_v52 = vmul.f32 0.70710677, %v15844_v30  ;;  %v4674_v42 = vmul.f32 3.8918573e-05, %v15626_v23 }
 0xa4c   : >> { %5262 = vmatmul.f32.vlgmr.msra.gmra.mxu2 %v5197_v37  ;;  %v15870_v59 = vadd.f32 1.1283791, %v4871_v12  ;;  %v15873_v25 = vmul.f32 %v4910_v49, %v15731_v51  ;;  %v4950_v43 = vadd.f32 0.18741608, %v4949_v4  ;;  %v4605_v28 = vmul.f32 %v8361_v32, %v15823_v7 }
 0xa4d   : >> { %v4989_v56 = vmul.f32 %v4988_v13, %v15773_v8  ;;  %v5027_v27 = vmul.f32 %v5026_v33, %v15792_v31  ;;  %v5063_v57 = vmul.f32 2.1237322e-06, %v15849_v36  ;;  %v4635_v19 = vadd.f32 0.001143296, %v4634_v0 }
 0xa4e   : >> { %v4606_v44 = vsub.f32 1.0, %v4605_v28  ;;  %v4615_v26 = vand.u32 2147483648, %v15823_v7  ;;  %v4675_v41 = vadd.f32 0.001143296, %v4674_v42  ;;  %v4714_v63 = vmul.f32 3.8918573e-05, %v15644_v40 }
 0xa4f   : >> { %v4613_v22 = vand.u32 2147483647, %v15823_v7  ;;  %v5101_v5 = vmul.f32 %v15867_v52, %v15867_v52  ;;  %v15887_v18 = vmul.f32 0.70710677, %v15876_v45  ;;  %v4636_v2 = vmul.f32 %v4635_v19, %v15620_v55 }
 0xa50   : >> { %v4607_v12 = vmul.f32 %v8361_v32, %v4606_v44  ;;  %vm4610_vm3 = vweird.f32 %v8361_v32  ;;  %v4676_v49 = vmul.f32 %v4675_v41, %v15626_v23  ;;  %v4715_v4 = vadd.f32 0.001143296, %v4714_v63 }
 0xa51   : >> { %17911 = vst [vmem:[#allocation281_spill] sm:$0xff] %v15887_v18  ;;  %v4990_v37 = vadd.f32 0.18741608, %v4989_v56  ;;  %v5064_v13 = vadd.f32 0.00028619796, %v5063_v57  ;;  %vm4609_vm8 = vweird.f32 %v15823_v7  ;;  %v4616_v42 = vor.u32 1.1754944e-38, %v4615_v26 }
 0xa52   : >> { %v4637_v33 = vadd.f32 0.014752088, %v4636_v2  ;;  %v4608_v0 = vadd.f32 %v8361_v32, %v4607_v12  ;;  %v4677_v28 = vadd.f32 0.014752088, %v4676_v49  ;;  %v4716_v30 = vmul.f32 %v4715_v4, %v15644_v40  ;;  %vm4611_vm14 = vmor %vm4609_vm8, %vm4610_vm3 }
 0xa53   : >> { %vm4614_vm6 = vcmp.eq.f32.partialorder %v4613_v22, 8.507059e+37  ;;  %v15893_v45 = vmin.f32 %v5101_v5, 16.0  ;;  %v4754_v44 = vmul.f32 3.8918573e-05, %v15652_v58  ;;  %v5141_v56 = vmul.f32 %v15887_v18, %v15887_v18 }
 0xa54   : >> { %v4638_v19 = vmul.f32 %v4637_v33, %v15620_v55  ;;  %v4612_v41 = vsel %vm4611_vm14, %v8361_v32, %v4608_v0  ;;  %v4678_v7 = vmul.f32 %v4677_v28, %v15626_v23  ;;  %v4717_v57 = vadd.f32 0.014752088, %v4716_v30 }
 0xa55   : >> { %v4951_v26 = vmul.f32 %v4950_v43, %v15749_v39  ;;  %v5065_v63 = vmul.f32 %v5064_v13, %v15849_v36  ;;  %v4617_v2 = vsel %vm4614_vm6, %v4616_v42, %v4612_v41  ;;  %v5028_v22 = vadd.f32 0.05243302, %v5027_v27 }
 0xa56   : >> { %v4639_v12 = vadd.f32 0.112945676, %v4638_v19  ;;  %v4618_v5 = vmul.f32 %v4617_v2, %v15777_v6  ;;  %v4679_v49 = vadd.f32 0.112945676, %v4678_v7  ;;  %v4718_v4 = vmul.f32 %v4717_v57, %v15644_v40 }
 0xa57   : >> { %v4991_v32 = vmul.f32 %v4990_v37, %v15773_v8  ;;  %v5103_v33 = vmul.f32 2.1237322e-06, %v15893_v45  ;;  %v4755_v28 = vadd.f32 0.001143296, %v4754_v44  ;;  %v15907_v18 = vmin.f32 %v5141_v56, 16.0 }
 0xa58   : >> { %v4640_v0 = vmul.f32 %v4639_v12, %v15620_v55  ;;  %v6121_v30 = vclamps-f32 %v4618_v5, 1.0  ;;  %v4680_v43 = vmul.f32 %v4679_v49, %v15626_v23  ;;  %v4719_v13 = vadd.f32 0.112945676, %v4718_v4 }
 0xa59   : >> { %v5066_v42 = vadd.f32 0.0036580483, %v5065_v63  ;;  %v4756_v6 = vmul.f32 %v4755_v28, %v15652_v58  ;;  %v4794_v19 = vmul.f32 3.8918573e-05, %v15676_v62  ;;  %v5029_v41 = vmul.f32 %v5028_v22, %v15792_v31 }
 0xa5a   : >> { %v4641_v27 = vadd.f32 0.4994258, %v4640_v0  ;;  %v5182_v37 = vadd.f32 1.0, %v6121_v30  ;;  %v4681_v7 = vadd.f32 0.4994258, %v4680_v43  ;;  %v4720_v57 = vmul.f32 %v4719_v13, %v15644_v40 }
 0xa5b   : >> { %v5104_v2 = vadd.f32 0.00028619796, %v5103_v33  ;;  %v4757_v56 = vadd.f32 0.014752088, %v4756_v6  ;;  %v4795_v12 = vadd.f32 0.001143296, %v4794_v19  ;;  %v5067_v22 = vmul.f32 %v5066_v42, %v15849_v36 }
 0xa5c   : >> { %v4642_v44 = vmul.f32 %v4641_v27, %v15620_v55  ;;  %v5198_v5 = vmul.f32 %v5182_v37, %v15697_v17  ;;  %v5143_v63 = vmul.f32 2.1237322e-06, %v15907_v18  ;;  %v4682_v49 = vmul.f32 %v4681_v7, %v15626_v23 }
 0xa5d   : >> { %v4721_v4 = vadd.f32 0.4994258, %v4720_v57  ;;  %v4912_v0 = vadd.f32 1.1283791, %v15873_v25  ;;  %v4952_v28 = vadd.f32 1.1283791, %v4951_v26  ;;  %v4758_v17 = vmul.f32 %v4757_v56, %v15652_v58 }
 0xa5e   : >> { %v15920_v30 = vadd.f32 1.0, %v4642_v44  ;;  %v4992_v43 = vadd.f32 1.1283791, %v4991_v32  ;;  %5303 = vmatmul.f32.vlgmr.msra.gmra.mxu3 %v5198_v5  ;;  %v15922_v33 = vadd.f32 1.0, %v4682_v49  ;;  %v5030_v13 = vadd.f32 0.18741608, %v5029_v41 }
 0xa5f   : >> { %v4722_v55 = vmul.f32 %v4721_v4, %v15644_v40  ;;  %v4796_v23 = vmul.f32 %v4795_v12, %v15676_v62  ;;  %v4834_v25 = vmul.f32 3.8918573e-05, %v15680_v35  ;;  %v15931_v26 = vmul.f32 %v15864_v29, %v15664_v10 }
 0xa60   : >> { %8362 = vrcp.f32 %v15920_v30  ;;  %v5105_v32 = vmul.f32 %v5104_v2, %v15893_v45  ;;  %v5144_v42 = vadd.f32 0.00028619796, %v5143_v63  ;;  %v15937_v40 = vmul.f32 %v15870_v59, %v15683_v14 }
 0xa61   : >> { %8364 = vrcp.f32 %v15922_v33  ;;  %v15940_v27 = vmul.f32 %v4912_v0, %v15710_v38  ;;  %v15943_v6 = vmul.f32 %v4952_v28, %v15734_v24  ;;  %v15945_v19 = vadd.f32 0.05243302, %v5067_v22 }
 0xa62   : >> { %v15948_v10 = vmul.f32 %v4992_v43, %v15752_v60  ;;  %v4653_v29 = vand.u32 2147483647, %v15920_v30  ;;  %v15951_v41 = vadd.f32 1.0, %v4722_v55  ;;  %v4759_v37 = vadd.f32 0.112945676, %v4758_v17 }
 0xa63   : >> { %v15954_v7 = vmul.f32 %v5030_v13, %v15792_v31  ;;  %v4655_v14 = vand.u32 2147483648, %v15920_v30  ;;  %v4797_v38 = vadd.f32 0.014752088, %v4796_v23  ;;  %v4835_v59 = vadd.f32 0.001143296, %v4834_v25 }
 0xa64   : >> { %v15957_v57 = vadd.f32 0.0036580483, %v5105_v32  ;;  %v15960_v24 = vmul.f32 %v5144_v42, %v15907_v18  ;;  %v4693_v60 = vand.u32 2147483647, %v15922_v33  ;;  %8366 = vrcp.f32 %v15951_v41 }
 0xa65   : >> { %v4695_v44 = vand.u32 2147483648, %v15922_v33  ;;  %v4760_v56 = vmul.f32 %v4759_v37, %v15652_v58  ;;  %v4798_v12 = vmul.f32 %v4797_v38, %v15676_v62  ;;  %v4836_v5 = vmul.f32 %v4835_v59, %v15680_v35 }
 0xa66   : >> { %v8363_v2 = vpop.eup %8362  ;;  %vm4649_vm9 = vweird.f32 %v15920_v30  ;;  %vm4689_vm12 = vweird.f32 %v15922_v33  ;;  %v4874_v4 = vmul.f32 3.8918573e-05, %v15701_v11  ;;  %vm15972_vm5 = vcmp.eq.f32.partialorder %v4653_v29, 8.507059e+37 }
 0xa67   : >> { %v8365_v63 = vpop.eup %8364  ;;  %v4645_v49 = vmul.f32 %v8363_v2, %v15920_v30  ;;  %v4656_v28 = vor.u32 1.1754944e-38, %v4655_v14  ;;  %v4761_v43 = vadd.f32 0.4994258, %v4760_v56  ;;  %vm15977_vm4 = vcmp.eq.f32.partialorder %v4693_v60, 8.507059e+37 }
 0xa68   : >> { %v4685_v22 = vmul.f32 %v8365_v63, %v15922_v33  ;;  %v4799_v13 = vadd.f32 0.112945676, %v4798_v12  ;;  %v4837_v23 = vadd.f32 0.014752088, %v4836_v5  ;;  %vm4650_vm7 = vweird.f32 %v8363_v2 }
 0xa69   : >> { %v4646_v55 = vsub.f32 1.0, %v4645_v49  ;;  %v4696_v32 = vor.u32 1.1754944e-38, %v4695_v44  ;;  %v4762_v42 = vmul.f32 %v4761_v43, %v15652_v58  ;;  %v4875_v59 = vadd.f32 0.001143296, %v4874_v4  ;;  %vm4651_vm11 = vmor %vm4649_vm9, %vm4650_vm7 }
 0xa6a   : >> { %v4686_v25 = vsub.f32 1.0, %v4685_v22  ;;  %v8367_v29 = vpop.eup %8366  ;;  %v4800_v38 = vmul.f32 %v4799_v13, %v15676_v62  ;;  %v4838_v14 = vmul.f32 %v4837_v23, %v15680_v35  ;;  %vm4690_vm10 = vweird.f32 %v8365_v63 }
 0xa6b   : >> { %v4647_v37 = vmul.f32 %v8363_v2, %v4646_v55  ;;  %v4725_v60 = vmul.f32 %v8367_v29, %v15951_v41  ;;  %v15985_v49 = vadd.f32 1.0, %v4762_v42  ;;  %v4733_v5 = vand.u32 2147483647, %v15951_v41  ;;  %vm4691_vm13 = vmor %vm4689_vm12, %vm4690_vm10 }
 0xa6c   : >> { %v4687_v56 = vmul.f32 %v8365_v63, %v4686_v25  ;;  %v4801_v22 = vadd.f32 0.4994258, %v4800_v38  ;;  %v4839_v44 = vadd.f32 0.112945676, %v4838_v14  ;;  %v4735_v55 = vand.u32 2147483648, %v15951_v41 }
 0xa6d   : >> { %v4648_v12 = vadd.f32 %v8363_v2, %v4647_v37  ;;  %v4726_v43 = vsub.f32 1.0, %v4725_v60  ;;  %8368 = vrcp.f32 %v15985_v49  ;;  %vm4730_vm15 = vweird.f32 %v8367_v29 }
 0xa6e   : >> { %v4688_v58 = vadd.f32 %v8365_v63, %v4687_v56  ;;  %v4802_v13 = vmul.f32 %v4801_v22, %v15676_v62  ;;  %v4876_v23 = vmul.f32 %v4875_v59, %v15701_v11  ;;  %v4840_v37 = vmul.f32 %v4839_v44, %v15680_v35 }
 0xa6f   : >> { %v4652_v4 = vsel %vm4651_vm11, %v8363_v2, %v4648_v12  ;;  %v4727_v42 = vmul.f32 %v8367_v29, %v4726_v43  ;;  %vm4729_vm0 = vweird.f32 %v15951_v41  ;;  %v4914_v33 = vmul.f32 3.8918573e-05, %v15731_v51 }
 0xa70   : >> { %v4657_v25 = vsel %vm15972_vm5, %v4656_v28, %v4652_v4  ;;  %v4692_v30 = vsel %vm4691_vm13, %v8365_v63, %v4688_v58  ;;  %vm4734_vm1 = vcmp.eq.f32.partialorder %v4733_v5, 8.507059e+37  ;;  %v16006_v59 = vadd.f32 1.0, %v4802_v13  ;;  %vm4731_vm2 = vmor %vm4729_vm0, %vm4730_vm15 }
 0xa71   : >> { %v4658_v38 = vmul.f32 %v4657_v25, %v15835_v50  ;;  %v4697_v2 = vsel %vm15977_vm4, %v4696_v32, %v4692_v30  ;;  %v4728_v14 = vadd.f32 %v8367_v29, %v4727_v42  ;;  %v4736_v63 = vor.u32 1.1754944e-38, %v4735_v55 }
 0xa72   : >> { %v4698_v62 = vmul.f32 %v4697_v2, %v15838_v1  ;;  %v4841_v28 = vadd.f32 0.4994258, %v4840_v37  ;;  %v4877_v56 = vadd.f32 0.014752088, %v4876_v23  ;;  %8370 = vrcp.f32 %v16006_v59 }
 0xa73   : >> { %v6122_v0 = vclamps-f32 %v4658_v38, 1.0  ;;  %v8369_v50 = vpop.eup %8368  ;;  %v4732_v17 = vsel %vm4731_vm2, %v8367_v29, %v4728_v14  ;;  %v4954_v41 = vmul.f32 3.8918573e-05, %v15749_v39  ;;  %v4915_v5 = vadd.f32 0.001143296, %v4914_v33 }
 0xa74   : >> { %v6123_v60 = vclamps-f32 %v4698_v62, 1.0  ;;  %v4737_v12 = vsel %vm4734_vm1, %v4736_v63, %v4732_v17  ;;  %v4765_v1 = vmul.f32 %v8369_v50, %v15985_v49  ;;  %v4773_v58 = vand.u32 2147483647, %v15985_v49 }
 0xa75   : >> { %v5183_v32 = vadd.f32 1.0, %v6122_v0  ;;  %v4738_v44 = vmul.f32 %v4737_v12, %v15852_v46  ;;  %v4775_v43 = vand.u32 2147483648, %v15985_v49  ;;  %v4842_v29 = vmul.f32 %v4841_v28, %v15680_v35 }
 0xa76   : >> { %v5184_v22 = vadd.f32 1.0, %v6123_v60  ;;  %v4766_v4 = vsub.f32 1.0, %v4765_v1  ;;  %v4878_v13 = vmul.f32 %v4877_v56, %v15701_v11  ;;  %v16020_v23 = vmul.f32 %v15957_v57, %v15893_v45 }
 0xa77   : >> { %v5199_v55 = vmul.f32 %v5183_v32, %v15704_v21  ;;  %v6124_v30 = vclamps-f32 %v4738_v44, 1.0  ;;  %vm4770_vm3 = vweird.f32 %v8369_v50  ;;  %v16023_v42 = vadd.f32 1.0, %v4842_v29 }
 0xa78   : >> { %v5200_v25 = vmul.f32 %v5184_v22, %v15707_v53  ;;  %v4767_v46 = vmul.f32 %v8369_v50, %v4766_v4  ;;  %v4879_v37 = vadd.f32 0.112945676, %v4878_v13  ;;  %v4916_v21 = vmul.f32 %v4915_v5, %v15731_v51  ;;  %v8371_v38 = vpop.eup %8370 }
 0xa79   : >> { %5265 = vmatmul.f32.gmra.mxu2 %v5199_v55  ;;  %v5185_v35 = vadd.f32 1.0, %v6124_v30  ;;  %vm4769_vm8 = vweird.f32 %v15985_v49  ;;  %vm4774_vm14 = vcmp.eq.f32.partialorder %v4773_v58, 8.507059e+37  ;;  %v4955_v2 = vadd.f32 0.001143296, %v4954_v41 }
 0xa7a   : >> { %5306 = vmatmul.f32.gmra.mxu3 %v5200_v25  ;;  %v4768_v57 = vadd.f32 %v8369_v50, %v4767_v46  ;;  %v4776_v33 = vor.u32 1.1754944e-38, %v4775_v43  ;;  %v4805_v53 = vmul.f32 %v8371_v38, %v16006_v59  ;;  %8372 = vrcp.f32 %v16023_v42  ;;  %vm4771_vm6 = vmor %vm4769_vm8, %vm4770_vm3 }
 0xa7b   : >> { %v5201_v62 = vmul.f32 %v5185_v35, %v15721_v20  ;;  %v4813_v14 = vand.u32 2147483647, %v16006_v59  ;;  %v4815_v0 = vand.u32 2147483648, %v16006_v59  ;;  %v4994_v63 = vmul.f32 3.8918573e-05, %v15773_v8 }
 0xa7c   : >> { %v4772_v28 = vsel %vm4771_vm6, %v8369_v50, %v4768_v57  ;;  %v4806_v49 = vsub.f32 1.0, %v4805_v53  ;;  %v4880_v56 = vmul.f32 %v4879_v37, %v15701_v11  ;;  %v4917_v60 = vadd.f32 0.014752088, %v4916_v21 }
 0xa7d   : >> { %v4777_v17 = vsel %vm4774_vm14, %v4776_v33, %v4772_v28  ;;  %vm4809_vm9 = vweird.f32 %v16006_v59  ;;  %vm4810_vm12 = vweird.f32 %v8371_v38  ;;  %v4956_v41 = vmul.f32 %v4955_v2, %v15749_v39 }
 0xa7e   : >> { %v4778_v20 = vmul.f32 %v4777_v17, %v15855_v16  ;;  %v4807_v32 = vmul.f32 %v8371_v38, %v4806_v49  ;;  %v4881_v12 = vadd.f32 0.4994258, %v4880_v56  ;;  %v4918_v1 = vmul.f32 %v4917_v60, %v15731_v51  ;;  %vm4811_vm4 = vmor %vm4809_vm9, %vm4810_vm12 }
 0xa7f   : >> { %vm16039_vm5 = vcmp.eq.f32.partialorder %v4813_v14, 8.507059e+37  ;;  %v4816_v50 = vor.u32 1.1754944e-38, %v4815_v0  ;;  %v4957_v22 = vadd.f32 0.014752088, %v4956_v41  ;;  %v4995_v44 = vadd.f32 0.001143296, %v4994_v63 }
 0xa80   : >> { %v8373_v58 = vpop.eup %8372  ;;  %v6125_v43 = vclamps-f32 %v4778_v20, 1.0  ;;  %v4808_v55 = vadd.f32 %v8371_v38, %v4807_v32  ;;  %v4882_v4 = vmul.f32 %v4881_v12, %v15701_v11  ;;  %v4919_v29 = vadd.f32 0.112945676, %v4918_v1 }
 0xa81   : >> { %5268 = vmatmul.f32.gmra.mxu2 %v5201_v62  ;;  %v4845_v16 = vmul.f32 %v8373_v58, %v16023_v42  ;;  %v4958_v13 = vmul.f32 %v4957_v22, %v15749_v39  ;;  %v4996_v25 = vmul.f32 %v4995_v44, %v15773_v8  ;;  %v5034_v30 = vmul.f32 3.8918573e-05, %v15792_v31 }
 0xa82   : >> { %v5186_v46 = vadd.f32 1.0, %v6125_v43  ;;  %v4812_v37 = vsel %vm4811_vm4, %v8371_v38, %v4808_v55  ;;  %v16051_v21 = vadd.f32 1.0, %v4882_v4  ;;  %v4920_v35 = vmul.f32 %v4919_v29, %v15731_v51 }
 0xa83   : >> { %v4817_v11 = vsel %vm16039_vm5, %v4816_v50, %v4812_v37  ;;  %v4846_v2 = vsub.f32 1.0, %v4845_v16  ;;  %v4959_v59 = vadd.f32 0.112945676, %v4958_v13  ;;  %v4997_v57 = vadd.f32 0.014752088, %v4996_v25 }
 0xa84   : >> { %v5202_v33 = vmul.f32 %v5186_v46, %v15729_v54  ;;  %v4818_v53 = vmul.f32 %v4817_v11, %v15862_v34  ;;  %v4855_v62 = vand.u32 2147483648, %v16023_v42  ;;  %8374 = vrcp.f32 %v16051_v21 }
 0xa85   : >> { %v4847_v14 = vmul.f32 %v8373_v58, %v4846_v2  ;;  %vm4850_vm7 = vweird.f32 %v8373_v58  ;;  %v4853_v38 = vand.u32 2147483647, %v16023_v42  ;;  %v4921_v0 = vadd.f32 0.4994258, %v4920_v35 }
 0xa86   : >> { %5309 = vmatmul.f32.gmra.mxu3 %v5202_v33  ;;  %v6126_v63 = vclamps-f32 %v4818_v53, 1.0  ;;  %v4960_v28 = vmul.f32 %v4959_v59, %v15749_v39  ;;  %v4998_v49 = vmul.f32 %v4997_v57, %v15773_v8  ;;  %v5035_v56 = vadd.f32 0.001143296, %v5034_v30  ;;  %v17920_v53 = vld [vmem:[#allocation277_spill] sm:$0xff] }
 0xa87   : >> { %v16064_v54 = vadd.f32 0.0036580483, %v15960_v24  ;;  %v4848_v34 = vadd.f32 %v8373_v58, %v4847_v14  ;;  %vm4849_vm10 = vweird.f32 %v16023_v42  ;;  %v4922_v60 = vmul.f32 %v4921_v0, %v15731_v51 }
 0xa88   : >> { %v5187_v17 = vadd.f32 1.0, %v6126_v63  ;;  %vm4851_vm11 = vmor %vm4849_vm10, %vm4850_vm7  ;;  %v4856_v41 = vor.u32 1.1754944e-38, %v4855_v62  ;;  %v4961_v20 = vadd.f32 0.4994258, %v4960_v28  ;;  %v4999_v32 = vadd.f32 0.112945676, %v4998_v49 }
 0xa89   : >> { %v4852_v12 = vsel %vm4851_vm11, %v8373_v58, %v4848_v34  ;;  %vm4854_vm13 = vcmp.eq.f32.partialorder %v4853_v38, 8.507059e+37  ;;  %v16068_v1 = vadd.f32 1.0, %v4922_v60  ;;  %v5036_v5 = vmul.f32 %v5035_v56, %v15792_v31 }
 0xa8a   : >> { %v8375_v50 = vpop.eup %8374  ;;  %v5203_v24 = vmul.f32 %v5187_v17, %v15759_v48  ;;  %v4857_v22 = vsel %vm4854_vm13, %v4856_v41, %v4852_v12  ;;  %v4962_v44 = vmul.f32 %v4961_v20, %v15749_v39  ;;  %v5000_v42 = vmul.f32 %v4999_v32, %v15773_v8 }
 0xa8b   : >> { %v4858_v51 = vmul.f32 %v4857_v22, %v15931_v26  ;;  %v4885_v43 = vmul.f32 %v8375_v50, %v16051_v21  ;;  %v4893_v55 = vand.u32 2147483647, %v16051_v21  ;;  %8376 = vrcp.f32 %v16068_v1 }
 0xa8c   : >> { %5271 = vmatmul.f32.gmra.mxu2 %v5203_v24  ;;  %v4895_v58 = vand.u32 2147483648, %v16051_v21  ;;  %v16079_v4 = vadd.f32 1.0, %v4962_v44  ;;  %v5074_v48 = vmul.f32 3.8918573e-05, %v15849_v36  ;;  %v5114_v29 = vmul.f32 3.8918573e-05, %v15893_v45 }
 0xa8d   : >> { %v6127_v39 = vclamps-f32 %v4858_v51, 1.0  ;;  %v4886_v16 = vsub.f32 1.0, %v4885_v43  ;;  %v5001_v13 = vadd.f32 0.4994258, %v5000_v42  ;;  %v5037_v25 = vadd.f32 0.014752088, %v5036_v5 }
 0xa8e   : >> { %vm4889_vm15 = vweird.f32 %v16051_v21  ;;  %v4933_v26 = vand.u32 2147483647, %v16068_v1  ;;  %v4935_v30 = vand.u32 2147483648, %v16068_v1  ;;  %8378 = vrcp.f32 %v16079_v4 }
 0xa8f   : >> { %v5188_v46 = vadd.f32 1.0, %v6127_v39  ;;  %v4887_v37 = vmul.f32 %v8375_v50, %v4886_v16  ;;  %vm4890_vm0 = vweird.f32 %v8375_v50  ;;  %vm16087_vm1 = vcmp.eq.f32.partialorder %v4893_v55, 8.507059e+37 }
 0xa90   : >> { %v5002_v11 = vmul.f32 %v5001_v13, %v15773_v8  ;;  %v5038_v2 = vmul.f32 %v5037_v25, %v15792_v31  ;;  %v5075_v59 = vadd.f32 0.001143296, %v5074_v48  ;;  %v5115_v57 = vadd.f32 0.001143296, %v5114_v29  ;;  %vm4891_vm3 = vmor %vm4889_vm15, %vm4890_vm0 }
 0xa91   : >> { %v8377_v33 = vpop.eup %8376  ;;  %v5204_v62 = vmul.f32 %v5188_v46, %v17920_v53  ;;  %v4888_v14 = vadd.f32 %v8375_v50, %v4887_v37  ;;  %v4896_v38 = vor.u32 1.1754944e-38, %v4895_v58  ;;  %vm4929_vm2 = vweird.f32 %v16068_v1 }
 0xa92   : >> { %v4925_v0 = vmul.f32 %v8377_v33, %v16068_v1  ;;  %vm16098_vm8 = vcmp.eq.f32.partialorder %v4933_v26, 8.507059e+37  ;;  %v4936_v8 = vor.u32 1.1754944e-38, %v4935_v30  ;;  %v16102_v28 = vadd.f32 1.0, %v5002_v11 }
 0xa93   : >> { %v5039_v49 = vadd.f32 0.112945676, %v5038_v2  ;;  %5312 = vmatmul.f32.gmra.mxu3 %v5204_v62  ;;  %v4892_v56 = vsel %vm4891_vm3, %v8375_v50, %v4888_v14  ;;  %v4973_v34 = vand.u32 2147483647, %v16079_v4  ;;  %v5076_v60 = vmul.f32 %v5075_v59, %v15849_v36 }
 0xa94   : >> { %v5116_v17 = vmul.f32 %v5115_v57, %v15893_v45  ;;  %v8379_v21 = vpop.eup %8378  ;;  %v4897_v41 = vsel %vm16087_vm1, %v4896_v38, %v4892_v56  ;;  %v4926_v20 = vsub.f32 1.0, %v4925_v0  ;;  %vm4969_vm14 = vweird.f32 %v16079_v4 }
 0xa95   : >> { %8380 = vrcp.f32 %v16102_v28  ;;  %v4898_v32 = vmul.f32 %v4897_v41, %v15937_v40  ;;  %v4965_v12 = vmul.f32 %v8379_v21, %v16079_v4  ;;  %v4975_v5 = vand.u32 2147483648, %v16079_v4 }
 0xa96   : >> { %v5154_v50 = vmul.f32 3.8918573e-05, %v15907_v18  ;;  %v4927_v24 = vmul.f32 %v8377_v33, %v4926_v20  ;;  %vm4930_vm6 = vweird.f32 %v8377_v33  ;;  %v5040_v22 = vmul.f32 %v5039_v49, %v15792_v31 }
 0xa97   : >> { %v5077_v44 = vadd.f32 0.014752088, %v5076_v60  ;;  %v6128_v42 = vclamps-f32 %v4898_v32, 1.0  ;;  %v4966_v51 = vsub.f32 1.0, %v4965_v12  ;;  %vm16116_vm9 = vcmp.eq.f32.partialorder %v4973_v34, 8.507059e+37  ;;  %vm4931_vm5 = vmor %vm4929_vm2, %vm4930_vm6 }
 0xa98   : >> { %v5117_v55 = vadd.f32 0.014752088, %v5116_v17  ;;  %v4928_v58 = vadd.f32 %v8377_v33, %v4927_v24  ;;  %vm4970_vm12 = vweird.f32 %v8379_v21  ;;  %v5041_v40 = vadd.f32 0.4994258, %v5040_v22 }
 0xa99   : >> { %v5078_v48 = vmul.f32 %v5077_v44, %v15849_v36  ;;  %v5189_v29 = vadd.f32 1.0, %v6128_v42  ;;  %v4967_v39 = vmul.f32 %v8379_v21, %v4966_v51  ;;  %v5155_v13 = vadd.f32 0.001143296, %v5154_v50  ;;  %vm4971_vm4 = vmor %vm4969_vm14, %vm4970_vm12 }
 0xa9a   : >> { %v5118_v16 = vmul.f32 %v5117_v55, %v15893_v45  ;;  %v4932_v26 = vsel %vm4931_vm5, %v8377_v33, %v4928_v58  ;;  %v4976_v30 = vor.u32 1.1754944e-38, %v4975_v5  ;;  %v5042_v46 = vmul.f32 %v5041_v40, %v15792_v31 }
 0xa9b   : >> { %v8381_v25 = vpop.eup %8380  ;;  %v5079_v37 = vadd.f32 0.112945676, %v5078_v48  ;;  %v5205_v35 = vmul.f32 %v5189_v29, %v15832_v9  ;;  %v4937_v11 = vsel %vm16098_vm8, %v4936_v8, %v4932_v26  ;;  %v4968_v2 = vadd.f32 %v8379_v21, %v4967_v39  ;;  %v17925_v39 = vld [vmem:[#allocation275_spill] sm:$0xff] }
 0xa9c   : >> { %v5005_v59 = vmul.f32 %v8381_v25, %v16102_v28  ;;  %v4938_v1 = vmul.f32 %v4937_v11, %v15940_v27  ;;  %v5015_v57 = vand.u32 2147483648, %v16102_v28  ;;  %v16134_v33 = vadd.f32 1.0, %v5042_v46 }
 0xa9d   : >> { %v5080_v31 = vmul.f32 %v5079_v37, %v15849_v36  ;;  %5274 = vmatmul.f32.gmra.mxu2 %v5205_v35  ;;  %v4972_v9 = vsel %vm4971_vm4, %v8379_v21, %v4968_v2  ;;  %v5119_v62 = vadd.f32 0.112945676, %v5118_v16  ;;  %v5156_v14 = vmul.f32 %v5155_v13, %v15907_v18 }
 0xa9e   : >> { %v5006_v53 = vsub.f32 1.0, %v5005_v59  ;;  %v5108_v38 = vadd.f32 0.05243302, %v16020_v23  ;;  %v6129_v0 = vclamps-f32 %v4938_v1, 1.0  ;;  %v4977_v27 = vsel %vm16116_vm9, %v4976_v30, %v4972_v9 }
 0xa9f   : >> { %8382 = vrcp.f32 %v16134_v33  ;;  %v4978_v4 = vmul.f32 %v4977_v27, %v15943_v6  ;;  %vm5010_vm7 = vweird.f32 %v8381_v25  ;;  %v5013_v8 = vand.u32 2147483647, %v16102_v28 }
 0xaa0   : >> { %v5007_v63 = vmul.f32 %v8381_v25, %v5006_v53  ;;  %v5190_v49 = vadd.f32 1.0, %v6129_v0  ;;  %v5081_v56 = vadd.f32 0.4994258, %v5080_v31  ;;  %v5120_v34 = vmul.f32 %v5119_v62, %v15893_v45 }
 0xaa1   : >> { %v5157_v60 = vadd.f32 0.014752088, %v5156_v14  ;;  %v6130_v17 = vclamps-f32 %v4978_v4, 1.0  ;;  %vm5009_vm10 = vweird.f32 %v16102_v28  ;;  %v5016_v23 = vor.u32 1.1754944e-38, %v5015_v57  ;;  %v17926_v57 = vld [vmem:[#allocation278_spill] sm:$0xff] }
 0xaa2   : >> { %v5008_v21 = vadd.f32 %v8381_v25, %v5007_v63  ;;  %v5206_v41 = vmul.f32 %v5190_v49, %v15847_v15  ;;  %vm5011_vm11 = vmor %vm5009_vm10, %vm5010_vm7  ;;  %v5082_v20 = vmul.f32 %v5081_v56, %v15849_v36  ;;  %v5121_v6 = vadd.f32 0.4994258, %v5120_v34  ;;  %v17927_v34 = vld [vmem:[#allocation276_spill] sm:$0xff] }
 0xaa3   : >> { %v5158_v32 = vmul.f32 %v5157_v60, %v15907_v18  ;;  %v5069_v12 = vmul.f32 %v15945_v19, %v15849_v36  ;;  %v5191_v5 = vadd.f32 1.0, %v6130_v17  ;;  %vm5014_vm13 = vcmp.eq.f32.partialorder %v5013_v8, 8.507059e+37 }
 0xaa4   : >> { %v5012_v50 = vsel %vm5011_vm11, %v8381_v25, %v5008_v21  ;;  %5315 = vmatmul.f32.gmra.mxu3 %v5206_v41  ;;  %v16151_v44 = vadd.f32 1.0, %v5082_v20  ;;  %v5122_v28 = vmul.f32 %v5121_v6, %v15893_v45  ;;  %v5032_v55 = vadd.f32 1.1283791, %v15954_v7 }
 0xaa5   : >> { %v8383_v24 = vpop.eup %8382  ;;  %v5017_v22 = vsel %vm5014_vm13, %v5016_v23, %v5012_v50  ;;  %v5159_v15 = vadd.f32 0.112945676, %v5158_v32  ;;  %v5207_v42 = vmul.f32 %v5191_v5, %v15858_v3  ;;  %v5109_v19 = vmul.f32 %v5108_v38, %v15893_v45 }
 0xaa6   : >> { %v5018_v51 = vmul.f32 %v5017_v22, %v15948_v10  ;;  %v5045_v43 = vmul.f32 %v8383_v24, %v16134_v33  ;;  %v5147_v58 = vmul.f32 %v16064_v54, %v15907_v18  ;;  %8384 = vrcp.f32 %v16151_v44 }
 0xaa7   : >> { %5277 = vmatmul.f32.gmra.mxu2 %v5207_v42  ;;  %v16162_v29 = vadd.f32 1.0, %v5122_v28  ;;  %v5160_v3 = vmul.f32 %v5159_v15, %v15907_v18  ;;  %v4520_v10 = vmul.f32 0.5, %v17925_v39  ;;  %v5070_v16 = vadd.f32 0.18741608, %v5069_v12 }
 0xaa8   : >> { %v6131_v40 = vclamps-f32 %v5018_v51, 1.0  ;;  %v5046_v48 = vsub.f32 1.0, %v5045_v43  ;;  %v5053_v13 = vand.u32 2147483647, %v16134_v33  ;;  %v5055_v7 = vand.u32 2147483648, %v16134_v33 }
 0xaa9   : >> { %vm5050_vm15 = vweird.f32 %v8383_v24  ;;  %8386 = vrcp.f32 %v16162_v29  ;;  %v5110_v54 = vadd.f32 0.18741608, %v5109_v19  ;;  %v5148_v30 = vadd.f32 0.05243302, %v5147_v58 }
 0xaaa   : >> { %v5192_v25 = vadd.f32 1.0, %v6131_v40  ;;  %v5047_v26 = vmul.f32 %v8383_v24, %v5046_v48  ;;  %v5161_v46 = vadd.f32 0.4994258, %v5160_v3  ;;  %vm5049_vm0 = vweird.f32 %v16134_v33 }
 0xaab   : >> { %v5071_v2 = vmul.f32 %v5070_v16, %v15849_v36  ;;  %vm5051_vm1 = vmor %vm5049_vm0, %vm5050_vm15  ;;  %v5056_v59 = vor.u32 1.1754944e-38, %v5055_v7  ;;  %v5033_v31 = vmul.f32 %v5032_v55, %v17926_v57  ;;  %vm5054_vm2 = vcmp.eq.f32.partialorder %v5053_v13, 8.507059e+37  ;;  %v17930_v57 = vld [vmem:[#allocation280_spill] sm:$0xff] }
 0xaac   : >> { %v5208_v37 = vmul.f32 %v5192_v25, %v4520_v10  ;;  %v5048_v35 = vadd.f32 %v8383_v24, %v5047_v26  ;;  %v8385_v11 = vpop.eup %8384  ;;  %v5162_v1 = vmul.f32 %v5161_v46, %v15907_v18  ;;  %v5111_v62 = vmul.f32 %v5110_v54, %v15893_v45 }
 0xaad   : >> { %v5085_v53 = vmul.f32 %v8385_v11, %v16151_v44  ;;  %v5149_v14 = vmul.f32 %v5148_v30, %v15907_v18  ;;  %v5072_v4 = vadd.f32 1.1283791, %v5071_v2  ;;  %v5095_v63 = vand.u32 2147483648, %v16151_v44 }
 0xaae   : >> { %5318 = vmatmul.f32.gmra.mxu3 %v5208_v37  ;;  %v5052_v9 = vsel %vm5051_vm1, %v8383_v24, %v5048_v35  ;;  %v16176_v33 = vadd.f32 1.0, %v5162_v1  ;;  %vm5090_vm3 = vweird.f32 %v8385_v11  ;;  %v5093_v45 = vand.u32 2147483647, %v16151_v44 }
 0xaaf   : >> { %v5057_v38 = vsel %vm5054_vm2, %v5056_v59, %v5052_v9  ;;  %v8387_v0 = vpop.eup %8386  ;;  %v5086_v27 = vsub.f32 1.0, %v5085_v53  ;;  %v4521_v60 = vmul.f32 0.5, %v17927_v34  ;;  %v5112_v17 = vadd.f32 1.1283791, %v5111_v62  ;;  %v17933_v34 = vld [vmem:[#allocation272_spill] sm:$0xff] }
 0xab0   : >> { %v5058_v36 = vmul.f32 %v5057_v38, %v5033_v31  ;;  %v5125_v8 = vmul.f32 %v8387_v0, %v16162_v29  ;;  %8388 = vrcp.f32 %v16176_v33  ;;  %v5150_v21 = vadd.f32 0.18741608, %v5149_v14 }
 0xab1   : >> { %v5087_v56 = vmul.f32 %v8385_v11, %v5086_v27  ;;  %vm5089_vm8 = vweird.f32 %v16151_v44  ;;  %v5135_v6 = vand.u32 2147483648, %v16162_v29  ;;  %v5096_v32 = vor.u32 1.1754944e-38, %v5095_v63  ;;  %v17932_v63 = vld [vmem:[#allocation273_spill] sm:$0xff] }
 0xab2   : >> { %v6132_v49 = vclamps-f32 %v5058_v36, 1.0  ;;  %v5126_v23 = vsub.f32 1.0, %v5125_v8  ;;  %vm5091_vm14 = vmor %vm5089_vm8, %vm5090_vm3  ;;  %vm5130_vm6 = vweird.f32 %v8387_v0  ;;  %v5133_v5 = vand.u32 2147483647, %v16162_v29 }
 0xab3   : >> { %v5088_v20 = vadd.f32 %v8385_v11, %v5087_v56  ;;  %v5073_v50 = vmul.f32 %v5072_v4, %v15816_v61  ;;  %vm5094_vm9 = vcmp.eq.f32.partialorder %v5093_v45, 8.507059e+37  ;;  %v5151_v15 = vmul.f32 %v5150_v21, %v15907_v18 }
 0xab4   : >> { %v5193_v41 = vadd.f32 1.0, %v6132_v49  ;;  %v5127_v12 = vmul.f32 %v8387_v0, %v5126_v23  ;;  %vm5129_vm12 = vweird.f32 %v16162_v29  ;;  %v5136_v43 = vor.u32 1.1754944e-38, %v5135_v6 }
 0xab5   : >> { %v5092_v22 = vsel %vm5091_vm14, %v8385_v11, %v5088_v20  ;;  %vm5131_vm5 = vmor %vm5129_vm12, %vm5130_vm6  ;;  %v5113_v19 = vmul.f32 %v5112_v17, %v15867_v52  ;;  %vm5134_vm4 = vcmp.eq.f32.partialorder %v5133_v5, 8.507059e+37  ;;  %v4522_v3 = vmul.f32 0.5, %v15801_v47  ;;  %v17928_v52 = vld [vmem:[#allocation279_spill] sm:$0xff]  ;;  %v17929_v47 = vld [vmem:[#allocation281_spill] sm:$0xff] }
 0xab6   : >> { %v5209_v24 = vmul.f32 %v5193_v41, %v4521_v60  ;;  %v8389_v28 = vpop.eup %8388  ;;  %v5097_v42 = vsel %vm5094_vm9, %v5096_v32, %v5092_v22  ;;  %v5128_v51 = vadd.f32 %v8387_v0, %v5127_v12  ;;  %v5152_v18 = vadd.f32 1.1283791, %v5151_v15  ;;  %v17934_v41 = vld [vmem:[#allocation271_spill] sm:$0xff]  ;;  %v17935_v5 = vld [vmem:[#allocation270_spill] sm:$0xff]  ;;  %v17936_v15 = vld [vmem:[#allocation269_spill] sm:$0xff] }
 0xab7   : >> { %v5098_v44 = vmul.f32 %v5097_v42, %v5073_v50  ;;  %v5165_v55 = vmul.f32 %v8389_v28, %v16176_v33  ;;  %v5175_v10 = vand.u32 2147483648, %v16176_v33  ;;  %vm5170_vm7 = vweird.f32 %v8389_v28 }
 0xab8   : >> { %5280 = vmatmul.f32.gmra.mxu2 %v5209_v24  ;;  %v5132_v58 = vsel %vm5131_vm5, %v8387_v0, %v5128_v51  ;;  %v5173_v13 = vand.u32 2147483647, %v16176_v33  ;;  %vm5169_vm10 = vweird.f32 %v16176_v33  ;;  %v4523_v54 = vmul.f32 0.5, %v17928_v52  ;;  %v17931_v33 = vld [vmem:[#allocation274_spill] sm:$0xff] }
 0xab9   : >> { %v6133_v61 = vclamps-f32 %v5098_v44, 1.0  ;;  %v5137_v40 = vsel %vm5134_vm4, %v5136_v43, %v5132_v58  ;;  %v5166_v48 = vsub.f32 1.0, %v5165_v55  ;;  %vm5171_vm11 = vmor %vm5169_vm10, %vm5170_vm7  ;;  %v5176_v46 = vor.u32 1.1754944e-38, %v5175_v10  ;;  %v17937_v55 = vld [vmem:[#allocation268_spill] sm:$0xff] }
 0xaba   : >> { %v5138_v39 = vmul.f32 %v5137_v40, %v5113_v19  ;;  %v5153_v37 = vmul.f32 %v5152_v18, %v17929_v47  ;;  %vm5174_vm13 = vcmp.eq.f32.partialorder %v5173_v13, 8.507059e+37  ;;  %v4524_v31 = vmul.f32 0.5, %v17930_v57 }
 0xabb   : >> { %v5194_v29 = vadd.f32 1.0, %v6133_v61  ;;  %v5167_v16 = vmul.f32 %v8389_v28, %v5166_v48  ;;  %v17938_v48 = vld [vmem:[#allocation267_spill] sm:$0xff] }
 0xabc   : >> { %v6134_v7 = vclamps-f32 %v5138_v39, 1.0  ;;  %v17947_v39 = vld [vmem:[#allocation104_spill] sm:$0xff] (%p4378_p8) }
 0xabd   : >> { %v5210_v25 = vmul.f32 %v5194_v29, %v4522_v3  ;;  %v5168_v26 = vadd.f32 %v8389_v28, %v5167_v16  ;;  %v17949_v29 = vld [vmem:[#allocation35_spill] sm:$0xff] (%p4378_p8) }
 0xabe   : >> { %v5195_v30 = vadd.f32 1.0, %v6134_v7  ;;  %v17950_v7 = vld [vmem:[#allocation108_spill] sm:$0xff] (%p4378_p8) }
 0xabf   : >> { %5321 = vmatmul.f32.gmra.mxu3 %v5210_v25  ;;  %v5172_v35 = vsel %vm5171_vm11, %v8389_v28, %v5168_v26  ;;  %v17951_v26 = vld [vmem:[#allocation44_spill] sm:$0xff] (%p4378_p8) }
 0xac0   : >> { %v5211_v11 = vmul.f32 %v5195_v30, %v4523_v54  ;;  %v5177_v2 = vsel %vm5174_vm13, %v5176_v46, %v5172_v35  ;;  %v17953_v54 = vld [vmem:[#allocation110_spill] sm:$0xff] (%p4378_p8) }
 0xac1   : >> { %v5178_v59 = vmul.f32 %v5177_v2, %v5153_v37  ;;  %v17954_v46 = vld [vmem:[#allocation98_spill] sm:$0xff] (%p4378_p8)  ;;  %v17957_v37 = vld [vmem:[#allocation103_spill] sm:$0xff] (%p4378_p8) }
 0xac2   : >> { %5283 = vmatmul.f32.gmra.mxu2 %v5211_v11 }
 0xac3   : >> { %v6135_v1 = vclamps-f32 %v5178_v59, 1.0 }
 0xac5   : >> { %v5196_v9 = vadd.f32 1.0, %v6135_v1 }
 0xac7   : >> { %v5212_v53 = vmul.f32 %v5196_v9, %v4524_v31 }
 0xac9   : >> { %5324 = vmatmul.f32.gmra.mxu3 %v5212_v53 }
 0xacf   : >> { %v5263_v62 = vpop.f32.mrf.mxu2 }
 0xae1   : >> { %v5304_v14 = vpop.f32.mrf.mxu3 }
 0xae2   : >> { %v5305_v38 = vadd.f32 %v5304_v14, %v5263_v62 }
 0xae4   : >> { %v5328_v0 = vadd.f32 %v17931_v33, %v5305_v38  }
 0xae6   : > { %v5336_v10 = vadd.f32 (%p4378_p8), %v5328_v0, %v17947_v39 }
 0xae8   : > { %5344 = vst [vmem:[%s11041_s24] sm:$0xff] (%p4378_p8), %v5336_v10 }
 0xafc   : >> { %v5266_v36 = vpop.f32.mrf.mxu2 }
 0xafd   : >> { %v5307_v27 = vpop.f32.mrf.mxu3 }
 0xafe   : >> { %v5308_v4 = vadd.f32 %v5307_v27, %v5266_v36 }
 0xb00   : >> { %v5329_v8 = vadd.f32 %v17932_v63, %v5308_v4  }
 0xb02   : >> { %v17945_v47 = vmov %v5329_v8  ;;  %v5337_v13 = vadd.f32 (%p4378_p8), %v5329_v8, %v17949_v29 }
 0xb04   : >> { %v5269_v49 = vpop.f32.mrf.mxu2  ;;  %5345 = vst [vmem:[%s11041_s24 + $0x8] sm:$0xff] (%p4378_p8), %v5337_v13 }
 0xb09   : >> { %v5310_v56 = vpop.f32.mrf.mxu3 }
 0xb0a   : >> { %v5311_v45 = vadd.f32 %v5310_v56, %v5269_v49 }
 0xb0c   : >> { %v5330_v60 = vadd.f32 %v17933_v34, %v5311_v45  }
 0xb0e   : >> { %v17944_v18 = vmov %v5330_v60  ;;  %v5338_v25 = vadd.f32 (%p4378_p8), %v5330_v60, %v17950_v7 }
 0xb0f   : >> { %v5272_v17 = vpop.f32.mrf.mxu2  ;;  %v17952_v18 = vld [vmem:[#allocation75_spill] sm:$0xff] (%p4378_p8) }
 0xb10   : > { %5346 = vst [vmem:[%s11041_s24 + $0x10] sm:$0xff] (%p4378_p8), %v5338_v25 }
 0xb16   : >> { %v5313_v21 = vpop.f32.mrf.mxu3 }
 0xb17   : >> { %v5314_v23 = vadd.f32 %v5313_v21, %v5272_v17 }
 0xb19   : >> { %v5331_v20 = vadd.f32 %v17934_v41, %v5314_v23   ;;  %v17946_v41 = vmov %v5328_v0 }
 0xb1b   : >> { %v17943_v16 = vmov %v5331_v20  ;;  %v5339_v52 = vadd.f32 (%p4378_p8), %v5331_v20, %v17951_v26 }
 0xb1d   : > { %5347 = vst [vmem:[%s11041_s24 + $0x18] sm:$0xff] (%p4378_p8), %v5339_v52 }
 0xb20   : >> { %v5275_v6 = vpop.f32.mrf.mxu2 }
 0xb27   : >> { %v5316_v32 = vpop.f32.mrf.mxu3 }
 0xb28   : >> { %v5317_v12 = vadd.f32 %v5316_v32, %v5275_v6 }
 0xb2a   : >> { %v5332_v50 = vadd.f32 %v17935_v5, %v5317_v12   ;;  %v5278_v24 = vpop.f32.mrf.mxu2 }
 0xb2c   : >> { %v17942_v9 = vmov %v5332_v50  ;;  %v5340_v16 = vadd.f32 (%p4378_p8), %v5332_v50, %v17952_v18 }
 0xb2e   : > { %5348 = vst [vmem:[%s11041_s24 + $0x20] sm:$0xff] (%p4378_p8), %v5340_v16 }
 0xb31   : >> { %v5319_v22 = vpop.f32.mrf.mxu3 }
 0xb32   : >> { %v5320_v28 = vadd.f32 %v5319_v22, %v5278_v24 }
 0xb34   : >> { %v5333_v42 = vadd.f32 %v17936_v15, %v5320_v28  }
 0xb36   : >> { %v17941_v6 = vmov %v5333_v42  ;;  %v5341_v30 = vadd.f32 (%p4378_p8), %v5333_v42, %v17953_v54 }
 0xb38   : > { %5349 = vst [vmem:[%s11041_s24 + $0x28] sm:$0xff] (%p4378_p8), %v5341_v30 }
 0xb3b   : >> { %v5281_v51 = vpop.f32.mrf.mxu2 }
 0xb42   : >> { %v5322_v44 = vpop.f32.mrf.mxu3 }
 0xb43   : >> { %v5323_v43 = vadd.f32 %v5322_v44, %v5281_v51 }
 0xb45   : >> { %v5334_v19 = vadd.f32 %v17937_v55, %v5323_v43   ;;  %v5284_v58 = vpop.f32.mrf.mxu2 }
 0xb47   : > { %v5342_v47 = vadd.f32 (%p4378_p8), %v5334_v19, %v17954_v46 }
 0xb49   : > { %5350 = vst [vmem:[%s11041_s24 + $0x30] sm:$0xff] (%p4378_p8), %v5342_v47 }
 0xb4c   : >> { %v5325_v61 = vpop.f32.mrf.mxu3 }
 0xb4d   : >> { %v5326_v40 = vadd.f32 %v5325_v61, %v5284_v58  ;;  %4380 = sbr.rel (!%p4378_p8) target bundleno = 2409 (0x969), region = 146 }
 0xb4f   : >> { %v5335_v3 = vadd.f32 %v17938_v48, %v5326_v40   ;;  %v17940_v48 = vmov %v5334_v19 }
 0xb51   : >> { %v17939_v36 = vmov %v5335_v3  ;;  %v5343_v35 = vadd.f32 (%p4378_p8), %v5335_v3, %v17957_v37 }
 0xb53   : > { %5351 = vst [vmem:[%s11041_s24 + $0x38] sm:$0xff] %v5343_v35 }
 0xb54   : > { %8567 = shalt.err (!%p8564_p7)
}
 0xb55   : > { %s10278_s16 = smov 128   ;;  %s10279_s24 = smov 8  }
 0xb56   : > { %6224 = dma.vmem_to_hbm [thread:$0]  (%p10439_p5), %s5368_s20, 1024, %s5370_s15, %s5353_s4, %s10278_s16, %s10278_s16, %s10279_s24  }
 0xb57 PF: > { %s17958_s19 = sld [smem:[#allocation18_spill]]  ;;  %p6256_p9 = scmp.ge.s32.totalorder %s9454_s8, 2 }
 0xb59   : > { %p6244_p2 = pnand %p6256_p9, %p10379_p6 }
 0xb5b   : > { %p6245_p1 = pneg %p6244_p2 }
 0xb5d   : > { %s5384_s23 = sand.u32 1, %s17958_s19  }
 0xb5e   : > { %s5385_s17 = scalar_lea.sflag [#allocation6], %s5384_s23 }
 0xb5f   : > { %9421 = dma.done.wait (%p6245_p1), %s5385_s17, 1024  }
 0xb60   : > { %9423 = vsyncadd (%p6245_p1), %s5385_s17, 4294966272  ;;  %s25_s8 = sadd.s32 1, %s9454_s8   ;;  %s17960_s20 = sld [smem:[#allocation21_spill]] }
 0xb61   : > { %p22_p4 = scmp.ge.s32.totalorder %s25_s8, 6   ;;  %s17961_s24 = smov %s9430_s25 }
 0xb62   : > { %s17962_s25 = smov %s9434_s26  ;;  %s17963_s26 = smov %s10452_s2 }
 0xb63   : > { %s17964_s27 = smov %s9446_s29  ;;  %s17965_s28 = smov %s9450_s30 }
 0xb64   : > { %s17967_s30 = smov %s17973_s9  ;;  %24 = sbr.rel (!%p22_p4) target bundleno = 15 (0xf), region = 157 }
 0xb66   : > { %s17966_s29 = smov %s17960_s20 }
 0xb69   :  { %5391 = vsyncpa [#allocation5], 1 }
 0xb6a   :  { %5393 = vsyncpa [#allocation5 + $0x1], 1 }
 0xb6b   :  { %5394 = vsyncpa [#allocation8], 1 }
 0xb6c   :  { %5395 = vsyncpa [#allocation11], 1 }
 0xb6d   :  { %5396 = vsyncpa [#allocation6], 1 }
 0xb6e   :  { %5398 = vsyncpa [#allocation6 + $0x1], 1 }

</bundles_post_ra>
